<compile_context>
chip_gen: v7x
topology: tpu7x:2x2x1
jax: 0.10.0
libtpu: 0.0.40
codegen_flags: <defaults>
</compile_context>

<pallas_src>
import jax
import jax.numpy as jnp
from jax.experimental import pallas as pl
from jax.experimental.pallas import tpu as pltpu


# ----------------------------------------------------------------------------
# Fused Pallas kernel: backbone-Linear + added_layers + meta_layers + final_layers
# ----------------------------------------------------------------------------
def _paw_kernel(
    feat_ref, meta_ref,
    bw_ref, bb_ref,                                   # synthetic backbone Linear(C, 1024)
    aw_ref, ab_ref,                                   # added_layers Linear(1024, 1024)   [bf16 W]
    m0w_ref, m0b_ref, m1w_ref, m1b_ref,               # meta_layers 12->128->256
    m2w_ref, m2b_ref, m3w_ref, m3b_ref,               # meta_layers 256->512->1024        [m3 bf16]
    f0wi_ref, f0wm_ref, f0b_ref,                      # final Linear(2048, 1024) split     [bf16 W]
    f1w_ref, f1b_ref,                                 # final Linear(1024, 512)            [bf16 W]
    f2wT_ref, f2b_ref,                                # final Linear(512, 1), W stored (1, 512)
    out_ref,
):
    f32 = jnp.float32
    dot = lambda a, b: jnp.dot(a, b, preferred_element_type=f32)
    # bf16 weight matmul with f32 accumulation (MXU-native bf16 on v5e/v6e/v7x).
    bdot = lambda a, b: jnp.dot(a.astype(jnp.bfloat16), b, preferred_element_type=f32)

    # --- meta_layers first: tiny, data-independent matmuls that fill MXU/VPU slots
    #     while the large bf16 weights of the image path are still streaming in.
    m = dot(meta_ref[...], m0w_ref[...]) + m0b_ref[...]
    m = dot(m, m1w_ref[...]) + m1b_ref[...]
    m = dot(m, m2w_ref[...]) + m2b_ref[...]
    m = bdot(m, m3w_ref[...]) + m3b_ref[...]

    # --- image path: synthetic backbone Linear(C, 1024) then added_layers Linear(1024, 1024)
    feat = dot(feat_ref[...], bw_ref[...]) + bb_ref[...]
    img_l = bdot(feat, aw_ref[...]) + ab_ref[...]

    # --- final_layers: torch.cat([img_l, m], axis=1) @ W(2048,1024) expressed as an
    #     exactly-equivalent split matmul; Dropout(0.2) layers are identity in eval.
    h = bdot(img_l, f0wi_ref[...]) + bdot(m, f0wm_ref[...]) + f0b_ref[...]
    h = bdot(h, f1w_ref[...]) + f1b_ref[...]
    # Linear(512, 1) as VPU multiply + cross-lane sum (avoids an N=1 MXU matmul).
    h = jnp.sum(h * f2wT_ref[...], axis=-1, keepdims=True) + f2b_ref[...]
    out_ref[...] = jnp.maximum(h, 0.0)  # final ReLU


# ----------------------------------------------------------------------------
# Wrapper
# ----------------------------------------------------------------------------
_VMEM = pl.BlockSpec(memory_space=pltpu.MemorySpace.VMEM)


def paw_model_forward(img, meta, p):
    # GAP of the synthetic backbone done in plain XLA (free, lane-dense) so the kernel
    # input DMA is only (B, C) instead of (B, C, H, W).
    feat = jnp.mean(img, axis=(2, 3)).astype(jnp.float32)
    args = (
        feat, meta,
        p["bw"], p["bb"],
        p["aw"], p["ab"],
        p["m0w"], p["m0b"], p["m1w"], p["m1b"],
        p["m2w"], p["m2b"], p["m3w"], p["m3b"],
        p["f0wi"], p["f0wm"], p["f0b"],
        p["f1w"], p["f1b"],
        p["f2wT"], p["f2b"],
    )
    B = img.shape[0]
    return pl.pallas_call(
        _paw_kernel,
        out_shape=jax.ShapeDtypeStruct((B, 1), jnp.float32),
        in_specs=[_VMEM] * len(args),
        out_specs=_VMEM,
        compiler_params=pltpu.CompilerParams(vmem_limit_bytes=32 << 20),
    )(*args)


# ----------------------------------------------------------------------------
# Deterministic parameter init (PyTorch nn.Linear default: U(-1/sqrt(in), 1/sqrt(in)))
# ----------------------------------------------------------------------------
def _init_linear(key, fan_in, fan_out):
    k1, k2 = jax.random.split(key)
    bound = 1.0 / (fan_in ** 0.5)
    w = jax.random.uniform(k1, (fan_in, fan_out), jnp.float32, -bound, bound)
    b = jax.random.uniform(k2, (1, fan_out), jnp.float32, -bound, bound)
    return w, b


def init_params(key, in_channels):
    keys = jax.random.split(key, 9)
    bw, bb = _init_linear(keys[0], in_channels, 1024)   # synthetic backbone
    aw, ab = _init_linear(keys[1], 1024, 1024)          # added_layers
    m0w, m0b = _init_linear(keys[2], 12, 128)           # meta_layers
    m1w, m1b = _init_linear(keys[3], 128, 256)
    m2w, m2b = _init_linear(keys[4], 256, 512)
    m3w, m3b = _init_linear(keys[5], 512, 1024)
    f0w, f0b = _init_linear(keys[6], 2048, 1024)        # final_layers
    f1w, f1b = _init_linear(keys[7], 1024, 512)
    f2w, f2b = _init_linear(keys[8], 512, 1)

    bf = lambda w: w.astype(jnp.bfloat16)
    return {
        "bw": bw, "bb": bb,
        "aw": bf(aw), "ab": ab,
        "m0w": m0w, "m0b": m0b, "m1w": m1w, "m1b": m1b,
        "m2w": m2w, "m2b": m2b, "m3w": bf(m3w), "m3b": m3b,
        "f0wi": bf(f0w[:1024]), "f0wm": bf(f0w[1024:]), "f0b": f0b,   # split cat-matmul
        "f1w": bf(f1w), "f1b": f1b,
        "f2wT": f2w.T, "f2b": f2b,                                    # (1, 512) pre-transposed
    }


# ----------------------------------------------------------------------------
# Pure-JAX reference (same bf16 weight quantization / f32 accumulation as the kernel)
# ----------------------------------------------------------------------------
def reference_forward(img, meta, p):
    f32 = jnp.float32
    dot = lambda a, b: jnp.dot(a, b, preferred_element_type=f32)
    bdot = lambda a, b: jnp.dot(a.astype(jnp.bfloat16), b, preferred_element_type=f32)

    feat = jnp.mean(img, axis=(2, 3))
    m = dot(meta, p["m0w"]) + p["m0b"]
    m = dot(m, p["m1w"]) + p["m1b"]
    m = dot(m, p["m2w"]) + p["m2b"]
    m = bdot(m, p["m3w"]) + p["m3b"]
    feat = dot(feat, p["bw"]) + p["bb"]
    img_l = bdot(feat, p["aw"]) + p["ab"]
    h = bdot(img_l, p["f0wi"]) + bdot(m, p["f0wm"]) + p["f0b"]
    h = bdot(h, p["f1w"]) + p["f1b"]
    h = jnp.sum(h * p["f2wT"], axis=-1, keepdims=True) + p["f2b"]
    return jnp.maximum(h, 0.0)


# ----------------------------------------------------------------------------
if __name__ == "__main__":
    key = jax.random.PRNGKey(0)
    k_img, k_meta, k_params = jax.random.split(key, 3)

    B, C, H, W = 2, 4, 16, 16
    img = jax.random.normal(k_img, (B, C, H, W), jnp.float32)   # NCHW, like PyTorch
    meta = jax.random.normal(k_meta, (B, 12), jnp.float32)
    params = init_params(k_params, C)

    out = paw_model_forward(img, meta, params)
    out = jax.block_until_ready(out)

    ref = reference_forward(img, meta, params)
    assert out.shape == (B, 1), out.shape
    assert jnp.allclose(out, ref, atol=2e-2, rtol=2e-2), (out, ref)
    print("KERNEL_OK")
</pallas_src>

<mosaic_0001>
module attributes {stable_mosaic.version = 11 : i64} {
  func.func @_paw_kernel(%arg0: memref<2x4xf32, #tpu.memory_space<vmem>>, %arg1: memref<2x12xf32, #tpu.memory_space<vmem>>, %arg2: memref<4x1024xf32, #tpu.memory_space<vmem>>, %arg3: memref<1x1024xf32, #tpu.memory_space<vmem>>, %arg4: memref<1024x1024xbf16, #tpu.memory_space<vmem>>, %arg5: memref<1x1024xf32, #tpu.memory_space<vmem>>, %arg6: memref<12x128xf32, #tpu.memory_space<vmem>>, %arg7: memref<1x128xf32, #tpu.memory_space<vmem>>, %arg8: memref<128x256xf32, #tpu.memory_space<vmem>>, %arg9: memref<1x256xf32, #tpu.memory_space<vmem>>, %arg10: memref<256x512xf32, #tpu.memory_space<vmem>>, %arg11: memref<1x512xf32, #tpu.memory_space<vmem>>, %arg12: memref<512x1024xbf16, #tpu.memory_space<vmem>>, %arg13: memref<1x1024xf32, #tpu.memory_space<vmem>>, %arg14: memref<1024x1024xbf16, #tpu.memory_space<vmem>>, %arg15: memref<1024x1024xbf16, #tpu.memory_space<vmem>>, %arg16: memref<1x1024xf32, #tpu.memory_space<vmem>>, %arg17: memref<1024x512xbf16, #tpu.memory_space<vmem>>, %arg18: memref<1x512xf32, #tpu.memory_space<vmem>>, %arg19: memref<1x512xf32, #tpu.memory_space<vmem>>, %arg20: memref<1x1xf32, #tpu.memory_space<vmem>>, %arg21: memref<2x1xf32, #tpu.memory_space<vmem>>) attributes {dimension_semantics = [], scalar_prefetch = 0 : i64, scratch_operands = 0 : i64, tpu.core_type = #tpu.core_type<tc>} {
    %c0 = arith.constant 0 : index
    %c0_0 = arith.constant 0 : index
    %0 = vector.load %arg1[%c0, %c0_0] : memref<2x12xf32, #tpu.memory_space<vmem>>, vector<2x12xf32>
    %c0_1 = arith.constant 0 : index
    %c0_2 = arith.constant 0 : index
    %1 = vector.load %arg6[%c0_1, %c0_2] : memref<12x128xf32, #tpu.memory_space<vmem>>, vector<12x128xf32>
    %cst = arith.constant dense<0.000000e+00> : vector<2x128xf32>
    %2 = tpu.matmul %0, %1, %cst {dimension_numbers = #tpu.dot_dimension_numbers<[1], [0], [0], [1], [0, 0, 1, 1], [], []>} : vector<2x12xf32>, vector<12x128xf32>, vector<2x128xf32> -> vector<2x128xf32>
    %c0_3 = arith.constant 0 : index
    %c0_4 = arith.constant 0 : index
    %3 = vector.load %arg7[%c0_3, %c0_4] : memref<1x128xf32, #tpu.memory_space<vmem>>, vector<1x128xf32>
    %4 = vector.broadcast %3 : vector<1x128xf32> to vector<2x128xf32>
    %5 = arith.addf %2, %4 : vector<2x128xf32>
    %c0_5 = arith.constant 0 : index
    %c0_6 = arith.constant 0 : index
    %6 = vector.load %arg8[%c0_5, %c0_6] : memref<128x256xf32, #tpu.memory_space<vmem>>, vector<128x256xf32>
    %cst_7 = arith.constant dense<0.000000e+00> : vector<2x256xf32>
    %7 = tpu.matmul %5, %6, %cst_7 {dimension_numbers = #tpu.dot_dimension_numbers<[1], [0], [0], [1], [0, 0, 1, 1], [], []>} : vector<2x128xf32>, vector<128x256xf32>, vector<2x256xf32> -> vector<2x256xf32>
    %c0_8 = arith.constant 0 : index
    %c0_9 = arith.constant 0 : index
    %8 = vector.load %arg9[%c0_8, %c0_9] : memref<1x256xf32, #tpu.memory_space<vmem>>, vector<1x256xf32>
    %9 = vector.broadcast %8 : vector<1x256xf32> to vector<2x256xf32>
    %10 = arith.addf %7, %9 : vector<2x256xf32>
    %c0_10 = arith.constant 0 : index
    %c0_11 = arith.constant 0 : index
    %11 = vector.load %arg10[%c0_10, %c0_11] : memref<256x512xf32, #tpu.memory_space<vmem>>, vector<256x512xf32>
    %cst_12 = arith.constant dense<0.000000e+00> : vector<2x512xf32>
    %12 = tpu.matmul %10, %11, %cst_12 {dimension_numbers = #tpu.dot_dimension_numbers<[1], [0], [0], [1], [0, 0, 1, 1], [], []>} : vector<2x256xf32>, vector<256x512xf32>, vector<2x512xf32> -> vector<2x512xf32>
    %c0_13 = arith.constant 0 : index
    %c0_14 = arith.constant 0 : index
    %13 = vector.load %arg11[%c0_13, %c0_14] : memref<1x512xf32, #tpu.memory_space<vmem>>, vector<1x512xf32>
    %14 = vector.broadcast %13 : vector<1x512xf32> to vector<2x512xf32>
    %15 = arith.addf %12, %14 : vector<2x512xf32>
    %c0_15 = arith.constant 0 : index
    %c0_16 = arith.constant 0 : index
    %16 = vector.load %arg12[%c0_15, %c0_16] : memref<512x1024xbf16, #tpu.memory_space<vmem>>, vector<512x1024xbf16>
    %17 = arith.truncf %15 : vector<2x512xf32> to vector<2x512xbf16>
    %cst_17 = arith.constant dense<0.000000e+00> : vector<2x1024xf32>
    %18 = tpu.matmul %17, %16, %cst_17 {dimension_numbers = #tpu.dot_dimension_numbers<[1], [0], [0], [1], [0, 0, 1, 1], [], []>} : vector<2x512xbf16>, vector<512x1024xbf16>, vector<2x1024xf32> -> vector<2x1024xf32>
    %c0_18 = arith.constant 0 : index
    %c0_19 = arith.constant 0 : index
    %19 = vector.load %arg13[%c0_18, %c0_19] : memref<1x1024xf32, #tpu.memory_space<vmem>>, vector<1x1024xf32>
    %20 = vector.broadcast %19 : vector<1x1024xf32> to vector<2x1024xf32>
    %21 = arith.addf %18, %20 : vector<2x1024xf32>
    %c0_20 = arith.constant 0 : index
    %c0_21 = arith.constant 0 : index
    %22 = vector.load %arg0[%c0_20, %c0_21] : memref<2x4xf32, #tpu.memory_space<vmem>>, vector<2x4xf32>
    %c0_22 = arith.constant 0 : index
    %c0_23 = arith.constant 0 : index
    %23 = vector.load %arg2[%c0_22, %c0_23] : memref<4x1024xf32, #tpu.memory_space<vmem>>, vector<4x1024xf32>
    %cst_24 = arith.constant dense<0.000000e+00> : vector<2x1024xf32>
    %24 = tpu.matmul %22, %23, %cst_24 {dimension_numbers = #tpu.dot_dimension_numbers<[1], [0], [0], [1], [0, 0, 1, 1], [], []>} : vector<2x4xf32>, vector<4x1024xf32>, vector<2x1024xf32> -> vector<2x1024xf32>
    %c0_25 = arith.constant 0 : index
    %c0_26 = arith.constant 0 : index
    %25 = vector.load %arg3[%c0_25, %c0_26] : memref<1x1024xf32, #tpu.memory_space<vmem>>, vector<1x1024xf32>
    %26 = vector.broadcast %25 : vector<1x1024xf32> to vector<2x1024xf32>
    %27 = arith.addf %24, %26 : vector<2x1024xf32>
    %c0_27 = arith.constant 0 : index
    %c0_28 = arith.constant 0 : index
    %28 = vector.load %arg4[%c0_27, %c0_28] : memref<1024x1024xbf16, #tpu.memory_space<vmem>>, vector<1024x1024xbf16>
    %29 = arith.truncf %27 : vector<2x1024xf32> to vector<2x1024xbf16>
    %cst_29 = arith.constant dense<0.000000e+00> : vector<2x1024xf32>
    %30 = tpu.matmul %29, %28, %cst_29 {dimension_numbers = #tpu.dot_dimension_numbers<[1], [0], [0], [1], [0, 0, 1, 1], [], []>} : vector<2x1024xbf16>, vector<1024x1024xbf16>, vector<2x1024xf32> -> vector<2x1024xf32>
    %c0_30 = arith.constant 0 : index
    %c0_31 = arith.constant 0 : index
    %31 = vector.load %arg5[%c0_30, %c0_31] : memref<1x1024xf32, #tpu.memory_space<vmem>>, vector<1x1024xf32>
    %32 = vector.broadcast %31 : vector<1x1024xf32> to vector<2x1024xf32>
    %33 = arith.addf %30, %32 : vector<2x1024xf32>
    %c0_32 = arith.constant 0 : index
    %c0_33 = arith.constant 0 : index
    %34 = vector.load %arg14[%c0_32, %c0_33] : memref<1024x1024xbf16, #tpu.memory_space<vmem>>, vector<1024x1024xbf16>
    %35 = arith.truncf %33 : vector<2x1024xf32> to vector<2x1024xbf16>
    %cst_34 = arith.constant dense<0.000000e+00> : vector<2x1024xf32>
    %36 = tpu.matmul %35, %34, %cst_34 {dimension_numbers = #tpu.dot_dimension_numbers<[1], [0], [0], [1], [0, 0, 1, 1], [], []>} : vector<2x1024xbf16>, vector<1024x1024xbf16>, vector<2x1024xf32> -> vector<2x1024xf32>
    %c0_35 = arith.constant 0 : index
    %c0_36 = arith.constant 0 : index
    %37 = vector.load %arg15[%c0_35, %c0_36] : memref<1024x1024xbf16, #tpu.memory_space<vmem>>, vector<1024x1024xbf16>
    %38 = arith.truncf %21 : vector<2x1024xf32> to vector<2x1024xbf16>
    %cst_37 = arith.constant dense<0.000000e+00> : vector<2x1024xf32>
    %39 = tpu.matmul %38, %37, %cst_37 {dimension_numbers = #tpu.dot_dimension_numbers<[1], [0], [0], [1], [0, 0, 1, 1], [], []>} : vector<2x1024xbf16>, vector<1024x1024xbf16>, vector<2x1024xf32> -> vector<2x1024xf32>
    %40 = arith.addf %36, %39 : vector<2x1024xf32>
    %c0_38 = arith.constant 0 : index
    %c0_39 = arith.constant 0 : index
    %41 = vector.load %arg16[%c0_38, %c0_39] : memref<1x1024xf32, #tpu.memory_space<vmem>>, vector<1x1024xf32>
    %42 = vector.broadcast %41 : vector<1x1024xf32> to vector<2x1024xf32>
    %43 = arith.addf %40, %42 : vector<2x1024xf32>
    %c0_40 = arith.constant 0 : index
    %c0_41 = arith.constant 0 : index
    %44 = vector.load %arg17[%c0_40, %c0_41] : memref<1024x512xbf16, #tpu.memory_space<vmem>>, vector<1024x512xbf16>
    %45 = arith.truncf %43 : vector<2x1024xf32> to vector<2x1024xbf16>
    %cst_42 = arith.constant dense<0.000000e+00> : vector<2x512xf32>
    %46 = tpu.matmul %45, %44, %cst_42 {dimension_numbers = #tpu.dot_dimension_numbers<[1], [0], [0], [1], [0, 0, 1, 1], [], []>} : vector<2x1024xbf16>, vector<1024x512xbf16>, vector<2x512xf32> -> vector<2x512xf32>
    %c0_43 = arith.constant 0 : index
    %c0_44 = arith.constant 0 : index
    %47 = vector.load %arg18[%c0_43, %c0_44] : memref<1x512xf32, #tpu.memory_space<vmem>>, vector<1x512xf32>
    %48 = vector.broadcast %47 : vector<1x512xf32> to vector<2x512xf32>
    %49 = arith.addf %46, %48 : vector<2x512xf32>
    %c0_45 = arith.constant 0 : index
    %c0_46 = arith.constant 0 : index
    %50 = vector.load %arg19[%c0_45, %c0_46] : memref<1x512xf32, #tpu.memory_space<vmem>>, vector<1x512xf32>
    %51 = vector.broadcast %50 : vector<1x512xf32> to vector<2x512xf32>
    %52 = arith.mulf %49, %51 : vector<2x512xf32>
    %cst_47 = arith.constant dense<0.000000e+00> : vector<2xf32>
    %53 = vector.multi_reduction <add>, %52, %cst_47 [1] : vector<2x512xf32> to vector<2xf32>
    %54 = vector.shape_cast %53 : vector<2xf32> to vector<2x1xf32>
    %c0_48 = arith.constant 0 : index
    %c0_49 = arith.constant 0 : index
    %55 = vector.load %arg20[%c0_48, %c0_49] : memref<1x1xf32, #tpu.memory_space<vmem>>, vector<1x1xf32>
    %56 = vector.broadcast %55 : vector<1x1xf32> to vector<2x1xf32>
    %57 = arith.addf %54, %56 : vector<2x1xf32>
    %cst_50 = arith.constant 0.000000e+00 : f32
    %58 = vector.broadcast %cst_50 : f32 to vector<2x1xf32>
    %59 = arith.maximumf %57, %58 : vector<2x1xf32>
    %c0_51 = arith.constant 0 : index
    %c0_52 = arith.constant 0 : index
    %60 = vector.load %arg21[%c0_51, %c0_52] : memref<2x1xf32, #tpu.memory_space<vmem>>, vector<2x1xf32>
    tpu.vector_store %arg21[%c0_51, %c0_52], %59 {strides = array<i32>} : memref<2x1xf32, #tpu.memory_space<vmem>>, vector<2x1xf32>,
    return
  }
}

</mosaic_0001>

<bundles_post_ra>
// kernel: tpu_custom_call.1
= control target key start
LH: loop header
LB: loop body
LE: loop exit
PB: predicated region body
PF: predicated region fallthrough
CT: control target
= control target key end

     0   :  { %s20448_s0 = inlined_call_operand.hbm [shape: f32[2,4], index: 0, kind: input, shape index: {}]   ;;  %s20449_s1 = inlined_call_operand.hbm [shape: f32[2,12], index: 1, kind: input, shape index: {}]   ;;  %s20450_s2 = inlined_call_operand.hbm [shape: f32[4,1024], index: 2, kind: input, shape index: {}]   ;;  %s20451_s3 = inlined_call_operand.hbm [shape: f32[1,1024], index: 3, kind: input, shape index: {}]   ;;  %s20452_s4 = inlined_call_operand.hbm [shape: bf16[1024,1024], index: 4, kind: input, shape index: {}]   ;;  %s20453_s5 = inlined_call_operand.hbm [shape: f32[1,1024], index: 5, kind: input, shape index: {}]   ;;  %s20454_s6 = inlined_call_operand.hbm [shape: f32[12,128], index: 6, kind: input, shape index: {}]   ;;  %s20455_s7 = inlined_call_operand.hbm [shape: f32[1,128], index: 7, kind: input, shape index: {}]   ;;  %s20456_s8 = inlined_call_operand.hbm [shape: f32[128,256], index: 8, kind: input, shape index: {}]   ;;  %s20457_s9 = inlined_call_operand.hbm [shape: f32[1,256], index: 9, kind: input, shape index: {}]   ;;  %s20458_s10 = inlined_call_operand.hbm [shape: f32[256,512], index: 10, kind: input, shape index: {}]   ;;  %s20459_s11 = inlined_call_operand.hbm [shape: f32[1,512], index: 11, kind: input, shape index: {}]   ;;  %s20460_s12 = inlined_call_operand.hbm [shape: bf16[512,1024], index: 12, kind: input, shape index: {}]   ;;  %s20461_s13 = inlined_call_operand.hbm [shape: f32[1,1024], index: 13, kind: input, shape index: {}]   ;;  %s20462_s14 = inlined_call_operand.hbm [shape: bf16[1024,1024], index: 14, kind: input, shape index: {}]   ;;  %s20463_s15 = inlined_call_operand.hbm [shape: bf16[1024,1024], index: 15, kind: input, shape index: {}]   ;;  %s20464_s16 = inlined_call_operand.hbm [shape: f32[1,1024], index: 16, kind: input, shape index: {}]   ;;  %s20465_s17 = inlined_call_operand.hbm [shape: bf16[1024,512], index: 17, kind: input, shape index: {}]   ;;  %s20466_s18 = inlined_call_operand.hbm [shape: f32[1,512], index: 18, kind: input, shape index: {}]   ;;  %s20467_s19 = inlined_call_operand.hbm [shape: f32[1,512], index: 19, kind: input, shape index: {}]   ;;  %s20468_s20 = inlined_call_operand.<no memory space> [shape: f32[1,1], index: 20, kind: input, shape index: {}]   ;;  %s20469_s21 = inlined_call_operand.vmem [shape: f32[2,1], index: 21, kind: output, shape index: {}]  }
   0x1   :  { %20476 = sst [smem:[#allocation45_spill]] %s20448_s0  ;;  %v26_v0 = vstv %s20468_s20 }
   0x2   :  { %20477 = sst [smem:[#allocation46_spill]] %s20449_s1  ;;  %27 = vst [vmem:[#allocation2] sm:$0x1] %v26_v0 }
   0x3   :  { %20478 = sst [smem:[#allocation47_spill]] %s20450_s2 }
   0x4   :  { %20479 = sst [smem:[#allocation48_spill]] %s20451_s3 }
   0x5   :  { %20480 = sst [smem:[#allocation49_spill]] %s20452_s4 }
   0x6   :  { %20481 = sst [smem:[#allocation50_spill]] %s20453_s5 }
   0x7   :  { %28 = vsyncpa [#allocation4], 0 }
   0x8   :  { %29 = vsyncpa [#allocation6], 0 }
   0x9   :  { %30 = vsyncpa [#allocation9], 0 }
   0xa   :  { %31 = vsyncpa [#allocation12], 0 }
   0xb   :  { %32 = vsyncpa [#allocation15], 0 }
   0xc   :  { %33 = vsyncpa [#allocation18], 0 }
   0xd   :  { %34 = vsyncpa [#allocation21], 0 }
   0xe   :  { %35 = vsyncpa [#allocation24], 0 }
   0xf   :  { %36 = vsyncpa [#allocation27], 0 }
  0x10   :  { %37 = vsyncpa [#allocation30], 0 }
  0x11   :  { %38 = vsyncpa [#allocation33], 0  ;;  %s19565_s26 = smov [#allocation5]   ;;  %s19566_s3 = smov [#allocation8]  }
  0x12   :  { %s55_s27 = sshll.u32 %s19565_s26, 4  ;;  %s75_s28 = sshll.u32 %s19566_s3, 4  ;;  %s56_s27 = int_to_ptr.vmem [resolvable:$true] %s55_s27  ;;  %s76_s28 = int_to_ptr.vmem [resolvable:$true] %s75_s28 }
  0x13   :  { %s20482_s0 = sld [smem:[#allocation46_spill]] }
  0x19   :  { %s19103_s4 = scalar_lea.hbm %s20482_s0, 32 }
  0x1a   :  { %p19104_p0 = scmp.ne.s32.totalorder %s20482_s0, %s19103_s4  ;;  %p19107_p1 = scmp.lt.u32.totalorder %s19103_s4, %s20482_s0 }
  0x1c   :  { %p19109_p2 = pnand %p19107_p1, %p19104_p0 }
  0x1e   :  { %19112 = shalt.err (!%p19109_p2)
}
  0x1f   :  { %s19113_s1 = scalar_lea.vmem %s56_s27, 32  ;;  %p19118_p4 = scmp.lt.s32.totalorder %s56_s27, %s56_s27 }
  0x20   :  { %p19114_p3 = scmp.ne.s32.totalorder %s56_s27, %s19113_s1  ;;  %p19119_p5 = scmp.lt.s32.totalorder %s19113_s1, %s19113_s1 }
  0x22   :  { %p19120_p6 = por %p19119_p5, %p19118_p4 }
  0x24   :  { %p19121_p7 = pnand %p19120_p6, %p19114_p3 }
  0x26   :  { %19124 = shalt.err (!%p19121_p7)
}
  0x27   :  { %58 = dma.hbm_to_vmem [thread:$0]  %s20482_s0, 32, %s56_s27, [#allocation6]  }
  0x28   :  { %s20483_s3 = sld [smem:[#allocation48_spill]] }
  0x2e   :  { %s19125_s29 = scalar_lea.hbm %s20483_s3, 128 }
  0x2f   :  { %p19126_p8 = scmp.ne.s32.totalorder %s20483_s3, %s19125_s29  ;;  %p19129_p9 = scmp.lt.u32.totalorder %s19125_s29, %s20483_s3 }
  0x31   :  { %p19131_p10 = pnand %p19129_p9, %p19126_p8 }
  0x33   :  { %19134 = shalt.err (!%p19131_p10)
}
  0x34   :  { %s19135_s22 = scalar_lea.vmem %s76_s28, 128  ;;  %p19140_p12 = scmp.lt.s32.totalorder %s76_s28, %s76_s28 }
  0x35   :  { %p19136_p11 = scmp.ne.s32.totalorder %s76_s28, %s19135_s22  ;;  %p19141_p13 = scmp.lt.s32.totalorder %s19135_s22, %s19135_s22 }
  0x37   :  { %p19142_p0 = por %p19141_p13, %p19140_p12 }
  0x39   :  { %p19143_p1 = pnand %p19142_p0, %p19136_p11 }
  0x3b   :  { %19146 = shalt.err (!%p19143_p1)
}
  0x3c   :  { %78 = dma.hbm_to_vmem [thread:$0]  %s20483_s3, 128, %s76_s28, [#allocation9]  }
  0x3d   :  { %s19567_s23 = smov [#allocation11]   ;;  %s19568_s24 = smov [#allocation14]  }
  0x3e   :  { %s97_s1 = sshll.u32 %s19567_s23, 4  ;;  %s119_s2 = sshll.u32 %s19568_s24, 4  ;;  %s98_s1 = int_to_ptr.vmem [resolvable:$true] %s97_s1  ;;  %s120_s2 = int_to_ptr.vmem [resolvable:$true] %s119_s2 }
  0x3f   :  { %s20484_s29 = sld [smem:[#allocation50_spill]] }
  0x45   :  { %s19147_s20 = scalar_lea.hbm %s20484_s29, 128 }
  0x46   :  { %p19148_p2 = scmp.ne.s32.totalorder %s20484_s29, %s19147_s20  ;;  %p19151_p3 = scmp.lt.u32.totalorder %s19147_s20, %s20484_s29 }
  0x48   :  { %p19153_p4 = pnand %p19151_p3, %p19148_p2 }
  0x4a   :  { %19156 = shalt.err (!%p19153_p4)
}
  0x4b   :  { %s19157_s28 = scalar_lea.vmem %s98_s1, 128  ;;  %p19162_p6 = scmp.lt.s32.totalorder %s98_s1, %s98_s1 }
  0x4c   :  { %p19158_p5 = scmp.ne.s32.totalorder %s98_s1, %s19157_s28  ;;  %p19163_p7 = scmp.lt.s32.totalorder %s19157_s28, %s19157_s28 }
  0x4e   :  { %p19164_p8 = por %p19163_p7, %p19162_p6 }
  0x50   :  { %p19165_p9 = pnand %p19164_p8, %p19158_p5 }
  0x52   :  { %19168 = shalt.err (!%p19165_p9)
}
  0x53   :  { %100 = dma.hbm_to_vmem [thread:$0]  %s20484_s29, 128, %s98_s1, [#allocation12]  }
  0x54   :  { %s19169_s24 = scalar_lea.hbm %s20455_s7, 16 }
  0x55   :  { %p19170_p10 = scmp.ne.s32.totalorder %s20455_s7, %s19169_s24  ;;  %p19173_p11 = scmp.lt.u32.totalorder %s19169_s24, %s20455_s7 }
  0x57   :  { %p19175_p12 = pnand %p19173_p11, %p19170_p10 }
  0x59   :  { %19178 = shalt.err (!%p19175_p12)
}
  0x5a   :  { %s19179_s4 = scalar_lea.vmem %s120_s2, 16  ;;  %s19183_s5 = scalar_lea.vmem %s120_s2, 32 }
  0x5b   :  { %p19180_p13 = scmp.ne.s32.totalorder %s120_s2, %s19179_s4  ;;  %p19184_p0 = scmp.lt.s32.totalorder %s120_s2, %s120_s2 }
  0x5c   :  { %p19185_p1 = scmp.lt.s32.totalorder %s19183_s5, %s19179_s4 }
  0x5e   :  { %p19186_p2 = por %p19185_p1, %p19184_p0 }
  0x60   :  { %p19187_p3 = pnand %p19186_p2, %p19180_p13 }
  0x62   :  { %19190 = shalt.err (!%p19187_p3)
}
  0x63   :  { %122 = dma.hbm_to_vmem [thread:$0]  %s20455_s7, 16, %s120_s2, [#allocation15]  }
  0x64   :  { %s19569_s22 = smov [#allocation17]   ;;  %s19570_s3 = smov [#allocation20]  }
  0x65   :  { %s141_s28 = sshll.u32 %s19569_s22, 4  ;;  %s163_s27 = sshll.u32 %s19570_s3, 4  ;;  %s142_s28 = int_to_ptr.vmem [resolvable:$true] %s141_s28  ;;  %s164_s27 = int_to_ptr.vmem [resolvable:$true] %s163_s27 }
  0x66   :  { %s19191_s24 = scalar_lea.hbm %s20457_s9, 32 }
  0x67   :  { %p19192_p4 = scmp.ne.s32.totalorder %s20457_s9, %s19191_s24  ;;  %p19195_p5 = scmp.lt.u32.totalorder %s19191_s24, %s20457_s9 }
  0x69   :  { %p19197_p6 = pnand %p19195_p5, %p19192_p4 }
  0x6b   :  { %19200 = shalt.err (!%p19197_p6)
}
  0x6c   :  { %s19201_s7 = scalar_lea.vmem %s142_s28, 32  ;;  %p19206_p8 = scmp.lt.s32.totalorder %s142_s28, %s142_s28 }
  0x6d   :  { %p19202_p7 = scmp.ne.s32.totalorder %s142_s28, %s19201_s7  ;;  %p19207_p9 = scmp.lt.s32.totalorder %s19201_s7, %s19201_s7 }
  0x6f   :  { %p19208_p10 = por %p19207_p9, %p19206_p8 }
  0x71   :  { %p19209_p11 = pnand %p19208_p10, %p19202_p7 }
  0x73   :  { %19212 = shalt.err (!%p19209_p11)
}
  0x74   :  { %144 = dma.hbm_to_vmem [thread:$0]  %s20457_s9, 32, %s142_s28, [#allocation18]  }
  0x75   :  { %s19213_s29 = scalar_lea.hbm %s20459_s11, 64 }
  0x76   :  { %p19214_p12 = scmp.ne.s32.totalorder %s20459_s11, %s19213_s29  ;;  %p19217_p13 = scmp.lt.u32.totalorder %s19213_s29, %s20459_s11 }
  0x78   :  { %p19219_p0 = pnand %p19217_p13, %p19214_p12 }
  0x7a   :  { %19222 = shalt.err (!%p19219_p0)
}
  0x7b   :  { %s19223_s24 = scalar_lea.vmem %s164_s27, 64  ;;  %p19228_p2 = scmp.lt.s32.totalorder %s164_s27, %s164_s27 }
  0x7c   :  { %p19224_p1 = scmp.ne.s32.totalorder %s164_s27, %s19223_s24  ;;  %p19229_p3 = scmp.lt.s32.totalorder %s19223_s24, %s19223_s24 }
  0x7e   :  { %p19230_p4 = por %p19229_p3, %p19228_p2 }
  0x80   :  { %p19231_p5 = pnand %p19230_p4, %p19224_p1 }
  0x82   :  { %19234 = shalt.err (!%p19231_p5)
}
  0x83   :  { %166 = dma.hbm_to_vmem [thread:$0]  %s20459_s11, 64, %s164_s27, [#allocation21]  }
  0x84   :  { %s19571_s25 = smov [#allocation23]   ;;  %s19235_s7 = scalar_lea.hbm %s20461_s13, 128 }
  0x85   :  { %s185_s26 = sshll.u32 %s19571_s25, 4  ;;  %p19236_p6 = scmp.ne.s32.totalorder %s20461_s13, %s19235_s7  ;;  %s186_s26 = int_to_ptr.vmem [resolvable:$true] %s185_s26 }
  0x86   :  { %p19239_p7 = scmp.lt.u32.totalorder %s19235_s7, %s20461_s13 }
  0x88   :  { %p19241_p8 = pnand %p19239_p7, %p19236_p6 }
  0x8a   :  { %19244 = shalt.err (!%p19241_p8)
}
  0x8b   :  { %s19245_s29 = scalar_lea.vmem %s186_s26, 128  ;;  %p19250_p10 = scmp.lt.s32.totalorder %s186_s26, %s186_s26 }
  0x8c   :  { %p19246_p9 = scmp.ne.s32.totalorder %s186_s26, %s19245_s29  ;;  %p19251_p11 = scmp.lt.s32.totalorder %s19245_s29, %s19245_s29 }
  0x8e   :  { %p19252_p12 = por %p19251_p11, %p19250_p10 }
  0x90   :  { %p19253_p13 = pnand %p19252_p12, %p19246_p9 }
  0x92   :  { %19256 = shalt.err (!%p19253_p13)
}
  0x93   :  { %188 = dma.hbm_to_vmem [thread:$0]  %s20461_s13, 128, %s186_s26, [#allocation24]  }
  0x94   :  { %s19572_s22 = smov [#allocation26]   ;;  %s19257_s24 = scalar_lea.hbm %s20463_s15, 65536 }
  0x95   :  { %s206_s3 = sshll.u32 %s19572_s22, 4  ;;  %p19258_p0 = scmp.ne.s32.totalorder %s20463_s15, %s19257_s24  ;;  %s207_s3 = int_to_ptr.vmem [resolvable:$true] %s206_s3 }
  0x96   :  { %p19261_p1 = scmp.lt.u32.totalorder %s19257_s24, %s20463_s15 }
  0x98   :  { %p19263_p2 = pnand %p19261_p1, %p19258_p0 }
  0x9a   :  { %19266 = shalt.err (!%p19263_p2)
}
  0x9b   :  { %s19267_s30 = scalar_lea.vmem %s207_s3, 65536  ;;  %p19272_p4 = scmp.lt.s32.totalorder %s207_s3, %s207_s3 }
  0x9c   :  { %p19268_p3 = scmp.ne.s32.totalorder %s207_s3, %s19267_s30  ;;  %p19273_p5 = scmp.lt.s32.totalorder %s19267_s30, %s19267_s30 }
  0x9e   :  { %p19274_p6 = por %p19273_p5, %p19272_p4 }
  0xa0   :  { %p19275_p7 = pnand %p19274_p6, %p19268_p3 }
  0xa2   :  { %19278 = shalt.err (!%p19275_p7)
}
  0xa3   :  { %s19573_s13 = smov 512   ;;  %s19574_s26 = smov 32  }
  0xa4   :  { %212 = dma.hbm_to_vmem [thread:$0]  %s20463_s15, 65536, %s207_s3, [#allocation27], %s19573_s13, %s19573_s13, %s19574_s26  }
  0xa5   :  { %s19575_s4 = smov [#allocation29]   ;;  %s19576_s1 = smov [#allocation3]  }
  0xa6   :  { %s228_s5 = sshll.u32 %s19575_s4, 4  ;;  %s45_s29 = sshll.u32 %s19576_s1, 4  ;;  %s229_s5 = int_to_ptr.vmem [resolvable:$true] %s228_s5  ;;  %s46_s29 = int_to_ptr.vmem [resolvable:$true] %s45_s29 }
  0xa7   :  { %s19279_s22 = scalar_lea.hbm %s20465_s17, 32768 }
  0xa8   :  { %p19280_p8 = scmp.ne.s32.totalorder %s20465_s17, %s19279_s22  ;;  %p19283_p9 = scmp.lt.u32.totalorder %s19279_s22, %s20465_s17 }
  0xaa   :  { %p19285_p10 = pnand %p19283_p9, %p19280_p8 }
  0xac   :  { %19288 = shalt.err (!%p19285_p10)
}
  0xad   :  { %s19289_s15 = scalar_lea.vmem %s229_s5, 32768  ;;  %p19294_p12 = scmp.lt.s32.totalorder %s229_s5, %s229_s5 }
  0xae   :  { %p19290_p11 = scmp.ne.s32.totalorder %s229_s5, %s19289_s15  ;;  %p19295_p13 = scmp.lt.s32.totalorder %s19289_s15, %s19289_s15 }
  0xb0   :  { %p19296_p0 = por %p19295_p13, %p19294_p12 }
  0xb2   :  { %p19297_p1 = pnand %p19296_p0, %p19290_p11 }
  0xb4   :  { %19300 = shalt.err (!%p19297_p1)
}
  0xb5   :  { %s19577_s3 = smov 256   ;;  %s19578_s28 = smov 16  }
  0xb6   :  { %234 = dma.hbm_to_vmem [thread:$0]  %s20465_s17, 32768, %s229_s5, [#allocation30], %s19577_s3, %s19577_s3, %s19578_s28  }
  0xb7   :  { %s20485_s2 = sld [smem:[#allocation45_spill]] }
  0xbd   :  { %s19301_s4 = scalar_lea.hbm %s20485_s2, 32 }
  0xbe   :  { %p19302_p2 = scmp.ne.s32.totalorder %s20485_s2, %s19301_s4  ;;  %p19305_p3 = scmp.lt.u32.totalorder %s19301_s4, %s20485_s2 }
  0xc0   :  { %p19307_p4 = pnand %p19305_p3, %p19302_p2 }
  0xc2   :  { %19310 = shalt.err (!%p19307_p4)
}
  0xc3   :  { %s19311_s0 = scalar_lea.vmem %s46_s29, 32  ;;  %p19316_p6 = scmp.lt.s32.totalorder %s46_s29, %s46_s29 }
  0xc4   :  { %p19312_p5 = scmp.ne.s32.totalorder %s46_s29, %s19311_s0  ;;  %p19317_p7 = scmp.lt.s32.totalorder %s19311_s0, %s19311_s0 }
  0xc6   :  { %p19318_p8 = por %p19317_p7, %p19316_p6 }
  0xc8   :  { %p19319_p9 = pnand %p19318_p8, %p19312_p5 }
  0xca   :  { %19322 = shalt.err (!%p19319_p9)
}
  0xcb   :  { %48 = dma.hbm_to_vmem [thread:$0]  %s20485_s2, 32, %s46_s29, [#allocation4]  }
  0xcc   :  { %s19579_s23 = smov [#allocation7]   ;;  %s19580_s9 = smov [#allocation10]  }
  0xcd   :  { %s65_s24 = sshll.u32 %s19579_s23, 4  ;;  %s84_s15 = sshll.u32 %s19580_s9, 4  ;;  %s66_s24 = int_to_ptr.vmem [resolvable:$true] %s65_s24  ;;  %s19834_s15 = int_to_ptr.vmem [resolvable:$true] %s84_s15 }
  0xce   :  { %s20486_s30 = sld [smem:[#allocation47_spill]] }
  0xd4   :  { %s19323_s7 = scalar_lea.hbm %s20486_s30, 512 }
  0xd5   :  { %p19324_p10 = scmp.ne.s32.totalorder %s20486_s30, %s19323_s7  ;;  %p19327_p11 = scmp.lt.u32.totalorder %s19323_s7, %s20486_s30 }
  0xd7   :  { %p19329_p12 = pnand %p19327_p11, %p19324_p10 }
  0xd9   :  { %19332 = shalt.err (!%p19329_p12)
}
  0xda   :  { %s19333_s29 = scalar_lea.vmem %s66_s24, 512  ;;  %p19338_p0 = scmp.lt.s32.totalorder %s66_s24, %s66_s24 }
  0xdb   :  { %p19334_p13 = scmp.ne.s32.totalorder %s66_s24, %s19333_s29  ;;  %p19339_p1 = scmp.lt.s32.totalorder %s19333_s29, %s19333_s29 }
  0xdd   :  { %p19340_p2 = por %p19339_p1, %p19338_p0 }
  0xdf   :  { %p19341_p3 = pnand %p19340_p2, %p19334_p13 }
  0xe1   :  { %19344 = shalt.err (!%p19341_p3)
}
  0xe2   :  { %68 = dma.hbm_to_vmem [thread:$0]  %s20486_s30, 512, %s66_s24, [#allocation6]  }
  0xe3   :  { %s20487_s5 = sld [smem:[#allocation49_spill]] }
  0xe9   :  { %s19345_s23 = scalar_lea.hbm %s20487_s5, 65536 }
  0xea   :  { %p19346_p4 = scmp.ne.s32.totalorder %s20487_s5, %s19345_s23  ;;  %p19349_p5 = scmp.lt.u32.totalorder %s19345_s23, %s20487_s5 }
  0xec   :  { %p19351_p6 = pnand %p19349_p5, %p19346_p4 }
  0xee   :  { %19354 = shalt.err (!%p19351_p6)
}
  0xef   :  { %s19355_s4 = scalar_lea.vmem %s19834_s15, 65536  ;;  %p19360_p8 = scmp.lt.s32.totalorder %s19834_s15, %s19834_s15 }
  0xf0   :  { %p19356_p7 = scmp.ne.s32.totalorder %s19834_s15, %s19355_s4  ;;  %p19361_p9 = scmp.lt.s32.totalorder %s19355_s4, %s19355_s4 }
  0xf2   :  { %p19362_p10 = por %p19361_p9, %p19360_p8 }
  0xf4   :  { %p19363_p11 = pnand %p19362_p10, %p19356_p7 }
  0xf6   :  { %19366 = shalt.err (!%p19363_p11)
}
  0xf7   :  { %90 = dma.hbm_to_vmem [thread:$0]  %s20487_s5, 65536, %s19834_s15, [#allocation9], %s19573_s13, %s19573_s13, %s19574_s26  }
  0xf8   :  { %s19581_s1 = smov [#allocation13]   ;;  %s19367_s2 = scalar_lea.hbm %s20454_s6, 256 }
  0xf9   :  { %s106_s11 = sshll.u32 %s19581_s1, 4  ;;  %p19368_p12 = scmp.ne.s32.totalorder %s20454_s6, %s19367_s2  ;;  %s107_s11 = int_to_ptr.vmem [resolvable:$true] %s106_s11 }
  0xfa   :  { %p19371_p13 = scmp.lt.u32.totalorder %s19367_s2, %s20454_s6 }
  0xfc   :  { %p19373_p0 = pnand %p19371_p13, %p19368_p12 }
  0xfe   :  { %19376 = shalt.err (!%p19373_p0)
}
  0xff   :  { %s19377_s9 = scalar_lea.vmem %s107_s11, 256  ;;  %p19382_p2 = scmp.lt.s32.totalorder %s107_s11, %s107_s11 }
 0x100   :  { %p19378_p1 = scmp.ne.s32.totalorder %s107_s11, %s19377_s9  ;;  %p19383_p3 = scmp.lt.s32.totalorder %s19377_s9, %s19377_s9 }
 0x102   :  { %p19384_p4 = por %p19383_p3, %p19382_p2 }
 0x104   :  { %p19385_p5 = pnand %p19384_p4, %p19378_p1 }
 0x106   :  { %19388 = shalt.err (!%p19385_p5)
}
 0x107   :  { %s19582_s15 = smov 128   ;;  %s19583_s5 = smov 8  }
 0x108   :  { %112 = dma.hbm_to_vmem [thread:$0]  %s20454_s6, 256, %s107_s11, [#allocation12], %s19582_s15, %s19582_s15, %s19583_s5  }
 0x109   :  { %s19584_s7 = smov [#allocation16]   ;;  %s19585_s24 = smov [#allocation19]  }
 0x10a   :  { %s128_s4 = sshll.u32 %s19584_s7, 4  ;;  %s150_s30 = sshll.u32 %s19585_s24, 4  ;;  %s129_s4 = int_to_ptr.vmem [resolvable:$true] %s128_s4  ;;  %s151_s30 = int_to_ptr.vmem [resolvable:$true] %s150_s30 }
 0x10b   :  { %s19389_s29 = scalar_lea.hbm %s20456_s8, 4096 }
 0x10c   :  { %p19390_p6 = scmp.ne.s32.totalorder %s20456_s8, %s19389_s29  ;;  %p19393_p7 = scmp.lt.u32.totalorder %s19389_s29, %s20456_s8 }
 0x10e   :  { %p19395_p8 = pnand %p19393_p7, %p19390_p6 }
 0x110   :  { %19398 = shalt.err (!%p19395_p8)
}
 0x111   :  { %s19399_s6 = scalar_lea.vmem %s129_s4, 4096  ;;  %p19404_p10 = scmp.lt.s32.totalorder %s129_s4, %s129_s4 }
 0x112   :  { %p19400_p9 = scmp.ne.s32.totalorder %s129_s4, %s19399_s6  ;;  %p19405_p11 = scmp.lt.s32.totalorder %s19399_s6, %s19399_s6 }
 0x114   :  { %p19406_p12 = por %p19405_p11, %p19404_p10 }
 0x116   :  { %p19407_p13 = pnand %p19406_p12, %p19400_p9 }
 0x118   :  { %19410 = shalt.err (!%p19407_p13)
}
 0x119   :  { %134 = dma.hbm_to_vmem [thread:$0]  %s20456_s8, 4096, %s129_s4, [#allocation15], %s19577_s3, %s19577_s3, %s19578_s28  }
 0x11a   :  { %s19411_s5 = scalar_lea.hbm %s20458_s10, 16384 }
 0x11b   :  { %p19412_p0 = scmp.ne.s32.totalorder %s20458_s10, %s19411_s5  ;;  %p19415_p1 = scmp.lt.u32.totalorder %s19411_s5, %s20458_s10 }
 0x11d   :  { %p19417_p2 = pnand %p19415_p1, %p19412_p0 }
 0x11f   :  { %19420 = shalt.err (!%p19417_p2)
}
 0x120   :  { %s19421_s1 = scalar_lea.vmem %s151_s30, 16384  ;;  %p19426_p4 = scmp.lt.s32.totalorder %s151_s30, %s151_s30 }
 0x121   :  { %p19422_p3 = scmp.ne.s32.totalorder %s151_s30, %s19421_s1  ;;  %p19427_p5 = scmp.lt.s32.totalorder %s19421_s1, %s19421_s1 }
 0x123   :  { %p19428_p6 = por %p19427_p5, %p19426_p4 }
 0x125   :  { %p19429_p7 = pnand %p19428_p6, %p19422_p3 }
 0x127   :  { %19432 = shalt.err (!%p19429_p7)
}
 0x128   :  { %156 = dma.hbm_to_vmem [thread:$0]  %s20458_s10, 16384, %s151_s30, [#allocation18], %s19573_s13, %s19573_s13, %s19574_s26  }
 0x129   :  { %s19586_s28 = smov [#allocation22]   ;;  %s19587_s27 = smov [#allocation25]  }
 0x12a   :  { %s172_s4 = sshll.u32 %s19586_s28, 4  ;;  %s194_s29 = sshll.u32 %s19587_s27, 4  ;;  %s173_s4 = int_to_ptr.vmem [resolvable:$true] %s172_s4  ;;  %s195_s29 = int_to_ptr.vmem [resolvable:$true] %s194_s29 }
 0x12b   :  { %s19433_s0 = scalar_lea.hbm %s20460_s12, 32768 }
 0x12c   :  { %p19434_p8 = scmp.ne.s32.totalorder %s20460_s12, %s19433_s0  ;;  %p19437_p9 = scmp.lt.u32.totalorder %s19433_s0, %s20460_s12 }
 0x12e   :  { %p19439_p10 = pnand %p19437_p9, %p19434_p8 }
 0x130   :  { %19442 = shalt.err (!%p19439_p10)
}
 0x131   :  { %s19443_s10 = scalar_lea.vmem %s173_s4, 32768  ;;  %p19448_p12 = scmp.lt.s32.totalorder %s173_s4, %s173_s4 }
 0x132   :  { %p19444_p11 = scmp.ne.s32.totalorder %s173_s4, %s19443_s10  ;;  %p19449_p13 = scmp.lt.s32.totalorder %s19443_s10, %s19443_s10 }
 0x134   :  { %p19450_p0 = por %p19449_p13, %p19448_p12 }
 0x136   :  { %p19451_p1 = pnand %p19450_p0, %p19444_p11 }
 0x138   :  { %19454 = shalt.err (!%p19451_p1)
}
 0x139   :  { %178 = dma.hbm_to_vmem [thread:$0]  %s20460_s12, 32768, %s173_s4, [#allocation21], %s19573_s13, %s19573_s13, %s19574_s26  }
 0x13a   :  { %s19455_s25 = scalar_lea.hbm %s20462_s14, 65536 }
 0x13b   :  { %p19456_p2 = scmp.ne.s32.totalorder %s20462_s14, %s19455_s25  ;;  %p19459_p3 = scmp.lt.u32.totalorder %s19455_s25, %s20462_s14 }
 0x13d   :  { %p19461_p4 = pnand %p19459_p3, %p19456_p2 }
 0x13f   :  { %19464 = shalt.err (!%p19461_p4)
}
 0x140   :  { %s19465_s8 = scalar_lea.vmem %s195_s29, 65536  ;;  %p19470_p6 = scmp.lt.s32.totalorder %s195_s29, %s195_s29 }
 0x141   :  { %p19466_p5 = scmp.ne.s32.totalorder %s195_s29, %s19465_s8  ;;  %p19471_p7 = scmp.lt.s32.totalorder %s19465_s8, %s19465_s8 }
 0x143   :  { %p19472_p8 = por %p19471_p7, %p19470_p6 }
 0x145   :  { %p19473_p9 = pnand %p19472_p8, %p19466_p5 }
 0x147   :  { %19476 = shalt.err (!%p19473_p9)
}
 0x148   :  { %200 = dma.hbm_to_vmem [thread:$0]  %s20462_s14, 65536, %s195_s29, [#allocation24], %s19573_s13, %s19573_s13, %s19574_s26  }
 0x149   :  { %s19588_s28 = smov [#allocation28]   ;;  %s19589_s27 = smov [#allocation31]  }
 0x14a   :  { %s219_s4 = sshll.u32 %s19588_s28, 4  ;;  %s241_s2 = sshll.u32 %s19589_s27, 4  ;;  %s220_s4 = int_to_ptr.vmem [resolvable:$true] %s219_s4  ;;  %s242_s2 = int_to_ptr.vmem [resolvable:$true] %s241_s2 }
 0x14b   :  { %s19477_s17 = scalar_lea.hbm %s20464_s16, 128 }
 0x14c   :  { %p19478_p10 = scmp.ne.s32.totalorder %s20464_s16, %s19477_s17  ;;  %p19481_p11 = scmp.lt.u32.totalorder %s19477_s17, %s20464_s16 }
 0x14e   :  { %p19483_p12 = pnand %p19481_p11, %p19478_p10 }
 0x150   :  { %19486 = shalt.err (!%p19483_p12)
}
 0x151   :  { %s19487_s14 = scalar_lea.vmem %s220_s4, 128  ;;  %p19492_p0 = scmp.lt.s32.totalorder %s220_s4, %s220_s4 }
 0x152   :  { %p19488_p13 = scmp.ne.s32.totalorder %s220_s4, %s19487_s14  ;;  %p19493_p1 = scmp.lt.s32.totalorder %s19487_s14, %s19487_s14 }
 0x154   :  { %p19494_p2 = por %p19493_p1, %p19492_p0 }
 0x156   :  { %p19495_p3 = pnand %p19494_p2, %p19488_p13 }
 0x158   :  { %19498 = shalt.err (!%p19495_p3)
}
 0x159   :  { %222 = dma.hbm_to_vmem [thread:$0]  %s20464_s16, 128, %s220_s4, [#allocation27]  }
 0x15a   :  { %s19499_s9 = scalar_lea.hbm %s20466_s18, 64 }
 0x15b   :  { %p19500_p4 = scmp.ne.s32.totalorder %s20466_s18, %s19499_s9  ;;  %p19503_p5 = scmp.lt.u32.totalorder %s19499_s9, %s20466_s18 }
 0x15d   :  { %p19505_p6 = pnand %p19503_p5, %p19500_p4 }
 0x15f   :  { %19508 = shalt.err (!%p19505_p6)
}
 0x160   :  { %s19509_s7 = scalar_lea.vmem %s242_s2, 64  ;;  %p19514_p8 = scmp.lt.s32.totalorder %s242_s2, %s242_s2 }
 0x161   :  { %p19510_p7 = scmp.ne.s32.totalorder %s242_s2, %s19509_s7  ;;  %p19515_p9 = scmp.lt.s32.totalorder %s19509_s7, %s19509_s7 }
 0x163   :  { %p19516_p10 = por %p19515_p9, %p19514_p8 }
 0x165   :  { %p19517_p11 = pnand %p19516_p10, %p19510_p7 }
 0x167   :  { %19520 = shalt.err (!%p19517_p11)
}
 0x168   :  { %244 = dma.hbm_to_vmem [thread:$0]  %s20466_s18, 64, %s242_s2, [#allocation30]  }
 0x169   :  { %s19590_s1 = smov [#allocation32]   ;;  %s19521_s28 = scalar_lea.hbm %s20467_s19, 64 }
 0x16a   :  { %s251_s8 = sshll.u32 %s19590_s1, 4  ;;  %p19522_p12 = scmp.ne.s32.totalorder %s20467_s19, %s19521_s28  ;;  %s252_s8 = int_to_ptr.vmem [resolvable:$true] %s251_s8 }
 0x16b   :  { %p19525_p13 = scmp.lt.u32.totalorder %s19521_s28, %s20467_s19 }
 0x16d   :  { %p19527_p0 = pnand %p19525_p13, %p19522_p12 }
 0x16f   :  { %19530 = shalt.err (!%p19527_p0)
}
 0x170   :  { %s19531_s17 = scalar_lea.vmem %s252_s8, 64  ;;  %p19536_p2 = scmp.lt.s32.totalorder %s252_s8, %s252_s8 }
 0x171   :  { %p19532_p1 = scmp.ne.s32.totalorder %s252_s8, %s19531_s17  ;;  %p19537_p3 = scmp.lt.s32.totalorder %s19531_s17, %s19531_s17 }
 0x173   :  { %p19538_p4 = por %p19537_p3, %p19536_p2 }
 0x175   :  { %p19539_p5 = pnand %p19538_p4, %p19532_p1 }
 0x177   :  { %19542 = shalt.err (!%p19539_p5)
}
 0x178   :  { %254 = dma.hbm_to_vmem [thread:$0]  %s20467_s19, 64, %s252_s8, [#allocation33]  }
 0x179   :  { %19543 = dma.done.wait [#allocation4], 32  }
 0x17a   :  { %19544 = vsyncadd [#allocation4], 4294967264 }
 0x17b   :  { %19545 = dma.done.wait [#allocation6], 544  }
 0x17c   :  { %19546 = vsyncadd [#allocation6], 4294966752 }
 0x17d   :  { %19547 = dma.done.wait [#allocation9], 65664  }
 0x17e   :  { %19548 = vsyncadd [#allocation9], 4294901632 }
 0x17f   :  { %19549 = dma.done.wait [#allocation12], 384  }
 0x180   :  { %19550 = vsyncadd [#allocation12], 4294966912 }
 0x181   :  { %19551 = dma.done.wait [#allocation15], 4112  }
 0x182   :  { %19552 = vsyncadd [#allocation15], 4294963184 }
 0x183   :  { %19553 = dma.done.wait [#allocation18], 16416  }
 0x184   :  { %19554 = vsyncadd [#allocation18], 4294950880 }
 0x185   :  { %19555 = dma.done.wait [#allocation21], 32832  }
 0x186   :  { %19556 = vsyncadd [#allocation21], 4294934464 }
 0x187   :  { %19557 = dma.done.wait [#allocation24], 65664  }
 0x188   :  { %19558 = vsyncadd [#allocation24], 4294901632 }
 0x189   :  { %19559 = dma.done.wait [#allocation27], 65664  }
 0x18a   :  { %19560 = vsyncadd [#allocation27], 4294901632 }
 0x18b   :  { %19561 = dma.done.wait [#allocation30], 32832  }
 0x18c   :  { %19562 = vsyncadd [#allocation30], 4294934464 }
 0x18d   :  { %19563 = dma.done.wait [#allocation33], 64  }
 0x18e   :  { %19564 = vsyncadd [#allocation33], 4294967232  ;;  %v19591_v1 = vmov 0.0|0.0   ;;  %vm19592_vm0 = vmmov 0   ;;  %v19593_v2 = vmov 0.0   ;;  %vm331_vm1 = vcmask 1043456  }
 0x18f   :  { %18411 = vmatprep.subr.bf16.mxu0 %v19591_v1  ;;  %18408 = vmatprep.mubr.msk.f32.mxu0 %vm19592_vm0, %v19593_v2  ;;  %v318_v3 = vld [vmem:[#allocation13] sm:$0xff]  ;;  %v319_v4 = vld [vmem:[#allocation13 + $0x8] sm:$0xf]  ;;  %vm19594_vm2 = vmmov 1   ;;  %v317_v6 = vld [vmem:[#allocation5] sm:$0x3] }
 0x190   :  { %513 = vmatprep.mubr.f32.mxu1 %v19593_v2  ;;  %vm18413_vm3 = vmpackc.low %vm331_vm1, %vm19594_vm2  ;;  %v18412_v5 = vpack.c.bf16 %v319_v4, %v318_v3  ;;  %v406_v7 = vld [vmem:[#allocation16 + $0x8] sm:$0xff]  ;;  %v408_v8 = vld [vmem:[#allocation16 + $0x18] sm:$0xff]  ;;  %vm327_vm4 = vcmask 97280   ;;  %vm2777_vm5 = vcmask 31744   ;;  %vm16301_vm6 = vcmask 1041408  }
 0x191   :  { %v405_v9 = vld [vmem:[#allocation16] sm:$0xff]  ;;  %v18415_v10 = vpack.c.bf16 %v408_v8, %v406_v7  ;;  %v407_v11 = vld [vmem:[#allocation16 + $0x10] sm:$0xff]  ;;  %v410_v12 = vld [vmem:[#allocation16 + $0x28] sm:$0xff]  ;;  %vm16320_vm7 = vcmask 1024  }
 0x192   :  { %v412_v13 = vld [vmem:[#allocation16 + $0x38] sm:$0xff]  ;;  %18414 = vmatpush3.bf16.msk.msra.mxu0 %vm18413_vm3, %v18412_v5  ;;  %v18417_v14 = vpack.c.bf16 %v407_v11, %v405_v9  ;;  %v409_v16 = vld [vmem:[#allocation16 + $0x20] sm:$0xff]  ;;  %v411_v17 = vld [vmem:[#allocation16 + $0x30] sm:$0xff] }
 0x193   :  { %v18419_v15 = vpack.c.bf16 %v412_v13, %v410_v12  ;;  %v414_v18 = vld [vmem:[#allocation16 + $0x48] sm:$0xff]  ;;  %18416 = vmatprep.subr.bf16.mxu1 %v18415_v10  ;;  %v416_v19 = vld [vmem:[#allocation16 + $0x58] sm:$0xff]  ;;  %v18421_v20 = vpack.c.bf16 %v411_v17, %v409_v16  ;;  %v413_v22 = vld [vmem:[#allocation16 + $0x40] sm:$0xff] }
 0x194   :  { %18418 = vmatpush1.bf16.msra.mxu1 %v18417_v14  ;;  %v18423_v21 = vpack.c.bf16 %v416_v19, %v414_v18  ;;  %v415_v23 = vld [vmem:[#allocation16 + $0x50] sm:$0xff]  ;;  %v418_v24 = vld [vmem:[#allocation16 + $0x68] sm:$0xff]  ;;  %v420_v25 = vld [vmem:[#allocation16 + $0x78] sm:$0xff] }
 0x195   :  { %18409 = vmatmul.mubr.msk.f32.vlgmr.msra.gmra.mrb[0].mxu0 %vm327_vm4, %v317_v6  ;;  %18420 = vmatprep.subr.bf16.mxu1 %v18419_v15  ;;  %v18425_v26 = vpack.c.bf16 %v415_v23, %v413_v22  ;;  %v18427_v27 = vpack.c.bf16 %v420_v25, %v418_v24  ;;  %v417_v28 = vld [vmem:[#allocation16 + $0x60] sm:$0xff]  ;;  %v419_v29 = vld [vmem:[#allocation16 + $0x70] sm:$0xff]  ;;  %v422_v30 = vld [vmem:[#allocation16 + $0x88] sm:$0xff] }
 0x196   :  { %v424_v31 = vld [vmem:[#allocation16 + $0x98] sm:$0xff]  ;;  %v421_v32 = vld [vmem:[#allocation16 + $0x80] sm:$0xff]  ;;  %v423_v33 = vld [vmem:[#allocation16 + $0x90] sm:$0xff]  ;;  %v18429_v34 = vpack.c.bf16 %v419_v29, %v417_v28 }
 0x197   :  { %v426_v35 = vld [vmem:[#allocation16 + $0xa8] sm:$0xff]  ;;  %v428_v36 = vld [vmem:[#allocation16 + $0xb8] sm:$0xff]  ;;  %v18431_v37 = vpack.c.bf16 %v424_v31, %v422_v30  ;;  %v425_v38 = vld [vmem:[#allocation16 + $0xa0] sm:$0xff]  ;;  %v18433_v40 = vpack.c.bf16 %v423_v33, %v421_v32 }
 0x198   :  { %18422 = vmatpush1.bf16.msra.mxu1 %v18421_v20  ;;  %v427_v39 = vld [vmem:[#allocation16 + $0xb0] sm:$0xff]  ;;  %v430_v41 = vld [vmem:[#allocation16 + $0xc8] sm:$0xff]  ;;  %v432_v42 = vld [vmem:[#allocation16 + $0xd8] sm:$0xff]  ;;  %v18435_v43 = vpack.c.bf16 %v428_v36, %v426_v35 }
 0x199   :  { %18424 = vmatprep.subr.bf16.mxu1 %v18423_v21  ;;  %v429_v44 = vld [vmem:[#allocation16 + $0xc0] sm:$0xff]  ;;  %v431_v45 = vld [vmem:[#allocation16 + $0xd0] sm:$0xff]  ;;  %v18437_v46 = vpack.c.bf16 %v427_v39, %v425_v38  ;;  %v434_v47 = vld [vmem:[#allocation16 + $0xe8] sm:$0xff]  ;;  %v18439_v49 = vpack.c.bf16 %v432_v42, %v430_v41 }
 0x19a   :  { %v436_v48 = vld [vmem:[#allocation16 + $0xf8] sm:$0xff]  ;;  %v18441_v50 = vpack.c.bf16 %v431_v45, %v429_v44  ;;  %v433_v52 = vld [vmem:[#allocation16 + $0xe0] sm:$0xff]  ;;  %v435_v53 = vld [vmem:[#allocation16 + $0xf0] sm:$0xff] }
 0x19b   :  { %v18443_v51 = vpack.c.bf16 %v436_v48, %v434_v47  ;;  %v18445_v54 = vpack.c.bf16 %v435_v53, %v433_v52  ;;  %v521_v55 = vld [vmem:[#allocation19 + $0x8] sm:$0xff]  ;;  %v523_v57 = vld [vmem:[#allocation19 + $0x18] sm:$0xff]  ;;  %v520_v60 = vld [vmem:[#allocation19] sm:$0xff] }
 0x19c   :  { %18426 = vmatpush1.bf16.msra.mxu1 %v18425_v26  ;;  %v525_v56 = vld [vmem:[#allocation19 + $0x28] sm:$0xff]  ;;  %v527_v59 = vld [vmem:[#allocation19 + $0x38] sm:$0xff]  ;;  %v524_v61 = vld [vmem:[#allocation19 + $0x20] sm:$0xff] }
 0x19d   :  { %18428 = vmatprep.subr.bf16.mxu1 %v18427_v27  ;;  %v18447_v58 = vpack.c.bf16 %v525_v56, %v521_v55  ;;  %v18511_v62 = vpack.c.bf16 %v527_v59, %v523_v57  ;;  %v18449_v63 = vpack.c.bf16 %v524_v61, %v520_v60  ;;  %v529_v0 = vld [vmem:[#allocation19 + $0x48] sm:$0xff]  ;;  %v528_v4 = vld [vmem:[#allocation19 + $0x40] sm:$0xff] }
 0x19e   :  { %v533_v1 = vld [vmem:[#allocation19 + $0x68] sm:$0xff]  ;;  %v532_v5 = vld [vmem:[#allocation19 + $0x60] sm:$0xff] }
 0x19f   :  { %18448 = vmatprep.subr.bf16.mxu0 %v18447_v58  ;;  %v18451_v3 = vpack.c.bf16 %v533_v1, %v529_v0  ;;  %v18453_v6 = vpack.c.bf16 %v532_v5, %v528_v4  ;;  %v537_v7 = vld [vmem:[#allocation19 + $0x88] sm:$0xff]  ;;  %v536_v10 = vld [vmem:[#allocation19 + $0x80] sm:$0xff] }
 0x1a0   :  { %18430 = vmatpush1.bf16.msra.mxu1 %v18429_v34  ;;  %18450 = vmatpush1.bf16.msra.mxu0 %v18449_v63  ;;  %v541_v8 = vld [vmem:[#allocation19 + $0xa8] sm:$0xff]  ;;  %v540_v11 = vld [vmem:[#allocation19 + $0xa0] sm:$0xff] }
 0x1a1   :  { %18432 = vmatprep.subr.bf16.mxu1 %v18431_v37  ;;  %18452 = vmatprep.subr.bf16.mxu0 %v18451_v3  ;;  %v18455_v9 = vpack.c.bf16 %v541_v8, %v537_v7  ;;  %v18457_v12 = vpack.c.bf16 %v540_v11, %v536_v10  ;;  %v545_v13 = vld [vmem:[#allocation19 + $0xc8] sm:$0xff]  ;;  %v544_v16 = vld [vmem:[#allocation19 + $0xc0] sm:$0xff] }
 0x1a2   :  { %v549_v14 = vld [vmem:[#allocation19 + $0xe8] sm:$0xff]  ;;  %v548_v17 = vld [vmem:[#allocation19 + $0xe0] sm:$0xff] }
 0x1a3   :  { %v18459_v15 = vpack.c.bf16 %v549_v14, %v545_v13  ;;  %v18461_v18 = vpack.c.bf16 %v548_v17, %v544_v16  ;;  %v553_v19 = vld [vmem:[#allocation19 + $0x108] sm:$0xff]  ;;  %v552_v22 = vld [vmem:[#allocation19 + $0x100] sm:$0xff] }
 0x1a4   :  { %18434 = vmatpush1.bf16.msra.mxu1 %v18433_v40  ;;  %18454 = vmatpush1.bf16.msra.mxu0 %v18453_v6  ;;  %v557_v20 = vld [vmem:[#allocation19 + $0x128] sm:$0xff]  ;;  %v556_v23 = vld [vmem:[#allocation19 + $0x120] sm:$0xff] }
 0x1a5   :  { %18436 = vmatprep.subr.bf16.mxu1 %v18435_v43  ;;  %18456 = vmatprep.subr.bf16.mxu0 %v18455_v9  ;;  %v18463_v21 = vpack.c.bf16 %v557_v20, %v553_v19  ;;  %v18465_v24 = vpack.c.bf16 %v556_v23, %v552_v22  ;;  %v561_v25 = vld [vmem:[#allocation19 + $0x148] sm:$0xff]  ;;  %v560_v28 = vld [vmem:[#allocation19 + $0x140] sm:$0xff]  ;;  %v522_v22 = vld [vmem:[#allocation19 + $0x10] sm:$0xff] }
 0x1a6   :  { %v565_v26 = vld [vmem:[#allocation19 + $0x168] sm:$0xff]  ;;  %v564_v29 = vld [vmem:[#allocation19 + $0x160] sm:$0xff]  ;;  %v526_v23 = vld [vmem:[#allocation19 + $0x30] sm:$0xff] }
 0x1a7   :  { %v18467_v27 = vpack.c.bf16 %v565_v26, %v561_v25  ;;  %v18469_v30 = vpack.c.bf16 %v564_v29, %v560_v28  ;;  %v569_v31 = vld [vmem:[#allocation19 + $0x188] sm:$0xff]  ;;  %v568_v34 = vld [vmem:[#allocation19 + $0x180] sm:$0xff]  ;;  %v531_v25 = vld [vmem:[#allocation19 + $0x58] sm:$0xff]  ;;  %v18513_v28 = vpack.c.bf16 %v526_v23, %v522_v22 }
 0x1a8   :  { %18438 = vmatpush1.bf16.msra.mxu1 %v18437_v46  ;;  %18458 = vmatpush1.bf16.msra.mxu0 %v18457_v12  ;;  %v573_v32 = vld [vmem:[#allocation19 + $0x1a8] sm:$0xff]  ;;  %v572_v35 = vld [vmem:[#allocation19 + $0x1a0] sm:$0xff]  ;;  %v535_v26 = vld [vmem:[#allocation19 + $0x78] sm:$0xff] }
 0x1a9   :  { %18440 = vmatprep.subr.bf16.mxu1 %v18439_v49  ;;  %18460 = vmatprep.subr.bf16.mxu0 %v18459_v15  ;;  %v18471_v33 = vpack.c.bf16 %v573_v32, %v569_v31  ;;  %v18473_v36 = vpack.c.bf16 %v572_v35, %v568_v34  ;;  %v577_v37 = vld [vmem:[#allocation19 + $0x1c8] sm:$0xff]  ;;  %v576_v40 = vld [vmem:[#allocation19 + $0x1c0] sm:$0xff]  ;;  %v18515_v31 = vpack.c.bf16 %v535_v26, %v531_v25  ;;  %v530_v32 = vld [vmem:[#allocation19 + $0x50] sm:$0xff] }
 0x1aa   :  { %v581_v38 = vld [vmem:[#allocation19 + $0x1e8] sm:$0xff]  ;;  %v580_v41 = vld [vmem:[#allocation19 + $0x1e0] sm:$0xff]  ;;  %v539_v34 = vld [vmem:[#allocation19 + $0x98] sm:$0xff] }
 0x1ab   :  { %v18475_v39 = vpack.c.bf16 %v581_v38, %v577_v37  ;;  %v18477_v42 = vpack.c.bf16 %v580_v41, %v576_v40  ;;  %v585_v43 = vld [vmem:[#allocation19 + $0x208] sm:$0xff]  ;;  %v584_v46 = vld [vmem:[#allocation19 + $0x200] sm:$0xff]  ;;  %v543_v35 = vld [vmem:[#allocation19 + $0xb8] sm:$0xff] }
 0x1ac   :  { %18442 = vmatpush1.bf16.msra.mxu1 %v18441_v50  ;;  %18462 = vmatpush1.bf16.msra.mxu0 %v18461_v18  ;;  %v589_v44 = vld [vmem:[#allocation19 + $0x228] sm:$0xff]  ;;  %v588_v47 = vld [vmem:[#allocation19 + $0x220] sm:$0xff]  ;;  %v18519_v37 = vpack.c.bf16 %v543_v35, %v539_v34  ;;  %v538_v38 = vld [vmem:[#allocation19 + $0x90] sm:$0xff] }
 0x1ad   :  { %18444 = vmatprep.subr.bf16.mxu1 %v18443_v51  ;;  %18464 = vmatprep.subr.bf16.mxu0 %v18463_v21  ;;  %v18479_v45 = vpack.c.bf16 %v589_v44, %v585_v43  ;;  %v18481_v48 = vpack.c.bf16 %v588_v47, %v584_v46  ;;  %v593_v49 = vld [vmem:[#allocation19 + $0x248] sm:$0xff]  ;;  %v592_v52 = vld [vmem:[#allocation19 + $0x240] sm:$0xff]  ;;  %v547_v40 = vld [vmem:[#allocation19 + $0xd8] sm:$0xff] }
 0x1ae   :  { %v597_v50 = vld [vmem:[#allocation19 + $0x268] sm:$0xff]  ;;  %v596_v53 = vld [vmem:[#allocation19 + $0x260] sm:$0xff]  ;;  %v551_v41 = vld [vmem:[#allocation19 + $0xf8] sm:$0xff] }
 0x1af   :  { %v18483_v51 = vpack.c.bf16 %v597_v50, %v593_v49  ;;  %v601_v55 = vld [vmem:[#allocation19 + $0x288] sm:$0xff]  ;;  %v600_v58 = vld [vmem:[#allocation19 + $0x280] sm:$0xff]  ;;  %v18523_v43 = vpack.c.bf16 %v551_v41, %v547_v40  ;;  %v546_v44 = vld [vmem:[#allocation19 + $0xd0] sm:$0xff] }
 0x1b0   :  { %18446 = vmatpush1.bf16.msra.mxu1 %v18445_v54  ;;  %18466 = vmatpush1.bf16.msra.mxu0 %v18465_v24  ;;  %v18485_v54 = vpack.c.bf16 %v596_v53, %v592_v52  ;;  %v605_v56 = vld [vmem:[#allocation19 + $0x2a8] sm:$0xff]  ;;  %v604_v59 = vld [vmem:[#allocation19 + $0x2a0] sm:$0xff]  ;;  %v16337_v24 = vld [vmem:[#allocation14] ss:$0 sm:$0xff] }
 0x1b1   :  { %18512 = vmatprep.subr.bf16.mxu1 %v18511_v62  ;;  %18468 = vmatprep.subr.bf16.mxu0 %v18467_v27  ;;  %v18487_v57 = vpack.c.bf16 %v605_v56, %v601_v55  ;;  %v18489_v60 = vpack.c.bf16 %v604_v59, %v600_v58  ;;  %v609_v61 = vld [vmem:[#allocation19 + $0x2c8] sm:$0xff]  ;;  %v608_v0 = vld [vmem:[#allocation19 + $0x2c0] sm:$0xff]  ;;  %v555_v46 = vld [vmem:[#allocation19 + $0x118] sm:$0xff] }
 0x1b2   :  { %v613_v62 = vld [vmem:[#allocation19 + $0x2e8] sm:$0xff]  ;;  %v612_v1 = vld [vmem:[#allocation19 + $0x2e0] sm:$0xff]  ;;  %v559_v47 = vld [vmem:[#allocation19 + $0x138] sm:$0xff] }
 0x1b3   :  { %v18491_v63 = vpack.c.bf16 %v613_v62, %v609_v61  ;;  %v18493_v3 = vpack.c.bf16 %v612_v1, %v608_v0  ;;  %v617_v4 = vld [vmem:[#allocation19 + $0x308] sm:$0xff]  ;;  %v616_v7 = vld [vmem:[#allocation19 + $0x300] sm:$0xff]  ;;  %v18527_v49 = vpack.c.bf16 %v559_v47, %v555_v46  ;;  %v554_v50 = vld [vmem:[#allocation19 + $0x110] sm:$0xff] }
 0x1b4   :  { %18470 = vmatpush1.bf16.msra.mxu0 %v18469_v30  ;;  %v621_v5 = vld [vmem:[#allocation19 + $0x328] sm:$0xff]  ;;  %v620_v8 = vld [vmem:[#allocation19 + $0x320] sm:$0xff]  ;;  %v563_v52 = vld [vmem:[#allocation19 + $0x158] sm:$0xff] }
 0x1b5   :  { %18472 = vmatprep.subr.bf16.mxu0 %v18471_v33  ;;  %v18495_v6 = vpack.c.bf16 %v621_v5, %v617_v4  ;;  %v18497_v9 = vpack.c.bf16 %v620_v8, %v616_v7  ;;  %v625_v10 = vld [vmem:[#allocation19 + $0x348] sm:$0xff]  ;;  %v624_v13 = vld [vmem:[#allocation19 + $0x340] sm:$0xff]  ;;  %v534_v33 = vld [vmem:[#allocation19 + $0x70] sm:$0xff] }
 0x1b6   :  { %v629_v11 = vld [vmem:[#allocation19 + $0x368] sm:$0xff]  ;;  %v628_v14 = vld [vmem:[#allocation19 + $0x360] sm:$0xff]  ;;  %v567_v53 = vld [vmem:[#allocation19 + $0x178] sm:$0xff] }
 0x1b7   :  { %v18499_v12 = vpack.c.bf16 %v629_v11, %v625_v10  ;;  %v18501_v15 = vpack.c.bf16 %v628_v14, %v624_v13  ;;  %v633_v16 = vld [vmem:[#allocation19 + $0x388] sm:$0xff]  ;;  %v632_v19 = vld [vmem:[#allocation19 + $0x380] sm:$0xff]  ;;  %v18531_v55 = vpack.c.bf16 %v567_v53, %v563_v52  ;;  %v562_v56 = vld [vmem:[#allocation19 + $0x150] sm:$0xff] }
 0x1b8   :  { %18474 = vmatpush1.bf16.msra.mxu0 %v18473_v36  ;;  %v637_v17 = vld [vmem:[#allocation19 + $0x3a8] sm:$0xff]  ;;  %v636_v20 = vld [vmem:[#allocation19 + $0x3a0] sm:$0xff]  ;;  %v18517_v36 = vpack.c.bf16 %v534_v33, %v530_v32  ;;  %v571_v58 = vld [vmem:[#allocation19 + $0x198] sm:$0xff] }
 0x1b9   :  { %18476 = vmatprep.subr.bf16.mxu0 %v18475_v39  ;;  %v18503_v18 = vpack.c.bf16 %v637_v17, %v633_v16  ;;  %v18505_v21 = vpack.c.bf16 %v636_v20, %v632_v19  ;;  %v542_v39 = vld [vmem:[#allocation19 + $0xb0] sm:$0xff]  ;;  %v575_v59 = vld [vmem:[#allocation19 + $0x1b8] sm:$0xff] }
 0x1ba   :  { %v18535_v61 = vpack.c.bf16 %v575_v59, %v571_v58  ;;  %v570_v62 = vld [vmem:[#allocation19 + $0x190] sm:$0xff]  ;;  %v579_v0 = vld [vmem:[#allocation19 + $0x1d8] sm:$0xff] }
 0x1bb   :  { %v583_v1 = vld [vmem:[#allocation19 + $0x1f8] sm:$0xff]  ;;  %v578_v5 = vld [vmem:[#allocation19 + $0x1d0] sm:$0xff] }
 0x1bc   :  { %18478 = vmatpush1.bf16.msra.mxu0 %v18477_v42  ;;  %v18521_v42 = vpack.c.bf16 %v542_v39, %v538_v38  ;;  %v18539_v4 = vpack.c.bf16 %v583_v1, %v579_v0  ;;  %v587_v7 = vld [vmem:[#allocation19 + $0x218] sm:$0xff]  ;;  %v586_v11 = vld [vmem:[#allocation19 + $0x210] sm:$0xff] }
 0x1bd   :  { %18480 = vmatprep.subr.bf16.mxu0 %v18479_v45  ;;  %v550_v45 = vld [vmem:[#allocation19 + $0xf0] sm:$0xff]  ;;  %v591_v8 = vld [vmem:[#allocation19 + $0x238] sm:$0xff] }
 0x1be   :  { %v18543_v10 = vpack.c.bf16 %v591_v8, %v587_v7  ;;  %v595_v13 = vld [vmem:[#allocation19 + $0x258] sm:$0xff]  ;;  %v594_v17 = vld [vmem:[#allocation19 + $0x250] sm:$0xff]  ;;  %v439_v7 = vlaneseq }
 0x1bf   :  { %v599_v14 = vld [vmem:[#allocation19 + $0x278] sm:$0xff]  ;;  %v602_v23 = vld [vmem:[#allocation19 + $0x290] sm:$0xff] }
 0x1c0   :  { %18482 = vmatpush1.bf16.msra.mxu0 %v18481_v48  ;;  %v18525_v48 = vpack.c.bf16 %v550_v45, %v546_v44  ;;  %v18547_v16 = vpack.c.bf16 %v599_v14, %v595_v13  ;;  %v603_v19 = vld [vmem:[#allocation19 + $0x298] sm:$0xff]  ;;  %v618_v35 = vld [vmem:[#allocation19 + $0x310] sm:$0xff]  ;;  %v19979_v8 = vshrl.u32 %v439_v7, 7  ;;  %v820_v14 = vld [vmem:[#allocation22 + $0x40] sm:$0xff] }
 0x1c1   :  { %18484 = vmatprep.subr.bf16.mxu0 %v18483_v51  ;;  %v558_v51 = vld [vmem:[#allocation19 + $0x130] sm:$0xff]  ;;  %v607_v20 = vld [vmem:[#allocation19 + $0x2b8] sm:$0xff] }
 0x1c2   :  { %v18551_v22 = vpack.c.bf16 %v607_v20, %v603_v19  ;;  %v611_v25 = vld [vmem:[#allocation19 + $0x2d8] sm:$0xff]  ;;  %v626_v41 = vld [vmem:[#allocation19 + $0x350] sm:$0xff] }
 0x1c3   :  { %v615_v26 = vld [vmem:[#allocation19 + $0x2f8] sm:$0xff]  ;;  %v634_v47 = vld [vmem:[#allocation19 + $0x390] sm:$0xff] }
 0x1c4   :  { %18486 = vmatpush1.bf16.msra.mxu0 %v18485_v54  ;;  %v18529_v54 = vpack.c.bf16 %v558_v51, %v554_v50  ;;  %v623_v32 = vld [vmem:[#allocation19 + $0x338] sm:$0xff]  ;;  %v641_v50 = vld [vmem:[#allocation19 + $0x3c8] sm:$0xff]  ;;  %v642_v59 = vld [vmem:[#allocation19 + $0x3d0] sm:$0xff] }
 0x1c5   :  { %18488 = vmatprep.subr.bf16.mxu0 %v18487_v57  ;;  %v566_v57 = vld [vmem:[#allocation19 + $0x170] sm:$0xff]  ;;  %v631_v38 = vld [vmem:[#allocation19 + $0x378] sm:$0xff]  ;;  %v645_v51 = vld [vmem:[#allocation19 + $0x3e8] sm:$0xff] }
 0x1c6   :  { %v639_v44 = vld [vmem:[#allocation19 + $0x3b8] sm:$0xff]  ;;  %v18507_v53 = vpack.c.bf16 %v645_v51, %v641_v50  ;;  %v813_v0 = vld [vmem:[#allocation22 + $0x8] sm:$0xff] }
 0x1c7   :  { %v643_v52 = vld [vmem:[#allocation19 + $0x3d8] sm:$0xff]  ;;  %v853_v50 = vld [vmem:[#allocation22 + $0x148] sm:$0xff] }
 0x1c8   :  { %18490 = vmatpush1.bf16.msra.mxu0 %v18489_v60  ;;  %v18533_v60 = vpack.c.bf16 %v566_v57, %v562_v56  ;;  %v644_v56 = vld [vmem:[#allocation19 + $0x3e0] sm:$0xff]  ;;  %v857_v51 = vld [vmem:[#allocation22 + $0x168] sm:$0xff] }
 0x1c9   :  { %18492 = vmatprep.subr.bf16.mxu0 %v18491_v63  ;;  %v574_v63 = vld [vmem:[#allocation19 + $0x1b0] sm:$0xff] }
 0x1cc   :  { %18494 = vmatpush1.bf16.msra.mxu0 %v18493_v3  ;;  %v18537_v3 = vpack.c.bf16 %v574_v63, %v570_v62  ;;  %v812_v62 = vld [vmem:[#allocation22] sm:$0xff] }
 0x1cd   :  { %18496 = vmatprep.subr.bf16.mxu0 %v18495_v6  ;;  %v582_v6 = vld [vmem:[#allocation19 + $0x1f0] sm:$0xff]  ;;  %v816_v63 = vld [vmem:[#allocation22 + $0x20] sm:$0xff] }
 0x1ce   :  { %v16340_v1 = vcombine.low %v812_v62, %v816_v63 }
 0x1d0   :  { %18498 = vmatpush1.bf16.msra.mxu0 %v18497_v9  ;;  %v18541_v9 = vpack.c.bf16 %v582_v6, %v578_v5 }
 0x1d1   :  { %18500 = vmatprep.subr.bf16.mxu0 %v18499_v12  ;;  %v590_v12 = vld [vmem:[#allocation19 + $0x230] sm:$0xff] }
 0x1d4   :  { %18502 = vmatpush1.bf16.msra.mxu0 %v18501_v15  ;;  %v18545_v15 = vpack.c.bf16 %v590_v12, %v586_v11  ;;  %v19985_v11 = vsub.s32 0, %v19979_v8 }
 0x1d5   :  { %18504 = vmatprep.subr.bf16.mxu0 %v18503_v18  ;;  %v598_v18 = vld [vmem:[#allocation19 + $0x270] sm:$0xff] }
 0x1d8   :  { %18506 = vmatpush1.bf16.msra.mxu0 %v18505_v21  ;;  %v18549_v21 = vpack.c.bf16 %v598_v18, %v594_v17  ;;  %v821_v17 = vld [vmem:[#allocation22 + $0x48] sm:$0xff] }
 0x1d9   :  { %18508 = vmatprep.subr.bf16.mxu0 %v18507_v53  ;;  %v825_v18 = vld [vmem:[#allocation22 + $0x68] sm:$0xff] }
 0x268   :  { %v401_v27 = vpop.f32.mrb[0].mxu0 }
 0x269   :  { %v402_v29 = vadd.f32 %v16337_v24, %v401_v27  ;;  %v18410_v30 = vpop.f32.mrb[1].mxu0  ;;  %v606_v24 = vld [vmem:[#allocation19 + $0x2b0] sm:$0xff] }
 0x26a   :  { %v18553_v27 = vpack.c.bf16 %v606_v24, %v602_v23  ;;  %v614_v30 = vld [vmem:[#allocation19 + $0x2f0] sm:$0xff]  ;;  %v16351_v23 = vcombine.high %v821_v17, %v825_v18  ;;  %v828_v24 = vld [vmem:[#allocation22 + $0x80] sm:$0xff] }
 0x26b   :  { %514 = vmatmul.mubr.f32.vlgmr.msra.gmra.mrb[0].mxu1 %v402_v29  ;;  %v610_v29 = vld [vmem:[#allocation19 + $0x2d0] sm:$0xff] }
 0x26c   :  { %18514 = vmatpush1.bf16.msra.mxu1 %v18513_v28  ;;  %v18555_v28 = vpack.c.bf16 %v615_v26, %v611_v25  ;;  %v18557_v33 = vpack.c.bf16 %v614_v30, %v610_v29  ;;  %v832_v25 = vld [vmem:[#allocation22 + $0xa0] sm:$0xff]  ;;  %v829_v26 = vld [vmem:[#allocation22 + $0x88] sm:$0xff]  ;;  %v16350_v29 = vcombine.low %v821_v17, %v825_v18 }
 0x26d   :  { %18516 = vmatprep.subr.bf16.mxu1 %v18515_v31  ;;  %v619_v31 = vld [vmem:[#allocation19 + $0x318] sm:$0xff]  ;;  %v16357_v30 = vcombine.high %v828_v24, %v832_v25 }
 0x26e   :  { %v18559_v34 = vpack.c.bf16 %v623_v32, %v619_v31  ;;  %v836_v32 = vld [vmem:[#allocation22 + $0xc0] sm:$0xff] }
 0x270   :  { %18518 = vmatpush1.bf16.msra.mxu1 %v18517_v36  ;;  %v622_v36 = vld [vmem:[#allocation19 + $0x330] sm:$0xff] }
 0x271   :  { %18520 = vmatprep.subr.bf16.mxu1 %v18519_v37  ;;  %v627_v37 = vld [vmem:[#allocation19 + $0x358] sm:$0xff]  ;;  %v18561_v39 = vpack.c.bf16 %v622_v36, %v618_v35  ;;  %v841_v35 = vld [vmem:[#allocation22 + $0xe8] sm:$0xff]  ;;  %v16356_v36 = vcombine.low %v828_v24, %v832_v25 }
 0x272   :  { %v18563_v40 = vpack.c.bf16 %v631_v38, %v627_v37 }
 0x274   :  { %18522 = vmatpush1.bf16.msra.mxu1 %v18521_v42  ;;  %v630_v42 = vld [vmem:[#allocation19 + $0x370] sm:$0xff] }
 0x275   :  { %18524 = vmatprep.subr.bf16.mxu1 %v18523_v43  ;;  %v635_v43 = vld [vmem:[#allocation19 + $0x398] sm:$0xff]  ;;  %v18565_v45 = vpack.c.bf16 %v630_v42, %v626_v41  ;;  %v848_v41 = vld [vmem:[#allocation22 + $0x120] sm:$0xff]  ;;  %v845_v42 = vld [vmem:[#allocation22 + $0x108] sm:$0xff] }
 0x276   :  { %v18567_v46 = vpack.c.bf16 %v639_v44, %v635_v43  ;;  %v849_v43 = vld [vmem:[#allocation22 + $0x128] sm:$0xff] }
 0x277   :  { %v16374_v53 = vcombine.low %v845_v42, %v849_v43 }
 0x278   :  { %18526 = vmatpush1.bf16.msra.mxu1 %v18525_v48  ;;  %v638_v48 = vld [vmem:[#allocation19 + $0x3b0] sm:$0xff] }
 0x279   :  { %18528 = vmatprep.subr.bf16.mxu1 %v18527_v49  ;;  %v18569_v49 = vpack.c.bf16 %v638_v48, %v634_v47  ;;  %v16375_v47 = vcombine.high %v845_v42, %v849_v43  ;;  %v852_v48 = vld [vmem:[#allocation22 + $0x140] sm:$0xff] }
 0x27c   :  { %18530 = vmatpush1.bf16.msra.mxu1 %v18529_v54  ;;  %v647_v54 = vld [vmem:[#allocation19 + $0x3f8] sm:$0xff] }
 0x27d   :  { %18532 = vmatprep.subr.bf16.mxu1 %v18531_v55  ;;  %v640_v55 = vld [vmem:[#allocation19 + $0x3c0] sm:$0xff]  ;;  %v18571_v57 = vpack.c.bf16 %v647_v54, %v643_v52 }
 0x27e   :  { %v18509_v58 = vpack.c.bf16 %v644_v56, %v640_v55  ;;  %v16383_v55 = vcombine.high %v853_v50, %v857_v51  ;;  %v860_v56 = vld [vmem:[#allocation22 + $0x180] sm:$0xff] }
 0x280   :  { %18534 = vmatpush1.bf16.msra.mxu1 %v18533_v60  ;;  %v646_v60 = vld [vmem:[#allocation19 + $0x3f0] sm:$0xff]  ;;  %18510 = vmatpush1.bf16.msra.mxu0 %v18509_v58 }
 0x281   :  { %18536 = vmatprep.subr.bf16.mxu1 %v18535_v61  ;;  %v18573_v61 = vpack.c.bf16 %v646_v60, %v642_v59  ;;  %v861_v58 = vld [vmem:[#allocation22 + $0x188] sm:$0xff] }
 0x282   :  { %v865_v59 = vld [vmem:[#allocation22 + $0x1a8] sm:$0xff] }
 0x284   :  { %18538 = vmatpush1.bf16.msra.mxu1 %v18537_v3  ;;  %v16341_v3 = vcombine.high %v812_v62, %v816_v63  ;;  %v16391_v63 = vcombine.high %v861_v58, %v865_v59 }
 0x285   :  { %18540 = vmatprep.subr.bf16.mxu1 %v18539_v4  ;;  %v817_v4 = vld [vmem:[#allocation22 + $0x28] sm:$0xff] }
 0x286   :  { %v16342_v5 = vcombine.low %v813_v0, %v817_v4  ;;  %v16343_v6 = vcombine.high %v813_v0, %v817_v4  ;;  %2394 = vmatprep.subr.bf16.mxu0 %v16341_v3  ;;  %v868_v0 = vld [vmem:[#allocation22 + $0x1c0] sm:$0xff]  ;;  %v869_v3 = vld [vmem:[#allocation22 + $0x1c8] sm:$0xff] }
 0x287   :  { %v873_v4 = vld [vmem:[#allocation22 + $0x1e8] sm:$0xff] }
 0x288   :  { %18542 = vmatpush1.bf16.msra.mxu1 %v18541_v9  ;;  %v19982_v9 = vsub.s32 1, %v19979_v8  ;;  %v16398_v17 = vcombine.low %v869_v3, %v873_v4 }
 0x289   :  { %18544 = vmatprep.subr.bf16.mxu1 %v18543_v10  ;;  %v437_v10 = vld [vmem:[#allocation17] sm:$0x3] }
 0x28a   :  { %v446_v12 = vrot.slane %v437_v10, %v19982_v9  ;;  %v442_v13 = vrot.slane %v437_v10, %v19985_v11  ;;  %v16399_v10 = vcombine.high %v869_v3, %v873_v4 }
 0x28c   :  { %18546 = vmatpush1.bf16.msra.mxu1 %v18545_v15 }
 0x28d   :  { %18548 = vmatprep.subr.bf16.mxu1 %v18547_v16  ;;  %v824_v16 = vld [vmem:[#allocation22 + $0x60] sm:$0xff] }
 0x290   :  { %18550 = vmatpush1.bf16.msra.mxu1 %v18549_v21 }
 0x291   :  { %18552 = vmatprep.subr.bf16.mxu1 %v18551_v22  ;;  %v16349_v22 = vcombine.high %v820_v14, %v824_v16 }
 0x294   :  { %18554 = vmatpush1.bf16.msra.mxu1 %v18553_v27  ;;  %v833_v27 = vld [vmem:[#allocation22 + $0xa8] sm:$0xff] }
 0x295   :  { %18556 = vmatprep.subr.bf16.mxu1 %v18555_v28  ;;  %v16348_v28 = vcombine.low %v820_v14, %v824_v16  ;;  %v16359_v31 = vcombine.high %v829_v26, %v833_v27  ;;  %v16358_v37 = vcombine.low %v829_v26, %v833_v27  ;;  %v877_v14 = vld [vmem:[#allocation22 + $0x208] sm:$0xff] }
 0x298   :  { %18558 = vmatpush1.bf16.msra.mxu1 %v18557_v33  ;;  %v840_v33 = vld [vmem:[#allocation22 + $0xe0] sm:$0xff] }
 0x299   :  { %18560 = vmatprep.subr.bf16.mxu1 %v18559_v34  ;;  %v837_v34 = vld [vmem:[#allocation22 + $0xc8] sm:$0xff]  ;;  %v16365_v38 = vcombine.high %v836_v32, %v840_v33  ;;  %v16364_v44 = vcombine.low %v836_v32, %v840_v33 }
 0x29c   :  { %18562 = vmatpush1.bf16.msra.mxu1 %v18561_v39  ;;  %v16367_v39 = vcombine.high %v837_v34, %v841_v35 }
 0x29d   :  { %18564 = vmatprep.subr.bf16.mxu1 %v18563_v40  ;;  %v844_v40 = vld [vmem:[#allocation22 + $0x100] sm:$0xff] }
 0x29e   :  { %v16372_v52 = vcombine.low %v844_v40, %v848_v41 }
 0x2a0   :  { %18566 = vmatpush1.bf16.msra.mxu1 %v18565_v45  ;;  %v16366_v45 = vcombine.low %v837_v34, %v841_v35 }
 0x2a1   :  { %18568 = vmatprep.subr.bf16.mxu1 %v18567_v46  ;;  %v16373_v46 = vcombine.high %v844_v40, %v848_v41 }
 0x2a4   :  { %18570 = vmatpush1.bf16.msra.mxu1 %v18569_v49  ;;  %v856_v49 = vld [vmem:[#allocation22 + $0x160] sm:$0xff] }
 0x2a5   :  { %18572 = vmatprep.subr.bf16.mxu1 %v18571_v57  ;;  %v16381_v54 = vcombine.high %v852_v48, %v856_v49  ;;  %v864_v57 = vld [vmem:[#allocation22 + $0x1a0] sm:$0xff]  ;;  %v16380_v60 = vcombine.low %v852_v48, %v856_v49 }
 0x2a6   :  { %v16389_v62 = vcombine.high %v860_v56, %v864_v57 }
 0x2a8   :  { %18574 = vmatpush1.bf16.msra.mxu1 %v18573_v61  ;;  %v16382_v61 = vcombine.low %v853_v50, %v857_v51 }
 0x2a9   :  { %2476 = vmatprep.subr.bf16.mxu1 %v16343_v6  ;;  %v16390_v6 = vcombine.low %v861_v58, %v865_v59 }
 0x33e   :  { %v515_v15 = vpop.f32.mrb[0].mxu1 }
 0x33f   :  { %v517_v19 = vpop.f32.mrb[1].mxu1  ;;  %v516_v21 = vadd.f32 %v515_v15, %v442_v13  ;;  %v880_v13 = vld [vmem:[#allocation22 + $0x220] sm:$0xff]  ;;  %v881_v15 = vld [vmem:[#allocation22 + $0x228] sm:$0xff] }
 0x340   :  { %v518_v20 = vadd.f32 %v517_v19, %v446_v12  ;;  %v876_v12 = vld [vmem:[#allocation22 + $0x200] sm:$0xff]  ;;  %v16407_v19 = vcombine.high %v877_v14, %v881_v15  ;;  %v16406_v25 = vcombine.low %v877_v14, %v881_v15  ;;  %v937_v14 = vld [vmem:[#allocation22 + $0x3e8] sm:$0xff] }
 0x341   :  { %v16405_v18 = vcombine.high %v876_v12, %v880_v13  ;;  %v16404_v24 = vcombine.low %v876_v12, %v880_v13  ;;  %v933_v12 = vld [vmem:[#allocation22 + $0x3c8] sm:$0xff] }
 0x342   :  { %734 = vmatprep.mubr.f32.mxu0 %v518_v20  ;;  %805 = vmatprep.mubr.f32.mxu1 %v518_v20  ;;  %v884_v20 = vld [vmem:[#allocation22 + $0x240] sm:$0xff] }
 0x343   :  { %735 = vmatmul.mubr.f32.vlgmr.msra.gmra.mrb[2].mxu0 %v516_v21  ;;  %806 = vmatmul.mubr.f32.vlgmr.msra.gmra.mrb[2].mxu1 %v516_v21  ;;  %v888_v21 = vld [vmem:[#allocation22 + $0x260] sm:$0xff] }
 0x344   :  { %2395 = vmatpush1.bf16.msra.mxu0 %v16340_v1  ;;  %2477 = vmatpush1.bf16.msra.mxu1 %v16342_v5  ;;  %v872_v1 = vld [vmem:[#allocation22 + $0x1e0] sm:$0xff]  ;;  %v16388_v5 = vcombine.low %v860_v56, %v864_v57  ;;  %v16413_v26 = vcombine.high %v884_v20, %v888_v21  ;;  %v16412_v32 = vcombine.low %v884_v20, %v888_v21  ;;  %v941_v20 = vld [vmem:[#allocation22 + $0x408] sm:$0xff] }
 0x345   :  { %2396 = vmatprep.subr.bf16.mxu0 %v16349_v22  ;;  %2478 = vmatprep.subr.bf16.mxu1 %v16351_v23  ;;  %v16397_v7 = vcombine.high %v868_v0, %v872_v1  ;;  %v16396_v16 = vcombine.low %v868_v0, %v872_v1  ;;  %v885_v22 = vld [vmem:[#allocation22 + $0x248] sm:$0xff] }
 0x346   :  { %v889_v23 = vld [vmem:[#allocation22 + $0x268] sm:$0xff] }
 0x347   :  { %v16415_v27 = vcombine.high %v885_v22, %v889_v23  ;;  %v16414_v33 = vcombine.low %v885_v22, %v889_v23  ;;  %v945_v22 = vld [vmem:[#allocation22 + $0x428] sm:$0xff] }
 0x348   :  { %2397 = vmatpush1.bf16.msra.mxu0 %v16348_v28  ;;  %2479 = vmatpush1.bf16.msra.mxu1 %v16350_v29  ;;  %v892_v28 = vld [vmem:[#allocation22 + $0x280] sm:$0xff] }
 0x349   :  { %2398 = vmatprep.subr.bf16.mxu0 %v16357_v30  ;;  %2480 = vmatprep.subr.bf16.mxu1 %v16359_v31  ;;  %v896_v29 = vld [vmem:[#allocation22 + $0x2a0] sm:$0xff]  ;;  %v893_v30 = vld [vmem:[#allocation22 + $0x288] sm:$0xff] }
 0x34a   :  { %v897_v31 = vld [vmem:[#allocation22 + $0x2a8] sm:$0xff]  ;;  %v16421_v34 = vcombine.high %v892_v28, %v896_v29  ;;  %v16420_v40 = vcombine.low %v892_v28, %v896_v29 }
 0x34b   :  { %v16423_v35 = vcombine.high %v893_v30, %v897_v31  ;;  %v16422_v41 = vcombine.low %v893_v30, %v897_v31 }
 0x34c   :  { %2399 = vmatpush1.bf16.msra.mxu0 %v16356_v36  ;;  %2481 = vmatpush1.bf16.msra.mxu1 %v16358_v37  ;;  %v900_v36 = vld [vmem:[#allocation22 + $0x2c0] sm:$0xff] }
 0x34d   :  { %2400 = vmatprep.subr.bf16.mxu0 %v16365_v38  ;;  %2482 = vmatprep.subr.bf16.mxu1 %v16367_v39  ;;  %v904_v37 = vld [vmem:[#allocation22 + $0x2e0] sm:$0xff]  ;;  %v901_v38 = vld [vmem:[#allocation22 + $0x2c8] sm:$0xff] }
 0x34e   :  { %v905_v39 = vld [vmem:[#allocation22 + $0x2e8] sm:$0xff]  ;;  %v16429_v42 = vcombine.high %v900_v36, %v904_v37  ;;  %v16428_v48 = vcombine.low %v900_v36, %v904_v37  ;;  %v948_v37 = vld [vmem:[#allocation22 + $0x440] sm:$0xff] }
 0x34f   :  { %v16431_v43 = vcombine.high %v901_v38, %v905_v39  ;;  %v16430_v49 = vcombine.low %v901_v38, %v905_v39  ;;  %v952_v39 = vld [vmem:[#allocation22 + $0x460] sm:$0xff] }
 0x350   :  { %2401 = vmatpush1.bf16.msra.mxu0 %v16364_v44  ;;  %2483 = vmatpush1.bf16.msra.mxu1 %v16366_v45  ;;  %v908_v44 = vld [vmem:[#allocation22 + $0x300] sm:$0xff] }
 0x351   :  { %2402 = vmatprep.subr.bf16.mxu0 %v16373_v46  ;;  %2484 = vmatprep.subr.bf16.mxu1 %v16375_v47  ;;  %v912_v45 = vld [vmem:[#allocation22 + $0x320] sm:$0xff]  ;;  %v909_v46 = vld [vmem:[#allocation22 + $0x308] sm:$0xff] }
 0x352   :  { %v913_v47 = vld [vmem:[#allocation22 + $0x328] sm:$0xff]  ;;  %v16437_v50 = vcombine.high %v908_v44, %v912_v45  ;;  %v16436_v56 = vcombine.low %v908_v44, %v912_v45  ;;  %v956_v44 = vld [vmem:[#allocation22 + $0x480] sm:$0xff]  ;;  %v16477_v45 = vcombine.high %v948_v37, %v952_v39 }
 0x353   :  { %v16439_v51 = vcombine.high %v909_v46, %v913_v47  ;;  %v16438_v57 = vcombine.low %v909_v46, %v913_v47  ;;  %v960_v47 = vld [vmem:[#allocation22 + $0x4a0] sm:$0xff] }
 0x354   :  { %2403 = vmatpush1.bf16.msra.mxu0 %v16372_v52  ;;  %2485 = vmatpush1.bf16.msra.mxu1 %v16374_v53  ;;  %v916_v52 = vld [vmem:[#allocation22 + $0x340] sm:$0xff] }
 0x355   :  { %2404 = vmatprep.subr.bf16.mxu0 %v16381_v54  ;;  %2486 = vmatprep.subr.bf16.mxu1 %v16383_v55  ;;  %v920_v53 = vld [vmem:[#allocation22 + $0x360] sm:$0xff]  ;;  %v917_v54 = vld [vmem:[#allocation22 + $0x348] sm:$0xff] }
 0x356   :  { %v921_v55 = vld [vmem:[#allocation22 + $0x368] sm:$0xff]  ;;  %v16445_v58 = vcombine.high %v916_v52, %v920_v53  ;;  %v16444_v0 = vcombine.low %v916_v52, %v920_v53  ;;  %v16485_v53 = vcombine.high %v956_v44, %v960_v47 }
 0x357   :  { %v16447_v59 = vcombine.high %v917_v54, %v921_v55  ;;  %v16446_v1 = vcombine.low %v917_v54, %v921_v55  ;;  %v964_v55 = vld [vmem:[#allocation22 + $0x4c0] sm:$0xff] }
 0x358   :  { %2405 = vmatpush1.bf16.msra.mxu0 %v16380_v60  ;;  %2487 = vmatpush1.bf16.msra.mxu1 %v16382_v61  ;;  %v924_v60 = vld [vmem:[#allocation22 + $0x380] sm:$0xff] }
 0x359   :  { %2406 = vmatprep.subr.bf16.mxu0 %v16389_v62  ;;  %2488 = vmatprep.subr.bf16.mxu1 %v16391_v63  ;;  %v928_v61 = vld [vmem:[#allocation22 + $0x3a0] sm:$0xff]  ;;  %v925_v62 = vld [vmem:[#allocation22 + $0x388] sm:$0xff] }
 0x35a   :  { %v929_v63 = vld [vmem:[#allocation22 + $0x3a8] sm:$0xff]  ;;  %v16453_v3 = vcombine.high %v924_v60, %v928_v61 }
 0x35b   :  { %v16455_v4 = vcombine.high %v925_v62, %v929_v63 }
 0x35c   :  { %2407 = vmatpush1.bf16.msra.mxu0 %v16388_v5  ;;  %2489 = vmatpush1.bf16.msra.mxu1 %v16390_v6  ;;  %v16452_v5 = vcombine.low %v924_v60, %v928_v61  ;;  %v16454_v6 = vcombine.low %v925_v62, %v929_v63  ;;  %v972_v63 = vld [vmem:[#allocation22 + $0x500] sm:$0xff] }
 0x35d   :  { %2408 = vmatprep.subr.bf16.mxu0 %v16397_v7  ;;  %2490 = vmatprep.subr.bf16.mxu1 %v16399_v10  ;;  %v932_v7 = vld [vmem:[#allocation22 + $0x3c0] sm:$0xff] }
 0x35e   :  { %v936_v10 = vld [vmem:[#allocation22 + $0x3e0] sm:$0xff] }
 0x35f   :  { %v16461_v13 = vcombine.high %v932_v7, %v936_v10  ;;  %v16460_v15 = vcombine.low %v932_v7, %v936_v10  ;;  %v980_v10 = vld [vmem:[#allocation22 + $0x540] sm:$0xff] }
 0x360   :  { %2409 = vmatpush1.bf16.msra.mxu0 %v16396_v16  ;;  %2491 = vmatpush1.bf16.msra.mxu1 %v16398_v17  ;;  %v16462_v16 = vcombine.low %v933_v12, %v937_v14  ;;  %v16463_v17 = vcombine.high %v933_v12, %v937_v14  ;;  %v984_v12 = vld [vmem:[#allocation22 + $0x560] sm:$0xff]  ;;  %v985_v14 = vld [vmem:[#allocation22 + $0x568] sm:$0xff] }
 0x361   :  { %2410 = vmatprep.subr.bf16.mxu0 %v16405_v18  ;;  %2492 = vmatprep.subr.bf16.mxu1 %v16407_v19  ;;  %v940_v18 = vld [vmem:[#allocation22 + $0x400] sm:$0xff] }
 0x362   :  { %v944_v19 = vld [vmem:[#allocation22 + $0x420] sm:$0xff] }
 0x363   :  { %v16469_v21 = vcombine.high %v940_v18, %v944_v19  ;;  %v16468_v23 = vcombine.low %v940_v18, %v944_v19  ;;  %v988_v19 = vld [vmem:[#allocation22 + $0x580] sm:$0xff] }
 0x364   :  { %2411 = vmatpush1.bf16.msra.mxu0 %v16404_v24  ;;  %2493 = vmatpush1.bf16.msra.mxu1 %v16406_v25  ;;  %v16470_v24 = vcombine.low %v941_v20, %v945_v22  ;;  %v16471_v25 = vcombine.high %v941_v20, %v945_v22  ;;  %v992_v20 = vld [vmem:[#allocation22 + $0x5a0] sm:$0xff]  ;;  %v993_v22 = vld [vmem:[#allocation22 + $0x5a8] sm:$0xff] }
 0x365   :  { %2412 = vmatprep.subr.bf16.mxu0 %v16413_v26  ;;  %2494 = vmatprep.subr.bf16.mxu1 %v16415_v27  ;;  %v19989_v26 = vld [vmem:[#allocation20] sm:$0xf]  ;;  %v19992_v27 = vsub.s32 3, %v19979_v8 }
 0x366   :  { %v653_v28 = vrot.slane %v19989_v26, %v19985_v11  ;;  %v657_v29 = vrot.slane %v19989_v26, %v19982_v9 }
 0x367   :  { %v665_v30 = vrot.slane %v19989_v26, %v19992_v27 }
 0x368   :  { %2413 = vmatpush1.bf16.msra.mxu0 %v16412_v32  ;;  %2495 = vmatpush1.bf16.msra.mxu1 %v16414_v33 }
 0x369   :  { %2414 = vmatprep.subr.bf16.mxu0 %v16421_v34  ;;  %2496 = vmatprep.subr.bf16.mxu1 %v16423_v35 }
 0x36c   :  { %2415 = vmatpush1.bf16.msra.mxu0 %v16420_v40  ;;  %2497 = vmatpush1.bf16.msra.mxu1 %v16422_v41  ;;  %v949_v40 = vld [vmem:[#allocation22 + $0x448] sm:$0xff] }
 0x36d   :  { %2416 = vmatprep.subr.bf16.mxu0 %v16429_v42  ;;  %2498 = vmatprep.subr.bf16.mxu1 %v16431_v43  ;;  %v953_v41 = vld [vmem:[#allocation22 + $0x468] sm:$0xff] }
 0x36e   :  { %v16479_v46 = vcombine.high %v949_v40, %v953_v41  ;;  %v16478_v52 = vcombine.low %v949_v40, %v953_v41  ;;  %v1005_v40 = vld [vmem:[#allocation22 + $0x608] sm:$0xff] }
 0x36f   :  { %v1009_v41 = vld [vmem:[#allocation22 + $0x628] sm:$0xff] }
 0x370   :  { %2417 = vmatpush1.bf16.msra.mxu0 %v16428_v48  ;;  %2499 = vmatpush1.bf16.msra.mxu1 %v16430_v49  ;;  %v957_v48 = vld [vmem:[#allocation22 + $0x488] sm:$0xff] }
 0x371   :  { %2418 = vmatprep.subr.bf16.mxu0 %v16437_v50  ;;  %2500 = vmatprep.subr.bf16.mxu1 %v16439_v51  ;;  %v961_v49 = vld [vmem:[#allocation22 + $0x4a8] sm:$0xff]  ;;  %v16476_v51 = vcombine.low %v948_v37, %v952_v39  ;;  %v1008_v39 = vld [vmem:[#allocation22 + $0x620] sm:$0xff] }
 0x372   :  { %v16487_v54 = vcombine.high %v957_v48, %v961_v49  ;;  %v16486_v60 = vcombine.low %v957_v48, %v961_v49  ;;  %v1012_v48 = vld [vmem:[#allocation22 + $0x640] sm:$0xff] }
 0x373   :  { %v1016_v49 = vld [vmem:[#allocation22 + $0x660] sm:$0xff] }
 0x374   :  { %2419 = vmatpush1.bf16.msra.mxu0 %v16436_v56  ;;  %2501 = vmatpush1.bf16.msra.mxu1 %v16438_v57  ;;  %v968_v56 = vld [vmem:[#allocation22 + $0x4e0] sm:$0xff]  ;;  %v965_v57 = vld [vmem:[#allocation22 + $0x4c8] sm:$0xff] }
 0x375   :  { %2420 = vmatprep.subr.bf16.mxu0 %v16445_v58  ;;  %2502 = vmatprep.subr.bf16.mxu1 %v16447_v59  ;;  %v969_v58 = vld [vmem:[#allocation22 + $0x4e8] sm:$0xff]  ;;  %v16484_v59 = vcombine.low %v956_v44, %v960_v47  ;;  %v16493_v61 = vcombine.high %v964_v55, %v968_v56  ;;  %v16535_v47 = vcombine.high %v1005_v40, %v1009_v41 }
 0x376   :  { %v16495_v62 = vcombine.high %v965_v57, %v969_v58 }
 0x378   :  { %2421 = vmatpush1.bf16.msra.mxu0 %v16444_v0  ;;  %2503 = vmatpush1.bf16.msra.mxu1 %v16446_v1  ;;  %v976_v0 = vld [vmem:[#allocation22 + $0x520] sm:$0xff]  ;;  %v973_v1 = vld [vmem:[#allocation22 + $0x508] sm:$0xff] }
 0x379   :  { %2422 = vmatprep.subr.bf16.mxu0 %v16453_v3  ;;  %2504 = vmatprep.subr.bf16.mxu1 %v16455_v4  ;;  %v977_v3 = vld [vmem:[#allocation22 + $0x528] sm:$0xff]  ;;  %v16492_v4 = vcombine.low %v964_v55, %v968_v56  ;;  %v16541_v55 = vcombine.high %v1012_v48, %v1016_v49 }
 0x37a   :  { %v16503_v7 = vcombine.high %v973_v1, %v977_v3 }
 0x37c   :  { %2423 = vmatpush1.bf16.msra.mxu0 %v16452_v5  ;;  %2505 = vmatpush1.bf16.msra.mxu1 %v16454_v6  ;;  %v16494_v5 = vcombine.low %v965_v57, %v969_v58  ;;  %v16501_v6 = vcombine.high %v972_v63, %v976_v0  ;;  %v1020_v57 = vld [vmem:[#allocation22 + $0x680] sm:$0xff] }
 0x37d   :  { %2424 = vmatprep.subr.bf16.mxu0 %v16461_v13  ;;  %2506 = vmatprep.subr.bf16.mxu1 %v16463_v17  ;;  %v981_v13 = vld [vmem:[#allocation22 + $0x548] sm:$0xff]  ;;  %v16509_v17 = vcombine.high %v980_v10, %v984_v12  ;;  %v1024_v58 = vld [vmem:[#allocation22 + $0x6a0] sm:$0xff] }
 0x37e   :  { %v16511_v18 = vcombine.high %v981_v13, %v985_v14 }
 0x380   :  { %2425 = vmatpush1.bf16.msra.mxu0 %v16460_v15  ;;  %2507 = vmatpush1.bf16.msra.mxu1 %v16462_v16  ;;  %v16500_v15 = vcombine.low %v972_v63, %v976_v0  ;;  %v16502_v16 = vcombine.low %v973_v1, %v977_v3  ;;  %v16549_v63 = vcombine.high %v1020_v57, %v1024_v58  ;;  %v1028_v1 = vld [vmem:[#allocation22 + $0x6c0] sm:$0xff] }
 0x381   :  { %2435 = vmatprep.subr.bf16.mxu0 %v16469_v21  ;;  %2517 = vmatprep.subr.bf16.mxu1 %v16471_v25  ;;  %v989_v21 = vld [vmem:[#allocation22 + $0x588] sm:$0xff]  ;;  %v16517_v25 = vcombine.high %v988_v19, %v992_v20  ;;  %v1032_v3 = vld [vmem:[#allocation22 + $0x6e0] sm:$0xff] }
 0x416   :  { %v736_v31 = vpop.f32.mrb[2].mxu0  ;;  %v20000_v32 = vpop.f32.mrb[2].mxu1 }
 0x417   :  { %v737_v33 = vadd.f32 %v736_v31, %v653_v28  ;;  %v738_v34 = vpop.f32.mrb[3].mxu0  ;;  %v809_v35 = vpop.f32.mrb[3].mxu1  ;;  %v16519_v28 = vcombine.high %v989_v21, %v993_v22  ;;  %v997_v31 = vld [vmem:[#allocation22 + $0x5c8] sm:$0xff] }
 0x418   :  { %v739_v36 = vadd.f32 %v738_v34, %v657_v29  ;;  %v810_v38 = vadd.f32 %v809_v35, %v665_v30  ;;  %v996_v29 = vld [vmem:[#allocation22 + $0x5c0] sm:$0xff]  ;;  %v16516_v34 = vcombine.low %v988_v19, %v992_v20  ;;  %v16518_v35 = vcombine.low %v989_v21, %v993_v22 }
 0x419   :  { %v20004_v43 = vpack.c.bf16 %v737_v33, %v737_v33  ;;  %v1000_v30 = vld [vmem:[#allocation22 + $0x5e0] sm:$0xff]  ;;  %v1001_v33 = vld [vmem:[#allocation22 + $0x5e8] sm:$0xff] }
 0x41a   :  { %v20002_v42 = vpack.c.bf16 %v739_v36, %v739_v36  ;;  %v20008_v50 = vpack.c.bf16 %v810_v38, %v810_v38  ;;  %v16525_v36 = vcombine.high %v996_v29, %v1000_v30  ;;  %v16527_v37 = vcombine.high %v997_v31, %v1001_v33  ;;  %v1004_v38 = vld [vmem:[#allocation22 + $0x600] sm:$0xff] }
 0x41b   :  { %v16524_v44 = vcombine.low %v996_v29, %v1000_v30  ;;  %v1044_v21 = vld [vmem:[#allocation22 + $0x740] sm:$0xff] }
 0x41c   :  { %2426 = vmatprep.mubr.bf16.mxu0 %v20002_v42  ;;  %2508 = vmatprep.mubr.bf16.mxu1 %v20002_v42  ;;  %v1048_v22 = vld [vmem:[#allocation22 + $0x760] sm:$0xff] }
 0x41d   :  { %2427 = vmatmul.mubr.bf16.vlgmr.msra.gmra.mrb[4].mxu0 %v20004_v43  ;;  %2509 = vmatmul.mubr.bf16.vlgmr.msra.gmra.mrb[4].mxu1 %v20004_v43  ;;  %v16573_v29 = vcombine.high %v1044_v21, %v1048_v22 }
 0x41e   :  { %2436 = vmatpush1.bf16.msra.mxu0 %v16468_v23  ;;  %2518 = vmatpush1.bf16.msra.mxu1 %v16470_v24  ;;  %v16508_v23 = vcombine.low %v980_v10, %v984_v12  ;;  %v16510_v24 = vcombine.low %v981_v13, %v985_v14  ;;  %v16557_v10 = vcombine.high %v1028_v1, %v1032_v3  ;;  %v1036_v13 = vld [vmem:[#allocation22 + $0x700] sm:$0xff] }
 0x41f   :  { %2467 = vmatprep.mubr.bf16.mxu0 %v20008_v50  ;;  %2549 = vmatprep.mubr.bf16.mxu1 %v20008_v50  ;;  %v1040_v14 = vld [vmem:[#allocation22 + $0x720] sm:$0xff] }
 0x420   :  { %2437 = vmatprep.subr.bf16.mxu0 %v16477_v45  ;;  %2519 = vmatprep.subr.bf16.mxu1 %v16479_v46  ;;  %v16526_v45 = vcombine.low %v997_v31, %v1001_v33  ;;  %v16533_v46 = vcombine.high %v1004_v38, %v1008_v39  ;;  %v16565_v19 = vcombine.high %v1036_v13, %v1040_v14  ;;  %v1052_v31 = vld [vmem:[#allocation22 + $0x780] sm:$0xff] }
 0x421   :  { %v1056_v33 = vld [vmem:[#allocation22 + $0x7a0] sm:$0xff] }
 0x422   :  { %2438 = vmatpush1.bf16.msra.mxu0 %v16476_v51  ;;  %2520 = vmatpush1.bf16.msra.mxu1 %v16478_v52  ;;  %v1013_v51 = vld [vmem:[#allocation22 + $0x648] sm:$0xff] }
 0x423   :  { %2439 = vmatprep.subr.bf16.mxu0 %v16485_v53  ;;  %2521 = vmatprep.subr.bf16.mxu1 %v16487_v54  ;;  %v1017_v52 = vld [vmem:[#allocation22 + $0x668] sm:$0xff]  ;;  %v16532_v53 = vcombine.low %v1004_v38, %v1008_v39  ;;  %v16534_v54 = vcombine.low %v1005_v40, %v1009_v41  ;;  %v20015_v38 = vsub.s32 2, %v19979_v8  ;;  %v16581_v39 = vcombine.high %v1052_v31, %v1056_v33  ;;  %v1060_v41 = vld [vmem:[#allocation22 + $0x7c0] sm:$0xff] }
 0x424   :  { %v16543_v56 = vcombine.high %v1013_v51, %v1017_v52 }
 0x426   :  { %2440 = vmatpush1.bf16.msra.mxu0 %v16484_v59  ;;  %2522 = vmatpush1.bf16.msra.mxu1 %v16486_v60  ;;  %v1021_v59 = vld [vmem:[#allocation22 + $0x688] sm:$0xff] }
 0x427   :  { %2441 = vmatprep.subr.bf16.mxu0 %v16493_v61  ;;  %2523 = vmatprep.subr.bf16.mxu1 %v16495_v62  ;;  %v1025_v60 = vld [vmem:[#allocation22 + $0x6a8] sm:$0xff]  ;;  %v16540_v61 = vcombine.low %v1012_v48, %v1016_v49  ;;  %v16542_v62 = vcombine.low %v1013_v51, %v1017_v52  ;;  %v661_v49 = vrot.slane %v19989_v26, %v20015_v38  ;;  %v826_v26 = vld [vmem:[#allocation22 + $0x70] sm:$0xff] }
 0x428   :  { %v16551_v0 = vcombine.high %v1021_v59, %v1025_v60 }
 0x42a   :  { %2442 = vmatpush1.bf16.msra.mxu0 %v16492_v4  ;;  %2524 = vmatpush1.bf16.msra.mxu1 %v16494_v5  ;;  %v1029_v4 = vld [vmem:[#allocation22 + $0x6c8] sm:$0xff] }
 0x42b   :  { %2443 = vmatprep.subr.bf16.mxu0 %v16501_v6  ;;  %2525 = vmatprep.subr.bf16.mxu1 %v16503_v7  ;;  %v1033_v5 = vld [vmem:[#allocation22 + $0x6e8] sm:$0xff]  ;;  %v16548_v6 = vcombine.low %v1020_v57, %v1024_v58  ;;  %v16550_v7 = vcombine.low %v1021_v59, %v1025_v60  ;;  %v808_v59 = vadd.f32 %v20000_v32, %v661_v49  ;;  %v834_v32 = vld [vmem:[#allocation22 + $0xb0] sm:$0xff]  ;;  %v867_v49 = vld [vmem:[#allocation22 + $0x1b8] sm:$0xff] }
 0x42c   :  { %v16559_v12 = vcombine.high %v1029_v4, %v1033_v5 }
 0x42e   :  { %2444 = vmatpush1.bf16.msra.mxu0 %v16500_v15  ;;  %2526 = vmatpush1.bf16.msra.mxu1 %v16502_v16  ;;  %v1037_v15 = vld [vmem:[#allocation22 + $0x708] sm:$0xff] }
 0x42f   :  { %2445 = vmatprep.subr.bf16.mxu0 %v16509_v17  ;;  %2527 = vmatprep.subr.bf16.mxu1 %v16511_v18  ;;  %v1041_v16 = vld [vmem:[#allocation22 + $0x728] sm:$0xff]  ;;  %v16556_v17 = vcombine.low %v1028_v1, %v1032_v3  ;;  %v16558_v18 = vcombine.low %v1029_v4, %v1033_v5  ;;  %v20020_v3 = vpack.c.bf16 %v808_v59, %v808_v59 }
 0x430   :  { %v16567_v20 = vcombine.high %v1037_v15, %v1041_v16 }
 0x432   :  { %2446 = vmatpush1.bf16.msra.mxu0 %v16508_v23  ;;  %2528 = vmatpush1.bf16.msra.mxu1 %v16510_v24  ;;  %v1045_v23 = vld [vmem:[#allocation22 + $0x748] sm:$0xff] }
 0x433   :  { %2447 = vmatprep.subr.bf16.mxu0 %v16517_v25  ;;  %2529 = vmatprep.subr.bf16.mxu1 %v16519_v28  ;;  %v1049_v24 = vld [vmem:[#allocation22 + $0x768] sm:$0xff]  ;;  %v16564_v25 = vcombine.low %v1036_v13, %v1040_v14  ;;  %v16566_v28 = vcombine.low %v1037_v15, %v1041_v16 }
 0x434   :  { %v16575_v30 = vcombine.high %v1045_v23, %v1049_v24 }
 0x436   :  { %2448 = vmatpush1.bf16.msra.mxu0 %v16516_v34  ;;  %2530 = vmatpush1.bf16.msra.mxu1 %v16518_v35  ;;  %v1053_v34 = vld [vmem:[#allocation22 + $0x788] sm:$0xff] }
 0x437   :  { %2449 = vmatprep.subr.bf16.mxu0 %v16525_v36  ;;  %2531 = vmatprep.subr.bf16.mxu1 %v16527_v37  ;;  %v1057_v35 = vld [vmem:[#allocation22 + $0x7a8] sm:$0xff]  ;;  %v16572_v36 = vcombine.low %v1044_v21, %v1048_v22  ;;  %v16574_v37 = vcombine.low %v1045_v23, %v1049_v24 }
 0x438   :  { %v16583_v40 = vcombine.high %v1053_v34, %v1057_v35  ;;  %v16582_v48 = vcombine.low %v1053_v34, %v1057_v35  ;;  %v854_v35 = vld [vmem:[#allocation22 + $0x150] sm:$0xff] }
 0x43a   :  { %2450 = vmatpush1.bf16.msra.mxu0 %v16524_v44  ;;  %2532 = vmatpush1.bf16.msra.mxu1 %v16526_v45  ;;  %v1064_v44 = vld [vmem:[#allocation22 + $0x7e0] sm:$0xff]  ;;  %v1061_v45 = vld [vmem:[#allocation22 + $0x7c8] sm:$0xff] }
 0x43b   :  { %2451 = vmatprep.subr.bf16.mxu0 %v16533_v46  ;;  %2533 = vmatprep.subr.bf16.mxu1 %v16535_v47  ;;  %v1065_v46 = vld [vmem:[#allocation22 + $0x7e8] sm:$0xff]  ;;  %v16580_v47 = vcombine.low %v1052_v31, %v1056_v33  ;;  %v16589_v51 = vcombine.high %v1060_v41, %v1064_v44  ;;  %v16588_v57 = vcombine.low %v1060_v41, %v1064_v44 }
 0x43c   :  { %v16591_v52 = vcombine.high %v1061_v45, %v1065_v46  ;;  %v16590_v58 = vcombine.low %v1061_v45, %v1065_v46  ;;  %v862_v46 = vld [vmem:[#allocation22 + $0x190] sm:$0xff] }
 0x43e   :  { %2452 = vmatpush1.bf16.msra.mxu0 %v16532_v53  ;;  %2534 = vmatpush1.bf16.msra.mxu1 %v16534_v54  ;;  %v814_v53 = vld [vmem:[#allocation22 + $0x10] sm:$0xff] }
 0x43f   :  { %2453 = vmatprep.subr.bf16.mxu0 %v16541_v55  ;;  %2535 = vmatprep.subr.bf16.mxu1 %v16543_v56  ;;  %v818_v54 = vld [vmem:[#allocation22 + $0x30] sm:$0xff]  ;;  %v815_v55 = vld [vmem:[#allocation22 + $0x18] sm:$0xff] }
 0x440   :  { %v819_v56 = vld [vmem:[#allocation22 + $0x38] sm:$0xff]  ;;  %v16345_v60 = vcombine.high %v814_v53, %v818_v54  ;;  %v16344_v1 = vcombine.low %v814_v53, %v818_v54 }
 0x441   :  { %v16346_v4 = vcombine.low %v815_v55, %v819_v56 }
 0x442   :  { %2454 = vmatpush1.bf16.msra.mxu0 %v16540_v61  ;;  %2536 = vmatpush1.bf16.msra.mxu1 %v16542_v62  ;;  %v16347_v61 = vcombine.high %v815_v55, %v819_v56  ;;  %v822_v62 = vld [vmem:[#allocation22 + $0x50] sm:$0xff] }
 0x443   :  { %2455 = vmatprep.subr.bf16.mxu0 %v16549_v63  ;;  %2537 = vmatprep.subr.bf16.mxu1 %v16551_v0  ;;  %v823_v63 = vld [vmem:[#allocation22 + $0x58] sm:$0xff]  ;;  %v16353_v5 = vcombine.high %v822_v62, %v826_v26  ;;  %v16352_v13 = vcombine.low %v822_v62, %v826_v26  ;;  %v870_v55 = vld [vmem:[#allocation22 + $0x1d0] sm:$0xff] }
 0x444   :  { %v827_v0 = vld [vmem:[#allocation22 + $0x78] sm:$0xff]  ;;  %v874_v56 = vld [vmem:[#allocation22 + $0x1f0] sm:$0xff] }
 0x445   :  { %v16354_v14 = vcombine.low %v823_v63, %v827_v0  ;;  %v878_v26 = vld [vmem:[#allocation22 + $0x210] sm:$0xff] }
 0x446   :  { %2456 = vmatpush1.bf16.msra.mxu0 %v16548_v6  ;;  %2538 = vmatpush1.bf16.msra.mxu1 %v16550_v7  ;;  %v16355_v6 = vcombine.high %v823_v63, %v827_v0  ;;  %v830_v7 = vld [vmem:[#allocation22 + $0x90] sm:$0xff]  ;;  %v879_v0 = vld [vmem:[#allocation22 + $0x218] sm:$0xff] }
 0x447   :  { %2457 = vmatprep.subr.bf16.mxu0 %v16557_v10  ;;  %2539 = vmatprep.subr.bf16.mxu1 %v16559_v12  ;;  %v831_v10 = vld [vmem:[#allocation22 + $0x98] sm:$0xff]  ;;  %v16361_v15 = vcombine.high %v830_v7, %v834_v32  ;;  %v16360_v21 = vcombine.low %v830_v7, %v834_v32  ;;  %v882_v63 = vld [vmem:[#allocation22 + $0x230] sm:$0xff] }
 0x448   :  { %v835_v12 = vld [vmem:[#allocation22 + $0xb8] sm:$0xff]  ;;  %v886_v32 = vld [vmem:[#allocation22 + $0x250] sm:$0xff] }
 0x449   :  { %v16363_v16 = vcombine.high %v831_v10, %v835_v12  ;;  %v16362_v22 = vcombine.low %v831_v10, %v835_v12  ;;  %v890_v10 = vld [vmem:[#allocation22 + $0x270] sm:$0xff]  ;;  %v887_v12 = vld [vmem:[#allocation22 + $0x258] sm:$0xff] }
 0x44a   :  { %2458 = vmatpush1.bf16.msra.mxu0 %v16556_v17  ;;  %2540 = vmatpush1.bf16.msra.mxu1 %v16558_v18  ;;  %v838_v17 = vld [vmem:[#allocation22 + $0xd0] sm:$0xff] }
 0x44b   :  { %2459 = vmatprep.subr.bf16.mxu0 %v16565_v19  ;;  %2541 = vmatprep.subr.bf16.mxu1 %v16567_v20  ;;  %v842_v18 = vld [vmem:[#allocation22 + $0xf0] sm:$0xff]  ;;  %v839_v19 = vld [vmem:[#allocation22 + $0xd8] sm:$0xff] }
 0x44c   :  { %v843_v20 = vld [vmem:[#allocation22 + $0xf8] sm:$0xff]  ;;  %v16369_v23 = vcombine.high %v838_v17, %v842_v18 }
 0x44d   :  { %v16371_v24 = vcombine.high %v839_v19, %v843_v20  ;;  %v16370_v31 = vcombine.low %v839_v19, %v843_v20  ;;  %v898_v19 = vld [vmem:[#allocation22 + $0x2b0] sm:$0xff]  ;;  %v895_v20 = vld [vmem:[#allocation22 + $0x298] sm:$0xff] }
 0x44e   :  { %2460 = vmatpush1.bf16.msra.mxu0 %v16564_v25  ;;  %2542 = vmatpush1.bf16.msra.mxu1 %v16566_v28  ;;  %v846_v25 = vld [vmem:[#allocation22 + $0x110] sm:$0xff] }
 0x44f   :  { %2461 = vmatprep.subr.bf16.mxu0 %v16573_v29  ;;  %2543 = vmatprep.subr.bf16.mxu1 %v16575_v30  ;;  %v850_v28 = vld [vmem:[#allocation22 + $0x130] sm:$0xff]  ;;  %v851_v29 = vld [vmem:[#allocation22 + $0x138] sm:$0xff]  ;;  %v16368_v30 = vcombine.low %v838_v17, %v842_v18 }
 0x450   :  { %v16377_v33 = vcombine.high %v846_v25, %v850_v28  ;;  %v894_v18 = vld [vmem:[#allocation22 + $0x290] sm:$0xff] }
 0x452   :  { %2462 = vmatpush1.bf16.msra.mxu0 %v16572_v36  ;;  %2544 = vmatpush1.bf16.msra.mxu1 %v16574_v37  ;;  %v858_v36 = vld [vmem:[#allocation22 + $0x170] sm:$0xff]  ;;  %v855_v37 = vld [vmem:[#allocation22 + $0x158] sm:$0xff] }
 0x453   :  { %2463 = vmatprep.subr.bf16.mxu0 %v16581_v39  ;;  %2545 = vmatprep.subr.bf16.mxu1 %v16583_v40  ;;  %v859_v39 = vld [vmem:[#allocation22 + $0x178] sm:$0xff]  ;;  %v16376_v40 = vcombine.low %v846_v25, %v850_v28  ;;  %v16385_v44 = vcombine.high %v854_v35, %v858_v36  ;;  %v902_v28 = vld [vmem:[#allocation22 + $0x2d0] sm:$0xff] }
 0x454   :  { %v16387_v45 = vcombine.high %v855_v37, %v859_v39 }
 0x456   :  { %2464 = vmatpush1.bf16.msra.mxu0 %v16580_v47  ;;  %2546 = vmatpush1.bf16.msra.mxu1 %v16582_v48  ;;  %v866_v47 = vld [vmem:[#allocation22 + $0x1b0] sm:$0xff]  ;;  %v863_v48 = vld [vmem:[#allocation22 + $0x198] sm:$0xff] }
 0x457   :  { %2465 = vmatprep.subr.bf16.mxu0 %v16589_v51  ;;  %2547 = vmatprep.subr.bf16.mxu1 %v16591_v52  ;;  %v16384_v51 = vcombine.low %v854_v35, %v858_v36  ;;  %v16386_v52 = vcombine.low %v855_v37, %v859_v39  ;;  %v16393_v53 = vcombine.high %v862_v46, %v866_v47  ;;  %v910_v36 = vld [vmem:[#allocation22 + $0x310] sm:$0xff]  ;;  %v911_v39 = vld [vmem:[#allocation22 + $0x318] sm:$0xff] }
 0x458   :  { %v16395_v54 = vcombine.high %v863_v48, %v867_v49  ;;  %v16392_v59 = vcombine.low %v862_v46, %v866_v47  ;;  %v914_v37 = vld [vmem:[#allocation22 + $0x330] sm:$0xff] }
 0x459   :  { %v918_v47 = vld [vmem:[#allocation22 + $0x350] sm:$0xff] }
 0x45a   :  { %2466 = vmatpush1.bf16.msra.mxu0 %v16588_v57  ;;  %2548 = vmatpush1.bf16.msra.mxu1 %v16590_v58  ;;  %v871_v57 = vld [vmem:[#allocation22 + $0x1d8] sm:$0xff] }
 0x45b   :  { %2558 = vmatprep.subr.bf16.mxu0 %v16345_v60  ;;  %2640 = vmatprep.subr.bf16.mxu1 %v16347_v61  ;;  %v875_v58 = vld [vmem:[#allocation22 + $0x1f8] sm:$0xff]  ;;  %v16394_v60 = vcombine.low %v863_v48, %v867_v49  ;;  %v16401_v61 = vcombine.high %v870_v55, %v874_v56  ;;  %v922_v48 = vld [vmem:[#allocation22 + $0x370] sm:$0xff] }
 0x45c   :  { %v16403_v62 = vcombine.high %v871_v57, %v875_v58  ;;  %v919_v49 = vld [vmem:[#allocation22 + $0x358] sm:$0xff] }
 0x45d   :  { %2468 = vmatmul.mubr.bf16.vlgmr.msra.gmra.mrb[4].mxu0 %v20020_v3  ;;  %2550 = vmatmul.mubr.bf16.vlgmr.msra.gmra.mrb[4].mxu1 %v20020_v3 }
 0x45e   :  { %2559 = vmatpush1.bf16.msra.mxu0 %v16344_v1  ;;  %2590 = vmatprep.mubr.bf16.mxu0 %v20002_v42  ;;  %v883_v1 = vld [vmem:[#allocation22 + $0x238] sm:$0xff] }
 0x45f   :  { %2641 = vmatpush1.bf16.msra.mxu1 %v16346_v4  ;;  %2672 = vmatprep.mubr.bf16.mxu1 %v20002_v42  ;;  %v847_v42 = vld [vmem:[#allocation22 + $0x118] sm:$0xff]  ;;  %v16400_v4 = vcombine.low %v870_v55, %v874_v56  ;;  %v16411_v7 = vcombine.high %v879_v0, %v883_v1  ;;  %v926_v56 = vld [vmem:[#allocation22 + $0x390] sm:$0xff] }
 0x460   :  { %2560 = vmatprep.subr.bf16.mxu0 %v16353_v5  ;;  %2642 = vmatprep.subr.bf16.mxu1 %v16355_v6  ;;  %v16379_v34 = vcombine.high %v847_v42, %v851_v29  ;;  %v16378_v41 = vcombine.low %v847_v42, %v851_v29  ;;  %v16402_v5 = vcombine.low %v871_v57, %v875_v58  ;;  %v906_v42 = vld [vmem:[#allocation22 + $0x2f0] sm:$0xff]  ;;  %v903_v29 = vld [vmem:[#allocation22 + $0x2d8] sm:$0xff] }
 0x461   :  { %v16409_v6 = vcombine.high %v878_v26, %v882_v63  ;;  %v930_v57 = vld [vmem:[#allocation22 + $0x3b0] sm:$0xff]  ;;  %v927_v58 = vld [vmem:[#allocation22 + $0x398] sm:$0xff] }
 0x462   :  { %2561 = vmatpush1.bf16.msra.mxu0 %v16352_v13  ;;  %v891_v13 = vld [vmem:[#allocation22 + $0x278] sm:$0xff] }
 0x463   :  { %2643 = vmatpush1.bf16.msra.mxu1 %v16354_v14  ;;  %2562 = vmatprep.subr.bf16.mxu0 %v16361_v15  ;;  %v16408_v14 = vcombine.low %v878_v26, %v882_v63  ;;  %v16410_v15 = vcombine.low %v879_v0, %v883_v1  ;;  %v16419_v17 = vcombine.high %v887_v12, %v891_v13  ;;  %v934_v63 = vld [vmem:[#allocation22 + $0x3d0] sm:$0xff]  ;;  %v935_v1 = vld [vmem:[#allocation22 + $0x3d8] sm:$0xff] }
 0x464   :  { %2644 = vmatprep.subr.bf16.mxu1 %v16363_v16  ;;  %v16417_v16 = vcombine.high %v886_v32, %v890_v10  ;;  %v938_v0 = vld [vmem:[#allocation22 + $0x3f0] sm:$0xff] }
 0x466   :  { %2563 = vmatpush1.bf16.msra.mxu0 %v16360_v21  ;;  %v899_v21 = vld [vmem:[#allocation22 + $0x2b8] sm:$0xff] }
 0x467   :  { %2645 = vmatpush1.bf16.msra.mxu1 %v16362_v22  ;;  %2564 = vmatprep.subr.bf16.mxu0 %v16369_v23  ;;  %v16416_v22 = vcombine.low %v886_v32, %v890_v10  ;;  %v16418_v23 = vcombine.low %v887_v12, %v891_v13  ;;  %v16427_v25 = vcombine.high %v895_v20, %v899_v21  ;;  %v942_v10 = vld [vmem:[#allocation22 + $0x410] sm:$0xff]  ;;  %v943_v13 = vld [vmem:[#allocation22 + $0x418] sm:$0xff] }
 0x468   :  { %2646 = vmatprep.subr.bf16.mxu1 %v16371_v24  ;;  %v16425_v24 = vcombine.high %v894_v18, %v898_v19  ;;  %v946_v12 = vld [vmem:[#allocation22 + $0x430] sm:$0xff] }
 0x46a   :  { %2565 = vmatpush1.bf16.msra.mxu0 %v16368_v30  ;;  %v907_v30 = vld [vmem:[#allocation22 + $0x2f8] sm:$0xff] }
 0x46b   :  { %2647 = vmatpush1.bf16.msra.mxu1 %v16370_v31  ;;  %2566 = vmatprep.subr.bf16.mxu0 %v16377_v33  ;;  %v16424_v31 = vcombine.low %v894_v18, %v898_v19  ;;  %v16426_v33 = vcombine.low %v895_v20, %v899_v21  ;;  %v16435_v35 = vcombine.high %v903_v29, %v907_v30  ;;  %v950_v19 = vld [vmem:[#allocation22 + $0x450] sm:$0xff] }
 0x46c   :  { %2648 = vmatprep.subr.bf16.mxu1 %v16379_v34  ;;  %v16433_v34 = vcombine.high %v902_v28, %v906_v42  ;;  %v954_v20 = vld [vmem:[#allocation22 + $0x470] sm:$0xff]  ;;  %v16472_v21 = vcombine.low %v942_v10, %v946_v12 }
 0x46e   :  { %2567 = vmatpush1.bf16.msra.mxu0 %v16376_v40  ;;  %v915_v40 = vld [vmem:[#allocation22 + $0x338] sm:$0xff] }
 0x46f   :  { %2649 = vmatpush1.bf16.msra.mxu1 %v16378_v41  ;;  %2568 = vmatprep.subr.bf16.mxu0 %v16385_v44  ;;  %v16432_v41 = vcombine.low %v902_v28, %v906_v42  ;;  %v16434_v44 = vcombine.low %v903_v29, %v907_v30  ;;  %v16443_v46 = vcombine.high %v911_v39, %v915_v40  ;;  %v958_v28 = vld [vmem:[#allocation22 + $0x490] sm:$0xff]  ;;  %v959_v30 = vld [vmem:[#allocation22 + $0x498] sm:$0xff] }
 0x470   :  { %2650 = vmatprep.subr.bf16.mxu1 %v16387_v45  ;;  %v16441_v45 = vcombine.high %v910_v36, %v914_v37  ;;  %v962_v42 = vld [vmem:[#allocation22 + $0x4b0] sm:$0xff] }
 0x472   :  { %2569 = vmatpush1.bf16.msra.mxu0 %v16384_v51  ;;  %v923_v51 = vld [vmem:[#allocation22 + $0x378] sm:$0xff] }
 0x473   :  { %2651 = vmatpush1.bf16.msra.mxu1 %v16386_v52  ;;  %2570 = vmatprep.subr.bf16.mxu0 %v16393_v53  ;;  %v16440_v52 = vcombine.low %v910_v36, %v914_v37  ;;  %v16442_v53 = vcombine.low %v911_v39, %v915_v40  ;;  %v16451_v55 = vcombine.high %v919_v49, %v923_v51  ;;  %v966_v37 = vld [vmem:[#allocation22 + $0x4d0] sm:$0xff]  ;;  %v967_v40 = vld [vmem:[#allocation22 + $0x4d8] sm:$0xff] }
 0x474   :  { %2652 = vmatprep.subr.bf16.mxu1 %v16395_v54  ;;  %v16449_v54 = vcombine.high %v918_v47, %v922_v48  ;;  %v970_v39 = vld [vmem:[#allocation22 + $0x4f0] sm:$0xff] }
 0x476   :  { %2571 = vmatpush1.bf16.msra.mxu0 %v16392_v59  ;;  %v931_v59 = vld [vmem:[#allocation22 + $0x3b8] sm:$0xff] }
 0x477   :  { %2653 = vmatpush1.bf16.msra.mxu1 %v16394_v60  ;;  %2572 = vmatprep.subr.bf16.mxu0 %v16401_v61  ;;  %v16448_v60 = vcombine.low %v918_v47, %v922_v48  ;;  %v16450_v61 = vcombine.low %v919_v49, %v923_v51  ;;  %v16459_v26 = vcombine.high %v927_v58, %v931_v59  ;;  %v974_v47 = vld [vmem:[#allocation22 + $0x510] sm:$0xff]  ;;  %v975_v49 = vld [vmem:[#allocation22 + $0x518] sm:$0xff] }
 0x478   :  { %2654 = vmatprep.subr.bf16.mxu1 %v16403_v62  ;;  %v16457_v62 = vcombine.high %v926_v56, %v930_v57  ;;  %v978_v48 = vld [vmem:[#allocation22 + $0x530] sm:$0xff]  ;;  %v979_v51 = vld [vmem:[#allocation22 + $0x538] sm:$0xff] }
 0x47a   :  { %2573 = vmatpush1.bf16.msra.mxu0 %v16400_v4  ;;  %v939_v4 = vld [vmem:[#allocation22 + $0x3f8] sm:$0xff] }
 0x47b   :  { %2655 = vmatpush1.bf16.msra.mxu1 %v16402_v5  ;;  %2574 = vmatprep.subr.bf16.mxu0 %v16409_v6  ;;  %v16456_v5 = vcombine.low %v926_v56, %v930_v57  ;;  %v16458_v6 = vcombine.low %v927_v58, %v931_v59  ;;  %v16467_v32 = vcombine.high %v935_v1, %v939_v4  ;;  %v986_v56 = vld [vmem:[#allocation22 + $0x570] sm:$0xff]  ;;  %v983_v57 = vld [vmem:[#allocation22 + $0x558] sm:$0xff] }
 0x47c   :  { %2656 = vmatprep.subr.bf16.mxu1 %v16411_v7  ;;  %v16465_v7 = vcombine.high %v934_v63, %v938_v0  ;;  %v987_v58 = vld [vmem:[#allocation22 + $0x578] sm:$0xff]  ;;  %v16504_v59 = vcombine.low %v974_v47, %v978_v48 }
 0x47e   :  { %2575 = vmatpush1.bf16.msra.mxu0 %v16408_v14  ;;  %v947_v14 = vld [vmem:[#allocation22 + $0x438] sm:$0xff] }
 0x47f   :  { %2657 = vmatpush1.bf16.msra.mxu1 %v16410_v15  ;;  %2576 = vmatprep.subr.bf16.mxu0 %v16417_v16  ;;  %v16464_v15 = vcombine.low %v934_v63, %v938_v0  ;;  %v16466_v16 = vcombine.low %v935_v1, %v939_v4  ;;  %v16475_v18 = vcombine.high %v943_v13, %v947_v14  ;;  %v994_v63 = vld [vmem:[#allocation22 + $0x5b0] sm:$0xff]  ;;  %v991_v0 = vld [vmem:[#allocation22 + $0x598] sm:$0xff] }
 0x480   :  { %2658 = vmatprep.subr.bf16.mxu1 %v16419_v17  ;;  %v16473_v17 = vcombine.high %v942_v10, %v946_v12  ;;  %v995_v1 = vld [vmem:[#allocation22 + $0x5b8] sm:$0xff]  ;;  %v1002_v10 = vld [vmem:[#allocation22 + $0x5f0] sm:$0xff] }
 0x481   :  { %v999_v12 = vld [vmem:[#allocation22 + $0x5d8] sm:$0xff] }
 0x482   :  { %2577 = vmatpush1.bf16.msra.mxu0 %v16416_v22  ;;  %v951_v22 = vld [vmem:[#allocation22 + $0x458] sm:$0xff] }
 0x483   :  { %2659 = vmatpush1.bf16.msra.mxu1 %v16418_v23  ;;  %2578 = vmatprep.subr.bf16.mxu0 %v16425_v24  ;;  %v955_v23 = vld [vmem:[#allocation22 + $0x478] sm:$0xff]  ;;  %v16474_v24 = vcombine.low %v943_v13, %v947_v14 }
 0x484   :  { %2660 = vmatprep.subr.bf16.mxu1 %v16427_v25  ;;  %v16481_v25 = vcombine.high %v950_v19, %v954_v20  ;;  %v16483_v29 = vcombine.high %v951_v22, %v955_v23  ;;  %v1003_v13 = vld [vmem:[#allocation22 + $0x5f8] sm:$0xff] }
 0x486   :  { %2579 = vmatpush1.bf16.msra.mxu0 %v16424_v31  ;;  %v963_v31 = vld [vmem:[#allocation22 + $0x4b8] sm:$0xff] }
 0x487   :  { %2661 = vmatpush1.bf16.msra.mxu1 %v16426_v33  ;;  %2580 = vmatprep.subr.bf16.mxu0 %v16433_v34  ;;  %v16480_v33 = vcombine.low %v950_v19, %v954_v20  ;;  %v16482_v34 = vcombine.low %v951_v22, %v955_v23  ;;  %v16491_v36 = vcombine.high %v959_v30, %v963_v31  ;;  %v1010_v19 = vld [vmem:[#allocation22 + $0x630] sm:$0xff]  ;;  %v1007_v20 = vld [vmem:[#allocation22 + $0x618] sm:$0xff] }
 0x488   :  { %2662 = vmatprep.subr.bf16.mxu1 %v16435_v35  ;;  %v16489_v35 = vcombine.high %v958_v28, %v962_v42  ;;  %v16530_v23 = vcombine.low %v999_v12, %v1003_v13 }
 0x48a   :  { %2581 = vmatpush1.bf16.msra.mxu0 %v16432_v41  ;;  %v971_v41 = vld [vmem:[#allocation22 + $0x4f8] sm:$0xff] }
 0x48b   :  { %2663 = vmatpush1.bf16.msra.mxu1 %v16434_v44  ;;  %2582 = vmatprep.subr.bf16.mxu0 %v16441_v45  ;;  %v16488_v44 = vcombine.low %v958_v28, %v962_v42  ;;  %v16497_v45 = vcombine.high %v966_v37, %v970_v39  ;;  %v1014_v28 = vld [vmem:[#allocation22 + $0x650] sm:$0xff] }
 0x48c   :  { %2664 = vmatprep.subr.bf16.mxu1 %v16443_v46  ;;  %v16499_v46 = vcombine.high %v967_v40, %v971_v41  ;;  %v1018_v42 = vld [vmem:[#allocation22 + $0x670] sm:$0xff] }
 0x48e   :  { %2583 = vmatpush1.bf16.msra.mxu0 %v16440_v52  ;;  %v16498_v52 = vcombine.low %v967_v40, %v971_v41  ;;  %v1027_v40 = vld [vmem:[#allocation22 + $0x6b8] sm:$0xff]  ;;  %v16544_v41 = vcombine.low %v1014_v28, %v1018_v42 }
 0x48f   :  { %2665 = vmatpush1.bf16.msra.mxu1 %v16442_v53  ;;  %2584 = vmatprep.subr.bf16.mxu0 %v16449_v54  ;;  %v16505_v53 = vcombine.high %v974_v47, %v978_v48  ;;  %v16507_v54 = vcombine.high %v975_v49, %v979_v51  ;;  %v1034_v47 = vld [vmem:[#allocation22 + $0x6f0] sm:$0xff]  ;;  %v1031_v48 = vld [vmem:[#allocation22 + $0x6d8] sm:$0xff] }
 0x490   :  { %2666 = vmatprep.subr.bf16.mxu1 %v16451_v55  ;;  %v982_v55 = vld [vmem:[#allocation22 + $0x550] sm:$0xff] }
 0x491   :  { %v16512_v4 = vcombine.low %v982_v55, %v986_v56 }
 0x492   :  { %2585 = vmatpush1.bf16.msra.mxu0 %v16448_v60  ;;  %v16506_v60 = vcombine.low %v975_v49, %v979_v51  ;;  %v1035_v49 = vld [vmem:[#allocation22 + $0x6f8] sm:$0xff] }
 0x493   :  { %2667 = vmatpush1.bf16.msra.mxu1 %v16450_v61  ;;  %2586 = vmatprep.subr.bf16.mxu0 %v16457_v62  ;;  %v16513_v61 = vcombine.high %v982_v55, %v986_v56  ;;  %v16515_v62 = vcombine.high %v983_v57, %v987_v58  ;;  %v1042_v55 = vld [vmem:[#allocation22 + $0x730] sm:$0xff]  ;;  %v1039_v56 = vld [vmem:[#allocation22 + $0x718] sm:$0xff] }
 0x494   :  { %2668 = vmatprep.subr.bf16.mxu1 %v16459_v26  ;;  %v990_v26 = vld [vmem:[#allocation22 + $0x590] sm:$0xff] }
 0x495   :  { %v16520_v14 = vcombine.low %v990_v26, %v994_v63 }
 0x496   :  { %2587 = vmatpush1.bf16.msra.mxu0 %v16456_v5  ;;  %v16514_v5 = vcombine.low %v983_v57, %v987_v58  ;;  %v1043_v57 = vld [vmem:[#allocation22 + $0x738] sm:$0xff] }
 0x497   :  { %2669 = vmatpush1.bf16.msra.mxu1 %v16458_v6  ;;  %2588 = vmatprep.subr.bf16.mxu0 %v16465_v7  ;;  %v16521_v6 = vcombine.high %v990_v26, %v994_v63  ;;  %v16523_v7 = vcombine.high %v991_v0, %v995_v1  ;;  %v1050_v26 = vld [vmem:[#allocation22 + $0x770] sm:$0xff]  ;;  %v1047_v63 = vld [vmem:[#allocation22 + $0x758] sm:$0xff] }
 0x498   :  { %2670 = vmatprep.subr.bf16.mxu1 %v16467_v32  ;;  %v998_v32 = vld [vmem:[#allocation22 + $0x5d0] sm:$0xff] }
 0x499   :  { %v16528_v22 = vcombine.low %v998_v32, %v1002_v10 }
 0x49a   :  { %2589 = vmatpush1.bf16.msra.mxu0 %v16464_v15  ;;  %v16522_v15 = vcombine.low %v991_v0, %v995_v1  ;;  %v1051_v0 = vld [vmem:[#allocation22 + $0x778] sm:$0xff] }
 0x49b   :  { %2671 = vmatpush1.bf16.msra.mxu1 %v16466_v16  ;;  %2599 = vmatprep.subr.bf16.mxu0 %v16473_v17  ;;  %v16529_v16 = vcombine.high %v998_v32, %v1002_v10  ;;  %v16531_v17 = vcombine.high %v999_v12, %v1003_v13  ;;  %v1058_v32 = vld [vmem:[#allocation22 + $0x7b0] sm:$0xff]  ;;  %v1055_v10 = vld [vmem:[#allocation22 + $0x798] sm:$0xff] }
 0x49c   :  { %2681 = vmatprep.subr.bf16.mxu1 %v16475_v18  ;;  %v1006_v18 = vld [vmem:[#allocation22 + $0x610] sm:$0xff]  ;;  %v1059_v12 = vld [vmem:[#allocation22 + $0x7b8] sm:$0xff] }
 0x49d   :  { %2591 = vmatmul.mubr.bf16.vlgmr.msra.gmra.mrb[8].mxu0 %v20004_v43 }
 0x49e   :  { %2673 = vmatmul.mubr.bf16.vlgmr.msra.gmra.mrb[8].mxu1 %v20004_v43  ;;  %2600 = vmatpush1.bf16.msra.mxu0 %v16472_v21  ;;  %v16490_v43 = vcombine.low %v959_v30, %v963_v31  ;;  %v1011_v21 = vld [vmem:[#allocation22 + $0x638] sm:$0xff]  ;;  %v16536_v31 = vcombine.low %v1006_v18, %v1010_v19 }
 0x49f   :  { %2631 = vmatprep.mubr.bf16.mxu0 %v20008_v50  ;;  %2682 = vmatpush1.bf16.msra.mxu1 %v16474_v24  ;;  %v16537_v24 = vcombine.high %v1006_v18, %v1010_v19  ;;  %v1019_v30 = vld [vmem:[#allocation22 + $0x678] sm:$0xff]  ;;  %v1066_v18 = vld [vmem:[#allocation22 + $0x7f0] sm:$0xff] }
 0x4a0   :  { %2713 = vmatprep.mubr.bf16.mxu1 %v20008_v50  ;;  %2601 = vmatprep.subr.bf16.mxu0 %v16481_v25  ;;  %v16496_v50 = vcombine.low %v966_v37, %v970_v39  ;;  %v16539_v25 = vcombine.high %v1007_v20, %v1011_v21  ;;  %v1026_v37 = vld [vmem:[#allocation22 + $0x6b0] sm:$0xff]  ;;  %v1023_v39 = vld [vmem:[#allocation22 + $0x698] sm:$0xff] }
 0x4a1   :  { %2683 = vmatprep.subr.bf16.mxu1 %v16483_v29  ;;  %v1015_v29 = vld [vmem:[#allocation22 + $0x658] sm:$0xff] }
 0x4a2   :  { %2602 = vmatpush1.bf16.msra.mxu0 %v16480_v33  ;;  %v16538_v33 = vcombine.low %v1007_v20, %v1011_v21  ;;  %v1063_v19 = vld [vmem:[#allocation22 + $0x7d8] sm:$0xff] }
 0x4a3   :  { %2684 = vmatpush1.bf16.msra.mxu1 %v16482_v34  ;;  %2603 = vmatprep.subr.bf16.mxu0 %v16489_v35  ;;  %v16545_v34 = vcombine.high %v1014_v28, %v1018_v42  ;;  %v16547_v35 = vcombine.high %v1015_v29, %v1019_v30  ;;  %v1067_v20 = vld [vmem:[#allocation22 + $0x7f8] sm:$0xff]  ;;  %v3082_v28 = vld [vmem:[#allocation10 + $0x8] sm:$0xff] }
 0x4a4   :  { %2685 = vmatprep.subr.bf16.mxu1 %v16491_v36  ;;  %v1022_v36 = vld [vmem:[#allocation22 + $0x690] sm:$0xff]  ;;  %v3086_v42 = vld [vmem:[#allocation10 + $0x28] sm:$0xff] }
 0x4a5   :  { %v16552_v51 = vcombine.low %v1022_v36, %v1026_v37 }
 0x4a6   :  { %2604 = vmatpush1.bf16.msra.mxu0 %v16488_v44  ;;  %v16546_v44 = vcombine.low %v1015_v29, %v1019_v30  ;;  %v16594_v30 = vcombine.low %v1063_v19, %v1067_v20 }
 0x4a7   :  { %2686 = vmatpush1.bf16.msra.mxu1 %v16490_v43  ;;  %2605 = vmatprep.subr.bf16.mxu0 %v16497_v45  ;;  %v16553_v43 = vcombine.high %v1022_v36, %v1026_v37  ;;  %v16555_v45 = vcombine.high %v1023_v39, %v1027_v40  ;;  %v3094_v36 = vld [vmem:[#allocation10 + $0x68] sm:$0xff] }
 0x4a8   :  { %2687 = vmatprep.subr.bf16.mxu1 %v16499_v46  ;;  %v1030_v46 = vld [vmem:[#allocation22 + $0x6d0] sm:$0xff] }
 0x4a9   :  { %v16560_v58 = vcombine.low %v1030_v46, %v1034_v47 }
 0x4aa   :  { %2606 = vmatpush1.bf16.msra.mxu0 %v16496_v50  ;;  %v16554_v50 = vcombine.low %v1023_v39, %v1027_v40  ;;  %v16610_v39 = vcombine.low %v3082_v28, %v3086_v42 }
 0x4ab   :  { %2688 = vmatpush1.bf16.msra.mxu1 %v16498_v52  ;;  %2607 = vmatprep.subr.bf16.mxu0 %v16505_v53  ;;  %v16561_v52 = vcombine.high %v1030_v46, %v1034_v47  ;;  %v16563_v53 = vcombine.high %v1031_v48, %v1035_v49  ;;  %v2722_v47 = vld [vmem:[#allocation3] sm:$0x3] }
 0x4ac   :  { %2689 = vmatprep.subr.bf16.mxu1 %v16507_v54  ;;  %v1038_v54 = vld [vmem:[#allocation22 + $0x710] sm:$0xff] }
 0x4ad   :  { %v16568_v1 = vcombine.low %v1038_v54, %v1042_v55 }
 0x4ae   :  { %2608 = vmatpush1.bf16.msra.mxu0 %v16504_v59  ;;  %v16562_v59 = vcombine.low %v1031_v48, %v1035_v49  ;;  %v3106_v48 = vld [vmem:[#allocation10 + $0xc8] sm:$0xff] }
 0x4af   :  { %2690 = vmatpush1.bf16.msra.mxu1 %v16506_v60  ;;  %2609 = vmatprep.subr.bf16.mxu0 %v16513_v61  ;;  %v16569_v60 = vcombine.high %v1038_v54, %v1042_v55  ;;  %v16571_v61 = vcombine.high %v1039_v56, %v1043_v57  ;;  %v3110_v49 = vld [vmem:[#allocation10 + $0xe8] sm:$0xff] }
 0x4b0   :  { %2691 = vmatprep.subr.bf16.mxu1 %v16515_v62  ;;  %v1046_v62 = vld [vmem:[#allocation22 + $0x750] sm:$0xff]  ;;  %v3118_v54 = vld [vmem:[#allocation10 + $0x128] sm:$0xff] }
 0x4b1   :  { %v16576_v13 = vcombine.low %v1046_v62, %v1050_v26 }
 0x4b2   :  { %2610 = vmatpush1.bf16.msra.mxu0 %v16512_v4  ;;  %v16570_v4 = vcombine.low %v1039_v56, %v1043_v57  ;;  %v3081_v56 = vld [vmem:[#allocation10] sm:$0xff] }
 0x4b3   :  { %2692 = vmatpush1.bf16.msra.mxu1 %v16514_v5  ;;  %2611 = vmatprep.subr.bf16.mxu0 %v16521_v6  ;;  %v16577_v5 = vcombine.high %v1046_v62, %v1050_v26  ;;  %v16579_v6 = vcombine.high %v1047_v63, %v1051_v0  ;;  %v3085_v57 = vld [vmem:[#allocation10 + $0x20] sm:$0xff] }
 0x4b4   :  { %2693 = vmatprep.subr.bf16.mxu1 %v16523_v7  ;;  %v1054_v7 = vld [vmem:[#allocation22 + $0x790] sm:$0xff]  ;;  %v16609_v62 = vcombine.high %v3081_v56, %v3085_v57  ;;  %v3089_v26 = vld [vmem:[#allocation10 + $0x40] sm:$0xff] }
 0x4b5   :  { %v16584_v21 = vcombine.low %v1054_v7, %v1058_v32 }
 0x4b6   :  { %2612 = vmatpush1.bf16.msra.mxu0 %v16520_v14  ;;  %v16578_v14 = vcombine.low %v1047_v63, %v1051_v0  ;;  %v3093_v63 = vld [vmem:[#allocation10 + $0x60] sm:$0xff] }
 0x4b7   :  { %2694 = vmatpush1.bf16.msra.mxu1 %v16522_v15  ;;  %2613 = vmatprep.subr.bf16.mxu0 %v16529_v16  ;;  %v16585_v15 = vcombine.high %v1054_v7, %v1058_v32  ;;  %v16587_v16 = vcombine.high %v1055_v10, %v1059_v12  ;;  %v16617_v7 = vcombine.high %v3089_v26, %v3093_v63  ;;  %v3097_v32 = vld [vmem:[#allocation10 + $0x80] sm:$0xff] }
 0x4b8   :  { %2695 = vmatprep.subr.bf16.mxu1 %v16531_v17  ;;  %v1062_v17 = vld [vmem:[#allocation22 + $0x7d0] sm:$0xff] }
 0x4b9   :  { %v16592_v29 = vcombine.low %v1062_v17, %v1066_v18 }
 0x4ba   :  { %2614 = vmatpush1.bf16.msra.mxu0 %v16528_v22  ;;  %v16586_v22 = vcombine.low %v1055_v10, %v1059_v12  ;;  %v3101_v10 = vld [vmem:[#allocation10 + $0xa0] sm:$0xff] }
 0x4bb   :  { %2696 = vmatpush1.bf16.msra.mxu1 %v16530_v23  ;;  %2615 = vmatprep.subr.bf16.mxu0 %v16537_v24  ;;  %v16593_v23 = vcombine.high %v1062_v17, %v1066_v18  ;;  %v16595_v24 = vcombine.high %v1063_v19, %v1067_v20  ;;  %v16625_v17 = vcombine.high %v3097_v32, %v3101_v10  ;;  %v3109_v18 = vld [vmem:[#allocation10 + $0xe0] sm:$0xff] }
 0x4bc   :  { %2697 = vmatprep.subr.bf16.mxu1 %v16539_v25  ;;  %v2723_v25 = vld [vmem:[#allocation7] sm:$0xff] }
 0x4be   :  { %2616 = vmatpush1.bf16.msra.mxu0 %v16536_v31  ;;  %v2773_v31 = vcombine.high %v2723_v25, %v2723_v25 }
 0x4bf   :  { %2698 = vmatpush1.bf16.msra.mxu1 %v16538_v33  ;;  %2617 = vmatprep.subr.bf16.mxu0 %v16545_v34  ;;  %v2724_v33 = vld [vmem:[#allocation7 + $0x8] sm:$0xff]  ;;  %v16611_v34 = vcombine.high %v3082_v28, %v3086_v42 }
 0x4c0   :  { %2699 = vmatprep.subr.bf16.mxu1 %v16547_v35  ;;  %v3090_v35 = vld [vmem:[#allocation10 + $0x48] sm:$0xff]  ;;  %v2774_v37 = vcombine.high %v2724_v33, %v2724_v33  ;;  %v3117_v28 = vld [vmem:[#allocation10 + $0x120] sm:$0xff] }
 0x4c1   :  { %v16619_v40 = vcombine.high %v3090_v35, %v3094_v36 }
 0x4c2   :  { %2618 = vmatpush1.bf16.msra.mxu0 %v16544_v41  ;;  %v3098_v41 = vld [vmem:[#allocation10 + $0x88] sm:$0xff] }
 0x4c3   :  { %2700 = vmatpush1.bf16.msra.mxu1 %v16546_v44  ;;  %2619 = vmatprep.subr.bf16.mxu0 %v16553_v43  ;;  %v3102_v44 = vld [vmem:[#allocation10 + $0xa8] sm:$0xff] }
 0x4c4   :  { %2701 = vmatprep.subr.bf16.mxu1 %v16555_v45  ;;  %v2725_v43 = vld [vmem:[#allocation7 + $0x10] sm:$0xff]  ;;  %v16618_v45 = vcombine.low %v3090_v35, %v3094_v36  ;;  %v16627_v46 = vcombine.high %v3098_v41, %v3102_v44  ;;  %v3121_v35 = vld [vmem:[#allocation10 + $0x140] sm:$0xff] }
 0x4c5   :  { %v3125_v36 = vld [vmem:[#allocation10 + $0x160] sm:$0xff] }
 0x4c6   :  { %2620 = vmatpush1.bf16.msra.mxu0 %v16552_v51  ;;  %v2775_v51 = vcombine.high %v2725_v43, %v2725_v43 }
 0x4c7   :  { %2702 = vmatpush1.bf16.msra.mxu1 %v16554_v50  ;;  %2621 = vmatprep.subr.bf16.mxu0 %v16561_v52  ;;  %v2726_v50 = vld [vmem:[#allocation7 + $0x18] sm:$0xff]  ;;  %v16635_v52 = vcombine.high %v3106_v48, %v3110_v49 }
 0x4c8   :  { %2703 = vmatprep.subr.bf16.mxu1 %v16563_v53  ;;  %v3114_v53 = vld [vmem:[#allocation10 + $0x108] sm:$0xff]  ;;  %v2776_v55 = vcombine.high %v2726_v50, %v2726_v50 }
 0x4c9   :  { %v16642_v0 = vcombine.low %v3114_v53, %v3118_v54 }
 0x4ca   :  { %2622 = vmatpush1.bf16.msra.mxu0 %v16560_v58  ;;  %v16634_v58 = vcombine.low %v3106_v48, %v3110_v49  ;;  %v16648_v49 = vcombine.low %v3121_v35, %v3125_v36 }
 0x4cb   :  { %2704 = vmatpush1.bf16.msra.mxu1 %v16562_v59  ;;  %2623 = vmatprep.subr.bf16.mxu0 %v16569_v60  ;;  %v16643_v59 = vcombine.high %v3114_v53, %v3118_v54  ;;  %v3122_v60 = vld [vmem:[#allocation10 + $0x148] sm:$0xff]  ;;  %v3141_v53 = vld [vmem:[#allocation10 + $0x1e0] sm:$0xff] }
 0x4cc   :  { %2705 = vmatprep.subr.bf16.mxu1 %v16571_v61  ;;  %v3126_v61 = vld [vmem:[#allocation10 + $0x168] sm:$0xff] }
 0x4cd   :  { %v16650_v12 = vcombine.low %v3122_v60, %v3126_v61 }
 0x4ce   :  { %2624 = vmatpush1.bf16.msra.mxu0 %v16568_v1  ;;  %v16651_v1 = vcombine.high %v3122_v60, %v3126_v61  ;;  %v3145_v60 = vld [vmem:[#allocation10 + $0x200] sm:$0xff] }
 0x4cf   :  { %2706 = vmatpush1.bf16.msra.mxu1 %v16570_v4  ;;  %2625 = vmatprep.subr.bf16.mxu0 %v16577_v5  ;;  %v16608_v4 = vcombine.low %v3081_v56, %v3085_v57  ;;  %v3130_v5 = vld [vmem:[#allocation10 + $0x188] sm:$0xff]  ;;  %v3149_v61 = vld [vmem:[#allocation10 + $0x220] sm:$0xff] }
 0x4d0   :  { %2707 = vmatprep.subr.bf16.mxu1 %v16579_v6  ;;  %v3134_v6 = vld [vmem:[#allocation10 + $0x1a8] sm:$0xff] }
 0x4d1   :  { %v16658_v19 = vcombine.low %v3130_v5, %v3134_v6  ;;  %v3178_v57 = vld [vmem:[#allocation10 + $0x308] sm:$0xff] }
 0x4d2   :  { %2626 = vmatpush1.bf16.msra.mxu0 %v16576_v13  ;;  %v16659_v13 = vcombine.high %v3130_v5, %v3134_v6  ;;  %v16672_v6 = vcombine.low %v3145_v60, %v3149_v61 }
 0x4d3   :  { %2708 = vmatpush1.bf16.msra.mxu1 %v16578_v14  ;;  %2627 = vmatprep.subr.bf16.mxu0 %v16585_v15  ;;  %v16616_v14 = vcombine.low %v3089_v26, %v3093_v63  ;;  %v3138_v15 = vld [vmem:[#allocation10 + $0x1c8] sm:$0xff] }
 0x4d4   :  { %2709 = vmatprep.subr.bf16.mxu1 %v16587_v16  ;;  %v3142_v16 = vld [vmem:[#allocation10 + $0x1e8] sm:$0xff] }
 0x4d5   :  { %v16667_v20 = vcombine.high %v3138_v15, %v3142_v16  ;;  %v16666_v42 = vcombine.low %v3138_v15, %v3142_v16  ;;  %v3173_v15 = vld [vmem:[#allocation10 + $0x2e0] sm:$0xff] }
 0x4d6   :  { %2628 = vmatpush1.bf16.msra.mxu0 %v16584_v21  ;;  %v16624_v21 = vcombine.low %v3097_v32, %v3101_v10  ;;  %v3161_v32 = vld [vmem:[#allocation10 + $0x280] sm:$0xff] }
 0x4d7   :  { %2710 = vmatpush1.bf16.msra.mxu1 %v16586_v22  ;;  %2629 = vmatprep.subr.bf16.mxu0 %v16593_v23  ;;  %v3146_v22 = vld [vmem:[#allocation10 + $0x208] sm:$0xff]  ;;  %v3165_v10 = vld [vmem:[#allocation10 + $0x2a0] sm:$0xff] }
 0x4d8   :  { %2711 = vmatprep.subr.bf16.mxu1 %v16595_v24  ;;  %v3150_v23 = vld [vmem:[#allocation10 + $0x228] sm:$0xff]  ;;  %v16688_v16 = vcombine.low %v3161_v32, %v3165_v10 }
 0x4da   :  { %2630 = vmatpush1.bf16.msra.mxu0 %v16592_v29  ;;  %v16675_v29 = vcombine.high %v3146_v22, %v3150_v23 }
 0x4db   :  { %2712 = vmatpush1.bf16.msra.mxu1 %v16594_v30  ;;  %16596 = vmatprep.subr.msk.mxu0 %vm331_vm1, %v2773_v31  ;;  %v3154_v31 = vld [vmem:[#allocation10 + $0x248] sm:$0xff] }
 0x4dc   :  { %6367 = vmatprep.subr.bf16.mxu1 %v16611_v34 }
 0x4dd   :  { %2632 = vmatmul.mubr.bf16.vlgmr.msra.gmra.mrb[8].mxu0 %v20020_v3 }
 0x4de   :  { %2714 = vmatmul.mubr.bf16.vlgmr.msra.gmra.mrb[8].mxu1 %v20020_v3  ;;  %16597 = vmatpush1.msk.msra.mxu0 %vm331_vm1, %v2723_v25  ;;  %v16626_v3 = vcombine.low %v3098_v41, %v3102_v44  ;;  %v3113_v25 = vld [vmem:[#allocation10 + $0x100] sm:$0xff]  ;;  %v3162_v41 = vld [vmem:[#allocation10 + $0x288] sm:$0xff] }
 0x4df   :  { %2861 = vmatprep.mubr.f32.mxu0 %v19593_v2  ;;  %16599 = vmatprep.subr.msk.mxu0 %vm331_vm1, %v2774_v37  ;;  %v16641_v34 = vcombine.high %v3113_v25, %v3117_v28  ;;  %v16674_v37 = vcombine.low %v3146_v22, %v3150_v23  ;;  %v3166_v44 = vld [vmem:[#allocation10 + $0x2a8] sm:$0xff] }
 0x4e0   :  { %6368 = vmatpush1.bf16.msra.mxu1 %v16610_v39  ;;  %v16691_v48 = vcombine.high %v3162_v41, %v3166_v44  ;;  %v16690_v54 = vcombine.low %v3162_v41, %v3166_v44  ;;  %v3193_v41 = vld [vmem:[#allocation10 + $0x380] sm:$0xff] }
 0x4e1   :  { %6369 = vmatprep.subr.bf16.mxu1 %v16619_v40  ;;  %v16640_v40 = vcombine.low %v3113_v25, %v3117_v28  ;;  %v3185_v28 = vld [vmem:[#allocation10 + $0x340] sm:$0xff] }
 0x4e2   :  { %v3197_v44 = vld [vmem:[#allocation10 + $0x3a0] sm:$0xff] }
 0x4e4   :  { %6370 = vmatpush1.bf16.msra.mxu1 %v16618_v45  ;;  %v3129_v45 = vld [vmem:[#allocation10 + $0x180] sm:$0xff] }
 0x4e5   :  { %16598 = vmatmul.mubr.msk.f32.vlgmr.msra.gmra.mrb[12].mxu0 %vm2777_vm5, %v2722_v47  ;;  %6371 = vmatprep.subr.bf16.mxu1 %v16627_v46  ;;  %v3133_v46 = vld [vmem:[#allocation10 + $0x1a0] sm:$0xff] }
 0x4e6   :  { %16600 = vmatpush1.msk.msra.mxu0 %vm331_vm1, %v2724_v33  ;;  %2932 = vmatprep.mubr.f32.mxu0 %v19593_v2  ;;  %v3158_v33 = vld [vmem:[#allocation10 + $0x268] sm:$0xff]  ;;  %v16656_v56 = vcombine.low %v3129_v45, %v3133_v46 }
 0x4e7   :  { %16602 = vmatprep.subr.msk.mxu0 %vm331_vm1, %v2775_v51  ;;  %v16683_v39 = vcombine.high %v3154_v31, %v3158_v33  ;;  %v3170_v51 = vld [vmem:[#allocation10 + $0x2c8] sm:$0xff] }
 0x4e8   :  { %6372 = vmatpush1.bf16.msra.mxu1 %v16626_v3  ;;  %v16657_v3 = vcombine.high %v3129_v45, %v3133_v46  ;;  %v16720_v45 = vcombine.low %v3193_v41, %v3197_v44  ;;  %v16721_v46 = vcombine.high %v3193_v41, %v3197_v44 }
 0x4e9   :  { %16601 = vmatmul.mubr.msk.f32.vlgmr.msra.gmra.mrb[14].mxu0 %vm2777_vm5, %v2722_v47  ;;  %6373 = vmatprep.subr.bf16.mxu1 %v16635_v52  ;;  %v3137_v52 = vld [vmem:[#allocation10 + $0x1c0] sm:$0xff] }
 0x4ea   :  { %16603 = vmatpush1.msk.msra.mxu0 %vm331_vm1, %v2725_v43  ;;  %3003 = vmatprep.mubr.f32.mxu0 %v19593_v2  ;;  %v16649_v43 = vcombine.high %v3121_v35, %v3125_v36  ;;  %v16664_v63 = vcombine.low %v3137_v52, %v3141_v53 }
 0x4eb   :  { %16605 = vmatprep.subr.msk.mxu0 %vm331_vm1, %v2776_v55 }
 0x4ec   :  { %6374 = vmatpush1.bf16.msra.mxu1 %v16634_v58  ;;  %v3182_v58 = vld [vmem:[#allocation10 + $0x328] sm:$0xff] }
 0x4ed   :  { %16604 = vmatmul.mubr.msk.f32.vlgmr.msra.gmra.mrb[16].mxu0 %vm2777_vm5, %v2722_v47  ;;  %6375 = vmatprep.subr.bf16.mxu1 %v16643_v59  ;;  %v16665_v59 = vcombine.high %v3137_v52, %v3141_v53  ;;  %v16707_v26 = vcombine.high %v3178_v57, %v3182_v58  ;;  %v16706_v5 = vcombine.low %v3178_v57, %v3182_v58  ;;  %v3206_v53 = vld [vmem:[#allocation10 + $0x3e8] sm:$0xff]  ;;  %v3209_v57 = vld [vmem:[#allocation10 + $0x400] sm:$0xff] }
 0x4ee   :  { %16606 = vmatpush1.msk.msra.mxu0 %vm331_vm1, %v2726_v50  ;;  %3074 = vmatprep.mubr.f32.mxu0 %v19593_v2  ;;  %v3105_v2 = vld [vmem:[#allocation10 + $0xc0] sm:$0xff]  ;;  %v3174_v50 = vld [vmem:[#allocation10 + $0x2e8] sm:$0xff] }
 0x4ef   :  { %6203 = vmatprep.subr.bf16.mxu0 %v16609_v62  ;;  %v16633_v24 = vcombine.high %v3105_v2, %v3109_v18  ;;  %v16632_v30 = vcombine.low %v3105_v2, %v3109_v18  ;;  %v16699_v55 = vcombine.high %v3170_v51, %v3174_v50  ;;  %v16698_v62 = vcombine.low %v3170_v51, %v3174_v50  ;;  %v3177_v2 = vld [vmem:[#allocation10 + $0x300] sm:$0xff] }
 0x4f0   :  { %6376 = vmatpush1.bf16.msra.mxu1 %v16642_v0  ;;  %v16673_v0 = vcombine.high %v3145_v60, %v3149_v61  ;;  %v3181_v18 = vld [vmem:[#allocation10 + $0x320] sm:$0xff] }
 0x4f1   :  { %16607 = vmatmul.mubr.msk.f32.vlgmr.msra.gmra.mrb[18].mxu0 %vm2777_vm5, %v2722_v47  ;;  %6377 = vmatprep.subr.bf16.mxu1 %v16651_v1  ;;  %v16682_v47 = vcombine.low %v3154_v31, %v3158_v33  ;;  %v3153_v1 = vld [vmem:[#allocation10 + $0x240] sm:$0xff]  ;;  %v3190_v33 = vld [vmem:[#allocation10 + $0x368] sm:$0xff] }
 0x4f2   :  { %6204 = vmatpush1.bf16.msra.mxu0 %v16608_v4  ;;  %v3157_v4 = vld [vmem:[#allocation10 + $0x260] sm:$0xff] }
 0x4f3   :  { %6205 = vmatprep.subr.bf16.mxu0 %v16617_v7  ;;  %v16681_v7 = vcombine.high %v3153_v1, %v3157_v4  ;;  %v3201_v51 = vld [vmem:[#allocation10 + $0x3c0] sm:$0xff] }
 0x4f4   :  { %6378 = vmatpush1.bf16.msra.mxu1 %v16650_v12  ;;  %v16680_v12 = vcombine.low %v3153_v1, %v3157_v4  ;;  %v3205_v50 = vld [vmem:[#allocation10 + $0x3e0] sm:$0xff] }
 0x4f5   :  { %6379 = vmatprep.subr.bf16.mxu1 %v16659_v13  ;;  %v16689_v13 = vcombine.high %v3161_v32, %v3165_v10  ;;  %v16729_v52 = vcombine.high %v3201_v51, %v3205_v50  ;;  %v3213_v58 = vld [vmem:[#allocation10 + $0x420] sm:$0xff] }
 0x4f6   :  { %6206 = vmatpush1.bf16.msra.mxu0 %v16616_v14  ;;  %v3169_v14 = vld [vmem:[#allocation10 + $0x2c0] sm:$0xff]  ;;  %v16736_v60 = vcombine.low %v3209_v57, %v3213_v58  ;;  %v16737_v61 = vcombine.high %v3209_v57, %v3213_v58  ;;  %v3242_v58 = vld [vmem:[#allocation10 + $0x508] sm:$0xff] }
 0x4f7   :  { %6207 = vmatprep.subr.bf16.mxu0 %v16625_v17  ;;  %v16697_v17 = vcombine.high %v3169_v14, %v3173_v15  ;;  %v3245_v57 = vld [vmem:[#allocation10 + $0x520] sm:$0xff] }
 0x4f8   :  { %6380 = vmatpush1.bf16.msra.mxu1 %v16658_v19  ;;  %v16696_v19 = vcombine.low %v3169_v14, %v3173_v15 }
 0x4f9   :  { %6381 = vmatprep.subr.bf16.mxu1 %v16667_v20  ;;  %v16705_v20 = vcombine.high %v3177_v2, %v3181_v18 }
 0x4fa   :  { %6208 = vmatpush1.bf16.msra.mxu0 %v16624_v21  ;;  %v16704_v21 = vcombine.low %v3177_v2, %v3181_v18  ;;  %v3217_v2 = vld [vmem:[#allocation10 + $0x440] sm:$0xff] }
 0x4fb   :  { %6209 = vmatprep.subr.bf16.mxu0 %v16633_v24 }
 0x4fc   :  { %6382 = vmatpush1.bf16.msra.mxu1 %v16666_v42  ;;  %v3189_v42 = vld [vmem:[#allocation10 + $0x360] sm:$0xff] }
 0x4fd   :  { %6383 = vmatprep.subr.bf16.mxu1 %v16675_v29  ;;  %v3186_v29 = vld [vmem:[#allocation10 + $0x348] sm:$0xff]  ;;  %v16712_v36 = vcombine.low %v3185_v28, %v3189_v42 }
 0x4fe   :  { %6210 = vmatpush1.bf16.msra.mxu0 %v16632_v30 }
 0x4ff   :  { %6211 = vmatprep.subr.bf16.mxu0 %v16641_v34 }
 0x500   :  { %6384 = vmatpush1.bf16.msra.mxu1 %v16674_v37  ;;  %v16713_v37 = vcombine.high %v3185_v28, %v3189_v42 }
 0x501   :  { %6385 = vmatprep.subr.bf16.mxu1 %v16683_v39  ;;  %v16714_v39 = vcombine.low %v3186_v29, %v3190_v33 }
 0x502   :  { %6212 = vmatpush1.bf16.msra.mxu0 %v16640_v40  ;;  %v16715_v40 = vcombine.high %v3186_v29, %v3190_v33 }
 0x503   :  { %6213 = vmatprep.subr.bf16.mxu0 %v16649_v43  ;;  %v3194_v43 = vld [vmem:[#allocation10 + $0x388] sm:$0xff] }
 0x504   :  { %6386 = vmatpush1.bf16.msra.mxu1 %v16682_v47  ;;  %v3198_v47 = vld [vmem:[#allocation10 + $0x3a8] sm:$0xff] }
 0x505   :  { %6387 = vmatprep.subr.bf16.mxu1 %v16691_v48  ;;  %v16722_v48 = vcombine.low %v3194_v43, %v3198_v47 }
 0x506   :  { %6214 = vmatpush1.bf16.msra.mxu0 %v16648_v49  ;;  %v16723_v49 = vcombine.high %v3194_v43, %v3198_v47 }
 0x507   :  { %6215 = vmatprep.subr.bf16.mxu0 %v16657_v3  ;;  %v3202_v3 = vld [vmem:[#allocation10 + $0x3c8] sm:$0xff] }
 0x508   :  { %6388 = vmatpush1.bf16.msra.mxu1 %v16690_v54  ;;  %v16728_v54 = vcombine.low %v3201_v51, %v3205_v50  ;;  %v3237_v51 = vld [vmem:[#allocation10 + $0x4e0] sm:$0xff]  ;;  %v3234_v50 = vld [vmem:[#allocation10 + $0x4c8] sm:$0xff] }
 0x509   :  { %6389 = vmatprep.subr.bf16.mxu1 %v16699_v55  ;;  %v16730_v55 = vcombine.low %v3202_v3, %v3206_v53 }
 0x50a   :  { %6216 = vmatpush1.bf16.msra.mxu0 %v16656_v56  ;;  %v16731_v56 = vcombine.high %v3202_v3, %v3206_v53  ;;  %v3238_v3 = vld [vmem:[#allocation10 + $0x4e8] sm:$0xff] }
 0x50b   :  { %6217 = vmatprep.subr.bf16.mxu0 %v16665_v59  ;;  %v3210_v59 = vld [vmem:[#allocation10 + $0x408] sm:$0xff] }
 0x50c   :  { %6390 = vmatpush1.bf16.msra.mxu1 %v16698_v62  ;;  %v3214_v62 = vld [vmem:[#allocation10 + $0x428] sm:$0xff] }
 0x50d   :  { %6391 = vmatprep.subr.bf16.mxu1 %v16707_v26  ;;  %v16738_v26 = vcombine.low %v3210_v59, %v3214_v62 }
 0x50e   :  { %6218 = vmatpush1.bf16.msra.mxu0 %v16664_v63  ;;  %v16739_v63 = vcombine.high %v3210_v59, %v3214_v62  ;;  %v3246_v59 = vld [vmem:[#allocation10 + $0x528] sm:$0xff] }
 0x50f   :  { %6219 = vmatprep.subr.bf16.mxu0 %v16673_v0 }
 0x510   :  { %6392 = vmatpush1.bf16.msra.mxu1 %v16706_v5 }
 0x511   :  { %6393 = vmatprep.subr.bf16.mxu1 %v16715_v40 }
 0x512   :  { %6220 = vmatpush1.bf16.msra.mxu0 %v16672_v6 }
 0x513   :  { %6221 = vmatprep.subr.bf16.mxu0 %v16681_v7  ;;  %v20064_v7 = vld [vmem:[#allocation8] sm:$0xff] }
 0x514   :  { %6394 = vmatpush1.bf16.msra.mxu1 %v16714_v39  ;;  %v2736_v14 = vrot.slane %v20064_v7, %v19982_v9  ;;  %v2744_v28 = vrot.slane %v20064_v7, %v19992_v27  ;;  %v3230_v39 = vld [vmem:[#allocation10 + $0x4a8] sm:$0xff] }
 0x515   :  { %6395 = vmatprep.subr.bf16.mxu1 %v16723_v49 }
 0x516   :  { %6222 = vmatpush1.bf16.msra.mxu0 %v16680_v12 }
 0x517   :  { %6223 = vmatprep.subr.bf16.mxu0 %v16689_v13  ;;  %v2732_v13 = vrot.slane %v20064_v7, %v19985_v11 }
 0x518   :  { %6396 = vmatpush1.bf16.msra.mxu1 %v16722_v48  ;;  %v3233_v48 = vld [vmem:[#allocation10 + $0x4c0] sm:$0xff] }
 0x519   :  { %6397 = vmatprep.subr.bf16.mxu1 %v16731_v56  ;;  %v3241_v56 = vld [vmem:[#allocation10 + $0x500] sm:$0xff] }
 0x51a   :  { %6224 = vmatpush1.bf16.msra.mxu0 %v16688_v16  ;;  %v16769_v62 = vcombine.high %v3241_v56, %v3245_v57 }
 0x51b   :  { %6225 = vmatprep.subr.bf16.mxu0 %v16697_v17 }
 0x51c   :  { %6398 = vmatpush1.bf16.msra.mxu1 %v16730_v55  ;;  %v16763_v55 = vcombine.high %v3234_v50, %v3238_v3 }
 0x51d   :  { %6408 = vmatprep.subr.bf16.mxu1 %v16739_v63  ;;  %v3249_v63 = vld [vmem:[#allocation10 + $0x540] sm:$0xff] }
 0x51e   :  { %6226 = vmatpush1.bf16.msra.mxu0 %v16696_v19  ;;  %v3221_v19 = vld [vmem:[#allocation10 + $0x460] sm:$0xff] }
 0x51f   :  { %6227 = vmatprep.subr.bf16.mxu0 %v16705_v20  ;;  %v3218_v20 = vld [vmem:[#allocation10 + $0x448] sm:$0xff]  ;;  %v16744_v41 = vcombine.low %v3217_v2, %v3221_v19 }
 0x522   :  { %6228 = vmatpush1.bf16.msra.mxu0 %v16704_v21  ;;  %v3222_v21 = vld [vmem:[#allocation10 + $0x468] sm:$0xff] }
 0x523   :  { %6229 = vmatprep.subr.bf16.mxu0 %v16713_v37  ;;  %v16747_v33 = vcombine.high %v3218_v20, %v3222_v21  ;;  %v3226_v37 = vld [vmem:[#allocation10 + $0x488] sm:$0xff]  ;;  %v16746_v44 = vcombine.low %v3218_v20, %v3222_v21 }
 0x524   :  { %v16755_v47 = vcombine.high %v3226_v37, %v3230_v39  ;;  %v16754_v53 = vcombine.low %v3226_v37, %v3230_v39  ;;  %v3270_v37 = vld [vmem:[#allocation10 + $0x5e8] sm:$0xff] }
 0x526   :  { %6230 = vmatpush1.bf16.msra.mxu0 %v16712_v36  ;;  %v3229_v36 = vld [vmem:[#allocation10 + $0x4a0] sm:$0xff] }
 0x527   :  { %6231 = vmatprep.subr.bf16.mxu0 %v16721_v46 }
 0x52a   :  { %6232 = vmatpush1.bf16.msra.mxu0 %v16720_v45 }
 0x52b   :  { %6233 = vmatprep.subr.bf16.mxu0 %v16729_v52 }
 0x52e   :  { %6234 = vmatpush1.bf16.msra.mxu0 %v16728_v54  ;;  %v16761_v54 = vcombine.high %v3233_v48, %v3237_v51 }
 0x52f   :  { %6244 = vmatprep.subr.bf16.mxu0 %v16737_v61  ;;  %v16762_v61 = vcombine.low %v3234_v50, %v3238_v3 }
 0x530   :  { %v20048_v22 = vpop.f32.mrb[4].mxu0  ;;  %v20050_v23 = vpop.f32.mrb[4].mxu1 }
 0x531   :  { %v20052_v24 = vpop.f32.mrb[5].mxu0  ;;  %v20054_v25 = vpop.f32.mrb[5].mxu1 }
 0x532   :  { %v2473_v30 = vpop.f32.mrb[6].mxu0  ;;  %v2555_v31 = vpop.f32.mrb[6].mxu1 }
 0x533   :  { %v2474_v34 = vpop.f32.mrb[7].mxu0  ;;  %v2556_v35 = vpop.f32.mrb[7].mxu1  ;;  %v16745_v31 = vcombine.high %v3217_v2, %v3221_v19  ;;  %v3258_v2 = vld [vmem:[#allocation10 + $0x588] sm:$0xff] }
 0x534   :  { %v3225_v34 = vld [vmem:[#allocation10 + $0x480] sm:$0xff] }
 0x535   :  { %v16753_v46 = vcombine.high %v3225_v34, %v3229_v36  ;;  %v16752_v52 = vcombine.low %v3225_v34, %v3229_v36  ;;  %v3266_v36 = vld [vmem:[#allocation10 + $0x5c8] sm:$0xff] }
 0x536   :  { %v16794_v3 = vcombine.low %v3266_v36, %v3270_v37 }
 0x5b0   :  { %v20056_v0 = vpop.f32.mrb[8].mxu0 }
 0x5b1   :  { %v20058_v1 = vpop.f32.mrb[8].mxu1  ;;  %v20060_v4 = vpop.f32.mrb[9].mxu0 }
 0x5b2   :  { %v20062_v5 = vpop.f32.mrb[9].mxu1  ;;  %v2637_v6 = vpop.f32.mrb[10].mxu0 }
 0x5b3   :  { %v2719_v32 = vpop.f32.mrb[10].mxu1  ;;  %v2638_v10 = vpop.f32.mrb[11].mxu0  ;;  %v3253_v6 = vld [vmem:[#allocation10 + $0x560] sm:$0xff] }
 0x5b4   :  { %v2720_v12 = vpop.f32.mrb[11].mxu1  ;;  %v3250_v32 = vld [vmem:[#allocation10 + $0x548] sm:$0xff]  ;;  %v16776_v19 = vcombine.low %v3249_v63, %v3253_v6 }
 0x5b5   :  { %v3254_v10 = vld [vmem:[#allocation10 + $0x568] sm:$0xff]  ;;  %v16768_v12 = vcombine.low %v3241_v56, %v3245_v57 }
 0x5b6   :  { %v16778_v20 = vcombine.low %v3250_v32, %v3254_v10  ;;  %v3282_v56 = vld [vmem:[#allocation10 + $0x648] sm:$0xff] }
 0x5b7   :  { %v3286_v57 = vld [vmem:[#allocation10 + $0x668] sm:$0xff] }
 0x5b8   :  { %v2863_v15 = vpop.f32.mrb[12].mxu0 }
 0x5b9   :  { %v2864_v16 = vadd.f32 %v2863_v15, %v2732_v13  ;;  %v2865_v17 = vpop.f32.mrb[13].mxu0  ;;  %v16770_v13 = vcombine.low %v3242_v58, %v3246_v59  ;;  %v16779_v15 = vcombine.high %v3250_v32, %v3254_v10  ;;  %v16810_v10 = vcombine.low %v3282_v56, %v3286_v57 }
 0x5ba   :  { %v2866_v18 = vadd.f32 %v2865_v17, %v2736_v14  ;;  %v16777_v14 = vcombine.high %v3249_v63, %v3253_v6  ;;  %v3261_v17 = vld [vmem:[#allocation10 + $0x5a0] sm:$0xff]  ;;  %v3290_v63 = vld [vmem:[#allocation10 + $0x688] sm:$0xff] }
 0x5bb   :  { %v20076_v30 = vpack.c.bf16 %v2864_v16, %v2864_v16  ;;  %v3257_v16 = vld [vmem:[#allocation10 + $0x580] sm:$0xff]  ;;  %v3294_v6 = vld [vmem:[#allocation10 + $0x6a8] sm:$0xff] }
 0x5bc   :  { %v20072_v42 = vpack.c.bf16 %v2866_v18, %v2866_v18  ;;  %v20074_v29 = vpop.f32.mrb[14].mxu0  ;;  %v3262_v18 = vld [vmem:[#allocation10 + $0x5a8] sm:$0xff]  ;;  %v16784_v39 = vcombine.low %v3257_v16, %v3261_v17 }
 0x5bd   :  { %v2936_v35 = vpop.f32.mrb[15].mxu0 }
 0x5be   :  { %6235 = vmatprep.mubr.bf16.mxu0 %v20072_v42  ;;  %6399 = vmatprep.mubr.bf16.mxu1 %v20072_v42  ;;  %v2937_v40 = vadd.f32 %v2936_v35, %v2744_v28  ;;  %v16785_v28 = vcombine.high %v3257_v16, %v3261_v17  ;;  %v3269_v35 = vld [vmem:[#allocation10 + $0x5e0] sm:$0xff]  ;;  %v3298_v16 = vld [vmem:[#allocation10 + $0x6c8] sm:$0xff] }
 0x5bf   :  { %6236 = vmatmul.mubr.bf16.vlgmr.msra.gmra.mrb[20].mxu0 %v20076_v30  ;;  %6400 = vmatmul.mubr.bf16.vlgmr.msra.gmra.mrb[12].mxu1 %v20076_v30  ;;  %v3302_v17 = vld [vmem:[#allocation10 + $0x6e8] sm:$0xff] }
 0x5c0   :  { %6245 = vmatpush1.bf16.msra.mxu0 %v16736_v60  ;;  %6409 = vmatpush1.bf16.msra.mxu1 %v16738_v26  ;;  %v20082_v43 = vpack.c.bf16 %v2937_v40, %v2937_v40  ;;  %v20084_v45 = vpop.f32.mrb[16].mxu0  ;;  %v16760_v60 = vcombine.low %v3233_v48, %v3237_v51  ;;  %v16771_v26 = vcombine.high %v3242_v58, %v3246_v59  ;;  %v3274_v48 = vld [vmem:[#allocation10 + $0x608] sm:$0xff] }
 0x5c1   :  { %6246 = vmatprep.subr.bf16.mxu0 %v16745_v31  ;;  %6410 = vmatprep.subr.bf16.mxu1 %v16747_v33  ;;  %v20086_v49 = vpop.f32.mrb[17].mxu0  ;;  %v16787_v31 = vcombine.high %v3258_v2, %v3262_v18  ;;  %v3265_v33 = vld [vmem:[#allocation10 + $0x5c0] sm:$0xff]  ;;  %v16786_v40 = vcombine.low %v3258_v2, %v3262_v18  ;;  %v3278_v51 = vld [vmem:[#allocation10 + $0x628] sm:$0xff]  ;;  %v16818_v18 = vcombine.low %v3290_v63, %v3294_v6 }
 0x5c2   :  { %6276 = vmatprep.mubr.bf16.mxu0 %v20082_v43  ;;  %6440 = vmatprep.mubr.bf16.mxu1 %v20082_v43  ;;  %v16792_v50 = vcombine.low %v3265_v33, %v3269_v35  ;;  %v16802_v59 = vcombine.low %v3274_v48, %v3278_v51 }
 0x5c4   :  { %6247 = vmatpush1.bf16.msra.mxu0 %v16744_v41  ;;  %6411 = vmatpush1.bf16.msra.mxu1 %v16746_v44  ;;  %v20090_v21 = vpop.f32.mrb[18].mxu0  ;;  %v16793_v41 = vcombine.high %v3265_v33, %v3269_v35  ;;  %v16795_v44 = vcombine.high %v3266_v36, %v3270_v37  ;;  %v3306_v33 = vld [vmem:[#allocation10 + $0x708] sm:$0xff]  ;;  %v16826_v37 = vcombine.low %v3298_v16, %v3302_v17 }
 0x5c5   :  { %6248 = vmatprep.subr.bf16.mxu0 %v16753_v46  ;;  %6412 = vmatprep.subr.bf16.mxu1 %v16755_v47  ;;  %v20092_v34 = vpop.f32.mrb[19].mxu0  ;;  %v3273_v46 = vld [vmem:[#allocation10 + $0x600] sm:$0xff]  ;;  %v3310_v35 = vld [vmem:[#allocation10 + $0x728] sm:$0xff] }
 0x5c6   :  { %v3277_v47 = vld [vmem:[#allocation10 + $0x620] sm:$0xff] }
 0x5c7   :  { %v16800_v58 = vcombine.low %v3273_v46, %v3277_v47 }
 0x5c8   :  { %6249 = vmatpush1.bf16.msra.mxu0 %v16752_v52  ;;  %6413 = vmatpush1.bf16.msra.mxu1 %v16754_v53  ;;  %v16801_v52 = vcombine.high %v3273_v46, %v3277_v47  ;;  %v16803_v53 = vcombine.high %v3274_v48, %v3278_v51  ;;  %v3314_v46 = vld [vmem:[#allocation10 + $0x748] sm:$0xff]  ;;  %v16834_v51 = vcombine.low %v3306_v33, %v3310_v35 }
 0x5c9   :  { %6250 = vmatprep.subr.bf16.mxu0 %v16761_v54  ;;  %6414 = vmatprep.subr.bf16.mxu1 %v16763_v55  ;;  %v3281_v54 = vld [vmem:[#allocation10 + $0x640] sm:$0xff]  ;;  %v3318_v47 = vld [vmem:[#allocation10 + $0x768] sm:$0xff] }
 0x5ca   :  { %v3285_v55 = vld [vmem:[#allocation10 + $0x660] sm:$0xff] }
 0x5cb   :  { %v16808_v32 = vcombine.low %v3281_v54, %v3285_v55 }
 0x5cc   :  { %6251 = vmatpush1.bf16.msra.mxu0 %v16760_v60  ;;  %6415 = vmatpush1.bf16.msra.mxu1 %v16762_v61  ;;  %v16809_v60 = vcombine.high %v3281_v54, %v3285_v55  ;;  %v16811_v61 = vcombine.high %v3282_v56, %v3286_v57  ;;  %v3322_v54 = vld [vmem:[#allocation10 + $0x788] sm:$0xff]  ;;  %v16842_v57 = vcombine.low %v3314_v46, %v3318_v47 }
 0x5cd   :  { %6252 = vmatprep.subr.bf16.mxu0 %v16769_v62  ;;  %6416 = vmatprep.subr.bf16.mxu1 %v16771_v26  ;;  %v3289_v62 = vld [vmem:[#allocation10 + $0x680] sm:$0xff]  ;;  %v3326_v55 = vld [vmem:[#allocation10 + $0x7a8] sm:$0xff] }
 0x5ce   :  { %v3293_v26 = vld [vmem:[#allocation10 + $0x6a0] sm:$0xff] }
 0x5cf   :  { %v16816_v2 = vcombine.low %v3289_v62, %v3293_v26 }
 0x5d0   :  { %6253 = vmatpush1.bf16.msra.mxu0 %v16768_v12  ;;  %6417 = vmatpush1.bf16.msra.mxu1 %v16770_v13  ;;  %v16817_v12 = vcombine.high %v3289_v62, %v3293_v26  ;;  %v16819_v13 = vcombine.high %v3290_v63, %v3294_v6  ;;  %v3330_v62 = vld [vmem:[#allocation10 + $0x7c8] sm:$0xff]  ;;  %v2740_v63 = vrot.slane %v20064_v7, %v20015_v38  ;;  %v20097_v6 = vsub.s32 5, %v19979_v8 }
 0x5d1   :  { %6254 = vmatprep.subr.bf16.mxu0 %v16777_v14  ;;  %6418 = vmatprep.subr.bf16.mxu1 %v16779_v15  ;;  %v3297_v14 = vld [vmem:[#allocation10 + $0x6c0] sm:$0xff]  ;;  %v3334_v26 = vld [vmem:[#allocation10 + $0x7e8] sm:$0xff] }
 0x5d2   :  { %v3301_v15 = vld [vmem:[#allocation10 + $0x6e0] sm:$0xff] }
 0x5d3   :  { %v16824_v36 = vcombine.low %v3297_v14, %v3301_v15 }
 0x5d4   :  { %6255 = vmatpush1.bf16.msra.mxu0 %v16776_v19  ;;  %6419 = vmatpush1.bf16.msra.mxu1 %v16778_v20  ;;  %v16825_v19 = vcombine.high %v3297_v14, %v3301_v15  ;;  %v16827_v20 = vcombine.high %v3298_v16, %v3302_v17  ;;  %v3337_v14 = vld [vmem:[#allocation10 + $0x800] sm:$0xff]  ;;  %v3338_v16 = vld [vmem:[#allocation10 + $0x808] sm:$0xff] }
 0x5d5   :  { %6256 = vmatprep.subr.bf16.mxu0 %v16785_v28  ;;  %6420 = vmatprep.subr.bf16.mxu1 %v16787_v31  ;;  %v3305_v28 = vld [vmem:[#allocation10 + $0x700] sm:$0xff]  ;;  %v3342_v17 = vld [vmem:[#allocation10 + $0x828] sm:$0xff] }
 0x5d6   :  { %v3309_v31 = vld [vmem:[#allocation10 + $0x720] sm:$0xff] }
 0x5d7   :  { %v16832_v48 = vcombine.low %v3305_v28, %v3309_v31  ;;  %v3341_v15 = vld [vmem:[#allocation10 + $0x820] sm:$0xff] }
 0x5d8   :  { %6257 = vmatpush1.bf16.msra.mxu0 %v16784_v39  ;;  %6421 = vmatpush1.bf16.msra.mxu1 %v16786_v40  ;;  %v16833_v39 = vcombine.high %v3305_v28, %v3309_v31  ;;  %v16835_v40 = vcombine.high %v3306_v33, %v3310_v35  ;;  %v16865_v28 = vcombine.high %v3337_v14, %v3341_v15  ;;  %v3345_v33 = vld [vmem:[#allocation10 + $0x840] sm:$0xff] }
 0x5d9   :  { %6258 = vmatprep.subr.bf16.mxu0 %v16793_v41  ;;  %6422 = vmatprep.subr.bf16.mxu1 %v16795_v44  ;;  %v3313_v41 = vld [vmem:[#allocation10 + $0x740] sm:$0xff]  ;;  %v16867_v31 = vcombine.high %v3338_v16, %v3342_v17 }
 0x5da   :  { %v3317_v44 = vld [vmem:[#allocation10 + $0x760] sm:$0xff] }
 0x5db   :  { %v16840_v56 = vcombine.low %v3313_v41, %v3317_v44  ;;  %v3349_v35 = vld [vmem:[#allocation10 + $0x860] sm:$0xff] }
 0x5dc   :  { %6259 = vmatpush1.bf16.msra.mxu0 %v16792_v50  ;;  %6423 = vmatpush1.bf16.msra.mxu1 %v16794_v3  ;;  %v16841_v50 = vcombine.high %v3313_v41, %v3317_v44  ;;  %v16843_v3 = vcombine.high %v3314_v46, %v3318_v47  ;;  %v16864_v41 = vcombine.low %v3337_v14, %v3341_v15  ;;  %v3353_v47 = vld [vmem:[#allocation10 + $0x880] sm:$0xff] }
 0x5dd   :  { %6260 = vmatprep.subr.bf16.mxu0 %v16801_v52  ;;  %6424 = vmatprep.subr.bf16.mxu1 %v16803_v53  ;;  %v3321_v52 = vld [vmem:[#allocation10 + $0x780] sm:$0xff]  ;;  %v16873_v44 = vcombine.high %v3345_v33, %v3349_v35 }
 0x5de   :  { %v3325_v53 = vld [vmem:[#allocation10 + $0x7a0] sm:$0xff] }
 0x5e0   :  { %6261 = vmatpush1.bf16.msra.mxu0 %v16800_v58  ;;  %6425 = vmatpush1.bf16.msra.mxu1 %v16802_v59  ;;  %v16849_v58 = vcombine.high %v3321_v52, %v3325_v53  ;;  %v16851_v59 = vcombine.high %v3322_v54, %v3326_v55 }
 0x5e1   :  { %6262 = vmatprep.subr.bf16.mxu0 %v16809_v60  ;;  %6426 = vmatprep.subr.bf16.mxu1 %v16811_v61  ;;  %v3329_v60 = vld [vmem:[#allocation10 + $0x7c0] sm:$0xff] }
 0x5e2   :  { %v3333_v61 = vld [vmem:[#allocation10 + $0x7e0] sm:$0xff] }
 0x5e4   :  { %6263 = vmatpush1.bf16.msra.mxu0 %v16808_v32  ;;  %6427 = vmatpush1.bf16.msra.mxu1 %v16810_v10  ;;  %v16848_v32 = vcombine.low %v3321_v52, %v3325_v53  ;;  %v16850_v10 = vcombine.low %v3322_v54, %v3326_v55  ;;  %v3361_v55 = vld [vmem:[#allocation10 + $0x8c0] sm:$0xff] }
 0x5e5   :  { %6264 = vmatprep.subr.bf16.mxu0 %v16817_v12  ;;  %6428 = vmatprep.subr.bf16.mxu1 %v16819_v13  ;;  %v16857_v12 = vcombine.high %v3329_v60, %v3333_v61  ;;  %v16859_v13 = vcombine.high %v3330_v62, %v3334_v26 }
 0x5e8   :  { %6265 = vmatpush1.bf16.msra.mxu0 %v16816_v2  ;;  %6429 = vmatpush1.bf16.msra.mxu1 %v16818_v18  ;;  %v2752_v2 = vrot.slane %v20064_v7, %v20097_v6  ;;  %v2935_v18 = vadd.f32 %v20074_v29, %v2740_v63  ;;  %v16866_v29 = vcombine.low %v3338_v16, %v3342_v17  ;;  %v3373_v63 = vld [vmem:[#allocation10 + $0x920] sm:$0xff] }
 0x5e9   :  { %6266 = vmatprep.subr.bf16.mxu0 %v16825_v19  ;;  %6430 = vmatprep.subr.bf16.mxu1 %v16827_v20  ;;  %v16856_v19 = vcombine.low %v3329_v60, %v3333_v61  ;;  %v16858_v20 = vcombine.low %v3330_v62, %v3334_v26  ;;  %v3369_v26 = vld [vmem:[#allocation10 + $0x900] sm:$0xff] }
 0x5ea   :  { %v16897_v14 = vcombine.high %v3369_v26, %v3373_v63  ;;  %v3377_v16 = vld [vmem:[#allocation10 + $0x940] sm:$0xff] }
 0x5eb   :  { %v3381_v17 = vld [vmem:[#allocation10 + $0x960] sm:$0xff] }
 0x5ec   :  { %6267 = vmatpush1.bf16.msra.mxu0 %v16824_v36  ;;  %6431 = vmatpush1.bf16.msra.mxu1 %v16826_v37  ;;  %v3346_v36 = vld [vmem:[#allocation10 + $0x848] sm:$0xff] }
 0x5ed   :  { %6268 = vmatprep.subr.bf16.mxu0 %v16833_v39  ;;  %6432 = vmatprep.subr.bf16.mxu1 %v16835_v40  ;;  %v3350_v37 = vld [vmem:[#allocation10 + $0x868] sm:$0xff]  ;;  %v3008_v39 = vadd.f32 %v20086_v49, %v2752_v2  ;;  %v20103_v40 = vpack.c.bf16 %v2935_v18, %v2935_v18  ;;  %v16872_v49 = vcombine.low %v3345_v33, %v3349_v35  ;;  %v3385_v33 = vld [vmem:[#allocation10 + $0x980] sm:$0xff] }
 0x5ee   :  { %v16875_v46 = vcombine.high %v3346_v36, %v3350_v37  ;;  %v16874_v52 = vcombine.low %v3346_v36, %v3350_v37  ;;  %v3378_v2 = vld [vmem:[#allocation10 + $0x948] sm:$0xff]  ;;  %v3389_v35 = vld [vmem:[#allocation10 + $0x9a0] sm:$0xff] }
 0x5ef   :  { %v3382_v18 = vld [vmem:[#allocation10 + $0x968] sm:$0xff] }
 0x5f0   :  { %6269 = vmatpush1.bf16.msra.mxu0 %v16832_v48  ;;  %6433 = vmatpush1.bf16.msra.mxu1 %v16834_v51  ;;  %v3357_v48 = vld [vmem:[#allocation10 + $0x8a0] sm:$0xff]  ;;  %v3354_v51 = vld [vmem:[#allocation10 + $0x888] sm:$0xff] }
 0x5f1   :  { %6270 = vmatprep.subr.bf16.mxu0 %v16841_v50  ;;  %6434 = vmatprep.subr.bf16.mxu1 %v16843_v3  ;;  %v3358_v50 = vld [vmem:[#allocation10 + $0x8a8] sm:$0xff]  ;;  %v20105_v3 = vpack.c.bf16 %v3008_v39, %v3008_v39  ;;  %v16881_v53 = vcombine.high %v3353_v47, %v3357_v48  ;;  %v16904_v39 = vcombine.low %v3377_v16, %v3381_v17 }
 0x5f2   :  { %v16883_v54 = vcombine.high %v3354_v51, %v3358_v50  ;;  %v16882_v60 = vcombine.low %v3354_v51, %v3358_v50  ;;  %v3386_v36 = vld [vmem:[#allocation10 + $0x988] sm:$0xff]  ;;  %v16912_v50 = vcombine.low %v3385_v33, %v3389_v35 }
 0x5f3   :  { %v3390_v37 = vld [vmem:[#allocation10 + $0x9a8] sm:$0xff] }
 0x5f4   :  { %6271 = vmatpush1.bf16.msra.mxu0 %v16840_v56  ;;  %6435 = vmatpush1.bf16.msra.mxu1 %v16842_v57  ;;  %v3365_v56 = vld [vmem:[#allocation10 + $0x8e0] sm:$0xff]  ;;  %v3362_v57 = vld [vmem:[#allocation10 + $0x8c8] sm:$0xff] }
 0x5f5   :  { %6272 = vmatprep.subr.bf16.mxu0 %v16849_v58  ;;  %6436 = vmatprep.subr.bf16.mxu1 %v16851_v59  ;;  %v3366_v58 = vld [vmem:[#allocation10 + $0x8e8] sm:$0xff]  ;;  %v16880_v59 = vcombine.low %v3353_v47, %v3357_v48  ;;  %v16889_v61 = vcombine.high %v3361_v55, %v3365_v56  ;;  %v3397_v47 = vld [vmem:[#allocation10 + $0x9e0] sm:$0xff] }
 0x5f6   :  { %v16891_v62 = vcombine.high %v3362_v57, %v3366_v58  ;;  %v3394_v48 = vld [vmem:[#allocation10 + $0x9c8] sm:$0xff] }
 0x5f7   :  { %v3398_v51 = vld [vmem:[#allocation10 + $0x9e8] sm:$0xff] }
 0x5f8   :  { %6273 = vmatpush1.bf16.msra.mxu0 %v16848_v32  ;;  %6437 = vmatpush1.bf16.msra.mxu1 %v16850_v10  ;;  %v3370_v32 = vld [vmem:[#allocation10 + $0x908] sm:$0xff] }
 0x5f9   :  { %6274 = vmatprep.subr.bf16.mxu0 %v16857_v12  ;;  %6438 = vmatprep.subr.bf16.mxu1 %v16859_v13  ;;  %v3374_v10 = vld [vmem:[#allocation10 + $0x928] sm:$0xff]  ;;  %v16888_v12 = vcombine.low %v3361_v55, %v3365_v56  ;;  %v16890_v13 = vcombine.low %v3362_v57, %v3366_v58  ;;  %v3405_v55 = vld [vmem:[#allocation10 + $0xa20] sm:$0xff] }
 0x5fa   :  { %v16899_v15 = vcombine.high %v3370_v32, %v3374_v10  ;;  %v3402_v56 = vld [vmem:[#allocation10 + $0xa08] sm:$0xff] }
 0x5fb   :  { %v3406_v57 = vld [vmem:[#allocation10 + $0xa28] sm:$0xff] }
 0x5fc   :  { %6275 = vmatpush1.bf16.msra.mxu0 %v16856_v19  ;;  %6439 = vmatpush1.bf16.msra.mxu1 %v16858_v20  ;;  %v16896_v19 = vcombine.low %v3369_v26, %v3373_v63  ;;  %v16898_v20 = vcombine.low %v3370_v32, %v3374_v10  ;;  %v3413_v26 = vld [vmem:[#allocation10 + $0xa60] sm:$0xff]  ;;  %v3410_v63 = vld [vmem:[#allocation10 + $0xa48] sm:$0xff] }
 0x5fd   :  { %6285 = vmatprep.subr.bf16.mxu0 %v16865_v28  ;;  %6449 = vmatprep.subr.bf16.mxu1 %v16867_v31  ;;  %v16905_v28 = vcombine.high %v3377_v16, %v3381_v17  ;;  %v16907_v31 = vcombine.high %v3378_v2, %v3382_v18  ;;  %v3414_v32 = vld [vmem:[#allocation10 + $0xa68] sm:$0xff]  ;;  %v3421_v16 = vld [vmem:[#allocation10 + $0xaa0] sm:$0xff] }
 0x5fe   :  { %v3418_v17 = vld [vmem:[#allocation10 + $0xa88] sm:$0xff] }
 0x5ff   :  { %6277 = vmatmul.mubr.bf16.vlgmr.msra.gmra.mrb[20].mxu0 %v20103_v40  ;;  %6441 = vmatmul.mubr.bf16.vlgmr.msra.gmra.mrb[12].mxu1 %v20103_v40 }
 0x600   :  { %6286 = vmatpush1.bf16.msra.mxu0 %v16864_v41  ;;  %6450 = vmatpush1.bf16.msra.mxu1 %v16866_v29  ;;  %v16906_v41 = vcombine.low %v3378_v2, %v3382_v18  ;;  %v16913_v29 = vcombine.high %v3385_v33, %v3389_v35  ;;  %v3422_v2 = vld [vmem:[#allocation10 + $0xaa8] sm:$0xff]  ;;  %v3429_v33 = vld [vmem:[#allocation10 + $0xae0] sm:$0xff] }
 0x601   :  { %6287 = vmatprep.subr.bf16.mxu0 %v16873_v44  ;;  %6451 = vmatprep.subr.bf16.mxu1 %v16875_v46  ;;  %v16915_v44 = vcombine.high %v3386_v36, %v3390_v37  ;;  %v3393_v46 = vld [vmem:[#allocation10 + $0x9c0] sm:$0xff]  ;;  %v3426_v35 = vld [vmem:[#allocation10 + $0xac8] sm:$0xff] }
 0x602   :  { %6317 = vmatprep.mubr.bf16.mxu0 %v20105_v3  ;;  %6481 = vmatprep.mubr.bf16.mxu1 %v20105_v3  ;;  %v16920_v58 = vcombine.low %v3393_v46, %v3397_v47 }
 0x604   :  { %6288 = vmatpush1.bf16.msra.mxu0 %v16872_v49  ;;  %6452 = vmatpush1.bf16.msra.mxu1 %v16874_v52  ;;  %v16914_v49 = vcombine.low %v3386_v36, %v3390_v37  ;;  %v16921_v52 = vcombine.high %v3393_v46, %v3397_v47  ;;  %v3430_v36 = vld [vmem:[#allocation10 + $0xae8] sm:$0xff]  ;;  %v3437_v46 = vld [vmem:[#allocation10 + $0xb20] sm:$0xff] }
 0x605   :  { %6289 = vmatprep.subr.bf16.mxu0 %v16881_v53  ;;  %6453 = vmatprep.subr.bf16.mxu1 %v16883_v54  ;;  %v16923_v53 = vcombine.high %v3394_v48, %v3398_v51  ;;  %v3401_v54 = vld [vmem:[#allocation10 + $0xa00] sm:$0xff]  ;;  %v3434_v47 = vld [vmem:[#allocation10 + $0xb08] sm:$0xff] }
 0x606   :  { %v16928_v10 = vcombine.low %v3401_v54, %v3405_v55 }
 0x608   :  { %6290 = vmatpush1.bf16.msra.mxu0 %v16880_v59  ;;  %6454 = vmatpush1.bf16.msra.mxu1 %v16882_v60  ;;  %v16922_v59 = vcombine.low %v3394_v48, %v3398_v51  ;;  %v16929_v60 = vcombine.high %v3401_v54, %v3405_v55  ;;  %v3438_v48 = vld [vmem:[#allocation10 + $0xb28] sm:$0xff]  ;;  %v3445_v54 = vld [vmem:[#allocation10 + $0xb60] sm:$0xff] }
 0x609   :  { %6291 = vmatprep.subr.bf16.mxu0 %v16889_v61  ;;  %6455 = vmatprep.subr.bf16.mxu1 %v16891_v62  ;;  %v16931_v61 = vcombine.high %v3402_v56, %v3406_v57  ;;  %v3409_v62 = vld [vmem:[#allocation10 + $0xa40] sm:$0xff]  ;;  %v3442_v55 = vld [vmem:[#allocation10 + $0xb48] sm:$0xff] }
 0x60a   :  { %v16936_v18 = vcombine.low %v3409_v62, %v3413_v26 }
 0x60c   :  { %6292 = vmatpush1.bf16.msra.mxu0 %v16888_v12  ;;  %6456 = vmatpush1.bf16.msra.mxu1 %v16890_v13  ;;  %v16930_v12 = vcombine.low %v3402_v56, %v3406_v57  ;;  %v16937_v13 = vcombine.high %v3409_v62, %v3413_v26  ;;  %v3446_v56 = vld [vmem:[#allocation10 + $0xb68] sm:$0xff]  ;;  %v3453_v62 = vld [vmem:[#allocation10 + $0xba0] sm:$0xff] }
 0x60d   :  { %6293 = vmatprep.subr.bf16.mxu0 %v16897_v14  ;;  %6457 = vmatprep.subr.bf16.mxu1 %v16899_v15  ;;  %v16939_v14 = vcombine.high %v3410_v63, %v3414_v32  ;;  %v3417_v15 = vld [vmem:[#allocation10 + $0xa80] sm:$0xff]  ;;  %v3450_v26 = vld [vmem:[#allocation10 + $0xb88] sm:$0xff] }
 0x60e   :  { %v16944_v37 = vcombine.low %v3417_v15, %v3421_v16 }
 0x610   :  { %6294 = vmatpush1.bf16.msra.mxu0 %v16896_v19  ;;  %6458 = vmatpush1.bf16.msra.mxu1 %v16898_v20  ;;  %v16938_v19 = vcombine.low %v3410_v63, %v3414_v32  ;;  %v16945_v20 = vcombine.high %v3417_v15, %v3421_v16  ;;  %v3454_v63 = vld [vmem:[#allocation10 + $0xba8] sm:$0xff]  ;;  %v3457_v15 = vld [vmem:[#allocation10 + $0xbc0] sm:$0xff] }
 0x611   :  { %6295 = vmatprep.subr.bf16.mxu0 %v16905_v28  ;;  %6459 = vmatprep.subr.bf16.mxu1 %v16907_v31  ;;  %v16947_v28 = vcombine.high %v3418_v17, %v3422_v2  ;;  %v3425_v31 = vld [vmem:[#allocation10 + $0xac0] sm:$0xff] }
 0x612   :  { %v16952_v51 = vcombine.low %v3425_v31, %v3429_v33  ;;  %v3461_v16 = vld [vmem:[#allocation10 + $0xbe0] sm:$0xff] }
 0x614   :  { %6296 = vmatpush1.bf16.msra.mxu0 %v16904_v39  ;;  %6460 = vmatpush1.bf16.msra.mxu1 %v16906_v41  ;;  %v16946_v39 = vcombine.low %v3418_v17, %v3422_v2  ;;  %v16953_v41 = vcombine.high %v3425_v31, %v3429_v33  ;;  %v3458_v17 = vld [vmem:[#allocation10 + $0xbc8] sm:$0xff]  ;;  %v16985_v31 = vcombine.high %v3457_v15, %v3461_v16 }
 0x615   :  { %6297 = vmatprep.subr.bf16.mxu0 %v16913_v29  ;;  %6461 = vmatprep.subr.bf16.mxu1 %v16915_v44  ;;  %v16955_v29 = vcombine.high %v3426_v35, %v3430_v36  ;;  %v3433_v44 = vld [vmem:[#allocation10 + $0xb00] sm:$0xff]  ;;  %v3462_v2 = vld [vmem:[#allocation10 + $0xbe8] sm:$0xff] }
 0x616   :  { %v16960_v57 = vcombine.low %v3433_v44, %v3437_v46  ;;  %v16987_v33 = vcombine.high %v3458_v17, %v3462_v2 }
 0x618   :  { %6298 = vmatpush1.bf16.msra.mxu0 %v16912_v50  ;;  %6462 = vmatpush1.bf16.msra.mxu1 %v16914_v49  ;;  %v16954_v50 = vcombine.low %v3426_v35, %v3430_v36  ;;  %v16961_v49 = vcombine.high %v3433_v44, %v3437_v46  ;;  %v3465_v35 = vld [vmem:[#allocation10 + $0xc00] sm:$0xff]  ;;  %v16984_v44 = vcombine.low %v3457_v15, %v3461_v16 }
 0x619   :  { %6299 = vmatprep.subr.bf16.mxu0 %v16921_v52  ;;  %6463 = vmatprep.subr.bf16.mxu1 %v16923_v53  ;;  %v16963_v52 = vcombine.high %v3434_v47, %v3438_v48  ;;  %v3441_v53 = vld [vmem:[#allocation10 + $0xb40] sm:$0xff]  ;;  %v16986_v46 = vcombine.low %v3458_v17, %v3462_v2 }
 0x61a   :  { %v16968_v32 = vcombine.low %v3441_v53, %v3445_v54  ;;  %v3469_v36 = vld [vmem:[#allocation10 + $0xc20] sm:$0xff] }
 0x61c   :  { %6300 = vmatpush1.bf16.msra.mxu0 %v16920_v58  ;;  %6464 = vmatpush1.bf16.msra.mxu1 %v16922_v59  ;;  %v16962_v58 = vcombine.low %v3434_v47, %v3438_v48  ;;  %v16969_v59 = vcombine.high %v3441_v53, %v3445_v54  ;;  %v16993_v47 = vcombine.high %v3465_v35, %v3469_v36 }
 0x61d   :  { %6301 = vmatprep.subr.bf16.mxu0 %v16929_v60  ;;  %6465 = vmatprep.subr.bf16.mxu1 %v16931_v61  ;;  %v16971_v60 = vcombine.high %v3442_v55, %v3446_v56  ;;  %v3449_v61 = vld [vmem:[#allocation10 + $0xb80] sm:$0xff] }
 0x620   :  { %6302 = vmatpush1.bf16.msra.mxu0 %v16928_v10  ;;  %6466 = vmatpush1.bf16.msra.mxu1 %v16930_v12  ;;  %v16970_v10 = vcombine.low %v3442_v55, %v3446_v56  ;;  %v20112_v12 = vsub.s32 4, %v19979_v8 }
 0x621   :  { %6303 = vmatprep.subr.bf16.mxu0 %v16937_v13  ;;  %6467 = vmatprep.subr.bf16.mxu1 %v16939_v14  ;;  %v16977_v13 = vcombine.high %v3449_v61, %v3453_v62  ;;  %v16979_v14 = vcombine.high %v3450_v26, %v3454_v63 }
 0x624   :  { %6304 = vmatpush1.bf16.msra.mxu0 %v16936_v18  ;;  %6468 = vmatpush1.bf16.msra.mxu1 %v16938_v19  ;;  %v2748_v18 = vrot.slane %v20064_v7, %v20112_v12  ;;  %v20117_v19 = vsub.s32 7, %v19979_v8 }
 0x625   :  { %6305 = vmatprep.subr.bf16.mxu0 %v16945_v20  ;;  %6469 = vmatprep.subr.bf16.mxu1 %v16947_v28  ;;  %v16976_v20 = vcombine.low %v3449_v61, %v3453_v62  ;;  %v16978_v28 = vcombine.low %v3450_v26, %v3454_v63 }
 0x628   :  { %6306 = vmatpush1.bf16.msra.mxu0 %v16944_v37  ;;  %6470 = vmatpush1.bf16.msra.mxu1 %v16946_v39  ;;  %v3466_v37 = vld [vmem:[#allocation10 + $0xc08] sm:$0xff] }
 0x629   :  { %6307 = vmatprep.subr.bf16.mxu0 %v16953_v41  ;;  %6471 = vmatprep.subr.bf16.mxu1 %v16955_v29  ;;  %v3470_v39 = vld [vmem:[#allocation10 + $0xc28] sm:$0xff]  ;;  %v2760_v41 = vrot.slane %v20064_v7, %v20117_v19  ;;  %v3006_v29 = vadd.f32 %v20084_v45, %v2748_v18  ;;  %v16992_v7 = vcombine.low %v3465_v35, %v3469_v36  ;;  %v3497_v18 = vld [vmem:[#allocation10 + $0xd00] sm:$0xff] }
 0x62a   :  { %v16995_v48 = vcombine.high %v3466_v37, %v3470_v39  ;;  %v16994_v45 = vcombine.low %v3466_v37, %v3470_v39  ;;  %v3505_v39 = vld [vmem:[#allocation10 + $0xd40] sm:$0xff] }
 0x62b   :  { %v3079_v53 = vadd.f32 %v20092_v34, %v2760_v41  ;;  %v20123_v54 = vpack.c.bf16 %v3006_v29, %v3006_v29  ;;  %v3509_v41 = vld [vmem:[#allocation10 + $0xd60] sm:$0xff]  ;;  %v3506_v29 = vld [vmem:[#allocation10 + $0xd48] sm:$0xff] }
 0x62c   :  { %6308 = vmatpush1.bf16.msra.mxu0 %v16952_v51  ;;  %6472 = vmatpush1.bf16.msra.mxu1 %v16954_v50  ;;  %v3473_v51 = vld [vmem:[#allocation10 + $0xc40] sm:$0xff] }
 0x62d   :  { %6309 = vmatprep.subr.bf16.mxu0 %v16961_v49  ;;  %6473 = vmatprep.subr.bf16.mxu1 %v16963_v52  ;;  %v3477_v50 = vld [vmem:[#allocation10 + $0xc60] sm:$0xff]  ;;  %v3474_v49 = vld [vmem:[#allocation10 + $0xc48] sm:$0xff]  ;;  %v20125_v61 = vpack.c.bf16 %v3079_v53, %v3079_v53 }
 0x62e   :  { %v3478_v52 = vld [vmem:[#allocation10 + $0xc68] sm:$0xff]  ;;  %v17001_v55 = vcombine.high %v3473_v51, %v3477_v50  ;;  %v17000_v34 = vcombine.low %v3473_v51, %v3477_v50  ;;  %v3513_v50 = vld [vmem:[#allocation10 + $0xd80] sm:$0xff] }
 0x62f   :  { %v17003_v56 = vcombine.high %v3474_v49, %v3478_v52  ;;  %v17002_v62 = vcombine.low %v3474_v49, %v3478_v52  ;;  %v3517_v49 = vld [vmem:[#allocation10 + $0xda0] sm:$0xff]  ;;  %v3514_v52 = vld [vmem:[#allocation10 + $0xd88] sm:$0xff] }
 0x630   :  { %6310 = vmatpush1.bf16.msra.mxu0 %v16960_v57  ;;  %6474 = vmatpush1.bf16.msra.mxu1 %v16962_v58  ;;  %v3481_v57 = vld [vmem:[#allocation10 + $0xc80] sm:$0xff]  ;;  %v3518_v53 = vld [vmem:[#allocation10 + $0xda8] sm:$0xff] }
 0x631   :  { %6311 = vmatprep.subr.bf16.mxu0 %v16969_v59  ;;  %6475 = vmatprep.subr.bf16.mxu1 %v16971_v60  ;;  %v3485_v58 = vld [vmem:[#allocation10 + $0xca0] sm:$0xff]  ;;  %v3482_v59 = vld [vmem:[#allocation10 + $0xc88] sm:$0xff] }
 0x632   :  { %v3486_v60 = vld [vmem:[#allocation10 + $0xca8] sm:$0xff]  ;;  %v17009_v26 = vcombine.high %v3481_v57, %v3485_v58  ;;  %v17008_v15 = vcombine.low %v3481_v57, %v3485_v58  ;;  %v3521_v57 = vld [vmem:[#allocation10 + $0xdc0] sm:$0xff] }
 0x633   :  { %v17011_v63 = vcombine.high %v3482_v59, %v3486_v60  ;;  %v17010_v16 = vcombine.low %v3482_v59, %v3486_v60  ;;  %v3525_v58 = vld [vmem:[#allocation10 + $0xde0] sm:$0xff]  ;;  %v3522_v59 = vld [vmem:[#allocation10 + $0xdc8] sm:$0xff] }
 0x634   :  { %6312 = vmatpush1.bf16.msra.mxu0 %v16968_v32  ;;  %6476 = vmatpush1.bf16.msra.mxu1 %v16970_v10  ;;  %v3489_v32 = vld [vmem:[#allocation10 + $0xcc0] sm:$0xff]  ;;  %v3526_v60 = vld [vmem:[#allocation10 + $0xde8] sm:$0xff] }
 0x635   :  { %6313 = vmatprep.subr.bf16.mxu0 %v16977_v13  ;;  %6477 = vmatprep.subr.bf16.mxu1 %v16979_v14  ;;  %v3493_v10 = vld [vmem:[#allocation10 + $0xce0] sm:$0xff]  ;;  %v3490_v13 = vld [vmem:[#allocation10 + $0xcc8] sm:$0xff] }
 0x636   :  { %v3494_v14 = vld [vmem:[#allocation10 + $0xce8] sm:$0xff]  ;;  %v17017_v17 = vcombine.high %v3489_v32, %v3493_v10 }
 0x637   :  { %v17019_v2 = vcombine.high %v3490_v13, %v3494_v14  ;;  %v17018_v35 = vcombine.low %v3490_v13, %v3494_v14  ;;  %v3530_v13 = vld [vmem:[#allocation10 + $0xe08] sm:$0xff] }
 0x638   :  { %6314 = vmatpush1.bf16.msra.mxu0 %v16976_v20  ;;  %6478 = vmatpush1.bf16.msra.mxu1 %v16978_v28  ;;  %v3501_v20 = vld [vmem:[#allocation10 + $0xd20] sm:$0xff]  ;;  %v3498_v28 = vld [vmem:[#allocation10 + $0xd08] sm:$0xff] }
 0x639   :  { %6315 = vmatprep.subr.bf16.mxu0 %v16985_v31  ;;  %6479 = vmatprep.subr.bf16.mxu1 %v16987_v33  ;;  %v3502_v31 = vld [vmem:[#allocation10 + $0xd28] sm:$0xff]  ;;  %v17016_v33 = vcombine.low %v3489_v32, %v3493_v10  ;;  %v17025_v36 = vcombine.high %v3497_v18, %v3501_v20  ;;  %v3529_v32 = vld [vmem:[#allocation10 + $0xe00] sm:$0xff] }
 0x63a   :  { %v17027_v37 = vcombine.high %v3498_v28, %v3502_v31  ;;  %v3533_v10 = vld [vmem:[#allocation10 + $0xe20] sm:$0xff]  ;;  %v3534_v14 = vld [vmem:[#allocation10 + $0xe28] sm:$0xff] }
 0x63c   :  { %6316 = vmatpush1.bf16.msra.mxu0 %v16984_v44  ;;  %6480 = vmatpush1.bf16.msra.mxu1 %v16986_v46  ;;  %v3510_v44 = vld [vmem:[#allocation10 + $0xd68] sm:$0xff]  ;;  %v17024_v46 = vcombine.low %v3497_v18, %v3501_v20  ;;  %v3537_v18 = vld [vmem:[#allocation10 + $0xe40] sm:$0xff] }
 0x63d   :  { %6326 = vmatprep.subr.bf16.mxu0 %v16993_v47  ;;  %6490 = vmatprep.subr.bf16.mxu1 %v16995_v48  ;;  %v17026_v47 = vcombine.low %v3498_v28, %v3502_v31  ;;  %v17033_v48 = vcombine.high %v3505_v39, %v3509_v41  ;;  %v17035_v51 = vcombine.high %v3506_v29, %v3510_v44  ;;  %v3541_v20 = vld [vmem:[#allocation10 + $0xe60] sm:$0xff]  ;;  %v3538_v28 = vld [vmem:[#allocation10 + $0xe48] sm:$0xff] }
 0x63e   :  { %v3542_v31 = vld [vmem:[#allocation10 + $0xe68] sm:$0xff] }
 0x63f   :  { %6318 = vmatmul.mubr.bf16.vlgmr.msra.gmra.mrb[20].mxu0 %v20123_v54  ;;  %6482 = vmatmul.mubr.bf16.vlgmr.msra.gmra.mrb[12].mxu1 %v20123_v54 }
 0x640   :  { %6327 = vmatpush1.bf16.msra.mxu0 %v16992_v7  ;;  %6491 = vmatpush1.bf16.msra.mxu1 %v16994_v45  ;;  %v17032_v7 = vcombine.low %v3505_v39, %v3509_v41  ;;  %v17034_v45 = vcombine.low %v3506_v29, %v3510_v44  ;;  %v3545_v39 = vld [vmem:[#allocation10 + $0xe80] sm:$0xff]  ;;  %v3546_v29 = vld [vmem:[#allocation10 + $0xe88] sm:$0xff] }
 0x641   :  { %6328 = vmatprep.subr.bf16.mxu0 %v17001_v55  ;;  %6492 = vmatprep.subr.bf16.mxu1 %v17003_v56  ;;  %v17041_v55 = vcombine.high %v3513_v50, %v3517_v49  ;;  %v17043_v56 = vcombine.high %v3514_v52, %v3518_v53  ;;  %v3549_v41 = vld [vmem:[#allocation10 + $0xea0] sm:$0xff]  ;;  %v3550_v44 = vld [vmem:[#allocation10 + $0xea8] sm:$0xff] }
 0x642   :  { %6358 = vmatprep.mubr.bf16.mxu0 %v20125_v61  ;;  %6522 = vmatprep.mubr.bf16.mxu1 %v20125_v61 }
 0x644   :  { %6329 = vmatpush1.bf16.msra.mxu0 %v17000_v34  ;;  %6493 = vmatpush1.bf16.msra.mxu1 %v17002_v62  ;;  %v17040_v34 = vcombine.low %v3513_v50, %v3517_v49  ;;  %v17042_v62 = vcombine.low %v3514_v52, %v3518_v53  ;;  %v3553_v50 = vld [vmem:[#allocation10 + $0xec0] sm:$0xff]  ;;  %v3554_v52 = vld [vmem:[#allocation10 + $0xec8] sm:$0xff] }
 0x645   :  { %6330 = vmatprep.subr.bf16.mxu0 %v17009_v26  ;;  %6494 = vmatprep.subr.bf16.mxu1 %v17011_v63  ;;  %v17049_v26 = vcombine.high %v3521_v57, %v3525_v58  ;;  %v17051_v63 = vcombine.high %v3522_v59, %v3526_v60  ;;  %v3557_v49 = vld [vmem:[#allocation10 + $0xee0] sm:$0xff]  ;;  %v3558_v53 = vld [vmem:[#allocation10 + $0xee8] sm:$0xff] }
 0x648   :  { %6331 = vmatpush1.bf16.msra.mxu0 %v17008_v15  ;;  %6495 = vmatpush1.bf16.msra.mxu1 %v17010_v16  ;;  %v17048_v15 = vcombine.low %v3521_v57, %v3525_v58  ;;  %v17050_v16 = vcombine.low %v3522_v59, %v3526_v60  ;;  %v3561_v57 = vld [vmem:[#allocation10 + $0xf00] sm:$0xff]  ;;  %v3562_v59 = vld [vmem:[#allocation10 + $0xf08] sm:$0xff] }
 0x649   :  { %6332 = vmatprep.subr.bf16.mxu0 %v17017_v17  ;;  %6496 = vmatprep.subr.bf16.mxu1 %v17019_v2  ;;  %v17057_v17 = vcombine.high %v3529_v32, %v3533_v10  ;;  %v17059_v2 = vcombine.high %v3530_v13, %v3534_v14  ;;  %v3565_v58 = vld [vmem:[#allocation10 + $0xf20] sm:$0xff]  ;;  %v3566_v60 = vld [vmem:[#allocation10 + $0xf28] sm:$0xff] }
 0x64c   :  { %6333 = vmatpush1.bf16.msra.mxu0 %v17016_v33  ;;  %6497 = vmatpush1.bf16.msra.mxu1 %v17018_v35  ;;  %v17056_v33 = vcombine.low %v3529_v32, %v3533_v10  ;;  %v17058_v35 = vcombine.low %v3530_v13, %v3534_v14  ;;  %v3569_v32 = vld [vmem:[#allocation10 + $0xf40] sm:$0xff]  ;;  %v3570_v13 = vld [vmem:[#allocation10 + $0xf48] sm:$0xff] }
 0x64d   :  { %6334 = vmatprep.subr.bf16.mxu0 %v17025_v36  ;;  %6498 = vmatprep.subr.bf16.mxu1 %v17027_v37  ;;  %v17065_v36 = vcombine.high %v3537_v18, %v3541_v20  ;;  %v17067_v37 = vcombine.high %v3538_v28, %v3542_v31  ;;  %v3573_v10 = vld [vmem:[#allocation10 + $0xf60] sm:$0xff]  ;;  %v3574_v14 = vld [vmem:[#allocation10 + $0xf68] sm:$0xff] }
 0x650   :  { %6335 = vmatpush1.bf16.msra.mxu0 %v17024_v46  ;;  %6499 = vmatpush1.bf16.msra.mxu1 %v17026_v47  ;;  %v17064_v46 = vcombine.low %v3537_v18, %v3541_v20  ;;  %v17066_v47 = vcombine.low %v3538_v28, %v3542_v31  ;;  %v3577_v18 = vld [vmem:[#allocation10 + $0xf80] sm:$0xff]  ;;  %v3578_v28 = vld [vmem:[#allocation10 + $0xf88] sm:$0xff] }
 0x651   :  { %6336 = vmatprep.subr.bf16.mxu0 %v17033_v48  ;;  %6500 = vmatprep.subr.bf16.mxu1 %v17035_v51  ;;  %v17073_v48 = vcombine.high %v3545_v39, %v3549_v41  ;;  %v17075_v51 = vcombine.high %v3546_v29, %v3550_v44  ;;  %v3581_v20 = vld [vmem:[#allocation10 + $0xfa0] sm:$0xff]  ;;  %v3582_v31 = vld [vmem:[#allocation10 + $0xfa8] sm:$0xff] }
 0x654   :  { %6337 = vmatpush1.bf16.msra.mxu0 %v17032_v7  ;;  %6501 = vmatpush1.bf16.msra.mxu1 %v17034_v45  ;;  %v17072_v7 = vcombine.low %v3545_v39, %v3549_v41  ;;  %v17074_v45 = vcombine.low %v3546_v29, %v3550_v44  ;;  %v3585_v39 = vld [vmem:[#allocation10 + $0xfc0] sm:$0xff]  ;;  %v3586_v29 = vld [vmem:[#allocation10 + $0xfc8] sm:$0xff] }
 0x655   :  { %6338 = vmatprep.subr.bf16.mxu0 %v17041_v55  ;;  %6502 = vmatprep.subr.bf16.mxu1 %v17043_v56  ;;  %v17081_v55 = vcombine.high %v3553_v50, %v3557_v49  ;;  %v17083_v56 = vcombine.high %v3554_v52, %v3558_v53  ;;  %v3589_v41 = vld [vmem:[#allocation10 + $0xfe0] sm:$0xff]  ;;  %v3590_v44 = vld [vmem:[#allocation10 + $0xfe8] sm:$0xff] }
 0x658   :  { %6339 = vmatpush1.bf16.msra.mxu0 %v17040_v34  ;;  %6503 = vmatpush1.bf16.msra.mxu1 %v17042_v62  ;;  %v17080_v34 = vcombine.low %v3553_v50, %v3557_v49  ;;  %v17082_v62 = vcombine.low %v3554_v52, %v3558_v53  ;;  %v17113_v49 = vcombine.high %v3585_v39, %v3589_v41  ;;  %v3083_v53 = vld [vmem:[#allocation10 + $0x10] sm:$0xff] }
 0x659   :  { %6340 = vmatprep.subr.bf16.mxu0 %v17049_v26  ;;  %6504 = vmatprep.subr.bf16.mxu1 %v17051_v63  ;;  %v17089_v26 = vcombine.high %v3561_v57, %v3565_v58  ;;  %v17091_v63 = vcombine.high %v3562_v59, %v3566_v60  ;;  %v17115_v52 = vcombine.high %v3586_v29, %v3590_v44 }
 0x65c   :  { %6341 = vmatpush1.bf16.msra.mxu0 %v17048_v15  ;;  %6505 = vmatpush1.bf16.msra.mxu1 %v17050_v16  ;;  %v17088_v15 = vcombine.low %v3561_v57, %v3565_v58  ;;  %v17090_v16 = vcombine.low %v3562_v59, %v3566_v60  ;;  %v3091_v60 = vld [vmem:[#allocation10 + $0x50] sm:$0xff] }
 0x65d   :  { %6342 = vmatprep.subr.bf16.mxu0 %v17057_v17  ;;  %6506 = vmatprep.subr.bf16.mxu1 %v17059_v2  ;;  %v17097_v17 = vcombine.high %v3569_v32, %v3573_v10  ;;  %v17099_v2 = vcombine.high %v3570_v13, %v3574_v14 }
 0x660   :  { %6343 = vmatpush1.bf16.msra.mxu0 %v17056_v33  ;;  %6507 = vmatpush1.bf16.msra.mxu1 %v17058_v35  ;;  %v17096_v33 = vcombine.low %v3569_v32, %v3573_v10  ;;  %v17098_v35 = vcombine.low %v3570_v13, %v3574_v14 }
 0x661   :  { %6344 = vmatprep.subr.bf16.mxu0 %v17065_v36  ;;  %6508 = vmatprep.subr.bf16.mxu1 %v17067_v37  ;;  %v17105_v36 = vcombine.high %v3577_v18, %v3581_v20  ;;  %v17107_v37 = vcombine.high %v3578_v28, %v3582_v31 }
 0x664   :  { %6345 = vmatpush1.bf16.msra.mxu0 %v17064_v46  ;;  %6509 = vmatpush1.bf16.msra.mxu1 %v17066_v47  ;;  %v20132_v46 = vsub.s32 6, %v19979_v8  ;;  %v17104_v47 = vcombine.low %v3577_v18, %v3581_v20  ;;  %v17114_v8 = vcombine.low %v3586_v29, %v3590_v44  ;;  %v3115_v44 = vld [vmem:[#allocation10 + $0x110] sm:$0xff] }
 0x665   :  { %6346 = vmatprep.subr.bf16.mxu0 %v17073_v48  ;;  %6510 = vmatprep.subr.bf16.mxu1 %v17075_v51  ;;  %v17106_v48 = vcombine.low %v3578_v28, %v3582_v31  ;;  %v19101_v51 = vld [vmem:[#allocation8] sm:$0xff]  ;;  %v3107_v31 = vld [vmem:[#allocation10 + $0xd0] sm:$0xff] }
 0x666   :  { %v2756_v50 = vrot.slane %v19101_v51, %v20132_v46 }
 0x668   :  { %6347 = vmatpush1.bf16.msra.mxu0 %v17072_v7  ;;  %6511 = vmatpush1.bf16.msra.mxu1 %v17074_v45  ;;  %v3087_v7 = vld [vmem:[#allocation10 + $0x30] sm:$0xff]  ;;  %v3084_v45 = vld [vmem:[#allocation10 + $0x18] sm:$0xff]  ;;  %v3077_v57 = vadd.f32 %v20090_v21, %v2756_v50 }
 0x669   :  { %6348 = vmatprep.subr.bf16.mxu0 %v17081_v55  ;;  %6512 = vmatprep.subr.bf16.mxu1 %v17083_v56  ;;  %v3088_v55 = vld [vmem:[#allocation10 + $0x38] sm:$0xff]  ;;  %v17112_v56 = vcombine.low %v3585_v39, %v3589_v41  ;;  %v16613_v58 = vcombine.high %v3083_v53, %v3087_v7  ;;  %v3103_v21 = vld [vmem:[#allocation10 + $0xb0] sm:$0xff] }
 0x66a   :  { %v16615_v59 = vcombine.high %v3084_v45, %v3088_v55  ;;  %v20136_v32 = vpack.c.bf16 %v3077_v57, %v3077_v57  ;;  %v16614_v10 = vcombine.low %v3084_v45, %v3088_v55  ;;  %v3124_v45 = vld [vmem:[#allocation10 + $0x158] sm:$0xff] }
 0x66b   :  { %v3128_v55 = vld [vmem:[#allocation10 + $0x178] sm:$0xff] }
 0x66c   :  { %6349 = vmatpush1.bf16.msra.mxu0 %v17080_v34  ;;  %6513 = vmatpush1.bf16.msra.mxu1 %v17082_v62  ;;  %v3095_v34 = vld [vmem:[#allocation10 + $0x70] sm:$0xff]  ;;  %v3092_v62 = vld [vmem:[#allocation10 + $0x58] sm:$0xff] }
 0x66d   :  { %6350 = vmatprep.subr.bf16.mxu0 %v17089_v26  ;;  %6514 = vmatprep.subr.bf16.mxu1 %v17091_v63  ;;  %v3096_v26 = vld [vmem:[#allocation10 + $0x78] sm:$0xff]  ;;  %v16612_v63 = vcombine.low %v3083_v53, %v3087_v7  ;;  %v16621_v13 = vcombine.high %v3091_v60, %v3095_v34  ;;  %v3123_v53 = vld [vmem:[#allocation10 + $0x150] sm:$0xff] }
 0x66e   :  { %v16623_v14 = vcombine.high %v3092_v62, %v3096_v26  ;;  %v16622_v18 = vcombine.low %v3092_v62, %v3096_v26  ;;  %v3127_v7 = vld [vmem:[#allocation10 + $0x170] sm:$0xff]  ;;  %v3136_v62 = vld [vmem:[#allocation10 + $0x1b8] sm:$0xff] }
 0x66f   :  { %v16653_v57 = vcombine.high %v3123_v53, %v3127_v7  ;;  %v16652_v26 = vcombine.low %v3123_v53, %v3127_v7  ;;  %v3167_v53 = vld [vmem:[#allocation10 + $0x2b0] sm:$0xff]  ;;  %v3164_v7 = vld [vmem:[#allocation10 + $0x298] sm:$0xff] }
 0x670   :  { %6351 = vmatpush1.bf16.msra.mxu0 %v17088_v15  ;;  %6515 = vmatpush1.bf16.msra.mxu1 %v17090_v16  ;;  %v3099_v15 = vld [vmem:[#allocation10 + $0x90] sm:$0xff]  ;;  %v3100_v16 = vld [vmem:[#allocation10 + $0x98] sm:$0xff] }
 0x671   :  { %6352 = vmatprep.subr.bf16.mxu0 %v17097_v17  ;;  %6516 = vmatprep.subr.bf16.mxu1 %v17099_v2  ;;  %v3104_v17 = vld [vmem:[#allocation10 + $0xb8] sm:$0xff]  ;;  %v16620_v2 = vcombine.low %v3091_v60, %v3095_v34  ;;  %v16629_v20 = vcombine.high %v3099_v15, %v3103_v21  ;;  %v3135_v60 = vld [vmem:[#allocation10 + $0x1b0] sm:$0xff] }
 0x672   :  { %v16631_v28 = vcombine.high %v3100_v16, %v3104_v17  ;;  %v16630_v39 = vcombine.low %v3100_v16, %v3104_v17  ;;  %v3132_v34 = vld [vmem:[#allocation10 + $0x198] sm:$0xff] }
 0x673   :  { %v3144_v16 = vld [vmem:[#allocation10 + $0x1f8] sm:$0xff] }
 0x674   :  { %6353 = vmatpush1.bf16.msra.mxu0 %v17096_v33  ;;  %6517 = vmatpush1.bf16.msra.mxu1 %v17098_v35  ;;  %v3111_v33 = vld [vmem:[#allocation10 + $0xf0] sm:$0xff]  ;;  %v3108_v35 = vld [vmem:[#allocation10 + $0xd8] sm:$0xff] }
 0x675   :  { %6354 = vmatprep.subr.bf16.mxu0 %v17105_v36  ;;  %6518 = vmatprep.subr.bf16.mxu1 %v17107_v37  ;;  %v3112_v36 = vld [vmem:[#allocation10 + $0xf8] sm:$0xff]  ;;  %v16628_v37 = vcombine.low %v3099_v15, %v3103_v21  ;;  %v16637_v41 = vcombine.high %v3107_v31, %v3111_v33  ;;  %v16636_v51 = vcombine.low %v3107_v31, %v3111_v33  ;;  %v3143_v15 = vld [vmem:[#allocation10 + $0x1f0] sm:$0xff] }
 0x676   :  { %v16639_v29 = vcombine.high %v3108_v35, %v3112_v36  ;;  %v16638_v50 = vcombine.low %v3108_v35, %v3112_v36  ;;  %v3140_v21 = vld [vmem:[#allocation10 + $0x1d8] sm:$0xff]  ;;  %v3151_v31 = vld [vmem:[#allocation10 + $0x230] sm:$0xff] }
 0x677   :  { %v3148_v33 = vld [vmem:[#allocation10 + $0x218] sm:$0xff] }
 0x678   :  { %6355 = vmatpush1.bf16.msra.mxu0 %v17104_v47  ;;  %6519 = vmatpush1.bf16.msra.mxu1 %v17106_v48  ;;  %v3119_v47 = vld [vmem:[#allocation10 + $0x130] sm:$0xff]  ;;  %v3120_v48 = vld [vmem:[#allocation10 + $0x138] sm:$0xff] }
 0x679   :  { %6356 = vmatprep.subr.bf16.mxu0 %v17113_v49  ;;  %6520 = vmatprep.subr.bf16.mxu1 %v17115_v52  ;;  %v16645_v49 = vcombine.high %v3115_v44, %v3119_v47  ;;  %v3152_v35 = vld [vmem:[#allocation10 + $0x238] sm:$0xff] }
 0x67c   :  { %6357 = vmatpush1.bf16.msra.mxu0 %v17112_v56  ;;  %6521 = vmatpush1.bf16.msra.mxu1 %v17114_v8  ;;  %v16644_v56 = vcombine.low %v3115_v44, %v3119_v47  ;;  %v3159_v44 = vld [vmem:[#allocation10 + $0x270] sm:$0xff]  ;;  %v3156_v47 = vld [vmem:[#allocation10 + $0x258] sm:$0xff] }
 0x67d   :  { %6531 = vmatprep.subr.bf16.mxu0 %v16613_v58  ;;  %6695 = vmatprep.subr.bf16.mxu1 %v16615_v59  ;;  %v16655_v58 = vcombine.high %v3124_v45, %v3128_v55  ;;  %v3131_v59 = vld [vmem:[#allocation10 + $0x190] sm:$0xff] }
 0x67e   :  { %v16660_v17 = vcombine.low %v3131_v59, %v3135_v60 }
 0x67f   :  { %6359 = vmatmul.mubr.bf16.vlgmr.msra.gmra.mrb[20].mxu0 %v20136_v32  ;;  %6523 = vmatmul.mubr.bf16.vlgmr.msra.gmra.mrb[12].mxu1 %v20136_v32 }
 0x680   :  { %6532 = vmatpush1.bf16.msra.mxu0 %v16612_v63  ;;  %6563 = vmatprep.mubr.bf16.mxu0 %v20072_v42  ;;  %v16654_v63 = vcombine.low %v3124_v45, %v3128_v55  ;;  %v3168_v45 = vld [vmem:[#allocation10 + $0x2b8] sm:$0xff] }
 0x681   :  { %6696 = vmatpush1.bf16.msra.mxu1 %v16614_v10  ;;  %6727 = vmatprep.mubr.bf16.mxu1 %v20072_v42  ;;  %v3116_v42 = vld [vmem:[#allocation10 + $0x118] sm:$0xff]  ;;  %v16661_v10 = vcombine.high %v3131_v59, %v3135_v60  ;;  %v3175_v59 = vld [vmem:[#allocation10 + $0x2f0] sm:$0xff] }
 0x682   :  { %6533 = vmatprep.subr.bf16.mxu0 %v16621_v13  ;;  %6697 = vmatprep.subr.bf16.mxu1 %v16623_v14  ;;  %v16647_v52 = vcombine.high %v3116_v42, %v3120_v48  ;;  %v16646_v8 = vcombine.low %v3116_v42, %v3120_v48  ;;  %v16663_v13 = vcombine.high %v3132_v34, %v3136_v62  ;;  %v3139_v14 = vld [vmem:[#allocation10 + $0x1d0] sm:$0xff]  ;;  %v3160_v42 = vld [vmem:[#allocation10 + $0x278] sm:$0xff] }
 0x683   :  { %v16668_v36 = vcombine.low %v3139_v14, %v3143_v15  ;;  %v3172_v60 = vld [vmem:[#allocation10 + $0x2d8] sm:$0xff] }
 0x684   :  { %6534 = vmatpush1.bf16.msra.mxu0 %v16620_v2  ;;  %v16662_v2 = vcombine.low %v3132_v34, %v3136_v62  ;;  %v3176_v34 = vld [vmem:[#allocation10 + $0x2f8] sm:$0xff] }
 0x685   :  { %6698 = vmatpush1.bf16.msra.mxu1 %v16622_v18  ;;  %6535 = vmatprep.subr.bf16.mxu0 %v16629_v20  ;;  %v16669_v18 = vcombine.high %v3139_v14, %v3143_v15  ;;  %v16671_v20 = vcombine.high %v3140_v21, %v3144_v16  ;;  %v3183_v14 = vld [vmem:[#allocation10 + $0x330] sm:$0xff]  ;;  %v3180_v15 = vld [vmem:[#allocation10 + $0x318] sm:$0xff] }
 0x686   :  { %6699 = vmatprep.subr.bf16.mxu1 %v16631_v28  ;;  %v3147_v28 = vld [vmem:[#allocation10 + $0x210] sm:$0xff] }
 0x687   :  { %v16676_v48 = vcombine.low %v3147_v28, %v3151_v31 }
 0x688   :  { %6536 = vmatpush1.bf16.msra.mxu0 %v16628_v37  ;;  %v16670_v37 = vcombine.low %v3140_v21, %v3144_v16  ;;  %v3184_v21 = vld [vmem:[#allocation10 + $0x338] sm:$0xff] }
 0x689   :  { %6700 = vmatpush1.bf16.msra.mxu1 %v16630_v39  ;;  %6537 = vmatprep.subr.bf16.mxu0 %v16637_v41  ;;  %v16677_v39 = vcombine.high %v3147_v28, %v3151_v31  ;;  %v16679_v41 = vcombine.high %v3148_v33, %v3152_v35  ;;  %v3191_v28 = vld [vmem:[#allocation10 + $0x370] sm:$0xff]  ;;  %v3188_v31 = vld [vmem:[#allocation10 + $0x358] sm:$0xff] }
 0x68a   :  { %6701 = vmatprep.subr.bf16.mxu1 %v16639_v29  ;;  %v3155_v29 = vld [vmem:[#allocation10 + $0x250] sm:$0xff] }
 0x68b   :  { %v16684_v55 = vcombine.low %v3155_v29, %v3159_v44 }
 0x68c   :  { %6538 = vmatpush1.bf16.msra.mxu0 %v16636_v51  ;;  %v16678_v51 = vcombine.low %v3148_v33, %v3152_v35  ;;  %v3192_v33 = vld [vmem:[#allocation10 + $0x378] sm:$0xff] }
 0x68d   :  { %6702 = vmatpush1.bf16.msra.mxu1 %v16638_v50  ;;  %6539 = vmatprep.subr.bf16.mxu0 %v16645_v49  ;;  %v16685_v50 = vcombine.high %v3155_v29, %v3159_v44  ;;  %v16687_v49 = vcombine.high %v3156_v47, %v3160_v42  ;;  %v3199_v29 = vld [vmem:[#allocation10 + $0x3b0] sm:$0xff]  ;;  %v3196_v44 = vld [vmem:[#allocation10 + $0x398] sm:$0xff] }
 0x68e   :  { %6703 = vmatprep.subr.bf16.mxu1 %v16647_v52  ;;  %v3163_v52 = vld [vmem:[#allocation10 + $0x290] sm:$0xff] }
 0x68f   :  { %v16692_v62 = vcombine.low %v3163_v52, %v3167_v53 }
 0x690   :  { %6540 = vmatpush1.bf16.msra.mxu0 %v16644_v56  ;;  %v16686_v56 = vcombine.low %v3156_v47, %v3160_v42  ;;  %v3200_v47 = vld [vmem:[#allocation10 + $0x3b8] sm:$0xff] }
 0x691   :  { %6704 = vmatpush1.bf16.msra.mxu1 %v16646_v8  ;;  %6541 = vmatprep.subr.bf16.mxu0 %v16653_v57  ;;  %v16693_v8 = vcombine.high %v3163_v52, %v3167_v53  ;;  %v16695_v57 = vcombine.high %v3164_v7, %v3168_v45  ;;  %v3207_v52 = vld [vmem:[#allocation10 + $0x3f0] sm:$0xff]  ;;  %v3204_v53 = vld [vmem:[#allocation10 + $0x3d8] sm:$0xff] }
 0x692   :  { %6705 = vmatprep.subr.bf16.mxu1 %v16655_v58  ;;  %v3171_v58 = vld [vmem:[#allocation10 + $0x2d0] sm:$0xff] }
 0x693   :  { %v16700_v16 = vcombine.low %v3171_v58, %v3175_v59 }
 0x694   :  { %6542 = vmatpush1.bf16.msra.mxu0 %v16652_v26  ;;  %v16694_v26 = vcombine.low %v3164_v7, %v3168_v45  ;;  %v3208_v7 = vld [vmem:[#allocation10 + $0x3f8] sm:$0xff] }
 0x695   :  { %6706 = vmatpush1.bf16.msra.mxu1 %v16654_v63  ;;  %6543 = vmatprep.subr.bf16.mxu0 %v16661_v10  ;;  %v16701_v63 = vcombine.high %v3171_v58, %v3175_v59  ;;  %v16703_v10 = vcombine.high %v3172_v60, %v3176_v34  ;;  %v3215_v58 = vld [vmem:[#allocation10 + $0x430] sm:$0xff]  ;;  %v3212_v59 = vld [vmem:[#allocation10 + $0x418] sm:$0xff] }
 0x696   :  { %6707 = vmatprep.subr.bf16.mxu1 %v16663_v13  ;;  %v3179_v13 = vld [vmem:[#allocation10 + $0x310] sm:$0xff] }
 0x697   :  { %v16708_v35 = vcombine.low %v3179_v13, %v3183_v14 }
 0x698   :  { %6544 = vmatpush1.bf16.msra.mxu0 %v16660_v17  ;;  %v16702_v17 = vcombine.low %v3172_v60, %v3176_v34  ;;  %v3216_v60 = vld [vmem:[#allocation10 + $0x438] sm:$0xff] }
 0x699   :  { %6708 = vmatpush1.bf16.msra.mxu1 %v16662_v2  ;;  %6545 = vmatprep.subr.bf16.mxu0 %v16669_v18  ;;  %v16709_v2 = vcombine.high %v3179_v13, %v3183_v14  ;;  %v16711_v18 = vcombine.high %v3180_v15, %v3184_v21  ;;  %v3223_v13 = vld [vmem:[#allocation10 + $0x470] sm:$0xff] }
 0x69a   :  { %6709 = vmatprep.subr.bf16.mxu1 %v16671_v20  ;;  %v3187_v20 = vld [vmem:[#allocation10 + $0x350] sm:$0xff] }
 0x69b   :  { %v16716_v42 = vcombine.low %v3187_v20, %v3191_v28 }
 0x69c   :  { %6546 = vmatpush1.bf16.msra.mxu0 %v16668_v36  ;;  %v16710_v36 = vcombine.low %v3180_v15, %v3184_v21  ;;  %v3220_v15 = vld [vmem:[#allocation10 + $0x458] sm:$0xff] }
 0x69d   :  { %6710 = vmatpush1.bf16.msra.mxu1 %v16670_v37  ;;  %6547 = vmatprep.subr.bf16.mxu0 %v16677_v39  ;;  %v16717_v37 = vcombine.high %v3187_v20, %v3191_v28  ;;  %v16719_v39 = vcombine.high %v3188_v31, %v3192_v33  ;;  %v3224_v21 = vld [vmem:[#allocation10 + $0x478] sm:$0xff] }
 0x69e   :  { %6711 = vmatprep.subr.bf16.mxu1 %v16679_v41  ;;  %v3195_v41 = vld [vmem:[#allocation10 + $0x390] sm:$0xff]  ;;  %v16751_v20 = vcombine.high %v3220_v15, %v3224_v21  ;;  %v3228_v28 = vld [vmem:[#allocation10 + $0x498] sm:$0xff] }
 0x69f   :  { %v16724_v45 = vcombine.low %v3195_v41, %v3199_v29 }
 0x6a0   :  { %6548 = vmatpush1.bf16.msra.mxu0 %v16676_v48  ;;  %v16718_v48 = vcombine.low %v3188_v31, %v3192_v33  ;;  %v3232_v31 = vld [vmem:[#allocation10 + $0x4b8] sm:$0xff] }
 0x6a1   :  { %6712 = vmatpush1.bf16.msra.mxu1 %v16678_v51  ;;  %6549 = vmatprep.subr.bf16.mxu0 %v16685_v50  ;;  %v16725_v51 = vcombine.high %v3195_v41, %v3199_v29  ;;  %v16727_v50 = vcombine.high %v3196_v44, %v3200_v47  ;;  %v3239_v41 = vld [vmem:[#allocation10 + $0x4f0] sm:$0xff]  ;;  %v3236_v29 = vld [vmem:[#allocation10 + $0x4d8] sm:$0xff] }
 0x6a2   :  { %6713 = vmatprep.subr.bf16.mxu1 %v16687_v49  ;;  %v3203_v49 = vld [vmem:[#allocation10 + $0x3d0] sm:$0xff] }
 0x6a3   :  { %v16732_v34 = vcombine.low %v3203_v49, %v3207_v52 }
 0x6a4   :  { %6550 = vmatpush1.bf16.msra.mxu0 %v16684_v55  ;;  %v16726_v55 = vcombine.low %v3196_v44, %v3200_v47  ;;  %v3240_v44 = vld [vmem:[#allocation10 + $0x4f8] sm:$0xff] }
 0x6a5   :  { %6714 = vmatpush1.bf16.msra.mxu1 %v16686_v56  ;;  %6551 = vmatprep.subr.bf16.mxu0 %v16693_v8  ;;  %v16733_v56 = vcombine.high %v3203_v49, %v3207_v52  ;;  %v16735_v8 = vcombine.high %v3204_v53, %v3208_v7  ;;  %v3244_v49 = vld [vmem:[#allocation10 + $0x518] sm:$0xff] }
 0x6a6   :  { %6715 = vmatprep.subr.bf16.mxu1 %v16695_v57  ;;  %v3211_v57 = vld [vmem:[#allocation10 + $0x410] sm:$0xff]  ;;  %v3248_v52 = vld [vmem:[#allocation10 + $0x538] sm:$0xff] }
 0x6a7   :  { %v16740_v14 = vcombine.low %v3211_v57, %v3215_v58 }
 0x6a8   :  { %6552 = vmatpush1.bf16.msra.mxu0 %v16692_v62  ;;  %v16734_v62 = vcombine.low %v3204_v53, %v3208_v7  ;;  %v16766_v53 = vcombine.low %v3236_v29, %v3240_v44 }
 0x6a9   :  { %6716 = vmatpush1.bf16.msra.mxu1 %v16694_v26  ;;  %6553 = vmatprep.subr.bf16.mxu0 %v16701_v63  ;;  %v16741_v26 = vcombine.high %v3211_v57, %v3215_v58  ;;  %v16743_v63 = vcombine.high %v3212_v59, %v3216_v60  ;;  %v3256_v57 = vld [vmem:[#allocation10 + $0x578] sm:$0xff] }
 0x6aa   :  { %6717 = vmatprep.subr.bf16.mxu1 %v16703_v10  ;;  %v3219_v10 = vld [vmem:[#allocation10 + $0x450] sm:$0xff] }
 0x6ab   :  { %v16748_v33 = vcombine.low %v3219_v10, %v3223_v13 }
 0x6ac   :  { %6554 = vmatpush1.bf16.msra.mxu0 %v16700_v16  ;;  %v16742_v16 = vcombine.low %v3212_v59, %v3216_v60  ;;  %v16774_v59 = vcombine.low %v3244_v49, %v3248_v52 }
 0x6ad   :  { %6718 = vmatpush1.bf16.msra.mxu1 %v16702_v17  ;;  %6555 = vmatprep.subr.bf16.mxu0 %v16709_v2  ;;  %v16749_v17 = vcombine.high %v3219_v10, %v3223_v13  ;;  %v3227_v2 = vld [vmem:[#allocation10 + $0x490] sm:$0xff]  ;;  %v3264_v10 = vld [vmem:[#allocation10 + $0x5b8] sm:$0xff] }
 0x6ae   :  { %6719 = vmatprep.subr.bf16.mxu1 %v16711_v18  ;;  %v3231_v18 = vld [vmem:[#allocation10 + $0x4b0] sm:$0xff] }
 0x6af   :  { %v16756_v47 = vcombine.low %v3227_v2, %v3231_v18 }
 0x6b0   :  { %6556 = vmatpush1.bf16.msra.mxu0 %v16708_v35  ;;  %v16750_v35 = vcombine.low %v3220_v15, %v3224_v21 }
 0x6b1   :  { %6720 = vmatpush1.bf16.msra.mxu1 %v16710_v36  ;;  %6557 = vmatprep.subr.bf16.mxu0 %v16717_v37  ;;  %v16757_v36 = vcombine.high %v3227_v2, %v3231_v18  ;;  %v16759_v37 = vcombine.high %v3228_v28, %v3232_v31  ;;  %v3268_v2 = vld [vmem:[#allocation10 + $0x5d8] sm:$0xff] }
 0x6b2   :  { %6721 = vmatprep.subr.bf16.mxu1 %v16719_v39  ;;  %v3235_v39 = vld [vmem:[#allocation10 + $0x4d0] sm:$0xff]  ;;  %v3272_v18 = vld [vmem:[#allocation10 + $0x5f8] sm:$0xff] }
 0x6b4   :  { %6558 = vmatpush1.bf16.msra.mxu0 %v16716_v42  ;;  %v16765_v42 = vcombine.high %v3235_v39, %v3239_v41 }
 0x6b5   :  { %6722 = vmatpush1.bf16.msra.mxu1 %v16718_v48  ;;  %6559 = vmatprep.subr.bf16.mxu0 %v16725_v51  ;;  %v16767_v48 = vcombine.high %v3236_v29, %v3240_v44  ;;  %v3243_v51 = vld [vmem:[#allocation10 + $0x510] sm:$0xff]  ;;  %v16798_v29 = vcombine.low %v3268_v2, %v3272_v18 }
 0x6b6   :  { %6723 = vmatprep.subr.bf16.mxu1 %v16727_v50  ;;  %v3247_v50 = vld [vmem:[#allocation10 + $0x530] sm:$0xff] }
 0x6b7   :  { %v16773_v7 = vcombine.high %v3243_v51, %v3247_v50  ;;  %v16772_v58 = vcombine.low %v3243_v51, %v3247_v50  ;;  %v3288_v51 = vld [vmem:[#allocation10 + $0x678] sm:$0xff] }
 0x6b8   :  { %6560 = vmatpush1.bf16.msra.mxu0 %v16724_v45  ;;  %v16775_v45 = vcombine.high %v3244_v49, %v3248_v52 }
 0x6b9   :  { %6724 = vmatpush1.bf16.msra.mxu1 %v16726_v55  ;;  %6561 = vmatprep.subr.bf16.mxu0 %v16733_v56  ;;  %v3251_v55 = vld [vmem:[#allocation10 + $0x550] sm:$0xff] }
 0x6ba   :  { %6725 = vmatprep.subr.bf16.mxu1 %v16735_v8  ;;  %v3255_v56 = vld [vmem:[#allocation10 + $0x570] sm:$0xff]  ;;  %v3252_v8 = vld [vmem:[#allocation10 + $0x558] sm:$0xff] }
 0x6bb   :  { %v16781_v60 = vcombine.high %v3251_v55, %v3255_v56  ;;  %v16780_v13 = vcombine.low %v3251_v55, %v3255_v56  ;;  %v3296_v55 = vld [vmem:[#allocation10 + $0x6b8] sm:$0xff] }
 0x6bc   :  { %6562 = vmatpush1.bf16.msra.mxu0 %v16732_v34  ;;  %v16783_v34 = vcombine.high %v3252_v8, %v3256_v57 }
 0x6bd   :  { %6726 = vmatpush1.bf16.msra.mxu1 %v16734_v62  ;;  %6572 = vmatprep.subr.bf16.mxu0 %v16741_v26  ;;  %v3259_v62 = vld [vmem:[#allocation10 + $0x590] sm:$0xff] }
 0x6be   :  { %6736 = vmatprep.subr.bf16.mxu1 %v16743_v63  ;;  %v3263_v26 = vld [vmem:[#allocation10 + $0x5b0] sm:$0xff]  ;;  %v3260_v63 = vld [vmem:[#allocation10 + $0x598] sm:$0xff] }
 0x6bf   :  { %6564 = vmatmul.mubr.bf16.vlgmr.msra.gmra.mrb[24].mxu0 %v20076_v30  ;;  %v16789_v15 = vcombine.high %v3259_v62, %v3263_v26  ;;  %v16791_v21 = vcombine.high %v3260_v63, %v3264_v10 }
 0x6c0   :  { %6728 = vmatmul.mubr.bf16.vlgmr.msra.gmra.mrb[16].mxu1 %v20076_v30  ;;  %6573 = vmatpush1.bf16.msra.mxu0 %v16740_v14  ;;  %v16758_v30 = vcombine.low %v3228_v28, %v3232_v31  ;;  %v16782_v14 = vcombine.low %v3252_v8, %v3256_v57  ;;  %v16790_v28 = vcombine.low %v3260_v63, %v3264_v10 }
 0x6c1   :  { %6604 = vmatprep.mubr.bf16.mxu0 %v20082_v43  ;;  %6737 = vmatpush1.bf16.msra.mxu1 %v16742_v16  ;;  %v3267_v16 = vld [vmem:[#allocation10 + $0x5d0] sm:$0xff] }
 0x6c2   :  { %6768 = vmatprep.mubr.bf16.mxu1 %v20082_v43  ;;  %6574 = vmatprep.subr.bf16.mxu0 %v16749_v17  ;;  %v16764_v43 = vcombine.low %v3235_v39, %v3239_v41  ;;  %v3271_v17 = vld [vmem:[#allocation10 + $0x5f0] sm:$0xff]  ;;  %v3280_v39 = vld [vmem:[#allocation10 + $0x638] sm:$0xff] }
 0x6c3   :  { %6738 = vmatprep.subr.bf16.mxu1 %v16751_v20  ;;  %v16788_v20 = vcombine.low %v3259_v62, %v3263_v26  ;;  %v16797_v31 = vcombine.high %v3267_v16, %v3271_v17  ;;  %v16796_v41 = vcombine.low %v3267_v16, %v3271_v17  ;;  %v3304_v62 = vld [vmem:[#allocation10 + $0x6f8] sm:$0xff] }
 0x6c4   :  { %6575 = vmatpush1.bf16.msra.mxu0 %v16748_v33  ;;  %v16799_v33 = vcombine.high %v3268_v2, %v3272_v18  ;;  %v3312_v16 = vld [vmem:[#allocation10 + $0x738] sm:$0xff] }
 0x6c5   :  { %6739 = vmatpush1.bf16.msra.mxu1 %v16750_v35  ;;  %6576 = vmatprep.subr.bf16.mxu0 %v16757_v36  ;;  %v3275_v35 = vld [vmem:[#allocation10 + $0x610] sm:$0xff] }
 0x6c6   :  { %6740 = vmatprep.subr.bf16.mxu1 %v16759_v37  ;;  %v3279_v36 = vld [vmem:[#allocation10 + $0x630] sm:$0xff]  ;;  %v3276_v37 = vld [vmem:[#allocation10 + $0x618] sm:$0xff] }
 0x6c7   :  { %v16805_v44 = vcombine.high %v3275_v35, %v3279_v36  ;;  %v16804_v50 = vcombine.low %v3275_v35, %v3279_v36  ;;  %v16806_v49 = vcombine.low %v3276_v37, %v3280_v39  ;;  %v3320_v35 = vld [vmem:[#allocation10 + $0x778] sm:$0xff] }
 0x6c8   :  { %6577 = vmatpush1.bf16.msra.mxu0 %v16756_v47  ;;  %v16807_v47 = vcombine.high %v3276_v37, %v3280_v39 }
 0x6c9   :  { %6741 = vmatpush1.bf16.msra.mxu1 %v16758_v30  ;;  %6578 = vmatprep.subr.bf16.mxu0 %v16765_v42  ;;  %v3283_v30 = vld [vmem:[#allocation10 + $0x650] sm:$0xff] }
 0x6ca   :  { %6742 = vmatprep.subr.bf16.mxu1 %v16767_v48  ;;  %v3287_v42 = vld [vmem:[#allocation10 + $0x670] sm:$0xff]  ;;  %v3284_v48 = vld [vmem:[#allocation10 + $0x658] sm:$0xff] }
 0x6cb   :  { %v16813_v52 = vcombine.high %v3283_v30, %v3287_v42  ;;  %v16812_v56 = vcombine.low %v3283_v30, %v3287_v42  ;;  %v16814_v8 = vcombine.low %v3284_v48, %v3288_v51  ;;  %v3328_v30 = vld [vmem:[#allocation10 + $0x7b8] sm:$0xff] }
 0x6cc   :  { %6579 = vmatpush1.bf16.msra.mxu0 %v16764_v43  ;;  %v16815_v43 = vcombine.high %v3284_v48, %v3288_v51 }
 0x6cd   :  { %6743 = vmatpush1.bf16.msra.mxu1 %v16766_v53  ;;  %6580 = vmatprep.subr.bf16.mxu0 %v16773_v7  ;;  %v3291_v53 = vld [vmem:[#allocation10 + $0x690] sm:$0xff] }
 0x6ce   :  { %6744 = vmatprep.subr.bf16.mxu1 %v16775_v45  ;;  %v3295_v7 = vld [vmem:[#allocation10 + $0x6b0] sm:$0xff]  ;;  %v3292_v45 = vld [vmem:[#allocation10 + $0x698] sm:$0xff] }
 0x6cf   :  { %v16821_v57 = vcombine.high %v3291_v53, %v3295_v7  ;;  %v16820_v26 = vcombine.low %v3291_v53, %v3295_v7  ;;  %v16822_v63 = vcombine.low %v3292_v45, %v3296_v55  ;;  %v3336_v53 = vld [vmem:[#allocation10 + $0x7f8] sm:$0xff] }
 0x6d0   :  { %6581 = vmatpush1.bf16.msra.mxu0 %v16772_v58  ;;  %v16823_v58 = vcombine.high %v3292_v45, %v3296_v55 }
 0x6d1   :  { %6745 = vmatpush1.bf16.msra.mxu1 %v16774_v59  ;;  %6582 = vmatprep.subr.bf16.mxu0 %v16781_v60  ;;  %v3299_v59 = vld [vmem:[#allocation10 + $0x6d0] sm:$0xff] }
 0x6d2   :  { %6746 = vmatprep.subr.bf16.mxu1 %v16783_v34  ;;  %v3303_v60 = vld [vmem:[#allocation10 + $0x6f0] sm:$0xff]  ;;  %v3300_v34 = vld [vmem:[#allocation10 + $0x6d8] sm:$0xff] }
 0x6d3   :  { %v16829_v10 = vcombine.high %v3299_v59, %v3303_v60  ;;  %v16828_v17 = vcombine.low %v3299_v59, %v3303_v60  ;;  %v16830_v2 = vcombine.low %v3300_v34, %v3304_v62  ;;  %v3344_v59 = vld [vmem:[#allocation10 + $0x838] sm:$0xff] }
 0x6d4   :  { %6583 = vmatpush1.bf16.msra.mxu0 %v16780_v13  ;;  %v16831_v13 = vcombine.high %v3300_v34, %v3304_v62 }
 0x6d5   :  { %6747 = vmatpush1.bf16.msra.mxu1 %v16782_v14  ;;  %6584 = vmatprep.subr.bf16.mxu0 %v16789_v15  ;;  %v3307_v14 = vld [vmem:[#allocation10 + $0x710] sm:$0xff] }
 0x6d6   :  { %6748 = vmatprep.subr.bf16.mxu1 %v16791_v21  ;;  %v3311_v15 = vld [vmem:[#allocation10 + $0x730] sm:$0xff]  ;;  %v3308_v21 = vld [vmem:[#allocation10 + $0x718] sm:$0xff] }
 0x6d7   :  { %v16837_v18 = vcombine.high %v3307_v14, %v3311_v15  ;;  %v16836_v36 = vcombine.low %v3307_v14, %v3311_v15  ;;  %v16838_v37 = vcombine.low %v3308_v21, %v3312_v16  ;;  %v3348_v14 = vld [vmem:[#allocation10 + $0x858] sm:$0xff] }
 0x6d8   :  { %6585 = vmatpush1.bf16.msra.mxu0 %v16788_v20  ;;  %v16839_v20 = vcombine.high %v3308_v21, %v3312_v16  ;;  %v3352_v15 = vld [vmem:[#allocation10 + $0x878] sm:$0xff] }
 0x6d9   :  { %6749 = vmatpush1.bf16.msra.mxu1 %v16790_v28  ;;  %6586 = vmatprep.subr.bf16.mxu0 %v16797_v31  ;;  %v3315_v28 = vld [vmem:[#allocation10 + $0x750] sm:$0xff] }
 0x6da   :  { %6750 = vmatprep.subr.bf16.mxu1 %v16799_v33  ;;  %v3319_v31 = vld [vmem:[#allocation10 + $0x770] sm:$0xff]  ;;  %v3316_v33 = vld [vmem:[#allocation10 + $0x758] sm:$0xff] }
 0x6db   :  { %v16845_v39 = vcombine.high %v3315_v28, %v3319_v31  ;;  %v16844_v42 = vcombine.low %v3315_v28, %v3319_v31  ;;  %v16846_v48 = vcombine.low %v3316_v33, %v3320_v35  ;;  %v3360_v28 = vld [vmem:[#allocation10 + $0x8b8] sm:$0xff] }
 0x6dc   :  { %6587 = vmatpush1.bf16.msra.mxu0 %v16796_v41  ;;  %v16847_v41 = vcombine.high %v3316_v33, %v3320_v35  ;;  %v16878_v33 = vcombine.low %v3348_v14, %v3352_v15 }
 0x6dd   :  { %6751 = vmatpush1.bf16.msra.mxu1 %v16798_v29  ;;  %6588 = vmatprep.subr.bf16.mxu0 %v16805_v44  ;;  %v3323_v29 = vld [vmem:[#allocation10 + $0x790] sm:$0xff] }
 0x6de   :  { %6752 = vmatprep.subr.bf16.mxu1 %v16807_v47  ;;  %v3327_v44 = vld [vmem:[#allocation10 + $0x7b0] sm:$0xff]  ;;  %v3324_v47 = vld [vmem:[#allocation10 + $0x798] sm:$0xff] }
 0x6df   :  { %v16853_v51 = vcombine.high %v3323_v29, %v3327_v44  ;;  %v16852_v7 = vcombine.low %v3323_v29, %v3327_v44  ;;  %v16854_v45 = vcombine.low %v3324_v47, %v3328_v30  ;;  %v3368_v29 = vld [vmem:[#allocation10 + $0x8f8] sm:$0xff] }
 0x6e0   :  { %6589 = vmatpush1.bf16.msra.mxu0 %v16804_v50  ;;  %v16855_v50 = vcombine.high %v3324_v47, %v3328_v30 }
 0x6e1   :  { %6753 = vmatpush1.bf16.msra.mxu1 %v16806_v49  ;;  %6590 = vmatprep.subr.bf16.mxu0 %v16813_v52  ;;  %v3331_v49 = vld [vmem:[#allocation10 + $0x7d0] sm:$0xff] }
 0x6e2   :  { %6754 = vmatprep.subr.bf16.mxu1 %v16815_v43  ;;  %v3335_v52 = vld [vmem:[#allocation10 + $0x7f0] sm:$0xff]  ;;  %v3332_v43 = vld [vmem:[#allocation10 + $0x7d8] sm:$0xff] }
 0x6e3   :  { %v16861_v55 = vcombine.high %v3331_v49, %v3335_v52  ;;  %v16860_v60 = vcombine.low %v3331_v49, %v3335_v52  ;;  %v16862_v34 = vcombine.low %v3332_v43, %v3336_v53 }
 0x6e4   :  { %6591 = vmatpush1.bf16.msra.mxu0 %v16812_v56  ;;  %v16863_v56 = vcombine.high %v3332_v43, %v3336_v53  ;;  %v3379_v53 = vld [vmem:[#allocation10 + $0x950] sm:$0xff] }
 0x6e5   :  { %6755 = vmatpush1.bf16.msra.mxu1 %v16814_v8  ;;  %6592 = vmatprep.subr.bf16.mxu0 %v16821_v57  ;;  %v3339_v8 = vld [vmem:[#allocation10 + $0x810] sm:$0xff] }
 0x6e6   :  { %6756 = vmatprep.subr.bf16.mxu1 %v16823_v58  ;;  %v3343_v57 = vld [vmem:[#allocation10 + $0x830] sm:$0xff]  ;;  %v3340_v58 = vld [vmem:[#allocation10 + $0x818] sm:$0xff] }
 0x6e7   :  { %v16869_v62 = vcombine.high %v3339_v8, %v3343_v57  ;;  %v16870_v21 = vcombine.low %v3340_v58, %v3344_v59 }
 0x6e8   :  { %6593 = vmatpush1.bf16.msra.mxu0 %v16820_v26  ;;  %v16871_v26 = vcombine.high %v3340_v58, %v3344_v59  ;;  %v3387_v59 = vld [vmem:[#allocation10 + $0x990] sm:$0xff] }
 0x6e9   :  { %6757 = vmatpush1.bf16.msra.mxu1 %v16822_v63  ;;  %6594 = vmatprep.subr.bf16.mxu0 %v16829_v10  ;;  %v3347_v63 = vld [vmem:[#allocation10 + $0x850] sm:$0xff] }
 0x6ea   :  { %6758 = vmatprep.subr.bf16.mxu1 %v16831_v13  ;;  %v3351_v10 = vld [vmem:[#allocation10 + $0x870] sm:$0xff]  ;;  %v16868_v13 = vcombine.low %v3339_v8, %v3343_v57 }
 0x6eb   :  { %v16877_v16 = vcombine.high %v3347_v63, %v3351_v10  ;;  %v16876_v31 = vcombine.low %v3347_v63, %v3351_v10 }
 0x6ec   :  { %6595 = vmatpush1.bf16.msra.mxu0 %v16828_v17  ;;  %v3355_v17 = vld [vmem:[#allocation10 + $0x890] sm:$0xff] }
 0x6ed   :  { %6759 = vmatpush1.bf16.msra.mxu1 %v16830_v2  ;;  %6596 = vmatprep.subr.bf16.mxu0 %v16837_v18  ;;  %v3359_v2 = vld [vmem:[#allocation10 + $0x8b0] sm:$0xff]  ;;  %v16879_v18 = vcombine.high %v3348_v14, %v3352_v15 }
 0x6ee   :  { %6760 = vmatprep.subr.bf16.mxu1 %v16839_v20  ;;  %v3356_v20 = vld [vmem:[#allocation10 + $0x898] sm:$0xff]  ;;  %v16885_v35 = vcombine.high %v3355_v17, %v3359_v2  ;;  %v16884_v44 = vcombine.low %v3355_v17, %v3359_v2  ;;  %v3395_v14 = vld [vmem:[#allocation10 + $0x9d0] sm:$0xff] }
 0x6ef   :  { %v3399_v15 = vld [vmem:[#allocation10 + $0x9f0] sm:$0xff] }
 0x6f0   :  { %6597 = vmatpush1.bf16.msra.mxu0 %v16836_v36  ;;  %v16887_v36 = vcombine.high %v3356_v20, %v3360_v28 }
 0x6f1   :  { %6761 = vmatpush1.bf16.msra.mxu1 %v16838_v37  ;;  %6598 = vmatprep.subr.bf16.mxu0 %v16845_v39  ;;  %v3363_v37 = vld [vmem:[#allocation10 + $0x8d0] sm:$0xff] }
 0x6f2   :  { %6762 = vmatprep.subr.bf16.mxu1 %v16847_v41  ;;  %v3367_v39 = vld [vmem:[#allocation10 + $0x8f0] sm:$0xff]  ;;  %v3364_v41 = vld [vmem:[#allocation10 + $0x8d8] sm:$0xff] }
 0x6f3   :  { %v16893_v47 = vcombine.high %v3363_v37, %v3367_v39  ;;  %v16895_v30 = vcombine.high %v3364_v41, %v3368_v29  ;;  %v16894_v49 = vcombine.low %v3364_v41, %v3368_v29  ;;  %v3411_v29 = vld [vmem:[#allocation10 + $0xa50] sm:$0xff] }
 0x6f4   :  { %6599 = vmatpush1.bf16.msra.mxu0 %v16844_v42  ;;  %v3371_v42 = vld [vmem:[#allocation10 + $0x910] sm:$0xff] }
 0x6f5   :  { %6763 = vmatpush1.bf16.msra.mxu1 %v16846_v48  ;;  %6600 = vmatprep.subr.bf16.mxu0 %v16853_v51  ;;  %v3375_v48 = vld [vmem:[#allocation10 + $0x930] sm:$0xff]  ;;  %v3372_v51 = vld [vmem:[#allocation10 + $0x918] sm:$0xff] }
 0x6f6   :  { %6764 = vmatprep.subr.bf16.mxu1 %v16855_v50  ;;  %v3376_v50 = vld [vmem:[#allocation10 + $0x938] sm:$0xff]  ;;  %v16901_v52 = vcombine.high %v3371_v42, %v3375_v48 }
 0x6f7   :  { %v16903_v43 = vcombine.high %v3372_v51, %v3376_v50  ;;  %v16902_v8 = vcombine.low %v3372_v51, %v3376_v50  ;;  %v3419_v50 = vld [vmem:[#allocation10 + $0xa90] sm:$0xff] }
 0x6f8   :  { %6601 = vmatpush1.bf16.msra.mxu0 %v16852_v7  ;;  %v3383_v7 = vld [vmem:[#allocation10 + $0x970] sm:$0xff] }
 0x6f9   :  { %6765 = vmatpush1.bf16.msra.mxu1 %v16854_v45  ;;  %6602 = vmatprep.subr.bf16.mxu0 %v16861_v55  ;;  %v3380_v45 = vld [vmem:[#allocation10 + $0x958] sm:$0xff]  ;;  %v16909_v57 = vcombine.high %v3379_v53, %v3383_v7 }
 0x6fa   :  { %6766 = vmatprep.subr.bf16.mxu1 %v16863_v56  ;;  %v3384_v55 = vld [vmem:[#allocation10 + $0x978] sm:$0xff]  ;;  %v16900_v56 = vcombine.low %v3371_v42, %v3375_v48 }
 0x6fb   :  { %v16911_v58 = vcombine.high %v3380_v45, %v3384_v55  ;;  %v16910_v63 = vcombine.low %v3380_v45, %v3384_v55  ;;  %v3427_v55 = vld [vmem:[#allocation10 + $0xad0] sm:$0xff] }
 0x6fc   :  { %6603 = vmatpush1.bf16.msra.mxu0 %v16860_v60  ;;  %v3391_v60 = vld [vmem:[#allocation10 + $0x9b0] sm:$0xff] }
 0x6fd   :  { %6767 = vmatpush1.bf16.msra.mxu1 %v16862_v34  ;;  %6613 = vmatprep.subr.bf16.mxu0 %v16869_v62  ;;  %v3388_v34 = vld [vmem:[#allocation10 + $0x998] sm:$0xff]  ;;  %v16917_v10 = vcombine.high %v3387_v59, %v3391_v60  ;;  %v16916_v17 = vcombine.low %v3387_v59, %v3391_v60 }
 0x6fe   :  { %6777 = vmatprep.subr.bf16.mxu1 %v16871_v26  ;;  %v3392_v62 = vld [vmem:[#allocation10 + $0x9b8] sm:$0xff]  ;;  %v16908_v26 = vcombine.low %v3379_v53, %v3383_v7 }
 0x6ff   :  { %6605 = vmatmul.mubr.bf16.vlgmr.msra.gmra.mrb[24].mxu0 %v20103_v40  ;;  %v16918_v2 = vcombine.low %v3388_v34, %v3392_v62 }
 0x700   :  { %6769 = vmatmul.mubr.bf16.vlgmr.msra.gmra.mrb[16].mxu1 %v20103_v40  ;;  %6614 = vmatpush1.bf16.msra.mxu0 %v16868_v13  ;;  %v16886_v40 = vcombine.low %v3356_v20, %v3360_v28  ;;  %v16919_v13 = vcombine.high %v3388_v34, %v3392_v62  ;;  %v3403_v28 = vld [vmem:[#allocation10 + $0xa10] sm:$0xff] }
 0x701   :  { %6645 = vmatprep.mubr.bf16.mxu0 %v20105_v3  ;;  %6778 = vmatpush1.bf16.msra.mxu1 %v16870_v21  ;;  %v3396_v21 = vld [vmem:[#allocation10 + $0x9d8] sm:$0xff]  ;;  %v3435_v62 = vld [vmem:[#allocation10 + $0xb10] sm:$0xff] }
 0x702   :  { %6809 = vmatprep.mubr.bf16.mxu1 %v20105_v3  ;;  %6615 = vmatprep.subr.bf16.mxu0 %v16877_v16  ;;  %v16892_v3 = vcombine.low %v3363_v37, %v3367_v39  ;;  %v3400_v16 = vld [vmem:[#allocation10 + $0x9f8] sm:$0xff] }
 0x703   :  { %6779 = vmatprep.subr.bf16.mxu1 %v16879_v18  ;;  %v16925_v18 = vcombine.high %v3395_v14, %v3399_v15  ;;  %v16927_v20 = vcombine.high %v3396_v21, %v3400_v16  ;;  %v16926_v37 = vcombine.low %v3396_v21, %v3400_v16  ;;  %v3443_v16 = vld [vmem:[#allocation10 + $0xb50] sm:$0xff] }
 0x704   :  { %6616 = vmatpush1.bf16.msra.mxu0 %v16876_v31  ;;  %v3407_v31 = vld [vmem:[#allocation10 + $0xa30] sm:$0xff] }
 0x705   :  { %6780 = vmatpush1.bf16.msra.mxu1 %v16878_v33  ;;  %6617 = vmatprep.subr.bf16.mxu0 %v16885_v35  ;;  %v3404_v33 = vld [vmem:[#allocation10 + $0xa18] sm:$0xff]  ;;  %v16933_v39 = vcombine.high %v3403_v28, %v3407_v31 }
 0x706   :  { %6781 = vmatprep.subr.bf16.mxu1 %v16887_v36  ;;  %v3408_v35 = vld [vmem:[#allocation10 + $0xa38] sm:$0xff]  ;;  %v16924_v36 = vcombine.low %v3395_v14, %v3399_v15 }
 0x707   :  { %v16935_v41 = vcombine.high %v3404_v33, %v3408_v35  ;;  %v16934_v42 = vcombine.low %v3404_v33, %v3408_v35  ;;  %v3451_v35 = vld [vmem:[#allocation10 + $0xb90] sm:$0xff] }
 0x708   :  { %6618 = vmatpush1.bf16.msra.mxu0 %v16884_v44  ;;  %v3415_v44 = vld [vmem:[#allocation10 + $0xa70] sm:$0xff] }
 0x709   :  { %6782 = vmatpush1.bf16.msra.mxu1 %v16886_v40  ;;  %6619 = vmatprep.subr.bf16.mxu0 %v16893_v47  ;;  %v3412_v40 = vld [vmem:[#allocation10 + $0xa58] sm:$0xff]  ;;  %v16941_v48 = vcombine.high %v3411_v29, %v3415_v44 }
 0x70a   :  { %6783 = vmatprep.subr.bf16.mxu1 %v16895_v30  ;;  %v3416_v47 = vld [vmem:[#allocation10 + $0xa78] sm:$0xff]  ;;  %v16932_v30 = vcombine.low %v3403_v28, %v3407_v31 }
 0x70b   :  { %v16943_v51 = vcombine.high %v3412_v40, %v3416_v47  ;;  %v16942_v53 = vcombine.low %v3412_v40, %v3416_v47  ;;  %v3459_v47 = vld [vmem:[#allocation10 + $0xbd0] sm:$0xff] }
 0x70c   :  { %6620 = vmatpush1.bf16.msra.mxu0 %v16892_v3  ;;  %v3423_v3 = vld [vmem:[#allocation10 + $0xab0] sm:$0xff] }
 0x70d   :  { %6784 = vmatpush1.bf16.msra.mxu1 %v16894_v49  ;;  %6621 = vmatprep.subr.bf16.mxu0 %v16901_v52  ;;  %v3420_v49 = vld [vmem:[#allocation10 + $0xa98] sm:$0xff]  ;;  %v16949_v7 = vcombine.high %v3419_v50, %v3423_v3 }
 0x70e   :  { %6785 = vmatprep.subr.bf16.mxu1 %v16903_v43  ;;  %v3424_v52 = vld [vmem:[#allocation10 + $0xab8] sm:$0xff]  ;;  %v16940_v43 = vcombine.low %v3411_v29, %v3415_v44 }
 0x70f   :  { %v16951_v45 = vcombine.high %v3420_v49, %v3424_v52  ;;  %v16950_v59 = vcombine.low %v3420_v49, %v3424_v52  ;;  %v3467_v52 = vld [vmem:[#allocation10 + $0xc10] sm:$0xff] }
 0x710   :  { %6622 = vmatpush1.bf16.msra.mxu0 %v16900_v56  ;;  %v3431_v56 = vld [vmem:[#allocation10 + $0xaf0] sm:$0xff] }
 0x711   :  { %6786 = vmatpush1.bf16.msra.mxu1 %v16902_v8  ;;  %6623 = vmatprep.subr.bf16.mxu0 %v16909_v57  ;;  %v3428_v8 = vld [vmem:[#allocation10 + $0xad8] sm:$0xff]  ;;  %v16957_v60 = vcombine.high %v3427_v55, %v3431_v56 }
 0x712   :  { %6787 = vmatprep.subr.bf16.mxu1 %v16911_v58  ;;  %v3432_v57 = vld [vmem:[#allocation10 + $0xaf8] sm:$0xff]  ;;  %v16948_v58 = vcombine.low %v3419_v50, %v3423_v3 }
 0x713   :  { %v16959_v34 = vcombine.high %v3428_v8, %v3432_v57  ;;  %v16958_v14 = vcombine.low %v3428_v8, %v3432_v57  ;;  %v3475_v57 = vld [vmem:[#allocation10 + $0xc50] sm:$0xff] }
 0x714   :  { %6624 = vmatpush1.bf16.msra.mxu0 %v16908_v26  ;;  %v3439_v26 = vld [vmem:[#allocation10 + $0xb30] sm:$0xff] }
 0x715   :  { %6788 = vmatpush1.bf16.msra.mxu1 %v16910_v63  ;;  %6625 = vmatprep.subr.bf16.mxu0 %v16917_v10  ;;  %v3436_v63 = vld [vmem:[#allocation10 + $0xb18] sm:$0xff]  ;;  %v16965_v15 = vcombine.high %v3435_v62, %v3439_v26 }
 0x716   :  { %6789 = vmatprep.subr.bf16.mxu1 %v16919_v13  ;;  %v3440_v10 = vld [vmem:[#allocation10 + $0xb38] sm:$0xff]  ;;  %v16956_v13 = vcombine.low %v3427_v55, %v3431_v56 }
 0x717   :  { %v16967_v21 = vcombine.high %v3436_v63, %v3440_v10  ;;  %v16966_v28 = vcombine.low %v3436_v63, %v3440_v10  ;;  %v3483_v63 = vld [vmem:[#allocation10 + $0xc90] sm:$0xff] }
 0x718   :  { %6626 = vmatpush1.bf16.msra.mxu0 %v16916_v17  ;;  %v3447_v17 = vld [vmem:[#allocation10 + $0xb70] sm:$0xff] }
 0x719   :  { %6790 = vmatpush1.bf16.msra.mxu1 %v16918_v2  ;;  %6627 = vmatprep.subr.bf16.mxu0 %v16925_v18  ;;  %v3444_v2 = vld [vmem:[#allocation10 + $0xb58] sm:$0xff]  ;;  %v16973_v31 = vcombine.high %v3443_v16, %v3447_v17  ;;  %v3487_v10 = vld [vmem:[#allocation10 + $0xcb0] sm:$0xff] }
 0x71a   :  { %6791 = vmatprep.subr.bf16.mxu1 %v16927_v20  ;;  %v3448_v18 = vld [vmem:[#allocation10 + $0xb78] sm:$0xff]  ;;  %v16964_v20 = vcombine.low %v3435_v62, %v3439_v26 }
 0x71b   :  { %v16975_v33 = vcombine.high %v3444_v2, %v3448_v18  ;;  %v16974_v29 = vcombine.low %v3444_v2, %v3448_v18  ;;  %v3491_v18 = vld [vmem:[#allocation10 + $0xcd0] sm:$0xff] }
 0x71c   :  { %6628 = vmatpush1.bf16.msra.mxu0 %v16924_v36  ;;  %v3455_v36 = vld [vmem:[#allocation10 + $0xbb0] sm:$0xff] }
 0x71d   :  { %6792 = vmatpush1.bf16.msra.mxu1 %v16926_v37  ;;  %6629 = vmatprep.subr.bf16.mxu0 %v16933_v39  ;;  %v3452_v37 = vld [vmem:[#allocation10 + $0xb98] sm:$0xff]  ;;  %v16981_v44 = vcombine.high %v3451_v35, %v3455_v36 }
 0x71e   :  { %6793 = vmatprep.subr.bf16.mxu1 %v16935_v41  ;;  %v3456_v39 = vld [vmem:[#allocation10 + $0xbb8] sm:$0xff]  ;;  %v16972_v41 = vcombine.low %v3443_v16, %v3447_v17  ;;  %v17013_v17 = vcombine.high %v3483_v63, %v3487_v10 }
 0x71f   :  { %v16983_v40 = vcombine.high %v3452_v37, %v3456_v39  ;;  %v16982_v50 = vcombine.low %v3452_v37, %v3456_v39  ;;  %v3499_v37 = vld [vmem:[#allocation10 + $0xd10] sm:$0xff] }
 0x720   :  { %6630 = vmatpush1.bf16.msra.mxu0 %v16932_v30  ;;  %v3463_v30 = vld [vmem:[#allocation10 + $0xbf0] sm:$0xff] }
 0x721   :  { %6794 = vmatpush1.bf16.msra.mxu1 %v16934_v42  ;;  %6631 = vmatprep.subr.bf16.mxu0 %v16941_v48  ;;  %v3460_v42 = vld [vmem:[#allocation10 + $0xbd8] sm:$0xff]  ;;  %v16989_v3 = vcombine.high %v3459_v47, %v3463_v30  ;;  %v3503_v39 = vld [vmem:[#allocation10 + $0xd30] sm:$0xff] }
 0x722   :  { %6795 = vmatprep.subr.bf16.mxu1 %v16943_v51  ;;  %v3464_v48 = vld [vmem:[#allocation10 + $0xbf8] sm:$0xff]  ;;  %v16980_v51 = vcombine.low %v3451_v35, %v3455_v36 }
 0x723   :  { %v16991_v49 = vcombine.high %v3460_v42, %v3464_v48  ;;  %v16990_v55 = vcombine.low %v3460_v42, %v3464_v48  ;;  %v3511_v42 = vld [vmem:[#allocation10 + $0xd70] sm:$0xff]  ;;  %v3508_v48 = vld [vmem:[#allocation10 + $0xd58] sm:$0xff] }
 0x724   :  { %6632 = vmatpush1.bf16.msra.mxu0 %v16940_v43  ;;  %v3471_v43 = vld [vmem:[#allocation10 + $0xc30] sm:$0xff] }
 0x725   :  { %6796 = vmatpush1.bf16.msra.mxu1 %v16942_v53  ;;  %6633 = vmatprep.subr.bf16.mxu0 %v16949_v7  ;;  %v3468_v53 = vld [vmem:[#allocation10 + $0xc18] sm:$0xff]  ;;  %v16997_v56 = vcombine.high %v3467_v52, %v3471_v43 }
 0x726   :  { %6797 = vmatprep.subr.bf16.mxu1 %v16951_v45  ;;  %v3472_v7 = vld [vmem:[#allocation10 + $0xc38] sm:$0xff]  ;;  %v16988_v45 = vcombine.low %v3459_v47, %v3463_v30  ;;  %v3507_v30 = vld [vmem:[#allocation10 + $0xd50] sm:$0xff] }
 0x727   :  { %v16999_v8 = vcombine.high %v3468_v53, %v3472_v7  ;;  %v16998_v62 = vcombine.low %v3468_v53, %v3472_v7  ;;  %v3519_v53 = vld [vmem:[#allocation10 + $0xdb0] sm:$0xff]  ;;  %v3516_v7 = vld [vmem:[#allocation10 + $0xd98] sm:$0xff] }
 0x728   :  { %6634 = vmatpush1.bf16.msra.mxu0 %v16948_v58  ;;  %v3479_v58 = vld [vmem:[#allocation10 + $0xc70] sm:$0xff] }
 0x729   :  { %6798 = vmatpush1.bf16.msra.mxu1 %v16950_v59  ;;  %6635 = vmatprep.subr.bf16.mxu0 %v16957_v60  ;;  %v16996_v59 = vcombine.low %v3467_v52, %v3471_v43  ;;  %v3476_v60 = vld [vmem:[#allocation10 + $0xc58] sm:$0xff]  ;;  %v17005_v26 = vcombine.high %v3475_v57, %v3479_v58  ;;  %v3515_v43 = vld [vmem:[#allocation10 + $0xd90] sm:$0xff] }
 0x72a   :  { %6799 = vmatprep.subr.bf16.mxu1 %v16959_v34  ;;  %v3480_v34 = vld [vmem:[#allocation10 + $0xc78] sm:$0xff] }
 0x72b   :  { %v17006_v16 = vcombine.low %v3476_v60, %v3480_v34 }
 0x72c   :  { %6636 = vmatpush1.bf16.msra.mxu0 %v16956_v13  ;;  %v17007_v13 = vcombine.high %v3476_v60, %v3480_v34  ;;  %v3523_v60 = vld [vmem:[#allocation10 + $0xdd0] sm:$0xff] }
 0x72d   :  { %6800 = vmatpush1.bf16.msra.mxu1 %v16958_v14  ;;  %6637 = vmatprep.subr.bf16.mxu0 %v16965_v15  ;;  %v3484_v14 = vld [vmem:[#allocation10 + $0xc98] sm:$0xff]  ;;  %v3527_v34 = vld [vmem:[#allocation10 + $0xdf0] sm:$0xff] }
 0x72e   :  { %6801 = vmatprep.subr.bf16.mxu1 %v16967_v21  ;;  %v3488_v15 = vld [vmem:[#allocation10 + $0xcb8] sm:$0xff]  ;;  %v17004_v21 = vcombine.low %v3475_v57, %v3479_v58 }
 0x72f   :  { %v17015_v2 = vcombine.high %v3484_v14, %v3488_v15 }
 0x730   :  { %6638 = vmatpush1.bf16.msra.mxu0 %v16964_v20  ;;  %v3495_v20 = vld [vmem:[#allocation10 + $0xcf0] sm:$0xff] }
 0x731   :  { %6802 = vmatpush1.bf16.msra.mxu1 %v16966_v28  ;;  %6639 = vmatprep.subr.bf16.mxu0 %v16973_v31  ;;  %v3492_v28 = vld [vmem:[#allocation10 + $0xcd8] sm:$0xff]  ;;  %v17021_v35 = vcombine.high %v3491_v18, %v3495_v20 }
 0x732   :  { %6803 = vmatprep.subr.bf16.mxu1 %v16975_v33  ;;  %v3496_v31 = vld [vmem:[#allocation10 + $0xcf8] sm:$0xff]  ;;  %v17012_v33 = vcombine.low %v3483_v63, %v3487_v10 }
 0x733   :  { %v17023_v36 = vcombine.high %v3492_v28, %v3496_v31  ;;  %v3524_v63 = vld [vmem:[#allocation10 + $0xdd8] sm:$0xff] }
 0x734   :  { %6640 = vmatpush1.bf16.msra.mxu0 %v16972_v41  ;;  %v3500_v41 = vld [vmem:[#allocation10 + $0xd18] sm:$0xff] }
 0x735   :  { %6804 = vmatpush1.bf16.msra.mxu1 %v16974_v29  ;;  %6641 = vmatprep.subr.bf16.mxu0 %v16981_v44  ;;  %v3504_v29 = vld [vmem:[#allocation10 + $0xd38] sm:$0xff]  ;;  %v17022_v44 = vcombine.low %v3492_v28, %v3496_v31  ;;  %v3535_v28 = vld [vmem:[#allocation10 + $0xe30] sm:$0xff] }
 0x736   :  { %6805 = vmatprep.subr.bf16.mxu1 %v16983_v40  ;;  %v17029_v40 = vcombine.high %v3499_v37, %v3503_v39  ;;  %v17031_v47 = vcombine.high %v3500_v41, %v3504_v29  ;;  %v3528_v10 = vld [vmem:[#allocation10 + $0xdf8] sm:$0xff] }
 0x737   :  { %v3532_v31 = vld [vmem:[#allocation10 + $0xe18] sm:$0xff] }
 0x738   :  { %6642 = vmatpush1.bf16.msra.mxu0 %v16980_v51  ;;  %v3512_v51 = vld [vmem:[#allocation10 + $0xd78] sm:$0xff] }
 0x739   :  { %6806 = vmatpush1.bf16.msra.mxu1 %v16982_v50  ;;  %6643 = vmatprep.subr.bf16.mxu0 %v16989_v3  ;;  %v17028_v50 = vcombine.low %v3499_v37, %v3503_v39  ;;  %v17030_v3 = vcombine.low %v3500_v41, %v3504_v29  ;;  %v17039_v52 = vcombine.high %v3508_v48, %v3512_v51  ;;  %v3539_v39 = vld [vmem:[#allocation10 + $0xe50] sm:$0xff]  ;;  %v3540_v29 = vld [vmem:[#allocation10 + $0xe58] sm:$0xff] }
 0x73a   :  { %6807 = vmatprep.subr.bf16.mxu1 %v16991_v49  ;;  %v17037_v49 = vcombine.high %v3507_v30, %v3511_v42  ;;  %v3543_v41 = vld [vmem:[#allocation10 + $0xe70] sm:$0xff] }
 0x73c   :  { %6644 = vmatpush1.bf16.msra.mxu0 %v16988_v45  ;;  %v3520_v45 = vld [vmem:[#allocation10 + $0xdb8] sm:$0xff] }
 0x73d   :  { %6808 = vmatpush1.bf16.msra.mxu1 %v16990_v55  ;;  %6654 = vmatprep.subr.bf16.mxu0 %v16997_v56  ;;  %v17036_v55 = vcombine.low %v3507_v30, %v3511_v42  ;;  %v17038_v56 = vcombine.low %v3508_v48, %v3512_v51  ;;  %v3547_v42 = vld [vmem:[#allocation10 + $0xe90] sm:$0xff]  ;;  %v3548_v51 = vld [vmem:[#allocation10 + $0xe98] sm:$0xff] }
 0x73e   :  { %6818 = vmatprep.subr.bf16.mxu1 %v16999_v8  ;;  %v17045_v8 = vcombine.high %v3515_v43, %v3519_v53  ;;  %v3551_v48 = vld [vmem:[#allocation10 + $0xeb0] sm:$0xff] }
 0x73f   :  { %6646 = vmatmul.mubr.bf16.vlgmr.msra.gmra.mrb[24].mxu0 %v20123_v54 }
 0x740   :  { %6810 = vmatmul.mubr.bf16.vlgmr.msra.gmra.mrb[16].mxu1 %v20123_v54  ;;  %6655 = vmatpush1.bf16.msra.mxu0 %v16996_v59  ;;  %v17014_v54 = vcombine.low %v3484_v14, %v3488_v15  ;;  %v17047_v59 = vcombine.high %v3516_v7, %v3520_v45  ;;  %v17044_v15 = vcombine.low %v3515_v43, %v3519_v53  ;;  %v3555_v53 = vld [vmem:[#allocation10 + $0xed0] sm:$0xff] }
 0x741   :  { %6686 = vmatprep.mubr.bf16.mxu0 %v20125_v61  ;;  %6819 = vmatpush1.bf16.msra.mxu1 %v16998_v62 }
 0x742   :  { %6850 = vmatprep.mubr.bf16.mxu1 %v20125_v61  ;;  %6656 = vmatprep.subr.bf16.mxu0 %v17005_v26  ;;  %v17020_v61 = vcombine.low %v3491_v18, %v3495_v20  ;;  %v17055_v18 = vcombine.high %v3524_v63, %v3528_v10  ;;  %v3531_v20 = vld [vmem:[#allocation10 + $0xe10] sm:$0xff] }
 0x743   :  { %6820 = vmatprep.subr.bf16.mxu1 %v17007_v13 }
 0x744   :  { %6657 = vmatpush1.bf16.msra.mxu0 %v17004_v21 }
 0x745   :  { %6821 = vmatpush1.bf16.msra.mxu1 %v17006_v16  ;;  %6658 = vmatprep.subr.bf16.mxu0 %v17013_v17  ;;  %v17046_v17 = vcombine.low %v3516_v7, %v3520_v45  ;;  %v3559_v7 = vld [vmem:[#allocation10 + $0xef0] sm:$0xff]  ;;  %v3556_v45 = vld [vmem:[#allocation10 + $0xed8] sm:$0xff] }
 0x746   :  { %6822 = vmatprep.subr.bf16.mxu1 %v17015_v2  ;;  %v17053_v2 = vcombine.high %v3523_v60, %v3527_v34 }
 0x748   :  { %6659 = vmatpush1.bf16.msra.mxu0 %v17012_v33  ;;  %v3536_v33 = vld [vmem:[#allocation10 + $0xe38] sm:$0xff] }
 0x749   :  { %6823 = vmatpush1.bf16.msra.mxu1 %v17014_v54  ;;  %6660 = vmatprep.subr.bf16.mxu0 %v17021_v35  ;;  %v17052_v54 = vcombine.low %v3523_v60, %v3527_v34  ;;  %v17054_v35 = vcombine.low %v3524_v63, %v3528_v10  ;;  %v17063_v37 = vcombine.high %v3532_v31, %v3536_v33  ;;  %v3563_v34 = vld [vmem:[#allocation10 + $0xf10] sm:$0xff]  ;;  %v3564_v10 = vld [vmem:[#allocation10 + $0xf18] sm:$0xff] }
 0x74a   :  { %6824 = vmatprep.subr.bf16.mxu1 %v17023_v36  ;;  %v17061_v36 = vcombine.high %v3531_v20, %v3535_v28  ;;  %v3567_v63 = vld [vmem:[#allocation10 + $0xf30] sm:$0xff] }
 0x74c   :  { %6661 = vmatpush1.bf16.msra.mxu0 %v17020_v61  ;;  %v3544_v61 = vld [vmem:[#allocation10 + $0xe78] sm:$0xff] }
 0x74d   :  { %6825 = vmatpush1.bf16.msra.mxu1 %v17022_v44  ;;  %6662 = vmatprep.subr.bf16.mxu0 %v17029_v40  ;;  %v17060_v44 = vcombine.low %v3531_v20, %v3535_v28  ;;  %v17062_v40 = vcombine.low %v3532_v31, %v3536_v33  ;;  %v17071_v30 = vcombine.high %v3540_v29, %v3544_v61  ;;  %v3576_v20 = vld [vmem:[#allocation10 + $0xf78] sm:$0xff] }
 0x74e   :  { %6826 = vmatprep.subr.bf16.mxu1 %v17031_v47  ;;  %v17069_v47 = vcombine.high %v3539_v39, %v3543_v41  ;;  %v17092_v28 = vcombine.low %v3563_v34, %v3567_v63 }
 0x750   :  { %6663 = vmatpush1.bf16.msra.mxu0 %v17028_v50  ;;  %v3552_v50 = vld [vmem:[#allocation10 + $0xeb8] sm:$0xff] }
 0x751   :  { %6827 = vmatpush1.bf16.msra.mxu1 %v17030_v3  ;;  %6664 = vmatprep.subr.bf16.mxu0 %v17037_v49  ;;  %v17068_v3 = vcombine.low %v3539_v39, %v3543_v41  ;;  %v17070_v49 = vcombine.low %v3540_v29, %v3544_v61  ;;  %v17079_v43 = vcombine.high %v3548_v51, %v3552_v50  ;;  %v3584_v39 = vld [vmem:[#allocation10 + $0xfb8] sm:$0xff] }
 0x752   :  { %v20154_v57 = vpop.f32.mrb[20].mxu0  ;;  %v20156_v58 = vpop.f32.mrb[12].mxu1  ;;  %6828 = vmatprep.subr.bf16.mxu1 %v17039_v52  ;;  %v17077_v52 = vcombine.high %v3547_v42, %v3551_v48 }
 0x753   :  { %v20158_v62 = vpop.f32.mrb[21].mxu0  ;;  %v20160_v26 = vpop.f32.mrb[13].mxu1 }
 0x754   :  { %v6364_v13 = vpop.f32.mrb[22].mxu0  ;;  %v6528_v14 = vpop.f32.mrb[14].mxu1  ;;  %6665 = vmatpush1.bf16.msra.mxu0 %v17036_v55  ;;  %v3560_v55 = vld [vmem:[#allocation10 + $0xef8] sm:$0xff] }
 0x755   :  { %6829 = vmatpush1.bf16.msra.mxu1 %v17038_v56  ;;  %v6365_v21 = vpop.f32.mrb[23].mxu0  ;;  %v6529_v16 = vpop.f32.mrb[15].mxu1  ;;  %6666 = vmatprep.subr.bf16.mxu0 %v17045_v8  ;;  %v17076_v56 = vcombine.low %v3547_v42, %v3551_v48  ;;  %v17078_v8 = vcombine.low %v3548_v51, %v3552_v50  ;;  %v17087_v60 = vcombine.high %v3556_v45, %v3560_v55  ;;  %v3568_v13 = vld [vmem:[#allocation10 + $0xf38] sm:$0xff]  ;;  %v20162_v48 = vld [vmem:[#allocation23] sm:$0xff] }
 0x756   :  { %6830 = vmatprep.subr.bf16.mxu1 %v17047_v59  ;;  %v17085_v59 = vcombine.high %v3555_v53, %v3559_v7  ;;  %v17084_v14 = vcombine.low %v3555_v53, %v3559_v7  ;;  %v17093_v21 = vcombine.high %v3563_v34, %v3567_v63  ;;  %v17095_v16 = vcombine.high %v3564_v10, %v3568_v13  ;;  %v3592_v42 = vld [vmem:[#allocation10 + $0xff8] sm:$0xff]  ;;  %v7507_v7 = vld [vmem:[#allocation26 + $0x400] sm:$0xff] }
 0x757   :  { %v17094_v31 = vcombine.low %v3564_v10, %v3568_v13  ;;  %v1081_v53 = vrot.slane %v20162_v48, %v19982_v9  ;;  %v7387_v63 = vld [vmem:[#allocation26 + $0x40] sm:$0xff] }
 0x758   :  { %6667 = vmatpush1.bf16.msra.mxu0 %v17044_v15  ;;  %v17086_v15 = vcombine.low %v3556_v45, %v3560_v55  ;;  %v7511_v45 = vld [vmem:[#allocation26 + $0x420] sm:$0xff]  ;;  %v1089_v55 = vrot.slane %v20162_v48, %v19992_v27 }
 0x759   :  { %6831 = vmatpush1.bf16.msra.mxu1 %v17046_v17  ;;  %6668 = vmatprep.subr.bf16.mxu0 %v17053_v2  ;;  %v3571_v17 = vld [vmem:[#allocation10 + $0xf50] sm:$0xff]  ;;  %v18576_v34 = vadd.f32 %v20052_v24, %v1081_v53  ;;  %v7391_v10 = vld [vmem:[#allocation26 + $0x60] sm:$0xff] }
 0x75a   :  { %6832 = vmatprep.subr.bf16.mxu1 %v17055_v18  ;;  %v3575_v2 = vld [vmem:[#allocation10 + $0xf70] sm:$0xff]  ;;  %v3572_v18 = vld [vmem:[#allocation10 + $0xf58] sm:$0xff]  ;;  %v18578_v13 = vadd.f32 %v20054_v25, %v1089_v55  ;;  %v17128_v25 = vcombine.low %v7387_v63, %v7391_v10  ;;  %v7423_v53 = vld [vmem:[#allocation26 + $0x160] sm:$0xff] }
 0x75b   :  { %v17101_v33 = vcombine.high %v3571_v17, %v3575_v2  ;;  %v17100_v41 = vcombine.low %v3571_v17, %v3575_v2  ;;  %v17102_v29 = vcombine.low %v3572_v18, %v3576_v20  ;;  %v17129_v17 = vcombine.high %v7387_v63, %v7391_v10  ;;  %v7395_v2 = vld [vmem:[#allocation26 + $0x80] sm:$0xff] }
 0x75c   :  { %6669 = vmatpush1.bf16.msra.mxu0 %v17052_v54  ;;  %v17103_v54 = vcombine.high %v3572_v18, %v3576_v20  ;;  %v7399_v18 = vld [vmem:[#allocation26 + $0xa0] sm:$0xff]  ;;  %v20170_v20 = vpack.c.bf16 %v18576_v34, %v18576_v34 }
 0x75d   :  { %6833 = vmatpush1.bf16.msra.mxu1 %v17054_v35  ;;  %6670 = vmatprep.subr.bf16.mxu0 %v17061_v36  ;;  %v3579_v35 = vld [vmem:[#allocation10 + $0xf90] sm:$0xff]  ;;  %v7431_v34 = vld [vmem:[#allocation26 + $0x1a0] sm:$0xff] }
 0x75e   :  { %6834 = vmatprep.subr.bf16.mxu1 %v17063_v37  ;;  %v3583_v36 = vld [vmem:[#allocation10 + $0xfb0] sm:$0xff]  ;;  %v3580_v37 = vld [vmem:[#allocation10 + $0xf98] sm:$0xff]  ;;  %v7555_v63 = vld [vmem:[#allocation26 + $0x580] sm:$0xff] }
 0x75f   :  { %v17109_v61 = vcombine.high %v3579_v35, %v3583_v36  ;;  %v17108_v51 = vcombine.low %v3579_v35, %v3583_v36  ;;  %v17110_v50 = vcombine.low %v3580_v37, %v3584_v39  ;;  %v17137_v35 = vcombine.high %v7395_v2, %v7399_v18  ;;  %v7559_v10 = vld [vmem:[#allocation26 + $0x5a0] sm:$0xff] }
 0x760   :  { %6671 = vmatpush1.bf16.msra.mxu0 %v17060_v44  ;;  %v17111_v44 = vcombine.high %v3580_v37, %v3584_v39  ;;  %v7403_v37 = vld [vmem:[#allocation26 + $0xc0] sm:$0xff] }
 0x761   :  { %6835 = vmatpush1.bf16.msra.mxu1 %v17062_v40  ;;  %6672 = vmatprep.subr.bf16.mxu0 %v17069_v47  ;;  %v3587_v40 = vld [vmem:[#allocation10 + $0xfd0] sm:$0xff]  ;;  %v7407_v39 = vld [vmem:[#allocation26 + $0xe0] sm:$0xff] }
 0x762   :  { %6836 = vmatprep.subr.bf16.mxu1 %v17071_v30  ;;  %v3591_v47 = vld [vmem:[#allocation10 + $0xff0] sm:$0xff]  ;;  %v3588_v30 = vld [vmem:[#allocation10 + $0xfd8] sm:$0xff] }
 0x764   :  { %6673 = vmatpush1.bf16.msra.mxu0 %v17068_v3  ;;  %v17117_v3 = vcombine.high %v3587_v40, %v3591_v47 }
 0x765   :  { %6837 = vmatpush1.bf16.msra.mxu1 %v17070_v49  ;;  %6674 = vmatprep.subr.bf16.mxu0 %v17077_v52  ;;  %v17119_v49 = vcombine.high %v3588_v30, %v3592_v42  ;;  %v7379_v52 = vld [vmem:[#allocation26] sm:$0xff] }
 0x766   :  { %6838 = vmatprep.subr.bf16.mxu1 %v17079_v43  ;;  %v7383_v43 = vld [vmem:[#allocation26 + $0x20] sm:$0xff] }
 0x768   :  { %6675 = vmatpush1.bf16.msra.mxu0 %v17076_v56  ;;  %v17116_v56 = vcombine.low %v3587_v40, %v3591_v47  ;;  %v7411_v47 = vld [vmem:[#allocation26 + $0x100] sm:$0xff] }
 0x769   :  { %6839 = vmatpush1.bf16.msra.mxu1 %v17078_v8  ;;  %6676 = vmatprep.subr.bf16.mxu0 %v17085_v59  ;;  %v17118_v8 = vcombine.low %v3588_v30, %v3592_v42  ;;  %v17121_v59 = vcombine.high %v7379_v52, %v7383_v43  ;;  %v7415_v30 = vld [vmem:[#allocation26 + $0x120] sm:$0xff] }
 0x76a   :  { %6840 = vmatprep.subr.bf16.mxu1 %v17087_v60  ;;  %v17249_v60 = vcombine.high %v7507_v7, %v7511_v45  ;;  %v7539_v42 = vld [vmem:[#allocation26 + $0x500] sm:$0xff]  ;;  %v17152_v55 = vcombine.low %v7411_v47, %v7415_v30 }
 0x76c   :  { %6677 = vmatpush1.bf16.msra.mxu0 %v17084_v14  ;;  %v17120_v14 = vcombine.low %v7379_v52, %v7383_v43  ;;  %v7419_v43 = vld [vmem:[#allocation26 + $0x140] sm:$0xff] }
 0x76d   :  { %6841 = vmatpush1.bf16.msra.mxu1 %v17086_v15  ;;  %6678 = vmatprep.subr.bf16.mxu0 %v17093_v21  ;;  %v7515_v15 = vld [vmem:[#allocation26 + $0x440] sm:$0xff] }
 0x76e   :  { %6842 = vmatprep.subr.bf16.mxu1 %v17095_v16  ;;  %v7519_v21 = vld [vmem:[#allocation26 + $0x460] sm:$0xff]  ;;  %v17248_v16 = vcombine.low %v7507_v7, %v7511_v45 }
 0x76f   :  { %v17257_v24 = vcombine.high %v7515_v15, %v7519_v21  ;;  %v7547_v7 = vld [vmem:[#allocation26 + $0x540] sm:$0xff] }
 0x770   :  { %6679 = vmatpush1.bf16.msra.mxu0 %v17092_v28  ;;  %v7523_v28 = vld [vmem:[#allocation26 + $0x480] sm:$0xff] }
 0x771   :  { %6843 = vmatpush1.bf16.msra.mxu1 %v17094_v31  ;;  %6680 = vmatprep.subr.bf16.mxu0 %v17101_v33  ;;  %v7527_v31 = vld [vmem:[#allocation26 + $0x4a0] sm:$0xff]  ;;  %v20173_v33 = vpack.c.bf16 %v18578_v13, %v18578_v13  ;;  %v17160_v13 = vcombine.low %v7419_v43, %v7423_v53 }
 0x772   :  { %6844 = vmatprep.subr.bf16.mxu1 %v17103_v54  ;;  %v17256_v54 = vcombine.low %v7515_v15, %v7519_v21  ;;  %v17265_v36 = vcombine.high %v7523_v28, %v7527_v31  ;;  %v7551_v45 = vld [vmem:[#allocation26 + $0x560] sm:$0xff]  ;;  %v17297_v21 = vcombine.high %v7555_v63, %v7559_v10 }
 0x774   :  { %6681 = vmatpush1.bf16.msra.mxu0 %v17100_v41  ;;  %v7531_v41 = vld [vmem:[#allocation26 + $0x4c0] sm:$0xff] }
 0x775   :  { %6845 = vmatpush1.bf16.msra.mxu1 %v17102_v29  ;;  %6682 = vmatprep.subr.bf16.mxu0 %v17109_v61  ;;  %v7535_v29 = vld [vmem:[#allocation26 + $0x4e0] sm:$0xff]  ;;  %v17136_v61 = vcombine.low %v7395_v2, %v7399_v18 }
 0x776   :  { %6846 = vmatprep.subr.bf16.mxu1 %v17111_v44  ;;  %v17145_v44 = vcombine.high %v7403_v37, %v7407_v39  ;;  %v17273_v40 = vcombine.high %v7531_v41, %v7535_v29  ;;  %v7563_v2 = vld [vmem:[#allocation26 + $0x5c0] sm:$0xff] }
 0x777   :  { %v7567_v18 = vld [vmem:[#allocation26 + $0x5e0] sm:$0xff] }
 0x778   :  { %6683 = vmatpush1.bf16.msra.mxu0 %v17108_v51  ;;  %v7543_v51 = vld [vmem:[#allocation26 + $0x520] sm:$0xff] }
 0x779   :  { %6847 = vmatpush1.bf16.msra.mxu1 %v17110_v50  ;;  %6684 = vmatprep.subr.bf16.mxu0 %v17117_v3  ;;  %v17144_v50 = vcombine.low %v7403_v37, %v7407_v39  ;;  %v17272_v3 = vcombine.low %v7531_v41, %v7535_v29  ;;  %v17281_v52 = vcombine.high %v7539_v42, %v7543_v51  ;;  %v7575_v37 = vld [vmem:[#allocation26 + $0x620] sm:$0xff] }
 0x77a   :  { %6848 = vmatprep.subr.bf16.mxu1 %v17119_v49  ;;  %v17153_v49 = vcombine.high %v7411_v47, %v7415_v30  ;;  %v17304_v41 = vcombine.low %v7563_v2, %v7567_v18  ;;  %v7583_v47 = vld [vmem:[#allocation26 + $0x660] sm:$0xff] }
 0x77c   :  { %6685 = vmatpush1.bf16.msra.mxu0 %v17116_v56  ;;  %v17280_v56 = vcombine.low %v7539_v42, %v7543_v51 }
 0x77d   :  { %6849 = vmatpush1.bf16.msra.mxu1 %v17118_v8  ;;  %10459 = vmatprep.subr.bf16.mxu0 %v17121_v59  ;;  %v17161_v8 = vcombine.high %v7419_v43, %v7423_v53  ;;  %v17289_v59 = vcombine.high %v7547_v7, %v7551_v45  ;;  %v7591_v43 = vld [vmem:[#allocation26 + $0x6a0] sm:$0xff] }
 0x77e   :  { %10500 = vmatprep.subr.bf16.mxu1 %v17249_v60  ;;  %v7427_v60 = vld [vmem:[#allocation26 + $0x180] sm:$0xff] }
 0x77f   :  { %6687 = vmatmul.mubr.bf16.vlgmr.msra.gmra.mrb[24].mxu0 %v20136_v32  ;;  %v17169_v15 = vcombine.high %v7427_v60, %v7431_v34 }
 0x780   :  { %6851 = vmatmul.mubr.bf16.vlgmr.msra.gmra.mrb[16].mxu1 %v20136_v32  ;;  %10460 = vmatpush1.bf16.msra.mxu0 %v17120_v14  ;;  %v17264_v32 = vcombine.low %v7523_v28, %v7527_v31  ;;  %v17288_v14 = vcombine.low %v7547_v7, %v7551_v45  ;;  %v17296_v28 = vcombine.low %v7555_v63, %v7559_v10 }
 0x781   :  { %10491 = vmatprep.mubr.bf16.mxu0 %v20170_v20  ;;  %10501 = vmatpush1.bf16.msra.mxu1 %v17248_v16  ;;  %v7435_v16 = vld [vmem:[#allocation26 + $0x1c0] sm:$0xff] }
 0x782   :  { %10532 = vmatprep.mubr.bf16.mxu1 %v20173_v33  ;;  %10461 = vmatprep.subr.bf16.mxu0 %v17129_v17  ;;  %v7439_v17 = vld [vmem:[#allocation26 + $0x1e0] sm:$0xff] }
 0x783   :  { %10502 = vmatprep.subr.bf16.mxu1 %v17257_v24  ;;  %v17168_v24 = vcombine.low %v7427_v60, %v7431_v34  ;;  %v17177_v31 = vcombine.high %v7435_v16, %v7439_v17  ;;  %v17176_v39 = vcombine.low %v7435_v16, %v7439_v17  ;;  %v7599_v60 = vld [vmem:[#allocation26 + $0x6e0] sm:$0xff] }
 0x784   :  { %10462 = vmatpush1.bf16.msra.mxu0 %v17128_v25  ;;  %v17305_v25 = vcombine.high %v7563_v2, %v7567_v18  ;;  %v7607_v16 = vld [vmem:[#allocation26 + $0x720] sm:$0xff] }
 0x785   :  { %10503 = vmatpush1.bf16.msra.mxu1 %v17256_v54  ;;  %10463 = vmatprep.subr.bf16.mxu0 %v17137_v35  ;;  %v7443_v54 = vld [vmem:[#allocation26 + $0x200] sm:$0xff] }
 0x786   :  { %10504 = vmatprep.subr.bf16.mxu1 %v17265_v36  ;;  %v7447_v35 = vld [vmem:[#allocation26 + $0x220] sm:$0xff] }
 0x787   :  { %v7571_v36 = vld [vmem:[#allocation26 + $0x600] sm:$0xff]  ;;  %v17185_v29 = vcombine.high %v7443_v54, %v7447_v35  ;;  %v17184_v30 = vcombine.low %v7443_v54, %v7447_v35 }
 0x788   :  { %10464 = vmatpush1.bf16.msra.mxu0 %v17136_v61  ;;  %v17313_v61 = vcombine.high %v7571_v36, %v7575_v37  ;;  %v17312_v42 = vcombine.low %v7571_v36, %v7575_v37  ;;  %v7615_v54 = vld [vmem:[#allocation26 + $0x760] sm:$0xff] }
 0x789   :  { %10505 = vmatpush1.bf16.msra.mxu1 %v17264_v32  ;;  %10465 = vmatprep.subr.bf16.mxu0 %v17145_v44  ;;  %v7451_v32 = vld [vmem:[#allocation26 + $0x240] sm:$0xff] }
 0x78a   :  { %10506 = vmatprep.subr.bf16.mxu1 %v17273_v40  ;;  %v7455_v44 = vld [vmem:[#allocation26 + $0x260] sm:$0xff] }
 0x78b   :  { %v7579_v40 = vld [vmem:[#allocation26 + $0x640] sm:$0xff]  ;;  %v17193_v51 = vcombine.high %v7451_v32, %v7455_v44  ;;  %v17192_v53 = vcombine.low %v7451_v32, %v7455_v44 }
 0x78c   :  { %10466 = vmatpush1.bf16.msra.mxu0 %v17144_v50  ;;  %v17321_v50 = vcombine.high %v7579_v40, %v7583_v47  ;;  %v17320_v7 = vcombine.low %v7579_v40, %v7583_v47  ;;  %v7623_v32 = vld [vmem:[#allocation26 + $0x7a0] sm:$0xff] }
 0x78d   :  { %10507 = vmatpush1.bf16.msra.mxu1 %v17272_v3  ;;  %10467 = vmatprep.subr.bf16.mxu0 %v17153_v49  ;;  %v7459_v3 = vld [vmem:[#allocation26 + $0x280] sm:$0xff] }
 0x78e   :  { %10508 = vmatprep.subr.bf16.mxu1 %v17281_v52  ;;  %v7463_v49 = vld [vmem:[#allocation26 + $0x2a0] sm:$0xff] }
 0x78f   :  { %v7587_v52 = vld [vmem:[#allocation26 + $0x680] sm:$0xff]  ;;  %v17201_v45 = vcombine.high %v7459_v3, %v7463_v49  ;;  %v17200_v34 = vcombine.low %v7459_v3, %v7463_v49 }
 0x790   :  { %10468 = vmatpush1.bf16.msra.mxu0 %v17152_v55  ;;  %v17329_v55 = vcombine.high %v7587_v52, %v7591_v43  ;;  %v17328_v63 = vcombine.low %v7587_v52, %v7591_v43  ;;  %v7631_v3 = vld [vmem:[#allocation26 + $0x7e0] sm:$0xff]  ;;  %v1077_v52 = vrot.slane %v20162_v48, %v19985_v11 }
 0x791   :  { %10509 = vmatpush1.bf16.msra.mxu1 %v17280_v56  ;;  %10469 = vmatprep.subr.bf16.mxu0 %v17161_v8  ;;  %v7467_v56 = vld [vmem:[#allocation26 + $0x2c0] sm:$0xff] }
 0x792   :  { %10510 = vmatprep.subr.bf16.mxu1 %v17289_v59  ;;  %v7471_v8 = vld [vmem:[#allocation26 + $0x2e0] sm:$0xff] }
 0x793   :  { %v7595_v59 = vld [vmem:[#allocation26 + $0x6c0] sm:$0xff]  ;;  %v17209_v10 = vcombine.high %v7467_v56, %v7471_v8  ;;  %v17208_v17 = vcombine.low %v7467_v56, %v7471_v8  ;;  %v1097_v8 = vrot.slane %v20162_v48, %v20097_v6 }
 0x794   :  { %10470 = vmatpush1.bf16.msra.mxu0 %v17160_v13  ;;  %v17337_v13 = vcombine.high %v7595_v59, %v7599_v60  ;;  %v17336_v2 = vcombine.low %v7595_v59, %v7599_v60  ;;  %v7639_v56 = vld [vmem:[#allocation26 + $0x820] sm:$0xff] }
 0x795   :  { %10511 = vmatpush1.bf16.msra.mxu1 %v17288_v14  ;;  %10471 = vmatprep.subr.bf16.mxu0 %v17169_v15  ;;  %v7475_v14 = vld [vmem:[#allocation26 + $0x300] sm:$0xff] }
 0x796   :  { %10512 = vmatprep.subr.bf16.mxu1 %v17297_v21  ;;  %v7479_v15 = vld [vmem:[#allocation26 + $0x320] sm:$0xff] }
 0x797   :  { %v7603_v21 = vld [vmem:[#allocation26 + $0x700] sm:$0xff]  ;;  %v17217_v18 = vcombine.high %v7475_v14, %v7479_v15  ;;  %v17216_v35 = vcombine.low %v7475_v14, %v7479_v15 }
 0x798   :  { %10472 = vmatpush1.bf16.msra.mxu0 %v17168_v24  ;;  %v17345_v24 = vcombine.high %v7603_v21, %v7607_v16  ;;  %v17344_v36 = vcombine.low %v7603_v21, %v7607_v16  ;;  %v7763_v59 = vld [vmem:[#allocation26 + $0xc00] sm:$0xff]  ;;  %v18580_v16 = vadd.f32 %v20060_v4, %v1097_v8 }
 0x799   :  { %10513 = vmatpush1.bf16.msra.mxu1 %v17296_v28  ;;  %10473 = vmatprep.subr.bf16.mxu0 %v17177_v31  ;;  %v7483_v28 = vld [vmem:[#allocation26 + $0x340] sm:$0xff] }
 0x79a   :  { %10514 = vmatprep.subr.bf16.mxu1 %v17305_v25  ;;  %v7487_v31 = vld [vmem:[#allocation26 + $0x360] sm:$0xff]  ;;  %v20194_v4 = vpack.c.bf16 %v18580_v16, %v18580_v16 }
 0x79b   :  { %v7611_v25 = vld [vmem:[#allocation26 + $0x740] sm:$0xff]  ;;  %v17225_v37 = vcombine.high %v7483_v28, %v7487_v31  ;;  %v17224_v44 = vcombine.low %v7483_v28, %v7487_v31 }
 0x79c   :  { %10474 = vmatpush1.bf16.msra.mxu0 %v17176_v39  ;;  %v17353_v39 = vcombine.high %v7611_v25, %v7615_v54  ;;  %v17352_v40 = vcombine.low %v7611_v25, %v7615_v54  ;;  %v7767_v60 = vld [vmem:[#allocation26 + $0xc20] sm:$0xff] }
 0x79d   :  { %10515 = vmatpush1.bf16.msra.mxu1 %v17304_v41  ;;  %10475 = vmatprep.subr.bf16.mxu0 %v17185_v29  ;;  %v7491_v41 = vld [vmem:[#allocation26 + $0x380] sm:$0xff]  ;;  %v17505_v21 = vcombine.high %v7763_v59, %v7767_v60 }
 0x79e   :  { %10516 = vmatprep.subr.bf16.mxu1 %v17313_v61  ;;  %v7495_v29 = vld [vmem:[#allocation26 + $0x3a0] sm:$0xff] }
 0x79f   :  { %v7619_v61 = vld [vmem:[#allocation26 + $0x780] sm:$0xff]  ;;  %v17233_v47 = vcombine.high %v7491_v41, %v7495_v29  ;;  %v17232_v49 = vcombine.low %v7491_v41, %v7495_v29 }
 0x7a0   :  { %10476 = vmatpush1.bf16.msra.mxu0 %v17184_v30  ;;  %v17361_v30 = vcombine.high %v7619_v61, %v7623_v32  ;;  %v17360_v43 = vcombine.low %v7619_v61, %v7623_v32  ;;  %v7771_v28 = vld [vmem:[#allocation26 + $0xc40] sm:$0xff] }
 0x7a1   :  { %10517 = vmatpush1.bf16.msra.mxu1 %v17312_v42  ;;  %10477 = vmatprep.subr.bf16.mxu0 %v17193_v51  ;;  %v7499_v42 = vld [vmem:[#allocation26 + $0x3c0] sm:$0xff] }
 0x7a2   :  { %10518 = vmatprep.subr.bf16.mxu1 %v17321_v50  ;;  %v7503_v51 = vld [vmem:[#allocation26 + $0x3e0] sm:$0xff] }
 0x7a3   :  { %v7627_v50 = vld [vmem:[#allocation26 + $0x7c0] sm:$0xff] }
 0x7a4   :  { %10478 = vmatpush1.bf16.msra.mxu0 %v17192_v53  ;;  %v17241_v53 = vcombine.high %v7499_v42, %v7503_v51  ;;  %v7775_v31 = vld [vmem:[#allocation26 + $0xc60] sm:$0xff] }
 0x7a5   :  { %10519 = vmatpush1.bf16.msra.mxu1 %v17320_v7  ;;  %10479 = vmatprep.subr.bf16.mxu0 %v17201_v45  ;;  %v1085_v7 = vrot.slane %v20162_v48, %v20015_v38  ;;  %v17369_v45 = vcombine.high %v7627_v50, %v7631_v3  ;;  %v17512_v61 = vcombine.low %v7771_v28, %v7775_v31  ;;  %v7687_v16 = vld [vmem:[#allocation26 + $0x9a0] sm:$0xff] }
 0x7a6   :  { %10520 = vmatprep.subr.bf16.mxu1 %v17329_v55  ;;  %v7635_v55 = vld [vmem:[#allocation26 + $0x800] sm:$0xff] }
 0x7a7   :  { %v17377_v14 = vcombine.high %v7635_v55, %v7639_v56  ;;  %v18577_v15 = vadd.f32 %v20050_v23, %v1085_v7  ;;  %v7799_v7 = vld [vmem:[#allocation26 + $0xd20] sm:$0xff] }
 0x7a8   :  { %10480 = vmatpush1.bf16.msra.mxu0 %v17200_v34  ;;  %v1105_v34 = vrot.slane %v20162_v48, %v20117_v19 }
 0x7a9   :  { %10521 = vmatpush1.bf16.msra.mxu1 %v17328_v63  ;;  %10481 = vmatprep.subr.bf16.mxu0 %v17209_v10  ;;  %v17240_v63 = vcombine.low %v7499_v42, %v7503_v51  ;;  %v18575_v10 = vadd.f32 %v20048_v22, %v1077_v52  ;;  %v17504_v22 = vcombine.low %v7763_v59, %v7767_v60  ;;  %v7791_v42 = vld [vmem:[#allocation26 + $0xce0] sm:$0xff] }
 0x7aa   :  { %10522 = vmatprep.subr.bf16.mxu1 %v17337_v13  ;;  %v17368_v13 = vcombine.low %v7627_v50, %v7631_v3  ;;  %v20192_v54 = vpack.c.bf16 %v18577_v15, %v18577_v15  ;;  %v7667_v52 = vld [vmem:[#allocation26 + $0x900] sm:$0xff] }
 0x7ab   :  { %v20190_v25 = vpack.c.bf16 %v18575_v10, %v18575_v10  ;;  %v7675_v59 = vld [vmem:[#allocation26 + $0x940] sm:$0xff] }
 0x7ac   :  { %10482 = vmatpush1.bf16.msra.mxu0 %v17208_v17  ;;  %v7643_v17 = vld [vmem:[#allocation26 + $0x840] sm:$0xff] }
 0x7ad   :  { %10523 = vmatpush1.bf16.msra.mxu1 %v17336_v2  ;;  %10483 = vmatprep.subr.bf16.mxu0 %v17217_v18  ;;  %v7647_v2 = vld [vmem:[#allocation26 + $0x860] sm:$0xff]  ;;  %v18582_v18 = vadd.f32 %v20062_v5, %v1105_v34  ;;  %v17513_v5 = vcombine.high %v7771_v28, %v7775_v31 }
 0x7ae   :  { %10524 = vmatprep.subr.bf16.mxu1 %v17345_v24  ;;  %v17376_v24 = vcombine.low %v7635_v55, %v7639_v56  ;;  %v17385_v23 = vcombine.high %v7643_v17, %v7647_v2  ;;  %v17384_v29 = vcombine.low %v7643_v17, %v7647_v2  ;;  %v7679_v60 = vld [vmem:[#allocation26 + $0x960] sm:$0xff] }
 0x7af   :  { %v20197_v41 = vpack.c.bf16 %v18582_v18, %v18582_v18  ;;  %v7803_v34 = vld [vmem:[#allocation26 + $0xd40] sm:$0xff]  ;;  %v17416_v18 = vcombine.low %v7675_v59, %v7679_v60 }
 0x7b0   :  { %10484 = vmatpush1.bf16.msra.mxu0 %v17216_v35  ;;  %v7651_v35 = vld [vmem:[#allocation26 + $0x880] sm:$0xff] }
 0x7b1   :  { %10525 = vmatpush1.bf16.msra.mxu1 %v17344_v36  ;;  %10485 = vmatprep.subr.bf16.mxu0 %v17225_v37  ;;  %v7655_v36 = vld [vmem:[#allocation26 + $0x8a0] sm:$0xff] }
 0x7b2   :  { %10526 = vmatprep.subr.bf16.mxu1 %v17353_v39  ;;  %v7779_v37 = vld [vmem:[#allocation26 + $0xc80] sm:$0xff]  ;;  %v17393_v32 = vcombine.high %v7651_v35, %v7655_v36  ;;  %v17392_v51 = vcombine.low %v7651_v35, %v7655_v36 }
 0x7b3   :  { %v7783_v39 = vld [vmem:[#allocation26 + $0xca0] sm:$0xff] }
 0x7b4   :  { %10486 = vmatpush1.bf16.msra.mxu0 %v17224_v44  ;;  %v17521_v44 = vcombine.high %v7779_v37, %v7783_v39  ;;  %v17520_v50 = vcombine.low %v7779_v37, %v7783_v39  ;;  %v7811_v17 = vld [vmem:[#allocation26 + $0xd80] sm:$0xff] }
 0x7b5   :  { %10527 = vmatpush1.bf16.msra.mxu1 %v17352_v40  ;;  %10487 = vmatprep.subr.bf16.mxu0 %v17233_v47  ;;  %v7659_v40 = vld [vmem:[#allocation26 + $0x8c0] sm:$0xff] }
 0x7b6   :  { %10528 = vmatprep.subr.bf16.mxu1 %v17361_v30  ;;  %v7663_v47 = vld [vmem:[#allocation26 + $0x8e0] sm:$0xff] }
 0x7b7   :  { %v7787_v30 = vld [vmem:[#allocation26 + $0xcc0] sm:$0xff]  ;;  %v17401_v3 = vcombine.high %v7659_v40, %v7663_v47 }
 0x7b8   :  { %10488 = vmatpush1.bf16.msra.mxu0 %v17232_v49  ;;  %v17529_v49 = vcombine.high %v7787_v30, %v7791_v42  ;;  %v17528_v55 = vcombine.low %v7787_v30, %v7791_v42  ;;  %v7815_v2 = vld [vmem:[#allocation26 + $0xda0] sm:$0xff] }
 0x7b9   :  { %10529 = vmatpush1.bf16.msra.mxu1 %v17360_v43  ;;  %10489 = vmatprep.subr.bf16.mxu0 %v17241_v53  ;;  %v7671_v43 = vld [vmem:[#allocation26 + $0x920] sm:$0xff]  ;;  %v17553_v31 = vcombine.high %v7811_v17, %v7815_v2  ;;  %v17552_v37 = vcombine.low %v7811_v17, %v7815_v2 }
 0x7ba   :  { %10530 = vmatprep.subr.bf16.mxu1 %v17369_v45  ;;  %v7795_v53 = vld [vmem:[#allocation26 + $0xd00] sm:$0xff]  ;;  %v17400_v45 = vcombine.low %v7659_v40, %v7663_v47  ;;  %v17409_v56 = vcombine.high %v7667_v52, %v7671_v43  ;;  %v17408_v10 = vcombine.low %v7667_v52, %v7671_v43 }
 0x7bb   :  { %v17537_v8 = vcombine.high %v7795_v53, %v7799_v7  ;;  %v7819_v35 = vld [vmem:[#allocation26 + $0xdc0] sm:$0xff] }
 0x7bc   :  { %10490 = vmatpush1.bf16.msra.mxu0 %v17240_v63  ;;  %v7807_v63 = vld [vmem:[#allocation26 + $0xd60] sm:$0xff] }
 0x7bd   :  { %10531 = vmatpush1.bf16.msra.mxu1 %v17368_v13  ;;  %10541 = vmatprep.subr.bf16.mxu0 %v17377_v14  ;;  %v17536_v13 = vcombine.low %v7795_v53, %v7799_v7  ;;  %v17417_v14 = vcombine.high %v7675_v59, %v7679_v60  ;;  %v17545_v15 = vcombine.high %v7803_v34, %v7807_v63  ;;  %v7823_v36 = vld [vmem:[#allocation26 + $0xde0] sm:$0xff] }
 0x7be   :  { %10582 = vmatprep.subr.bf16.mxu1 %v17505_v21  ;;  %v7683_v21 = vld [vmem:[#allocation26 + $0x980] sm:$0xff]  ;;  %v17560_v30 = vcombine.low %v7819_v35, %v7823_v36 }
 0x7bf   :  { %10492 = vmatmul.mubr.bf16.vlgmr.msra.gmra.mrb[28].mxu0 %v20190_v25  ;;  %v17425_v28 = vcombine.high %v7683_v21, %v7687_v16  ;;  %v7831_v40 = vld [vmem:[#allocation26 + $0xe20] sm:$0xff] }
 0x7c0   :  { %10533 = vmatmul.mubr.bf16.vlgmr.msra.gmra.mrb[20].mxu1 %v20192_v54  ;;  %10542 = vmatpush1.bf16.msra.mxu0 %v17376_v24  ;;  %v17544_v24 = vcombine.low %v7803_v34, %v7807_v63  ;;  %v7839_v52 = vld [vmem:[#allocation26 + $0xe60] sm:$0xff] }
 0x7c1   :  { %10573 = vmatprep.mubr.bf16.mxu0 %v20194_v4  ;;  %10583 = vmatpush1.bf16.msra.mxu1 %v17504_v22  ;;  %v7691_v22 = vld [vmem:[#allocation26 + $0x9c0] sm:$0xff] }
 0x7c2   :  { %10614 = vmatprep.mubr.bf16.mxu1 %v20197_v41  ;;  %10543 = vmatprep.subr.bf16.mxu0 %v17385_v23  ;;  %v7695_v23 = vld [vmem:[#allocation26 + $0x9e0] sm:$0xff] }
 0x7c3   :  { %10584 = vmatprep.subr.bf16.mxu1 %v17513_v5  ;;  %v17424_v5 = vcombine.low %v7683_v21, %v7687_v16  ;;  %v17433_v39 = vcombine.high %v7691_v22, %v7695_v23  ;;  %v17432_v47 = vcombine.low %v7691_v22, %v7695_v23  ;;  %v7847_v59 = vld [vmem:[#allocation26 + $0xea0] sm:$0xff] }
 0x7c4   :  { %10544 = vmatpush1.bf16.msra.mxu0 %v17384_v29  ;;  %v17561_v29 = vcombine.high %v7819_v35, %v7823_v36  ;;  %v7855_v21 = vld [vmem:[#allocation26 + $0xee0] sm:$0xff] }
 0x7c5   :  { %10585 = vmatpush1.bf16.msra.mxu1 %v17512_v61  ;;  %10545 = vmatprep.subr.bf16.mxu0 %v17393_v32  ;;  %v7699_v61 = vld [vmem:[#allocation26 + $0xa00] sm:$0xff] }
 0x7c6   :  { %10586 = vmatprep.subr.bf16.mxu1 %v17521_v44  ;;  %v7703_v32 = vld [vmem:[#allocation26 + $0xa20] sm:$0xff] }
 0x7c7   :  { %v7827_v44 = vld [vmem:[#allocation26 + $0xe00] sm:$0xff]  ;;  %v17441_v42 = vcombine.high %v7699_v61, %v7703_v32  ;;  %v17440_v43 = vcombine.low %v7699_v61, %v7703_v32 }
 0x7c8   :  { %10546 = vmatpush1.bf16.msra.mxu0 %v17392_v51  ;;  %v17569_v51 = vcombine.high %v7827_v44, %v7831_v40  ;;  %v17568_v53 = vcombine.low %v7827_v44, %v7831_v40  ;;  %v7863_v22 = vld [vmem:[#allocation26 + $0xf20] sm:$0xff] }
 0x7c9   :  { %10587 = vmatpush1.bf16.msra.mxu1 %v17520_v50  ;;  %10547 = vmatprep.subr.bf16.mxu0 %v17401_v3  ;;  %v7707_v50 = vld [vmem:[#allocation26 + $0xa40] sm:$0xff] }
 0x7ca   :  { %10588 = vmatprep.subr.bf16.mxu1 %v17529_v49  ;;  %v7711_v3 = vld [vmem:[#allocation26 + $0xa60] sm:$0xff] }
 0x7cb   :  { %v7835_v49 = vld [vmem:[#allocation26 + $0xe40] sm:$0xff]  ;;  %v17449_v7 = vcombine.high %v7707_v50, %v7711_v3  ;;  %v17448_v60 = vcombine.low %v7707_v50, %v7711_v3 }
 0x7cc   :  { %10548 = vmatpush1.bf16.msra.mxu0 %v17400_v45  ;;  %v17577_v45 = vcombine.high %v7835_v49, %v7839_v52  ;;  %v17576_v34 = vcombine.low %v7835_v49, %v7839_v52  ;;  %v7871_v61 = vld [vmem:[#allocation26 + $0xf60] sm:$0xff] }
 0x7cd   :  { %10589 = vmatpush1.bf16.msra.mxu1 %v17528_v55  ;;  %10549 = vmatprep.subr.bf16.mxu0 %v17409_v56  ;;  %v7715_v55 = vld [vmem:[#allocation26 + $0xa80] sm:$0xff] }
 0x7ce   :  { %10590 = vmatprep.subr.bf16.mxu1 %v17537_v8  ;;  %v7719_v56 = vld [vmem:[#allocation26 + $0xaa0] sm:$0xff] }
 0x7cf   :  { %v7843_v8 = vld [vmem:[#allocation26 + $0xe80] sm:$0xff]  ;;  %v17457_v63 = vcombine.high %v7715_v55, %v7719_v56  ;;  %v17456_v16 = vcombine.low %v7715_v55, %v7719_v56 }
 0x7d0   :  { %10550 = vmatpush1.bf16.msra.mxu0 %v17408_v10  ;;  %v17585_v10 = vcombine.high %v7843_v8, %v7847_v59  ;;  %v17584_v17 = vcombine.low %v7843_v8, %v7847_v59  ;;  %v7879_v50 = vld [vmem:[#allocation26 + $0xfa0] sm:$0xff]  ;;  %v1093_v8 = vrot.slane %v20162_v48, %v20112_v12 }
 0x7d1   :  { %10591 = vmatpush1.bf16.msra.mxu1 %v17536_v13  ;;  %10551 = vmatprep.subr.bf16.mxu0 %v17417_v14  ;;  %v7723_v13 = vld [vmem:[#allocation26 + $0xac0] sm:$0xff] }
 0x7d2   :  { %10592 = vmatprep.subr.bf16.mxu1 %v17545_v15  ;;  %v7727_v14 = vld [vmem:[#allocation26 + $0xae0] sm:$0xff] }
 0x7d3   :  { %v7851_v15 = vld [vmem:[#allocation26 + $0xec0] sm:$0xff]  ;;  %v17465_v2 = vcombine.high %v7723_v13, %v7727_v14  ;;  %v17464_v23 = vcombine.low %v7723_v13, %v7727_v14  ;;  %v7384_v13 = vld [vmem:[#allocation26 + $0x28] sm:$0xff] }
 0x7d4   :  { %10552 = vmatpush1.bf16.msra.mxu0 %v17416_v18  ;;  %v17593_v18 = vcombine.high %v7851_v15, %v7855_v21  ;;  %v17592_v35 = vcombine.low %v7851_v15, %v7855_v21  ;;  %v7887_v55 = vld [vmem:[#allocation26 + $0xfe0] sm:$0xff]  ;;  %v7508_v14 = vld [vmem:[#allocation26 + $0x408] sm:$0xff] }
 0x7d5   :  { %10593 = vmatpush1.bf16.msra.mxu1 %v17544_v24  ;;  %10553 = vmatprep.subr.bf16.mxu0 %v17425_v28  ;;  %v7731_v24 = vld [vmem:[#allocation26 + $0xb00] sm:$0xff]  ;;  %v7512_v15 = vld [vmem:[#allocation26 + $0x428] sm:$0xff] }
 0x7d6   :  { %10594 = vmatprep.subr.bf16.mxu1 %v17553_v31  ;;  %v7735_v28 = vld [vmem:[#allocation26 + $0xb20] sm:$0xff] }
 0x7d7   :  { %v7859_v31 = vld [vmem:[#allocation26 + $0xf00] sm:$0xff]  ;;  %v17473_v36 = vcombine.high %v7731_v24, %v7735_v28  ;;  %v17472_v32 = vcombine.low %v7731_v24, %v7735_v28  ;;  %v17251_v24 = vcombine.high %v7508_v14, %v7512_v15  ;;  %v7388_v28 = vld [vmem:[#allocation26 + $0x48] sm:$0xff] }
 0x7d8   :  { %10554 = vmatpush1.bf16.msra.mxu0 %v17424_v5  ;;  %v17601_v5 = vcombine.high %v7859_v31, %v7863_v22  ;;  %v17600_v44 = vcombine.low %v7859_v31, %v7863_v22  ;;  %v7516_v22 = vld [vmem:[#allocation26 + $0x448] sm:$0xff] }
 0x7d9   :  { %10595 = vmatpush1.bf16.msra.mxu1 %v17552_v37  ;;  %10555 = vmatprep.subr.bf16.mxu0 %v17433_v39  ;;  %v7739_v37 = vld [vmem:[#allocation26 + $0xb40] sm:$0xff] }
 0x7da   :  { %10596 = vmatprep.subr.bf16.mxu1 %v17561_v29  ;;  %v7743_v39 = vld [vmem:[#allocation26 + $0xb60] sm:$0xff] }
 0x7db   :  { %v7867_v29 = vld [vmem:[#allocation26 + $0xf40] sm:$0xff]  ;;  %v17481_v40 = vcombine.high %v7739_v37, %v7743_v39  ;;  %v17480_v3 = vcombine.low %v7739_v37, %v7743_v39  ;;  %v7396_v37 = vld [vmem:[#allocation26 + $0x88] sm:$0xff] }
 0x7dc   :  { %10556 = vmatpush1.bf16.msra.mxu0 %v17432_v47  ;;  %v17609_v47 = vcombine.high %v7867_v29, %v7871_v61  ;;  %v17608_v49 = vcombine.low %v7867_v29, %v7871_v61  ;;  %v7400_v39 = vld [vmem:[#allocation26 + $0xa8] sm:$0xff] }
 0x7dd   :  { %10597 = vmatpush1.bf16.msra.mxu1 %v17560_v30  ;;  %10557 = vmatprep.subr.bf16.mxu0 %v17441_v42  ;;  %v7747_v30 = vld [vmem:[#allocation26 + $0xb80] sm:$0xff]  ;;  %v7524_v29 = vld [vmem:[#allocation26 + $0x488] sm:$0xff] }
 0x7de   :  { %10598 = vmatprep.subr.bf16.mxu1 %v17569_v51  ;;  %v7751_v42 = vld [vmem:[#allocation26 + $0xba0] sm:$0xff]  ;;  %v7528_v61 = vld [vmem:[#allocation26 + $0x4a8] sm:$0xff] }
 0x7df   :  { %v7875_v51 = vld [vmem:[#allocation26 + $0xf80] sm:$0xff]  ;;  %v17489_v52 = vcombine.high %v7747_v30, %v7751_v42  ;;  %v17488_v56 = vcombine.low %v7747_v30, %v7751_v42  ;;  %v7404_v30 = vld [vmem:[#allocation26 + $0xc8] sm:$0xff] }
 0x7e0   :  { %10558 = vmatpush1.bf16.msra.mxu0 %v17440_v43  ;;  %v17617_v43 = vcombine.high %v7875_v51, %v7879_v50  ;;  %v17616_v59 = vcombine.low %v7875_v51, %v7879_v50  ;;  %v7408_v42 = vld [vmem:[#allocation26 + $0xe8] sm:$0xff] }
 0x7e1   :  { %10599 = vmatpush1.bf16.msra.mxu1 %v17568_v53  ;;  %10559 = vmatprep.subr.bf16.mxu0 %v17449_v7  ;;  %v7755_v53 = vld [vmem:[#allocation26 + $0xbc0] sm:$0xff]  ;;  %v7532_v51 = vld [vmem:[#allocation26 + $0x4c8] sm:$0xff] }
 0x7e2   :  { %10600 = vmatprep.subr.bf16.mxu1 %v17577_v45  ;;  %v7759_v7 = vld [vmem:[#allocation26 + $0xbe0] sm:$0xff]  ;;  %v7536_v50 = vld [vmem:[#allocation26 + $0x4e8] sm:$0xff] }
 0x7e3   :  { %v7883_v45 = vld [vmem:[#allocation26 + $0xfc0] sm:$0xff]  ;;  %v17496_v21 = vcombine.low %v7755_v53, %v7759_v7 }
 0x7e4   :  { %10560 = vmatpush1.bf16.msra.mxu0 %v17448_v60  ;;  %v17497_v60 = vcombine.high %v7755_v53, %v7759_v7  ;;  %v7412_v53 = vld [vmem:[#allocation26 + $0x108] sm:$0xff] }
 0x7e5   :  { %10601 = vmatpush1.bf16.msra.mxu1 %v17576_v34  ;;  %10561 = vmatprep.subr.bf16.mxu0 %v17457_v63  ;;  %v1101_v34 = vrot.slane %v20162_v48, %v20132_v46  ;;  %v17625_v63 = vcombine.high %v7883_v45, %v7887_v55  ;;  %v7392_v48 = vld [vmem:[#allocation26 + $0x68] sm:$0xff] }
 0x7e6   :  { %10602 = vmatprep.subr.bf16.mxu1 %v17585_v10  ;;  %v7380_v10 = vld [vmem:[#allocation26 + $0x8] sm:$0xff] }
 0x7e7   :  { %v17122_v31 = vcombine.low %v7380_v10, %v7384_v13  ;;  %v7416_v7 = vld [vmem:[#allocation26 + $0x128] sm:$0xff] }
 0x7e8   :  { %10562 = vmatpush1.bf16.msra.mxu0 %v17456_v16  ;;  %v18579_v16 = vadd.f32 %v20056_v0, %v1093_v8  ;;  %v17274_v8 = vcombine.low %v7532_v51, %v7536_v50 }
 0x7e9   :  { %10603 = vmatpush1.bf16.msra.mxu1 %v17584_v17  ;;  %10563 = vmatprep.subr.bf16.mxu0 %v17465_v2  ;;  %v17624_v17 = vcombine.low %v7883_v45, %v7887_v55  ;;  %v17123_v2 = vcombine.high %v7380_v10, %v7384_v13  ;;  %v7540_v45 = vld [vmem:[#allocation26 + $0x508] sm:$0xff] }
 0x7ea   :  { %10604 = vmatprep.subr.bf16.mxu1 %v17593_v18  ;;  %v18581_v18 = vadd.f32 %v20058_v1, %v1101_v34  ;;  %v7544_v55 = vld [vmem:[#allocation26 + $0x528] sm:$0xff] }
 0x7eb   :  { %v7420_v34 = vld [vmem:[#allocation26 + $0x148] sm:$0xff] }
 0x7ec   :  { %10564 = vmatpush1.bf16.msra.mxu0 %v17464_v23  ;;  %v7520_v23 = vld [vmem:[#allocation26 + $0x468] sm:$0xff]  ;;  %v20210_v0 = vpack.c.bf16 %v18581_v18, %v18581_v18 }
 0x7ed   :  { %10605 = vmatpush1.bf16.msra.mxu1 %v17592_v35  ;;  %10565 = vmatprep.subr.bf16.mxu0 %v17473_v36  ;;  %v20208_v35 = vpack.c.bf16 %v18579_v16, %v18579_v16  ;;  %v17250_v36 = vcombine.low %v7508_v14, %v7512_v15  ;;  %v17259_v1 = vcombine.high %v7516_v22, %v7520_v23  ;;  %v7548_v10 = vld [vmem:[#allocation26 + $0x548] sm:$0xff] }
 0x7ee   :  { %10606 = vmatprep.subr.bf16.mxu1 %v17601_v5  ;;  %v17131_v5 = vcombine.high %v7388_v28, %v7392_v48  ;;  %v7552_v13 = vld [vmem:[#allocation26 + $0x568] sm:$0xff]  ;;  %v17154_v14 = vcombine.low %v7412_v53, %v7416_v7  ;;  %v17282_v15 = vcombine.low %v7540_v45, %v7544_v55 }
 0x7ef   :  { %v17291_v16 = vcombine.high %v7548_v10, %v7552_v13  ;;  %v7556_v18 = vld [vmem:[#allocation26 + $0x588] sm:$0xff] }
 0x7f0   :  { %10566 = vmatpush1.bf16.msra.mxu0 %v17472_v32  ;;  %v17130_v32 = vcombine.low %v7388_v28, %v7392_v48  ;;  %v17290_v48 = vcombine.low %v7548_v10, %v7552_v13 }
 0x7f1   :  { %10607 = vmatpush1.bf16.msra.mxu1 %v17600_v44  ;;  %10567 = vmatprep.subr.bf16.mxu0 %v17481_v40  ;;  %v17258_v44 = vcombine.low %v7516_v22, %v7520_v23  ;;  %v17139_v40 = vcombine.high %v7396_v37, %v7400_v39  ;;  %v7436_v23 = vld [vmem:[#allocation26 + $0x1c8] sm:$0xff] }
 0x7f2   :  { %10608 = vmatprep.subr.bf16.mxu1 %v17609_v47  ;;  %v17267_v47 = vcombine.high %v7524_v29, %v7528_v61 }
 0x7f4   :  { %10568 = vmatpush1.bf16.msra.mxu0 %v17480_v3  ;;  %v17138_v3 = vcombine.low %v7396_v37, %v7400_v39  ;;  %v7568_v37 = vld [vmem:[#allocation26 + $0x5e8] sm:$0xff] }
 0x7f5   :  { %10609 = vmatpush1.bf16.msra.mxu1 %v17608_v49  ;;  %10569 = vmatprep.subr.bf16.mxu0 %v17489_v52  ;;  %v17266_v49 = vcombine.low %v7524_v29, %v7528_v61  ;;  %v17147_v52 = vcombine.high %v7404_v30, %v7408_v42 }
 0x7f6   :  { %10610 = vmatprep.subr.bf16.mxu1 %v17617_v43  ;;  %v17275_v43 = vcombine.high %v7532_v51, %v7536_v50 }
 0x7f8   :  { %10570 = vmatpush1.bf16.msra.mxu0 %v17488_v56  ;;  %v17146_v56 = vcombine.low %v7404_v30, %v7408_v42 }
 0x7f9   :  { %10611 = vmatpush1.bf16.msra.mxu1 %v17616_v59  ;;  %10571 = vmatprep.subr.bf16.mxu0 %v17497_v60  ;;  %v17155_v59 = vcombine.high %v7412_v53, %v7416_v7  ;;  %v17283_v60 = vcombine.high %v7540_v45, %v7544_v55 }
 0x7fa   :  { %10612 = vmatprep.subr.bf16.mxu1 %v17625_v63  ;;  %v7424_v63 = vld [vmem:[#allocation26 + $0x168] sm:$0xff] }
 0x7fb   :  { %v17162_v28 = vcombine.low %v7420_v34, %v7424_v63 }
 0x7fc   :  { %10572 = vmatpush1.bf16.msra.mxu0 %v17496_v21  ;;  %v17163_v21 = vcombine.high %v7420_v34, %v7424_v63 }
 0x7fd   :  { %10613 = vmatpush1.bf16.msra.mxu1 %v17624_v17  ;;  %10623 = vmatprep.subr.bf16.mxu0 %v17123_v2  ;;  %v7428_v17 = vld [vmem:[#allocation26 + $0x188] sm:$0xff] }
 0x7fe   :  { %10664 = vmatprep.subr.bf16.mxu1 %v17251_v24  ;;  %v7432_v2 = vld [vmem:[#allocation26 + $0x1a8] sm:$0xff] }
 0x7ff   :  { %10574 = vmatmul.mubr.bf16.vlgmr.msra.gmra.mrb[32].mxu0 %v20208_v35  ;;  %v7560_v24 = vld [vmem:[#allocation26 + $0x5a8] sm:$0xff]  ;;  %v17170_v39 = vcombine.low %v7428_v17, %v7432_v2 }
 0x800   :  { %10615 = vmatmul.mubr.bf16.vlgmr.msra.gmra.mrb[24].mxu1 %v20210_v0  ;;  %10624 = vmatpush1.bf16.msra.mxu0 %v17122_v31  ;;  %v17171_v31 = vcombine.high %v7428_v17, %v7432_v2  ;;  %v17299_v22 = vcombine.high %v7556_v18, %v7560_v24 }
 0x801   :  { %10655 = vmatprep.mubr.bf16.mxu0 %v20170_v20  ;;  %10665 = vmatpush1.bf16.msra.mxu1 %v17250_v36  ;;  %v7440_v36 = vld [vmem:[#allocation26 + $0x1e8] sm:$0xff] }
 0x802   :  { %10696 = vmatprep.mubr.bf16.mxu1 %v20173_v33  ;;  %10625 = vmatprep.subr.bf16.mxu0 %v17131_v5  ;;  %v7564_v5 = vld [vmem:[#allocation26 + $0x5c8] sm:$0xff]  ;;  %v17179_v29 = vcombine.high %v7436_v23, %v7440_v36  ;;  %v17178_v30 = vcombine.low %v7436_v23, %v7440_v36 }
 0x803   :  { %10666 = vmatprep.subr.bf16.mxu1 %v17259_v1  ;;  %v17298_v1 = vcombine.low %v7556_v18, %v7560_v24  ;;  %v17307_v61 = vcombine.high %v7564_v5, %v7568_v37  ;;  %v17306_v42 = vcombine.low %v7564_v5, %v7568_v37 }
 0x804   :  { %10626 = vmatpush1.bf16.msra.mxu0 %v17130_v32  ;;  %v7444_v32 = vld [vmem:[#allocation26 + $0x208] sm:$0xff] }
 0x805   :  { %10667 = vmatpush1.bf16.msra.mxu1 %v17258_v44  ;;  %10627 = vmatprep.subr.bf16.mxu0 %v17139_v40  ;;  %v7448_v44 = vld [vmem:[#allocation26 + $0x228] sm:$0xff] }
 0x806   :  { %10668 = vmatprep.subr.bf16.mxu1 %v17267_v47  ;;  %v7572_v40 = vld [vmem:[#allocation26 + $0x608] sm:$0xff]  ;;  %v17187_v51 = vcombine.high %v7444_v32, %v7448_v44  ;;  %v17186_v53 = vcombine.low %v7444_v32, %v7448_v44 }
 0x807   :  { %v7576_v47 = vld [vmem:[#allocation26 + $0x628] sm:$0xff] }
 0x808   :  { %10628 = vmatpush1.bf16.msra.mxu0 %v17138_v3  ;;  %v17315_v50 = vcombine.high %v7572_v40, %v7576_v47  ;;  %v7452_v3 = vld [vmem:[#allocation26 + $0x248] sm:$0xff]  ;;  %v17314_v7 = vcombine.low %v7572_v40, %v7576_v47 }
 0x809   :  { %10669 = vmatpush1.bf16.msra.mxu1 %v17266_v49  ;;  %10629 = vmatprep.subr.bf16.mxu0 %v17147_v52  ;;  %v7456_v49 = vld [vmem:[#allocation26 + $0x268] sm:$0xff] }
 0x80a   :  { %10670 = vmatprep.subr.bf16.mxu1 %v17275_v43  ;;  %v7580_v52 = vld [vmem:[#allocation26 + $0x648] sm:$0xff]  ;;  %v17195_v45 = vcombine.high %v7452_v3, %v7456_v49  ;;  %v17194_v34 = vcombine.low %v7452_v3, %v7456_v49 }
 0x80b   :  { %v7584_v43 = vld [vmem:[#allocation26 + $0x668] sm:$0xff] }
 0x80c   :  { %10630 = vmatpush1.bf16.msra.mxu0 %v17146_v56  ;;  %v17323_v55 = vcombine.high %v7580_v52, %v7584_v43  ;;  %v7460_v56 = vld [vmem:[#allocation26 + $0x288] sm:$0xff]  ;;  %v17322_v63 = vcombine.low %v7580_v52, %v7584_v43 }
 0x80d   :  { %10671 = vmatpush1.bf16.msra.mxu1 %v17274_v8  ;;  %10631 = vmatprep.subr.bf16.mxu0 %v17155_v59  ;;  %v7464_v8 = vld [vmem:[#allocation26 + $0x2a8] sm:$0xff] }
 0x80e   :  { %10672 = vmatprep.subr.bf16.mxu1 %v17283_v60  ;;  %v7588_v59 = vld [vmem:[#allocation26 + $0x688] sm:$0xff]  ;;  %v17203_v10 = vcombine.high %v7460_v56, %v7464_v8  ;;  %v17202_v17 = vcombine.low %v7460_v56, %v7464_v8 }
 0x80f   :  { %v7592_v60 = vld [vmem:[#allocation26 + $0x6a8] sm:$0xff] }
 0x810   :  { %10632 = vmatpush1.bf16.msra.mxu0 %v17154_v14  ;;  %v17331_v13 = vcombine.high %v7588_v59, %v7592_v60  ;;  %v7468_v14 = vld [vmem:[#allocation26 + $0x2c8] sm:$0xff]  ;;  %v17330_v2 = vcombine.low %v7588_v59, %v7592_v60 }
 0x811   :  { %10673 = vmatpush1.bf16.msra.mxu1 %v17282_v15  ;;  %10633 = vmatprep.subr.bf16.mxu0 %v17163_v21  ;;  %v7472_v15 = vld [vmem:[#allocation26 + $0x2e8] sm:$0xff] }
 0x812   :  { %10674 = vmatprep.subr.bf16.mxu1 %v17291_v16  ;;  %v7596_v21 = vld [vmem:[#allocation26 + $0x6c8] sm:$0xff]  ;;  %v17211_v18 = vcombine.high %v7468_v14, %v7472_v15  ;;  %v17210_v23 = vcombine.low %v7468_v14, %v7472_v15 }
 0x813   :  { %v7600_v16 = vld [vmem:[#allocation26 + $0x6e8] sm:$0xff] }
 0x814   :  { %10634 = vmatpush1.bf16.msra.mxu0 %v17162_v28  ;;  %v17339_v24 = vcombine.high %v7596_v21, %v7600_v16  ;;  %v7476_v28 = vld [vmem:[#allocation26 + $0x308] sm:$0xff]  ;;  %v17338_v36 = vcombine.low %v7596_v21, %v7600_v16 }
 0x815   :  { %10675 = vmatpush1.bf16.msra.mxu1 %v17290_v48  ;;  %10635 = vmatprep.subr.bf16.mxu0 %v17171_v31  ;;  %v7480_v48 = vld [vmem:[#allocation26 + $0x328] sm:$0xff] }
 0x816   :  { %10676 = vmatprep.subr.bf16.mxu1 %v17299_v22  ;;  %v7604_v31 = vld [vmem:[#allocation26 + $0x708] sm:$0xff]  ;;  %v17219_v5 = vcombine.high %v7476_v28, %v7480_v48  ;;  %v17218_v32 = vcombine.low %v7476_v28, %v7480_v48 }
 0x817   :  { %v7608_v22 = vld [vmem:[#allocation26 + $0x728] sm:$0xff] }
 0x818   :  { %10636 = vmatpush1.bf16.msra.mxu0 %v17170_v39  ;;  %v17347_v37 = vcombine.high %v7604_v31, %v7608_v22  ;;  %v7484_v39 = vld [vmem:[#allocation26 + $0x348] sm:$0xff]  ;;  %v17346_v44 = vcombine.low %v7604_v31, %v7608_v22 }
 0x819   :  { %10677 = vmatpush1.bf16.msra.mxu1 %v17298_v1  ;;  %10637 = vmatprep.subr.bf16.mxu0 %v17179_v29  ;;  %v7488_v1 = vld [vmem:[#allocation26 + $0x368] sm:$0xff] }
 0x81a   :  { %10678 = vmatprep.subr.bf16.mxu1 %v17307_v61  ;;  %v7612_v29 = vld [vmem:[#allocation26 + $0x748] sm:$0xff]  ;;  %v17227_v40 = vcombine.high %v7484_v39, %v7488_v1  ;;  %v17226_v3 = vcombine.low %v7484_v39, %v7488_v1 }
 0x81b   :  { %v7616_v61 = vld [vmem:[#allocation26 + $0x768] sm:$0xff] }
 0x81c   :  { %10638 = vmatpush1.bf16.msra.mxu0 %v17178_v30  ;;  %v17355_v47 = vcombine.high %v7612_v29, %v7616_v61  ;;  %v7492_v30 = vld [vmem:[#allocation26 + $0x388] sm:$0xff]  ;;  %v17354_v49 = vcombine.low %v7612_v29, %v7616_v61 }
 0x81d   :  { %10679 = vmatpush1.bf16.msra.mxu1 %v17306_v42  ;;  %10639 = vmatprep.subr.bf16.mxu0 %v17187_v51  ;;  %v7496_v42 = vld [vmem:[#allocation26 + $0x3a8] sm:$0xff] }
 0x81e   :  { %10680 = vmatprep.subr.bf16.mxu1 %v17315_v50  ;;  %v7620_v51 = vld [vmem:[#allocation26 + $0x788] sm:$0xff]  ;;  %v17235_v52 = vcombine.high %v7492_v30, %v7496_v42  ;;  %v17234_v56 = vcombine.low %v7492_v30, %v7496_v42 }
 0x81f   :  { %v7624_v50 = vld [vmem:[#allocation26 + $0x7a8] sm:$0xff] }
 0x820   :  { %10640 = vmatpush1.bf16.msra.mxu0 %v17186_v53  ;;  %v17363_v43 = vcombine.high %v7620_v51, %v7624_v50  ;;  %v7500_v53 = vld [vmem:[#allocation26 + $0x3c8] sm:$0xff]  ;;  %v17362_v8 = vcombine.low %v7620_v51, %v7624_v50 }
 0x821   :  { %10681 = vmatpush1.bf16.msra.mxu1 %v17314_v7  ;;  %10641 = vmatprep.subr.bf16.mxu0 %v17195_v45  ;;  %v7504_v7 = vld [vmem:[#allocation26 + $0x3e8] sm:$0xff] }
 0x822   :  { %10682 = vmatprep.subr.bf16.mxu1 %v17323_v55  ;;  %v7628_v45 = vld [vmem:[#allocation26 + $0x7c8] sm:$0xff]  ;;  %v17243_v59 = vcombine.high %v7500_v53, %v7504_v7  ;;  %v17242_v14 = vcombine.low %v7500_v53, %v7504_v7 }
 0x823   :  { %v7632_v55 = vld [vmem:[#allocation26 + $0x7e8] sm:$0xff] }
 0x824   :  { %10642 = vmatpush1.bf16.msra.mxu0 %v17194_v34  ;;  %v17371_v60 = vcombine.high %v7628_v45, %v7632_v55  ;;  %v7636_v34 = vld [vmem:[#allocation26 + $0x808] sm:$0xff]  ;;  %v17370_v15 = vcombine.low %v7628_v45, %v7632_v55 }
 0x825   :  { %10683 = vmatpush1.bf16.msra.mxu1 %v17322_v63  ;;  %10643 = vmatprep.subr.bf16.mxu0 %v17203_v10  ;;  %v7640_v63 = vld [vmem:[#allocation26 + $0x828] sm:$0xff] }
 0x826   :  { %10684 = vmatprep.subr.bf16.mxu1 %v17331_v13  ;;  %v7764_v10 = vld [vmem:[#allocation26 + $0xc08] sm:$0xff]  ;;  %v17379_v21 = vcombine.high %v7636_v34, %v7640_v63 }
 0x827   :  { %v7768_v13 = vld [vmem:[#allocation26 + $0xc28] sm:$0xff] }
 0x828   :  { %10644 = vmatpush1.bf16.msra.mxu0 %v17202_v17  ;;  %v17507_v16 = vcombine.high %v7764_v10, %v7768_v13  ;;  %v7644_v17 = vld [vmem:[#allocation26 + $0x848] sm:$0xff]  ;;  %v17506_v48 = vcombine.low %v7764_v10, %v7768_v13 }
 0x829   :  { %10685 = vmatpush1.bf16.msra.mxu1 %v17330_v2  ;;  %10645 = vmatprep.subr.bf16.mxu0 %v17211_v18  ;;  %v7648_v2 = vld [vmem:[#allocation26 + $0x868] sm:$0xff]  ;;  %v17378_v18 = vcombine.low %v7636_v34, %v7640_v63 }
 0x82a   :  { %10686 = vmatprep.subr.bf16.mxu1 %v17339_v24  ;;  %v7772_v24 = vld [vmem:[#allocation26 + $0xc48] sm:$0xff]  ;;  %v17387_v31 = vcombine.high %v7644_v17, %v7648_v2  ;;  %v17386_v39 = vcombine.low %v7644_v17, %v7648_v2 }
 0x82b   :  { %v7776_v28 = vld [vmem:[#allocation26 + $0xc68] sm:$0xff] }
 0x82c   :  { %10646 = vmatpush1.bf16.msra.mxu0 %v17210_v23  ;;  %v7652_v22 = vld [vmem:[#allocation26 + $0x888] sm:$0xff]  ;;  %v17514_v1 = vcombine.low %v7772_v24, %v7776_v28 }
 0x82d   :  { %10687 = vmatpush1.bf16.msra.mxu1 %v17338_v36  ;;  %10647 = vmatprep.subr.bf16.mxu0 %v17219_v5  ;;  %v7656_v23 = vld [vmem:[#allocation26 + $0x8a8] sm:$0xff]  ;;  %v17515_v36 = vcombine.high %v7772_v24, %v7776_v28 }
 0x82e   :  { %10688 = vmatprep.subr.bf16.mxu1 %v17347_v37  ;;  %v7780_v5 = vld [vmem:[#allocation26 + $0xc88] sm:$0xff]  ;;  %v17395_v29 = vcombine.high %v7652_v22, %v7656_v23  ;;  %v17394_v30 = vcombine.low %v7652_v22, %v7656_v23 }
 0x82f   :  { %v7784_v37 = vld [vmem:[#allocation26 + $0xca8] sm:$0xff] }
 0x830   :  { %10648 = vmatpush1.bf16.msra.mxu0 %v17218_v32  ;;  %v17523_v61 = vcombine.high %v7780_v5, %v7784_v37  ;;  %v7660_v32 = vld [vmem:[#allocation26 + $0x8c8] sm:$0xff]  ;;  %v17522_v42 = vcombine.low %v7780_v5, %v7784_v37 }
 0x831   :  { %10689 = vmatpush1.bf16.msra.mxu1 %v17346_v44  ;;  %10649 = vmatprep.subr.bf16.mxu0 %v17227_v40  ;;  %v7664_v44 = vld [vmem:[#allocation26 + $0x8e8] sm:$0xff] }
 0x832   :  { %10690 = vmatprep.subr.bf16.mxu1 %v17355_v47  ;;  %v7788_v40 = vld [vmem:[#allocation26 + $0xcc8] sm:$0xff]  ;;  %v17403_v51 = vcombine.high %v7660_v32, %v7664_v44  ;;  %v17402_v53 = vcombine.low %v7660_v32, %v7664_v44 }
 0x833   :  { %v7792_v47 = vld [vmem:[#allocation26 + $0xce8] sm:$0xff] }
 0x834   :  { %10650 = vmatpush1.bf16.msra.mxu0 %v17226_v3  ;;  %v17531_v50 = vcombine.high %v7788_v40, %v7792_v47  ;;  %v7668_v3 = vld [vmem:[#allocation26 + $0x908] sm:$0xff]  ;;  %v17530_v7 = vcombine.low %v7788_v40, %v7792_v47 }
 0x835   :  { %10691 = vmatpush1.bf16.msra.mxu1 %v17354_v49  ;;  %10651 = vmatprep.subr.bf16.mxu0 %v17235_v52  ;;  %v7672_v49 = vld [vmem:[#allocation26 + $0x928] sm:$0xff] }
 0x836   :  { %10692 = vmatprep.subr.bf16.mxu1 %v17363_v43  ;;  %v7796_v52 = vld [vmem:[#allocation26 + $0xd08] sm:$0xff]  ;;  %v17411_v45 = vcombine.high %v7668_v3, %v7672_v49  ;;  %v17410_v34 = vcombine.low %v7668_v3, %v7672_v49 }
 0x837   :  { %v7800_v43 = vld [vmem:[#allocation26 + $0xd28] sm:$0xff] }
 0x838   :  { %10652 = vmatpush1.bf16.msra.mxu0 %v17234_v56  ;;  %v17539_v55 = vcombine.high %v7796_v52, %v7800_v43  ;;  %v7676_v56 = vld [vmem:[#allocation26 + $0x948] sm:$0xff]  ;;  %v17538_v63 = vcombine.low %v7796_v52, %v7800_v43 }
 0x839   :  { %10693 = vmatpush1.bf16.msra.mxu1 %v17362_v8  ;;  %10653 = vmatprep.subr.bf16.mxu0 %v17243_v59  ;;  %v7680_v8 = vld [vmem:[#allocation26 + $0x968] sm:$0xff] }
 0x83a   :  { %10694 = vmatprep.subr.bf16.mxu1 %v17371_v60  ;;  %v7804_v59 = vld [vmem:[#allocation26 + $0xd48] sm:$0xff]  ;;  %v17419_v10 = vcombine.high %v7676_v56, %v7680_v8  ;;  %v17418_v17 = vcombine.low %v7676_v56, %v7680_v8 }
 0x83b   :  { %v7808_v60 = vld [vmem:[#allocation26 + $0xd68] sm:$0xff] }
 0x83c   :  { %10654 = vmatpush1.bf16.msra.mxu0 %v17242_v14  ;;  %v17547_v13 = vcombine.high %v7804_v59, %v7808_v60  ;;  %v7684_v14 = vld [vmem:[#allocation26 + $0x988] sm:$0xff]  ;;  %v17546_v2 = vcombine.low %v7804_v59, %v7808_v60 }
 0x83d   :  { %10695 = vmatpush1.bf16.msra.mxu1 %v17370_v15  ;;  %10705 = vmatprep.subr.bf16.mxu0 %v17379_v21  ;;  %v7688_v15 = vld [vmem:[#allocation26 + $0x9a8] sm:$0xff] }
 0x83e   :  { %10746 = vmatprep.subr.bf16.mxu1 %v17507_v16  ;;  %v7812_v21 = vld [vmem:[#allocation26 + $0xd88] sm:$0xff] }
 0x83f   :  { %10656 = vmatmul.mubr.bf16.vlgmr.msra.gmra.mrb[36].mxu0 %v20190_v25  ;;  %v7816_v16 = vld [vmem:[#allocation26 + $0xda8] sm:$0xff] }
 0x840   :  { %10697 = vmatmul.mubr.bf16.vlgmr.msra.gmra.mrb[28].mxu1 %v20192_v54  ;;  %10706 = vmatpush1.bf16.msra.mxu0 %v17378_v18  ;;  %v17427_v18 = vcombine.high %v7684_v14, %v7688_v15  ;;  %v17555_v28 = vcombine.high %v7812_v21, %v7816_v16  ;;  %v7824_v5 = vld [vmem:[#allocation26 + $0xde8] sm:$0xff]  ;;  %v17554_v32 = vcombine.low %v7812_v21, %v7816_v16 }
 0x841   :  { %10737 = vmatprep.mubr.bf16.mxu0 %v20194_v4  ;;  %10747 = vmatpush1.bf16.msra.mxu1 %v17506_v48  ;;  %v7692_v48 = vld [vmem:[#allocation26 + $0x9c8] sm:$0xff] }
 0x842   :  { %10778 = vmatprep.mubr.bf16.mxu1 %v20197_v41  ;;  %10707 = vmatprep.subr.bf16.mxu0 %v17387_v31  ;;  %v7696_v31 = vld [vmem:[#allocation26 + $0x9e8] sm:$0xff] }
 0x843   :  { %10748 = vmatprep.subr.bf16.mxu1 %v17515_v36  ;;  %v7820_v36 = vld [vmem:[#allocation26 + $0xdc8] sm:$0xff]  ;;  %v17435_v44 = vcombine.high %v7692_v48, %v7696_v31  ;;  %v17434_v3 = vcombine.low %v7692_v48, %v7696_v31 }
 0x844   :  { %10708 = vmatpush1.bf16.msra.mxu0 %v17386_v39  ;;  %v17563_v47 = vcombine.high %v7820_v36, %v7824_v5  ;;  %v17562_v49 = vcombine.low %v7820_v36, %v7824_v5 }
 0x845   :  { %10749 = vmatpush1.bf16.msra.mxu1 %v17514_v1  ;;  %10709 = vmatprep.subr.bf16.mxu0 %v17395_v29  ;;  %v17426_v1 = vcombine.low %v7684_v14, %v7688_v15 }
 0x846   :  { %10750 = vmatprep.subr.bf16.mxu1 %v17523_v61 }
 0x848   :  { %10710 = vmatpush1.bf16.msra.mxu0 %v17394_v30  ;;  %v7700_v30 = vld [vmem:[#allocation26 + $0xa08] sm:$0xff] }
 0x849   :  { %10751 = vmatpush1.bf16.msra.mxu1 %v17522_v42  ;;  %10711 = vmatprep.subr.bf16.mxu0 %v17403_v51  ;;  %v7704_v42 = vld [vmem:[#allocation26 + $0xa28] sm:$0xff] }
 0x84a   :  { %10752 = vmatprep.subr.bf16.mxu1 %v17531_v50  ;;  %v7828_v51 = vld [vmem:[#allocation26 + $0xe08] sm:$0xff]  ;;  %v17443_v52 = vcombine.high %v7700_v30, %v7704_v42  ;;  %v17442_v56 = vcombine.low %v7700_v30, %v7704_v42 }
 0x84b   :  { %v7832_v50 = vld [vmem:[#allocation26 + $0xe28] sm:$0xff] }
 0x84c   :  { %10712 = vmatpush1.bf16.msra.mxu0 %v17402_v53  ;;  %v17571_v43 = vcombine.high %v7828_v51, %v7832_v50  ;;  %v7708_v53 = vld [vmem:[#allocation26 + $0xa48] sm:$0xff]  ;;  %v17570_v8 = vcombine.low %v7828_v51, %v7832_v50 }
 0x84d   :  { %10753 = vmatpush1.bf16.msra.mxu1 %v17530_v7  ;;  %10713 = vmatprep.subr.bf16.mxu0 %v17411_v45  ;;  %v7712_v7 = vld [vmem:[#allocation26 + $0xa68] sm:$0xff] }
 0x84e   :  { %10754 = vmatprep.subr.bf16.mxu1 %v17539_v55  ;;  %v7836_v45 = vld [vmem:[#allocation26 + $0xe48] sm:$0xff]  ;;  %v17451_v59 = vcombine.high %v7708_v53, %v7712_v7  ;;  %v17450_v14 = vcombine.low %v7708_v53, %v7712_v7 }
 0x84f   :  { %v7840_v55 = vld [vmem:[#allocation26 + $0xe68] sm:$0xff] }
 0x850   :  { %10714 = vmatpush1.bf16.msra.mxu0 %v17410_v34  ;;  %v17579_v60 = vcombine.high %v7836_v45, %v7840_v55  ;;  %v7716_v34 = vld [vmem:[#allocation26 + $0xa88] sm:$0xff]  ;;  %v17578_v15 = vcombine.low %v7836_v45, %v7840_v55 }
 0x851   :  { %10755 = vmatpush1.bf16.msra.mxu1 %v17538_v63  ;;  %10715 = vmatprep.subr.bf16.mxu0 %v17419_v10  ;;  %v7720_v63 = vld [vmem:[#allocation26 + $0xaa8] sm:$0xff] }
 0x852   :  { %v20220_v24 = vpop.f32.mrb[24].mxu0  ;;  %10756 = vmatprep.subr.bf16.mxu1 %v17547_v13  ;;  %v7844_v10 = vld [vmem:[#allocation26 + $0xe88] sm:$0xff]  ;;  %v17459_v21 = vcombine.high %v7716_v34, %v7720_v63  ;;  %v17458_v48 = vcombine.low %v7716_v34, %v7720_v63 }
 0x853   :  { %v20222_v22 = vpop.f32.mrb[16].mxu1  ;;  %v20224_v23 = vpop.f32.mrb[25].mxu0  ;;  %v7848_v13 = vld [vmem:[#allocation26 + $0xea8] sm:$0xff] }
 0x854   :  { %v20226_v37 = vpop.f32.mrb[17].mxu1  ;;  %v6692_v39 = vpop.f32.mrb[26].mxu0  ;;  %10716 = vmatpush1.bf16.msra.mxu0 %v17418_v17  ;;  %v17587_v16 = vcombine.high %v7844_v10, %v7848_v13  ;;  %v7724_v17 = vld [vmem:[#allocation26 + $0xac8] sm:$0xff]  ;;  %v17586_v31 = vcombine.low %v7844_v10, %v7848_v13 }
 0x855   :  { %v6856_v29 = vpop.f32.mrb[18].mxu1  ;;  %10757 = vmatpush1.bf16.msra.mxu1 %v17546_v2  ;;  %v6693_v61 = vpop.f32.mrb[27].mxu0  ;;  %10717 = vmatprep.subr.bf16.mxu0 %v17427_v18  ;;  %v7728_v2 = vld [vmem:[#allocation26 + $0xae8] sm:$0xff] }
 0x856   :  { %v6857_v40 = vpop.f32.mrb[19].mxu1  ;;  %10758 = vmatprep.subr.bf16.mxu1 %v17555_v28  ;;  %v7852_v18 = vld [vmem:[#allocation26 + $0xec8] sm:$0xff]  ;;  %v17467_v36 = vcombine.high %v7724_v17, %v7728_v2 }
 0x857   :  { %v7856_v28 = vld [vmem:[#allocation26 + $0xee8] sm:$0xff] }
 0x858   :  { %10718 = vmatpush1.bf16.msra.mxu0 %v17426_v1  ;;  %v17595_v5 = vcombine.high %v7852_v18, %v7856_v28  ;;  %v7732_v39 = vld [vmem:[#allocation26 + $0xb08] sm:$0xff] }
 0x859   :  { %10759 = vmatpush1.bf16.msra.mxu1 %v17554_v32  ;;  %10719 = vmatprep.subr.bf16.mxu0 %v17435_v44  ;;  %v7736_v1 = vld [vmem:[#allocation26 + $0xb28] sm:$0xff]  ;;  %v17466_v32 = vcombine.low %v7724_v17, %v7728_v2  ;;  %v17594_v44 = vcombine.low %v7852_v18, %v7856_v28  ;;  %v7381_v17 = vld [vmem:[#allocation26 + $0x10] sm:$0xff] }
 0x85a   :  { %10760 = vmatprep.subr.bf16.mxu1 %v17563_v47  ;;  %v7860_v29 = vld [vmem:[#allocation26 + $0xf08] sm:$0xff]  ;;  %v17475_v40 = vcombine.high %v7732_v39, %v7736_v1  ;;  %v7385_v2 = vld [vmem:[#allocation26 + $0x30] sm:$0xff] }
 0x85b   :  { %v7864_v61 = vld [vmem:[#allocation26 + $0xf28] sm:$0xff]  ;;  %v7509_v18 = vld [vmem:[#allocation26 + $0x410] sm:$0xff] }
 0x85c   :  { %10720 = vmatpush1.bf16.msra.mxu0 %v17434_v3  ;;  %v17603_v47 = vcombine.high %v7860_v29, %v7864_v61  ;;  %v7740_v30 = vld [vmem:[#allocation26 + $0xb48] sm:$0xff]  ;;  %v17474_v3 = vcombine.low %v7732_v39, %v7736_v1  ;;  %v7513_v28 = vld [vmem:[#allocation26 + $0x430] sm:$0xff] }
 0x85d   :  { %10761 = vmatpush1.bf16.msra.mxu1 %v17562_v49  ;;  %10721 = vmatprep.subr.bf16.mxu0 %v17443_v52  ;;  %v7744_v42 = vld [vmem:[#allocation26 + $0xb68] sm:$0xff]  ;;  %v17602_v49 = vcombine.low %v7860_v29, %v7864_v61  ;;  %v7389_v39 = vld [vmem:[#allocation26 + $0x50] sm:$0xff]  ;;  %v17124_v29 = vcombine.low %v7381_v17, %v7385_v2 }
 0x85e   :  { %10762 = vmatprep.subr.bf16.mxu1 %v17571_v43  ;;  %v7868_v51 = vld [vmem:[#allocation26 + $0xf48] sm:$0xff]  ;;  %v17483_v52 = vcombine.high %v7740_v30, %v7744_v42  ;;  %v7393_v1 = vld [vmem:[#allocation26 + $0x70] sm:$0xff] }
 0x85f   :  { %v7872_v50 = vld [vmem:[#allocation26 + $0xf68] sm:$0xff]  ;;  %v7517_v61 = vld [vmem:[#allocation26 + $0x450] sm:$0xff] }
 0x860   :  { %10722 = vmatpush1.bf16.msra.mxu0 %v17442_v56  ;;  %v17611_v43 = vcombine.high %v7868_v51, %v7872_v50  ;;  %v7748_v53 = vld [vmem:[#allocation26 + $0xb88] sm:$0xff]  ;;  %v17482_v56 = vcombine.low %v7740_v30, %v7744_v42  ;;  %v7401_v30 = vld [vmem:[#allocation26 + $0xb0] sm:$0xff] }
 0x861   :  { %10763 = vmatpush1.bf16.msra.mxu1 %v17570_v8  ;;  %10723 = vmatprep.subr.bf16.mxu0 %v17451_v59  ;;  %v7752_v7 = vld [vmem:[#allocation26 + $0xba8] sm:$0xff]  ;;  %v17610_v8 = vcombine.low %v7868_v51, %v7872_v50  ;;  %v7525_v51 = vld [vmem:[#allocation26 + $0x490] sm:$0xff] }
 0x862   :  { %10764 = vmatprep.subr.bf16.mxu1 %v17579_v60  ;;  %v7876_v45 = vld [vmem:[#allocation26 + $0xf88] sm:$0xff]  ;;  %v17491_v59 = vcombine.high %v7748_v53, %v7752_v7  ;;  %v7529_v50 = vld [vmem:[#allocation26 + $0x4b0] sm:$0xff] }
 0x863   :  { %v7880_v55 = vld [vmem:[#allocation26 + $0xfa8] sm:$0xff] }
 0x864   :  { %10724 = vmatpush1.bf16.msra.mxu0 %v17450_v14  ;;  %v17619_v60 = vcombine.high %v7876_v45, %v7880_v55  ;;  %v7756_v34 = vld [vmem:[#allocation26 + $0xbc8] sm:$0xff]  ;;  %v17490_v14 = vcombine.low %v7748_v53, %v7752_v7  ;;  %v7405_v53 = vld [vmem:[#allocation26 + $0xd0] sm:$0xff] }
 0x865   :  { %10765 = vmatpush1.bf16.msra.mxu1 %v17578_v15  ;;  %10725 = vmatprep.subr.bf16.mxu0 %v17459_v21  ;;  %v7760_v63 = vld [vmem:[#allocation26 + $0xbe8] sm:$0xff]  ;;  %v17618_v15 = vcombine.low %v7876_v45, %v7880_v55  ;;  %v7409_v7 = vld [vmem:[#allocation26 + $0xf0] sm:$0xff] }
 0x866   :  { %10766 = vmatprep.subr.bf16.mxu1 %v17587_v16  ;;  %v7884_v10 = vld [vmem:[#allocation26 + $0xfc8] sm:$0xff]  ;;  %v17499_v21 = vcombine.high %v7756_v34, %v7760_v63  ;;  %v7533_v45 = vld [vmem:[#allocation26 + $0x4d0] sm:$0xff] }
 0x867   :  { %v7888_v13 = vld [vmem:[#allocation26 + $0xfe8] sm:$0xff]  ;;  %v7537_v55 = vld [vmem:[#allocation26 + $0x4f0] sm:$0xff] }
 0x868   :  { %10726 = vmatpush1.bf16.msra.mxu0 %v17458_v48  ;;  %v17627_v16 = vcombine.high %v7884_v10, %v7888_v13  ;;  %v17498_v48 = vcombine.low %v7756_v34, %v7760_v63  ;;  %v7413_v34 = vld [vmem:[#allocation26 + $0x110] sm:$0xff] }
 0x869   :  { %10767 = vmatpush1.bf16.msra.mxu1 %v17586_v31  ;;  %10727 = vmatprep.subr.bf16.mxu0 %v17467_v36  ;;  %v17626_v31 = vcombine.low %v7884_v10, %v7888_v13  ;;  %v17125_v36 = vcombine.high %v7381_v17, %v7385_v2  ;;  %v7417_v63 = vld [vmem:[#allocation26 + $0x130] sm:$0xff] }
 0x86a   :  { %10768 = vmatprep.subr.bf16.mxu1 %v17595_v5  ;;  %v17253_v5 = vcombine.high %v7509_v18, %v7513_v28  ;;  %v7541_v10 = vld [vmem:[#allocation26 + $0x510] sm:$0xff] }
 0x86b   :  { %v7545_v13 = vld [vmem:[#allocation26 + $0x530] sm:$0xff] }
 0x86c   :  { %10728 = vmatpush1.bf16.msra.mxu0 %v17466_v32  ;;  %v7521_v32 = vld [vmem:[#allocation26 + $0x470] sm:$0xff] }
 0x86d   :  { %10769 = vmatpush1.bf16.msra.mxu1 %v17594_v44  ;;  %10729 = vmatprep.subr.bf16.mxu0 %v17475_v40  ;;  %v17252_v44 = vcombine.low %v7509_v18, %v7513_v28  ;;  %v17133_v40 = vcombine.high %v7389_v39, %v7393_v1  ;;  %v17261_v42 = vcombine.high %v7517_v61, %v7521_v32  ;;  %v7421_v17 = vld [vmem:[#allocation26 + $0x150] sm:$0xff] }
 0x86e   :  { %10770 = vmatprep.subr.bf16.mxu1 %v17603_v47  ;;  %v7397_v47 = vld [vmem:[#allocation26 + $0x90] sm:$0xff] }
 0x86f   :  { %v7425_v2 = vld [vmem:[#allocation26 + $0x170] sm:$0xff] }
 0x870   :  { %10730 = vmatpush1.bf16.msra.mxu0 %v17474_v3  ;;  %v17132_v3 = vcombine.low %v7389_v39, %v7393_v1  ;;  %v7549_v18 = vld [vmem:[#allocation26 + $0x550] sm:$0xff] }
 0x871   :  { %10771 = vmatpush1.bf16.msra.mxu1 %v17602_v49  ;;  %10731 = vmatprep.subr.bf16.mxu0 %v17483_v52  ;;  %v17260_v49 = vcombine.low %v7517_v61, %v7521_v32  ;;  %v17141_v52 = vcombine.high %v7397_v47, %v7401_v30  ;;  %v7553_v28 = vld [vmem:[#allocation26 + $0x570] sm:$0xff]  ;;  %v17164_v32 = vcombine.low %v7421_v17, %v7425_v2 }
 0x872   :  { %10772 = vmatprep.subr.bf16.mxu1 %v17611_v43  ;;  %v17269_v43 = vcombine.high %v7525_v51, %v7529_v50  ;;  %v7429_v39 = vld [vmem:[#allocation26 + $0x190] sm:$0xff] }
 0x873   :  { %v7433_v1 = vld [vmem:[#allocation26 + $0x1b0] sm:$0xff] }
 0x874   :  { %10732 = vmatpush1.bf16.msra.mxu0 %v17482_v56  ;;  %v17140_v56 = vcombine.low %v7397_v47, %v7401_v30  ;;  %v7561_v61 = vld [vmem:[#allocation26 + $0x5b0] sm:$0xff] }
 0x875   :  { %10773 = vmatpush1.bf16.msra.mxu1 %v17610_v8  ;;  %10733 = vmatprep.subr.bf16.mxu0 %v17491_v59  ;;  %v17268_v8 = vcombine.low %v7525_v51, %v7529_v50  ;;  %v17149_v59 = vcombine.high %v7405_v53, %v7409_v7  ;;  %v7441_v51 = vld [vmem:[#allocation26 + $0x1f0] sm:$0xff] }
 0x876   :  { %10774 = vmatprep.subr.bf16.mxu1 %v17619_v60  ;;  %v17277_v60 = vcombine.high %v7533_v45, %v7537_v55 }
 0x878   :  { %10734 = vmatpush1.bf16.msra.mxu0 %v17490_v14  ;;  %v17148_v14 = vcombine.low %v7405_v53, %v7409_v7 }
 0x879   :  { %10775 = vmatpush1.bf16.msra.mxu1 %v17618_v15  ;;  %10735 = vmatprep.subr.bf16.mxu0 %v17499_v21  ;;  %v17276_v15 = vcombine.low %v7533_v45, %v7537_v55  ;;  %v17157_v21 = vcombine.high %v7413_v34, %v7417_v63  ;;  %v17172_v45 = vcombine.low %v7429_v39, %v7433_v1 }
 0x87a   :  { %10776 = vmatprep.subr.bf16.mxu1 %v17627_v16  ;;  %v17285_v16 = vcombine.high %v7541_v10, %v7545_v13 }
 0x87c   :  { %10736 = vmatpush1.bf16.msra.mxu0 %v17498_v48  ;;  %v17156_v48 = vcombine.low %v7413_v34, %v7417_v63 }
 0x87d   :  { %10777 = vmatpush1.bf16.msra.mxu1 %v17626_v31  ;;  %10787 = vmatprep.subr.bf16.mxu0 %v17125_v36  ;;  %v17284_v31 = vcombine.low %v7541_v10, %v7545_v13  ;;  %v17165_v36 = vcombine.high %v7421_v17, %v7425_v2  ;;  %v7445_v10 = vld [vmem:[#allocation26 + $0x210] sm:$0xff] }
 0x87e   :  { %10828 = vmatprep.subr.bf16.mxu1 %v17253_v5  ;;  %v17293_v5 = vcombine.high %v7549_v18, %v7553_v28  ;;  %v7449_v13 = vld [vmem:[#allocation26 + $0x230] sm:$0xff] }
 0x87f   :  { %10738 = vmatmul.mubr.bf16.vlgmr.msra.gmra.mrb[40].mxu0 %v20208_v35  ;;  %v17189_v17 = vcombine.high %v7445_v10, %v7449_v13 }
 0x880   :  { %10779 = vmatmul.mubr.bf16.vlgmr.msra.gmra.mrb[32].mxu1 %v20210_v0  ;;  %10788 = vmatpush1.bf16.msra.mxu0 %v17124_v29  ;;  %v7557_v29 = vld [vmem:[#allocation26 + $0x590] sm:$0xff] }
 0x881   :  { %10819 = vmatprep.mubr.bf16.mxu0 %v20170_v20  ;;  %10829 = vmatpush1.bf16.msra.mxu1 %v17252_v44  ;;  %v17292_v44 = vcombine.low %v7549_v18, %v7553_v28  ;;  %v17301_v30 = vcombine.high %v7557_v29, %v7561_v61  ;;  %v7453_v18 = vld [vmem:[#allocation26 + $0x250] sm:$0xff] }
 0x882   :  { %10860 = vmatprep.mubr.bf16.mxu1 %v20173_v33  ;;  %10789 = vmatprep.subr.bf16.mxu0 %v17133_v40  ;;  %v17173_v40 = vcombine.high %v7429_v39, %v7433_v1  ;;  %v7457_v28 = vld [vmem:[#allocation26 + $0x270] sm:$0xff] }
 0x883   :  { %10830 = vmatprep.subr.bf16.mxu1 %v17261_v42  ;;  %v7437_v42 = vld [vmem:[#allocation26 + $0x1d0] sm:$0xff]  ;;  %v17197_v39 = vcombine.high %v7453_v18, %v7457_v28 }
 0x884   :  { %10790 = vmatpush1.bf16.msra.mxu0 %v17132_v3 }
 0x885   :  { %10831 = vmatpush1.bf16.msra.mxu1 %v17260_v49  ;;  %10791 = vmatprep.subr.bf16.mxu0 %v17141_v52  ;;  %v7565_v49 = vld [vmem:[#allocation26 + $0x5d0] sm:$0xff] }
 0x886   :  { %10832 = vmatprep.subr.bf16.mxu1 %v17269_v43  ;;  %v7569_v52 = vld [vmem:[#allocation26 + $0x5f0] sm:$0xff] }
 0x887   :  { %v17309_v63 = vcombine.high %v7565_v49, %v7569_v52 }
 0x888   :  { %10792 = vmatpush1.bf16.msra.mxu0 %v17140_v56 }
 0x889   :  { %10833 = vmatpush1.bf16.msra.mxu1 %v17268_v8  ;;  %10793 = vmatprep.subr.bf16.mxu0 %v17149_v59  ;;  %v17300_v59 = vcombine.low %v7557_v29, %v7561_v61  ;;  %v7461_v29 = vld [vmem:[#allocation26 + $0x290] sm:$0xff] }
 0x88a   :  { %10834 = vmatprep.subr.bf16.mxu1 %v17277_v60  ;;  %v17181_v60 = vcombine.high %v7437_v42, %v7441_v51  ;;  %v7465_v61 = vld [vmem:[#allocation26 + $0x2b0] sm:$0xff] }
 0x88c   :  { %10794 = vmatpush1.bf16.msra.mxu0 %v17148_v14  ;;  %v7573_v14 = vld [vmem:[#allocation26 + $0x610] sm:$0xff] }
 0x88d   :  { %10835 = vmatpush1.bf16.msra.mxu1 %v17276_v15  ;;  %10795 = vmatprep.subr.bf16.mxu0 %v17157_v21  ;;  %v7577_v15 = vld [vmem:[#allocation26 + $0x630] sm:$0xff]  ;;  %v17180_v21 = vcombine.low %v7437_v42, %v7441_v51 }
 0x88e   :  { %10836 = vmatprep.subr.bf16.mxu1 %v17285_v16  ;;  %v17308_v16 = vcombine.low %v7565_v49, %v7569_v52  ;;  %v17317_v2 = vcombine.high %v7573_v14, %v7577_v15  ;;  %v7469_v51 = vld [vmem:[#allocation26 + $0x2d0] sm:$0xff]  ;;  %v17204_v52 = vcombine.low %v7461_v29, %v7465_v61 }
 0x88f   :  { %v7601_v49 = vld [vmem:[#allocation26 + $0x6f0] sm:$0xff] }
 0x890   :  { %10796 = vmatpush1.bf16.msra.mxu0 %v17156_v48  ;;  %v7581_v48 = vld [vmem:[#allocation26 + $0x650] sm:$0xff] }
 0x891   :  { %10837 = vmatpush1.bf16.msra.mxu1 %v17284_v31  ;;  %10797 = vmatprep.subr.bf16.mxu0 %v17165_v36  ;;  %v7585_v31 = vld [vmem:[#allocation26 + $0x670] sm:$0xff]  ;;  %v17188_v36 = vcombine.low %v7445_v10, %v7449_v13 }
 0x892   :  { %v10493_v47 = vpop.f32.mrb[28].mxu0  ;;  %10838 = vmatprep.subr.bf16.mxu1 %v17293_v5  ;;  %v17316_v5 = vcombine.low %v7573_v14, %v7577_v15  ;;  %v17325_v1 = vcombine.high %v7581_v48, %v7585_v31  ;;  %v7485_v14 = vld [vmem:[#allocation26 + $0x350] sm:$0xff] }
 0x893   :  { %v10534_v50 = vpop.f32.mrb[20].mxu1  ;;  %v10495_v3 = vpop.f32.mrb[29].mxu0  ;;  %v7489_v15 = vld [vmem:[#allocation26 + $0x370] sm:$0xff] }
 0x894   :  { %v20232_v43 = vadd.f32 %v10534_v50, %v10493_v47  ;;  %v10536_v53 = vpop.f32.mrb[21].mxu1  ;;  %v10497_v7 = vpop.f32.mrb[30].mxu0  ;;  %10798 = vmatpush1.bf16.msra.mxu0 %v17164_v32  ;;  %v7589_v32 = vld [vmem:[#allocation26 + $0x690] sm:$0xff]  ;;  %v17324_v47 = vcombine.low %v7581_v48, %v7585_v31 }
 0x895   :  { %v20234_v55 = vadd.f32 %v10536_v53, %v10495_v3  ;;  %v10538_v56 = vpop.f32.mrb[22].mxu1  ;;  %10839 = vmatpush1.bf16.msra.mxu1 %v17292_v44  ;;  %v10498_v8 = vpop.f32.mrb[31].mxu0  ;;  %10799 = vmatprep.subr.bf16.mxu0 %v17173_v40  ;;  %v7593_v44 = vld [vmem:[#allocation26 + $0x6b0] sm:$0xff]  ;;  %v17196_v40 = vcombine.low %v7453_v18, %v7457_v28  ;;  %v17229_v18 = vcombine.high %v7485_v14, %v7489_v15 }
 0x896   :  { %v10539_v34 = vpop.f32.mrb[23].mxu1  ;;  %10840 = vmatprep.subr.bf16.mxu1 %v17301_v30  ;;  %v17205_v30 = vcombine.high %v7461_v29, %v7465_v61  ;;  %v17333_v42 = vcombine.high %v7589_v32, %v7593_v44  ;;  %v7473_v50 = vld [vmem:[#allocation26 + $0x2f0] sm:$0xff]  ;;  %v17332_v53 = vcombine.low %v7589_v32, %v7593_v44 }
 0x897   :  { %v7597_v3 = vld [vmem:[#allocation26 + $0x6d0] sm:$0xff]  ;;  %v17213_v7 = vcombine.high %v7469_v51, %v7473_v50  ;;  %v17212_v34 = vcombine.low %v7469_v51, %v7473_v50 }
 0x898   :  { %10800 = vmatpush1.bf16.msra.mxu0 %v17172_v45  ;;  %v17341_v45 = vcombine.high %v7597_v3, %v7601_v49  ;;  %v7477_v56 = vld [vmem:[#allocation26 + $0x310] sm:$0xff] }
 0x899   :  { %10841 = vmatpush1.bf16.msra.mxu1 %v17300_v59  ;;  %10801 = vmatprep.subr.bf16.mxu0 %v17181_v60  ;;  %v7481_v8 = vld [vmem:[#allocation26 + $0x330] sm:$0xff] }
 0x89a   :  { %10842 = vmatprep.subr.bf16.mxu1 %v17309_v63  ;;  %v7605_v59 = vld [vmem:[#allocation26 + $0x710] sm:$0xff]  ;;  %v17340_v63 = vcombine.low %v7597_v3, %v7601_v49  ;;  %v17221_v10 = vcombine.high %v7477_v56, %v7481_v8 }
 0x89b   :  { %v7609_v60 = vld [vmem:[#allocation26 + $0x730] sm:$0xff] }
 0x89c   :  { %10802 = vmatpush1.bf16.msra.mxu0 %v17180_v21  ;;  %v17349_v13 = vcombine.high %v7605_v59, %v7609_v60  ;;  %v7613_v21 = vld [vmem:[#allocation26 + $0x750] sm:$0xff] }
 0x89d   :  { %10843 = vmatpush1.bf16.msra.mxu1 %v17308_v16  ;;  %10803 = vmatprep.subr.bf16.mxu0 %v17189_v17  ;;  %v7617_v16 = vld [vmem:[#allocation26 + $0x770] sm:$0xff]  ;;  %v17220_v17 = vcombine.low %v7477_v56, %v7481_v8 }
 0x89e   :  { %10844 = vmatprep.subr.bf16.mxu1 %v17317_v2  ;;  %v17348_v2 = vcombine.low %v7605_v59, %v7609_v60  ;;  %v17357_v28 = vcombine.high %v7613_v21, %v7617_v16  ;;  %v7493_v48 = vld [vmem:[#allocation26 + $0x390] sm:$0xff] }
 0x89f   :  { %v7497_v31 = vld [vmem:[#allocation26 + $0x3b0] sm:$0xff] }
 0x8a0   :  { %10804 = vmatpush1.bf16.msra.mxu0 %v17188_v36  ;;  %v7621_v36 = vld [vmem:[#allocation26 + $0x790] sm:$0xff]  ;;  %v17237_v29 = vcombine.high %v7493_v48, %v7497_v31 }
 0x8a1   :  { %10845 = vmatpush1.bf16.msra.mxu1 %v17316_v5  ;;  %10805 = vmatprep.subr.bf16.mxu0 %v17197_v39  ;;  %v7625_v5 = vld [vmem:[#allocation26 + $0x7b0] sm:$0xff]  ;;  %v17228_v39 = vcombine.low %v7485_v14, %v7489_v15 }
 0x8a2   :  { %10846 = vmatprep.subr.bf16.mxu1 %v17325_v1  ;;  %v17356_v1 = vcombine.low %v7613_v21, %v7617_v16  ;;  %v17365_v61 = vcombine.high %v7621_v36, %v7625_v5  ;;  %v7501_v32 = vld [vmem:[#allocation26 + $0x3d0] sm:$0xff] }
 0x8a3   :  { %v7505_v44 = vld [vmem:[#allocation26 + $0x3f0] sm:$0xff] }
 0x8a4   :  { %10806 = vmatpush1.bf16.msra.mxu0 %v17196_v40  ;;  %v7629_v40 = vld [vmem:[#allocation26 + $0x7d0] sm:$0xff]  ;;  %v17245_v51 = vcombine.high %v7501_v32, %v7505_v44 }
 0x8a5   :  { %10847 = vmatpush1.bf16.msra.mxu1 %v17324_v47  ;;  %10807 = vmatprep.subr.bf16.mxu0 %v17205_v30  ;;  %v7633_v47 = vld [vmem:[#allocation26 + $0x7f0] sm:$0xff]  ;;  %v17236_v30 = vcombine.low %v7493_v48, %v7497_v31 }
 0x8a6   :  { %10848 = vmatprep.subr.bf16.mxu1 %v17333_v42  ;;  %v17364_v42 = vcombine.low %v7621_v36, %v7625_v5  ;;  %v17373_v50 = vcombine.high %v7629_v40, %v7633_v47  ;;  %v7637_v3 = vld [vmem:[#allocation26 + $0x810] sm:$0xff] }
 0x8a7   :  { %v7641_v49 = vld [vmem:[#allocation26 + $0x830] sm:$0xff] }
 0x8a8   :  { %10808 = vmatpush1.bf16.msra.mxu0 %v17204_v52  ;;  %v7765_v52 = vld [vmem:[#allocation26 + $0xc10] sm:$0xff]  ;;  %v17381_v56 = vcombine.high %v7637_v3, %v7641_v49 }
 0x8a9   :  { %10849 = vmatpush1.bf16.msra.mxu1 %v17332_v53  ;;  %10809 = vmatprep.subr.bf16.mxu0 %v17213_v7  ;;  %v7769_v53 = vld [vmem:[#allocation26 + $0xc30] sm:$0xff]  ;;  %v17244_v7 = vcombine.low %v7501_v32, %v7505_v44 }
 0x8aa   :  { %10850 = vmatprep.subr.bf16.mxu1 %v17341_v45  ;;  %v17372_v45 = vcombine.low %v7629_v40, %v7633_v47  ;;  %v17509_v8 = vcombine.high %v7765_v52, %v7769_v53  ;;  %v7645_v59 = vld [vmem:[#allocation26 + $0x850] sm:$0xff] }
 0x8ab   :  { %v7649_v60 = vld [vmem:[#allocation26 + $0x870] sm:$0xff] }
 0x8ac   :  { %10810 = vmatpush1.bf16.msra.mxu0 %v17212_v34  ;;  %v17380_v34 = vcombine.low %v7637_v3, %v7641_v49  ;;  %v17389_v14 = vcombine.high %v7645_v59, %v7649_v60  ;;  %v7653_v15 = vld [vmem:[#allocation26 + $0x890] sm:$0xff] }
 0x8ad   :  { %10851 = vmatpush1.bf16.msra.mxu1 %v17340_v63  ;;  %10811 = vmatprep.subr.bf16.mxu0 %v17221_v10  ;;  %v7773_v63 = vld [vmem:[#allocation26 + $0xc50] sm:$0xff] }
 0x8ae   :  { %10852 = vmatprep.subr.bf16.mxu1 %v17349_v13  ;;  %v7777_v10 = vld [vmem:[#allocation26 + $0xc70] sm:$0xff]  ;;  %v17508_v13 = vcombine.low %v7765_v52, %v7769_v53 }
 0x8af   :  { %v7657_v21 = vld [vmem:[#allocation26 + $0x8b0] sm:$0xff]  ;;  %v17517_v16 = vcombine.high %v7773_v63, %v7777_v10 }
 0x8b0   :  { %10812 = vmatpush1.bf16.msra.mxu0 %v17220_v17  ;;  %v7781_v17 = vld [vmem:[#allocation26 + $0xc90] sm:$0xff]  ;;  %v17397_v48 = vcombine.high %v7653_v15, %v7657_v21 }
 0x8b1   :  { %10853 = vmatpush1.bf16.msra.mxu1 %v17348_v2  ;;  %10813 = vmatprep.subr.bf16.mxu0 %v17229_v18  ;;  %v7785_v2 = vld [vmem:[#allocation26 + $0xcb0] sm:$0xff]  ;;  %v17388_v18 = vcombine.low %v7645_v59, %v7649_v60 }
 0x8b2   :  { %10854 = vmatprep.subr.bf16.mxu1 %v17357_v28  ;;  %v17516_v28 = vcombine.low %v7773_v63, %v7777_v10  ;;  %v17525_v31 = vcombine.high %v7781_v17, %v7785_v2  ;;  %v7661_v36 = vld [vmem:[#allocation26 + $0x8d0] sm:$0xff] }
 0x8b3   :  { %v7665_v5 = vld [vmem:[#allocation26 + $0x8f0] sm:$0xff] }
 0x8b4   :  { %10814 = vmatpush1.bf16.msra.mxu0 %v17228_v39  ;;  %v7789_v39 = vld [vmem:[#allocation26 + $0xcd0] sm:$0xff]  ;;  %v17405_v32 = vcombine.high %v7661_v36, %v7665_v5 }
 0x8b5   :  { %10855 = vmatpush1.bf16.msra.mxu1 %v17356_v1  ;;  %10815 = vmatprep.subr.bf16.mxu0 %v17237_v29  ;;  %v7793_v1 = vld [vmem:[#allocation26 + $0xcf0] sm:$0xff]  ;;  %v17396_v29 = vcombine.low %v7653_v15, %v7657_v21 }
 0x8b6   :  { %10856 = vmatprep.subr.bf16.mxu1 %v17365_v61  ;;  %v17524_v61 = vcombine.low %v7781_v17, %v7785_v2  ;;  %v17533_v44 = vcombine.high %v7789_v39, %v7793_v1  ;;  %v7669_v40 = vld [vmem:[#allocation26 + $0x910] sm:$0xff] }
 0x8b7   :  { %v7673_v47 = vld [vmem:[#allocation26 + $0x930] sm:$0xff] }
 0x8b8   :  { %10816 = vmatpush1.bf16.msra.mxu0 %v17236_v30  ;;  %v7797_v30 = vld [vmem:[#allocation26 + $0xd10] sm:$0xff]  ;;  %v17413_v3 = vcombine.high %v7669_v40, %v7673_v47 }
 0x8b9   :  { %10857 = vmatpush1.bf16.msra.mxu1 %v17364_v42  ;;  %10817 = vmatprep.subr.bf16.mxu0 %v17245_v51  ;;  %v7801_v42 = vld [vmem:[#allocation26 + $0xd30] sm:$0xff]  ;;  %v17404_v51 = vcombine.low %v7661_v36, %v7665_v5 }
 0x8ba   :  { %10858 = vmatprep.subr.bf16.mxu1 %v17373_v50  ;;  %v17532_v50 = vcombine.low %v7789_v39, %v7793_v1  ;;  %v17541_v49 = vcombine.high %v7797_v30, %v7801_v42  ;;  %v7677_v52 = vld [vmem:[#allocation26 + $0x950] sm:$0xff] }
 0x8bb   :  { %v7681_v53 = vld [vmem:[#allocation26 + $0x970] sm:$0xff] }
 0x8bc   :  { %10818 = vmatpush1.bf16.msra.mxu0 %v17244_v7  ;;  %v7805_v7 = vld [vmem:[#allocation26 + $0xd50] sm:$0xff]  ;;  %v17421_v59 = vcombine.high %v7677_v52, %v7681_v53 }
 0x8bd   :  { %10859 = vmatpush1.bf16.msra.mxu1 %v17372_v45  ;;  %10869 = vmatprep.subr.bf16.mxu0 %v17381_v56  ;;  %v7809_v45 = vld [vmem:[#allocation26 + $0xd70] sm:$0xff]  ;;  %v17412_v56 = vcombine.low %v7669_v40, %v7673_v47 }
 0x8be   :  { %10910 = vmatprep.subr.bf16.mxu1 %v17509_v8  ;;  %v17540_v8 = vcombine.low %v7797_v30, %v7801_v42  ;;  %v17549_v60 = vcombine.high %v7805_v7, %v7809_v45  ;;  %v7689_v63 = vld [vmem:[#allocation26 + $0x9b0] sm:$0xff]  ;;  %v17548_v15 = vcombine.low %v7805_v7, %v7809_v45 }
 0x8bf   :  { %10820 = vmatmul.mubr.bf16.vlgmr.msra.gmra.mrb[44].mxu0 %v20190_v25  ;;  %v7813_v10 = vld [vmem:[#allocation26 + $0xd90] sm:$0xff] }
 0x8c0   :  { %10861 = vmatmul.mubr.bf16.vlgmr.msra.gmra.mrb[36].mxu1 %v20192_v54  ;;  %10870 = vmatpush1.bf16.msra.mxu0 %v17380_v34  ;;  %v7685_v34 = vld [vmem:[#allocation26 + $0x990] sm:$0xff] }
 0x8c1   :  { %10901 = vmatprep.mubr.bf16.mxu0 %v20194_v4  ;;  %10911 = vmatpush1.bf16.msra.mxu1 %v17508_v13  ;;  %v7817_v13 = vld [vmem:[#allocation26 + $0xdb0] sm:$0xff]  ;;  %v17429_v21 = vcombine.high %v7685_v34, %v7689_v63 }
 0x8c2   :  { %10942 = vmatprep.mubr.bf16.mxu1 %v20197_v41  ;;  %10871 = vmatprep.subr.bf16.mxu0 %v17389_v14  ;;  %v17420_v14 = vcombine.low %v7677_v52, %v7681_v53  ;;  %v17557_v17 = vcombine.high %v7813_v10, %v7817_v13  ;;  %v7693_v2 = vld [vmem:[#allocation26 + $0x9d0] sm:$0xff]  ;;  %v17556_v47 = vcombine.low %v7813_v10, %v7817_v13 }
 0x8c3   :  { %10912 = vmatprep.subr.bf16.mxu1 %v17517_v16  ;;  %v7821_v36 = vld [vmem:[#allocation26 + $0xdd0] sm:$0xff] }
 0x8c4   :  { %10872 = vmatpush1.bf16.msra.mxu0 %v17388_v18  ;;  %v7697_v18 = vld [vmem:[#allocation26 + $0x9f0] sm:$0xff] }
 0x8c5   :  { %10913 = vmatpush1.bf16.msra.mxu1 %v17516_v28  ;;  %10873 = vmatprep.subr.bf16.mxu0 %v17397_v48  ;;  %v7825_v5 = vld [vmem:[#allocation26 + $0xdf0] sm:$0xff]  ;;  %v17437_v30 = vcombine.high %v7693_v2, %v7697_v18  ;;  %v17436_v52 = vcombine.low %v7693_v2, %v7697_v18 }
 0x8c6   :  { %10914 = vmatprep.subr.bf16.mxu1 %v17525_v31  ;;  %v17564_v53 = vcombine.low %v7821_v36, %v7825_v5 }
 0x8c8   :  { %10874 = vmatpush1.bf16.msra.mxu0 %v17396_v29 }
 0x8c9   :  { %10915 = vmatpush1.bf16.msra.mxu1 %v17524_v61  ;;  %10875 = vmatprep.subr.bf16.mxu0 %v17405_v32  ;;  %v17428_v61 = vcombine.low %v7685_v34, %v7689_v63 }
 0x8ca   :  { %10916 = vmatprep.subr.bf16.mxu1 %v17533_v44 }
 0x8cc   :  { %10876 = vmatpush1.bf16.msra.mxu0 %v17404_v51  ;;  %v17565_v51 = vcombine.high %v7821_v36, %v7825_v5  ;;  %v7853_v36 = vld [vmem:[#allocation26 + $0xed0] sm:$0xff] }
 0x8cd   :  { %10917 = vmatpush1.bf16.msra.mxu1 %v17532_v50  ;;  %10877 = vmatprep.subr.bf16.mxu0 %v17413_v3  ;;  %v7701_v50 = vld [vmem:[#allocation26 + $0xa10] sm:$0xff] }
 0x8ce   :  { %10918 = vmatprep.subr.bf16.mxu1 %v17541_v49  ;;  %v7705_v3 = vld [vmem:[#allocation26 + $0xa30] sm:$0xff] }
 0x8cf   :  { %v7833_v49 = vld [vmem:[#allocation26 + $0xe30] sm:$0xff]  ;;  %v17445_v7 = vcombine.high %v7701_v50, %v7705_v3  ;;  %v17444_v34 = vcombine.low %v7701_v50, %v7705_v3 }
 0x8d0   :  { %10878 = vmatpush1.bf16.msra.mxu0 %v17412_v56  ;;  %v7709_v56 = vld [vmem:[#allocation26 + $0xa50] sm:$0xff] }
 0x8d1   :  { %10919 = vmatpush1.bf16.msra.mxu1 %v17540_v8  ;;  %10879 = vmatprep.subr.bf16.mxu0 %v17421_v59  ;;  %v7713_v8 = vld [vmem:[#allocation26 + $0xa70] sm:$0xff] }
 0x8d2   :  { %v10575_v16 = vpop.f32.mrb[32].mxu0  ;;  %10920 = vmatprep.subr.bf16.mxu1 %v17549_v60  ;;  %v7837_v59 = vld [vmem:[#allocation26 + $0xe50] sm:$0xff]  ;;  %v17453_v10 = vcombine.high %v7709_v56, %v7713_v8 }
 0x8d3   :  { %v10576_v28 = vadd.f32 %v10575_v16, %v20232_v43  ;;  %v10616_v48 = vpop.f32.mrb[24].mxu1  ;;  %v10577_v31 = vpop.f32.mrb[33].mxu0  ;;  %v7841_v60 = vld [vmem:[#allocation26 + $0xe70] sm:$0xff] }
 0x8d4   :  { %v10578_v39 = vadd.f32 %v10577_v31, %v20234_v55  ;;  %v10618_v1 = vpop.f32.mrb[25].mxu1  ;;  %v10579_v29 = vpop.f32.mrb[34].mxu0  ;;  %10880 = vmatpush1.bf16.msra.mxu0 %v17420_v14  ;;  %v7829_v55 = vld [vmem:[#allocation26 + $0xe10] sm:$0xff]  ;;  %v17581_v13 = vcombine.high %v7837_v59, %v7841_v60  ;;  %v17580_v2 = vcombine.low %v7837_v59, %v7841_v60 }
 0x8d5   :  { %v20242_v32 = vadd.f32 %v10616_v48, %v10576_v28  ;;  %v10620_v44 = vpop.f32.mrb[26].mxu1  ;;  %10921 = vmatpush1.bf16.msra.mxu1 %v17548_v15  ;;  %v10580_v40 = vpop.f32.mrb[35].mxu0  ;;  %10881 = vmatprep.subr.bf16.mxu0 %v17429_v21  ;;  %v17573_v45 = vcombine.high %v7829_v55, %v7833_v49  ;;  %v17572_v63 = vcombine.low %v7829_v55, %v7833_v49  ;;  %v7717_v14 = vld [vmem:[#allocation26 + $0xa90] sm:$0xff] }
 0x8d6   :  { %v20244_v42 = vadd.f32 %v10618_v1, %v10578_v39  ;;  %v10621_v43 = vpop.f32.mrb[27].mxu1  ;;  %10922 = vmatprep.subr.bf16.mxu1 %v17557_v17  ;;  %v7721_v15 = vld [vmem:[#allocation26 + $0xab0] sm:$0xff]  ;;  %v17452_v17 = vcombine.low %v7709_v56, %v7713_v8 }
 0x8d7   :  { %v7845_v21 = vld [vmem:[#allocation26 + $0xe90] sm:$0xff]  ;;  %v17461_v18 = vcombine.high %v7717_v14, %v7721_v15  ;;  %v17460_v39 = vcombine.low %v7717_v14, %v7721_v15 }
 0x8d8   :  { %10882 = vmatpush1.bf16.msra.mxu0 %v17428_v61  ;;  %v7849_v16 = vld [vmem:[#allocation26 + $0xeb0] sm:$0xff] }
 0x8d9   :  { %10923 = vmatpush1.bf16.msra.mxu1 %v17556_v47  ;;  %10883 = vmatprep.subr.bf16.mxu0 %v17437_v30  ;;  %v17589_v28 = vcombine.high %v7845_v21, %v7849_v16  ;;  %v7725_v48 = vld [vmem:[#allocation26 + $0xad0] sm:$0xff]  ;;  %v17588_v1 = vcombine.low %v7845_v21, %v7849_v16 }
 0x8da   :  { %10924 = vmatprep.subr.bf16.mxu1 %v17565_v51  ;;  %v7729_v31 = vld [vmem:[#allocation26 + $0xaf0] sm:$0xff] }
 0x8db   :  { %v7857_v5 = vld [vmem:[#allocation26 + $0xef0] sm:$0xff]  ;;  %v17469_v29 = vcombine.high %v7725_v48, %v7729_v31  ;;  %v17468_v43 = vcombine.low %v7725_v48, %v7729_v31 }
 0x8dc   :  { %10884 = vmatpush1.bf16.msra.mxu0 %v17436_v52  ;;  %v17597_v61 = vcombine.high %v7853_v36, %v7857_v5  ;;  %v7733_v44 = vld [vmem:[#allocation26 + $0xb10] sm:$0xff]  ;;  %v17596_v51 = vcombine.low %v7853_v36, %v7857_v5  ;;  %v7382_v36 = vld [vmem:[#allocation26 + $0x18] sm:$0xff] }
 0x8dd   :  { %10925 = vmatpush1.bf16.msra.mxu1 %v17564_v53  ;;  %10885 = vmatprep.subr.bf16.mxu0 %v17445_v7  ;;  %v7737_v40 = vld [vmem:[#allocation26 + $0xb30] sm:$0xff]  ;;  %v7386_v5 = vld [vmem:[#allocation26 + $0x38] sm:$0xff] }
 0x8de   :  { %10926 = vmatprep.subr.bf16.mxu1 %v17573_v45  ;;  %v7861_v47 = vld [vmem:[#allocation26 + $0xf10] sm:$0xff]  ;;  %v17477_v50 = vcombine.high %v7733_v44, %v7737_v40  ;;  %v17476_v7 = vcombine.low %v7733_v44, %v7737_v40  ;;  %v17127_v44 = vcombine.high %v7382_v36, %v7386_v5 }
 0x8df   :  { %v7865_v30 = vld [vmem:[#allocation26 + $0xf30] sm:$0xff] }
 0x8e0   :  { %10886 = vmatpush1.bf16.msra.mxu0 %v17444_v34  ;;  %v17605_v3 = vcombine.high %v7861_v47, %v7865_v30  ;;  %v7741_v55 = vld [vmem:[#allocation26 + $0xb50] sm:$0xff]  ;;  %v17604_v45 = vcombine.low %v7861_v47, %v7865_v30  ;;  %v7390_v47 = vld [vmem:[#allocation26 + $0x58] sm:$0xff] }
 0x8e1   :  { %10927 = vmatpush1.bf16.msra.mxu1 %v17572_v63  ;;  %10887 = vmatprep.subr.bf16.mxu0 %v17453_v10  ;;  %v7745_v49 = vld [vmem:[#allocation26 + $0xb70] sm:$0xff]  ;;  %v7394_v30 = vld [vmem:[#allocation26 + $0x78] sm:$0xff] }
 0x8e2   :  { %10928 = vmatprep.subr.bf16.mxu1 %v17581_v13  ;;  %v7869_v52 = vld [vmem:[#allocation26 + $0xf50] sm:$0xff]  ;;  %v17485_v56 = vcombine.high %v7741_v55, %v7745_v49  ;;  %v17484_v10 = vcombine.low %v7741_v55, %v7745_v49  ;;  %v17135_v55 = vcombine.high %v7390_v47, %v7394_v30  ;;  %v7398_v49 = vld [vmem:[#allocation26 + $0x98] sm:$0xff] }
 0x8e3   :  { %v7873_v53 = vld [vmem:[#allocation26 + $0xf70] sm:$0xff] }
 0x8e4   :  { %10888 = vmatpush1.bf16.msra.mxu0 %v17452_v17  ;;  %v17613_v8 = vcombine.high %v7869_v52, %v7873_v53  ;;  %v7749_v59 = vld [vmem:[#allocation26 + $0xb90] sm:$0xff]  ;;  %v17612_v13 = vcombine.low %v7869_v52, %v7873_v53  ;;  %v7402_v52 = vld [vmem:[#allocation26 + $0xb8] sm:$0xff] }
 0x8e5   :  { %10929 = vmatpush1.bf16.msra.mxu1 %v17580_v2  ;;  %10889 = vmatprep.subr.bf16.mxu0 %v17461_v18  ;;  %v7753_v60 = vld [vmem:[#allocation26 + $0xbb0] sm:$0xff] }
 0x8e6   :  { %10930 = vmatprep.subr.bf16.mxu1 %v17589_v28  ;;  %v7877_v34 = vld [vmem:[#allocation26 + $0xf90] sm:$0xff]  ;;  %v17493_v14 = vcombine.high %v7749_v59, %v7753_v60  ;;  %v17492_v18 = vcombine.low %v7749_v59, %v7753_v60  ;;  %v17143_v59 = vcombine.high %v7398_v49, %v7402_v52 }
 0x8e7   :  { %v7881_v63 = vld [vmem:[#allocation26 + $0xfb0] sm:$0xff] }
 0x8e8   :  { %10890 = vmatpush1.bf16.msra.mxu0 %v17460_v39  ;;  %v17621_v15 = vcombine.high %v7877_v34, %v7881_v63  ;;  %v7757_v21 = vld [vmem:[#allocation26 + $0xbd0] sm:$0xff]  ;;  %v17620_v28 = vcombine.low %v7877_v34, %v7881_v63  ;;  %v7510_v39 = vld [vmem:[#allocation26 + $0x418] sm:$0xff] }
 0x8e9   :  { %10931 = vmatpush1.bf16.msra.mxu1 %v17588_v1  ;;  %10891 = vmatprep.subr.bf16.mxu0 %v17469_v29  ;;  %v7761_v16 = vld [vmem:[#allocation26 + $0xbf0] sm:$0xff]  ;;  %v7514_v1 = vld [vmem:[#allocation26 + $0x438] sm:$0xff] }
 0x8ea   :  { %10932 = vmatprep.subr.bf16.mxu1 %v17597_v61  ;;  %v7885_v17 = vld [vmem:[#allocation26 + $0xfd0] sm:$0xff]  ;;  %v17501_v48 = vcombine.high %v7757_v21, %v7761_v16  ;;  %v17500_v29 = vcombine.low %v7757_v21, %v7761_v16  ;;  %v17255_v40 = vcombine.high %v7510_v39, %v7514_v1  ;;  %v7406_v34 = vld [vmem:[#allocation26 + $0xd8] sm:$0xff] }
 0x8eb   :  { %v7889_v2 = vld [vmem:[#allocation26 + $0xff0] sm:$0xff]  ;;  %v7410_v63 = vld [vmem:[#allocation26 + $0xf8] sm:$0xff] }
 0x8ec   :  { %10892 = vmatpush1.bf16.msra.mxu0 %v17468_v43  ;;  %v17629_v31 = vcombine.high %v7885_v17, %v7889_v2  ;;  %v17628_v61 = vcombine.low %v7885_v17, %v7889_v2  ;;  %v17126_v43 = vcombine.low %v7382_v36, %v7386_v5  ;;  %v17151_v21 = vcombine.high %v7406_v34, %v7410_v63  ;;  %v7414_v16 = vld [vmem:[#allocation26 + $0x118] sm:$0xff] }
 0x8ed   :  { %10933 = vmatpush1.bf16.msra.mxu1 %v17596_v51  ;;  %10893 = vmatprep.subr.bf16.mxu0 %v17477_v50  ;;  %v7518_v51 = vld [vmem:[#allocation26 + $0x458] sm:$0xff] }
 0x8ee   :  { %10934 = vmatprep.subr.bf16.mxu1 %v17605_v3  ;;  %v7522_v50 = vld [vmem:[#allocation26 + $0x478] sm:$0xff]  ;;  %v17254_v3 = vcombine.low %v7510_v39, %v7514_v1 }
 0x8ef   :  { %v17263_v53 = vcombine.high %v7518_v51, %v7522_v50  ;;  %v7418_v17 = vld [vmem:[#allocation26 + $0x138] sm:$0xff] }
 0x8f0   :  { %10894 = vmatpush1.bf16.msra.mxu0 %v17476_v7  ;;  %v7526_v7 = vld [vmem:[#allocation26 + $0x498] sm:$0xff] }
 0x8f1   :  { %10935 = vmatpush1.bf16.msra.mxu1 %v17604_v45  ;;  %10895 = vmatprep.subr.bf16.mxu0 %v17485_v56  ;;  %v7530_v45 = vld [vmem:[#allocation26 + $0x4b8] sm:$0xff]  ;;  %v17134_v56 = vcombine.low %v7390_v47, %v7394_v30 }
 0x8f2   :  { %10936 = vmatprep.subr.bf16.mxu1 %v17613_v8  ;;  %v17262_v8 = vcombine.low %v7518_v51, %v7522_v50  ;;  %v17271_v60 = vcombine.high %v7526_v7, %v7530_v45  ;;  %v7542_v2 = vld [vmem:[#allocation26 + $0x518] sm:$0xff] }
 0x8f3   :  { %v7422_v36 = vld [vmem:[#allocation26 + $0x158] sm:$0xff] }
 0x8f4   :  { %10896 = vmatpush1.bf16.msra.mxu0 %v17484_v10  ;;  %v7534_v10 = vld [vmem:[#allocation26 + $0x4d8] sm:$0xff] }
 0x8f5   :  { %10937 = vmatpush1.bf16.msra.mxu1 %v17612_v13  ;;  %10897 = vmatprep.subr.bf16.mxu0 %v17493_v14  ;;  %v7538_v13 = vld [vmem:[#allocation26 + $0x4f8] sm:$0xff]  ;;  %v17142_v14 = vcombine.low %v7398_v49, %v7402_v52 }
 0x8f6   :  { %10938 = vmatprep.subr.bf16.mxu1 %v17621_v15  ;;  %v17270_v15 = vcombine.low %v7526_v7, %v7530_v45  ;;  %v7426_v5 = vld [vmem:[#allocation26 + $0x178] sm:$0xff] }
 0x8f7   :  { %v7550_v39 = vld [vmem:[#allocation26 + $0x558] sm:$0xff]  ;;  %v17166_v50 = vcombine.low %v7422_v36, %v7426_v5 }
 0x8f8   :  { %10898 = vmatpush1.bf16.msra.mxu0 %v17492_v18  ;;  %v7546_v18 = vld [vmem:[#allocation26 + $0x538] sm:$0xff] }
 0x8f9   :  { %10939 = vmatpush1.bf16.msra.mxu1 %v17620_v28  ;;  %10899 = vmatprep.subr.bf16.mxu0 %v17501_v48  ;;  %v17278_v28 = vcombine.low %v7534_v10, %v7538_v13  ;;  %v17159_v48 = vcombine.high %v7414_v16, %v7418_v17  ;;  %v7554_v1 = vld [vmem:[#allocation26 + $0x578] sm:$0xff] }
 0x8fa   :  { %10940 = vmatprep.subr.bf16.mxu1 %v17629_v31  ;;  %v17287_v31 = vcombine.high %v7542_v2, %v7546_v18  ;;  %v7430_v47 = vld [vmem:[#allocation26 + $0x198] sm:$0xff] }
 0x8fb   :  { %v7434_v30 = vld [vmem:[#allocation26 + $0x1b8] sm:$0xff] }
 0x8fc   :  { %10900 = vmatpush1.bf16.msra.mxu0 %v17500_v29  ;;  %v17158_v29 = vcombine.low %v7414_v16, %v7418_v17  ;;  %v7562_v51 = vld [vmem:[#allocation26 + $0x5b8] sm:$0xff] }
 0x8fd   :  { %10941 = vmatpush1.bf16.msra.mxu1 %v17628_v61  ;;  %10951 = vmatprep.subr.bf16.mxu0 %v17127_v44  ;;  %v17286_v61 = vcombine.low %v7542_v2, %v7546_v18  ;;  %v17167_v44 = vcombine.high %v7422_v36, %v7426_v5  ;;  %v7442_v7 = vld [vmem:[#allocation26 + $0x1f8] sm:$0xff] }
 0x8fe   :  { %10992 = vmatprep.subr.bf16.mxu1 %v17255_v40  ;;  %v17295_v40 = vcombine.high %v7550_v39, %v7554_v1  ;;  %v7446_v2 = vld [vmem:[#allocation26 + $0x218] sm:$0xff] }
 0x8ff   :  { %10902 = vmatmul.mubr.bf16.vlgmr.msra.gmra.mrb[48].mxu0 %v20208_v35  ;;  %v7450_v18 = vld [vmem:[#allocation26 + $0x238] sm:$0xff] }
 0x900   :  { %10943 = vmatmul.mubr.bf16.vlgmr.msra.gmra.mrb[40].mxu1 %v20210_v0  ;;  %10952 = vmatpush1.bf16.msra.mxu0 %v17126_v43  ;;  %v7558_v43 = vld [vmem:[#allocation26 + $0x598] sm:$0xff]  ;;  %v17191_v36 = vcombine.high %v7446_v2, %v7450_v18 }
 0x901   :  { %10983 = vmatprep.mubr.bf16.mxu0 %v20170_v20  ;;  %10993 = vmatpush1.bf16.msra.mxu1 %v17254_v3  ;;  %v17279_v20 = vcombine.high %v7534_v10, %v7538_v13  ;;  %v17294_v3 = vcombine.low %v7550_v39, %v7554_v1  ;;  %v17303_v52 = vcombine.high %v7558_v43, %v7562_v51  ;;  %v7454_v39 = vld [vmem:[#allocation26 + $0x258] sm:$0xff] }
 0x902   :  { %11024 = vmatprep.mubr.bf16.mxu1 %v20173_v33  ;;  %10953 = vmatprep.subr.bf16.mxu0 %v17135_v55  ;;  %v17150_v33 = vcombine.low %v7406_v34, %v7410_v63  ;;  %v17175_v55 = vcombine.high %v7430_v47, %v7434_v30  ;;  %v17174_v10 = vcombine.low %v7430_v47, %v7434_v30  ;;  %v7458_v1 = vld [vmem:[#allocation26 + $0x278] sm:$0xff] }
 0x903   :  { %10994 = vmatprep.subr.bf16.mxu1 %v17263_v53  ;;  %v7438_v53 = vld [vmem:[#allocation26 + $0x1d8] sm:$0xff]  ;;  %v17199_v47 = vcombine.high %v7454_v39, %v7458_v1 }
 0x904   :  { %10954 = vmatpush1.bf16.msra.mxu0 %v17134_v56 }
 0x905   :  { %10995 = vmatpush1.bf16.msra.mxu1 %v17262_v8  ;;  %10955 = vmatprep.subr.bf16.mxu0 %v17143_v59  ;;  %v7566_v8 = vld [vmem:[#allocation26 + $0x5d8] sm:$0xff] }
 0x906   :  { %10996 = vmatprep.subr.bf16.mxu1 %v17271_v60  ;;  %v7570_v59 = vld [vmem:[#allocation26 + $0x5f8] sm:$0xff] }
 0x907   :  { %v17311_v17 = vcombine.high %v7566_v8, %v7570_v59 }
 0x908   :  { %10956 = vmatpush1.bf16.msra.mxu0 %v17142_v14 }
 0x909   :  { %10997 = vmatpush1.bf16.msra.mxu1 %v17270_v15  ;;  %10957 = vmatprep.subr.bf16.mxu0 %v17151_v21  ;;  %v17302_v21 = vcombine.low %v7558_v43, %v7562_v51  ;;  %v7462_v43 = vld [vmem:[#allocation26 + $0x298] sm:$0xff] }
 0x90a   :  { %10998 = vmatprep.subr.bf16.mxu1 %v17279_v20  ;;  %v17183_v20 = vcombine.high %v7438_v53, %v7442_v7  ;;  %v7466_v51 = vld [vmem:[#allocation26 + $0x2b8] sm:$0xff] }
 0x90c   :  { %10958 = vmatpush1.bf16.msra.mxu0 %v17150_v33  ;;  %v7574_v33 = vld [vmem:[#allocation26 + $0x618] sm:$0xff] }
 0x90d   :  { %10999 = vmatpush1.bf16.msra.mxu1 %v17278_v28  ;;  %10959 = vmatprep.subr.bf16.mxu0 %v17159_v48  ;;  %v7578_v28 = vld [vmem:[#allocation26 + $0x638] sm:$0xff]  ;;  %v17182_v48 = vcombine.low %v7438_v53, %v7442_v7 }
 0x90e   :  { %11000 = vmatprep.subr.bf16.mxu1 %v17287_v31  ;;  %v17310_v31 = vcombine.low %v7566_v8, %v7570_v59  ;;  %v17319_v5 = vcombine.high %v7574_v33, %v7578_v28  ;;  %v7470_v7 = vld [vmem:[#allocation26 + $0x2d8] sm:$0xff]  ;;  %v17206_v59 = vcombine.low %v7462_v43, %v7466_v51 }
 0x90f   :  { %v7602_v8 = vld [vmem:[#allocation26 + $0x6f8] sm:$0xff] }
 0x910   :  { %10960 = vmatpush1.bf16.msra.mxu0 %v17158_v29  ;;  %v7582_v29 = vld [vmem:[#allocation26 + $0x658] sm:$0xff] }
 0x911   :  { %11001 = vmatpush1.bf16.msra.mxu1 %v17286_v61  ;;  %10961 = vmatprep.subr.bf16.mxu0 %v17167_v44  ;;  %v7586_v61 = vld [vmem:[#allocation26 + $0x678] sm:$0xff]  ;;  %v17190_v44 = vcombine.low %v7446_v2, %v7450_v18 }
 0x912   :  { %v10657_v49 = vpop.f32.mrb[36].mxu0  ;;  %11002 = vmatprep.subr.bf16.mxu1 %v17295_v40  ;;  %v17318_v40 = vcombine.low %v7574_v33, %v7578_v28  ;;  %v17327_v30 = vcombine.high %v7582_v29, %v7586_v61  ;;  %v7486_v33 = vld [vmem:[#allocation26 + $0x358] sm:$0xff] }
 0x913   :  { %v10698_v45 = vpop.f32.mrb[28].mxu1  ;;  %v10659_v56 = vpop.f32.mrb[37].mxu0  ;;  %v7490_v28 = vld [vmem:[#allocation26 + $0x378] sm:$0xff] }
 0x914   :  { %v20250_v60 = vadd.f32 %v10698_v45, %v10657_v49  ;;  %v10700_v34 = vpop.f32.mrb[29].mxu1  ;;  %v10661_v63 = vpop.f32.mrb[38].mxu0  ;;  %10962 = vmatpush1.bf16.msra.mxu0 %v17166_v50  ;;  %v7590_v50 = vld [vmem:[#allocation26 + $0x698] sm:$0xff]  ;;  %v17326_v49 = vcombine.low %v7582_v29, %v7586_v61 }
 0x915   :  { %v20252_v13 = vadd.f32 %v10700_v34, %v10659_v56  ;;  %v10702_v14 = vpop.f32.mrb[30].mxu1  ;;  %11003 = vmatpush1.bf16.msra.mxu1 %v17294_v3  ;;  %v10662_v15 = vpop.f32.mrb[39].mxu0  ;;  %10963 = vmatprep.subr.bf16.mxu0 %v17175_v55  ;;  %v7594_v3 = vld [vmem:[#allocation26 + $0x6b8] sm:$0xff]  ;;  %v17198_v55 = vcombine.low %v7454_v39, %v7458_v1  ;;  %v17231_v39 = vcombine.high %v7486_v33, %v7490_v28 }
 0x916   :  { %v10703_v16 = vpop.f32.mrb[31].mxu1  ;;  %11004 = vmatprep.subr.bf16.mxu1 %v17303_v52  ;;  %v17207_v52 = vcombine.high %v7462_v43, %v7466_v51  ;;  %v17335_v53 = vcombine.high %v7590_v50, %v7594_v3  ;;  %v7474_v45 = vld [vmem:[#allocation26 + $0x2f8] sm:$0xff]  ;;  %v17334_v34 = vcombine.low %v7590_v50, %v7594_v3 }
 0x917   :  { %v7598_v56 = vld [vmem:[#allocation26 + $0x6d8] sm:$0xff]  ;;  %v17215_v63 = vcombine.high %v7470_v7, %v7474_v45  ;;  %v17214_v16 = vcombine.low %v7470_v7, %v7474_v45 }
 0x918   :  { %10964 = vmatpush1.bf16.msra.mxu0 %v17174_v10  ;;  %v17343_v10 = vcombine.high %v7598_v56, %v7602_v8  ;;  %v7478_v14 = vld [vmem:[#allocation26 + $0x318] sm:$0xff] }
 0x919   :  { %11005 = vmatpush1.bf16.msra.mxu1 %v17302_v21  ;;  %10965 = vmatprep.subr.bf16.mxu0 %v17183_v20  ;;  %v7482_v15 = vld [vmem:[#allocation26 + $0x338] sm:$0xff] }
 0x91a   :  { %11006 = vmatprep.subr.bf16.mxu1 %v17311_v17  ;;  %v7606_v21 = vld [vmem:[#allocation26 + $0x718] sm:$0xff]  ;;  %v17342_v17 = vcombine.low %v7598_v56, %v7602_v8  ;;  %v17223_v2 = vcombine.high %v7478_v14, %v7482_v15 }
 0x91b   :  { %v7610_v20 = vld [vmem:[#allocation26 + $0x738] sm:$0xff] }
 0x91c   :  { %10966 = vmatpush1.bf16.msra.mxu0 %v17182_v48  ;;  %v17351_v18 = vcombine.high %v7606_v21, %v7610_v20  ;;  %v7614_v48 = vld [vmem:[#allocation26 + $0x758] sm:$0xff] }
 0x91d   :  { %11007 = vmatpush1.bf16.msra.mxu1 %v17310_v31  ;;  %10967 = vmatprep.subr.bf16.mxu0 %v17191_v36  ;;  %v7618_v31 = vld [vmem:[#allocation26 + $0x778] sm:$0xff]  ;;  %v17222_v36 = vcombine.low %v7478_v14, %v7482_v15 }
 0x91e   :  { %11008 = vmatprep.subr.bf16.mxu1 %v17319_v5  ;;  %v17350_v5 = vcombine.low %v7606_v21, %v7610_v20  ;;  %v17359_v1 = vcombine.high %v7614_v48, %v7618_v31  ;;  %v7494_v29 = vld [vmem:[#allocation26 + $0x398] sm:$0xff] }
 0x91f   :  { %v7498_v61 = vld [vmem:[#allocation26 + $0x3b8] sm:$0xff] }
 0x920   :  { %10968 = vmatpush1.bf16.msra.mxu0 %v17190_v44  ;;  %v7622_v44 = vld [vmem:[#allocation26 + $0x798] sm:$0xff]  ;;  %v17239_v43 = vcombine.high %v7494_v29, %v7498_v61 }
 0x921   :  { %11009 = vmatpush1.bf16.msra.mxu1 %v17318_v40  ;;  %10969 = vmatprep.subr.bf16.mxu0 %v17199_v47  ;;  %v7626_v40 = vld [vmem:[#allocation26 + $0x7b8] sm:$0xff]  ;;  %v17230_v47 = vcombine.low %v7486_v33, %v7490_v28 }
 0x922   :  { %11010 = vmatprep.subr.bf16.mxu1 %v17327_v30  ;;  %v17358_v30 = vcombine.low %v7614_v48, %v7618_v31  ;;  %v17367_v51 = vcombine.high %v7622_v44, %v7626_v40  ;;  %v7502_v50 = vld [vmem:[#allocation26 + $0x3d8] sm:$0xff] }
 0x923   :  { %v7506_v3 = vld [vmem:[#allocation26 + $0x3f8] sm:$0xff] }
 0x924   :  { %10970 = vmatpush1.bf16.msra.mxu0 %v17198_v55  ;;  %v7630_v55 = vld [vmem:[#allocation26 + $0x7d8] sm:$0xff]  ;;  %v17247_v7 = vcombine.high %v7502_v50, %v7506_v3 }
 0x925   :  { %11011 = vmatpush1.bf16.msra.mxu1 %v17326_v49  ;;  %10971 = vmatprep.subr.bf16.mxu0 %v17207_v52  ;;  %v7634_v49 = vld [vmem:[#allocation26 + $0x7f8] sm:$0xff]  ;;  %v17238_v52 = vcombine.low %v7494_v29, %v7498_v61 }
 0x926   :  { %11012 = vmatprep.subr.bf16.mxu1 %v17335_v53  ;;  %v17366_v53 = vcombine.low %v7622_v44, %v7626_v40  ;;  %v17375_v45 = vcombine.high %v7630_v55, %v7634_v49  ;;  %v7638_v56 = vld [vmem:[#allocation26 + $0x818] sm:$0xff] }
 0x927   :  { %v7642_v8 = vld [vmem:[#allocation26 + $0x838] sm:$0xff] }
 0x928   :  { %10972 = vmatpush1.bf16.msra.mxu0 %v17206_v59  ;;  %v7766_v59 = vld [vmem:[#allocation26 + $0xc18] sm:$0xff]  ;;  %v17383_v14 = vcombine.high %v7638_v56, %v7642_v8 }
 0x929   :  { %11013 = vmatpush1.bf16.msra.mxu1 %v17334_v34  ;;  %10973 = vmatprep.subr.bf16.mxu0 %v17215_v63  ;;  %v7770_v34 = vld [vmem:[#allocation26 + $0xc38] sm:$0xff]  ;;  %v17246_v63 = vcombine.low %v7502_v50, %v7506_v3 }
 0x92a   :  { %11014 = vmatprep.subr.bf16.mxu1 %v17343_v10  ;;  %v17374_v10 = vcombine.low %v7630_v55, %v7634_v49  ;;  %v17511_v15 = vcombine.high %v7766_v59, %v7770_v34  ;;  %v7646_v21 = vld [vmem:[#allocation26 + $0x858] sm:$0xff] }
 0x92b   :  { %v7650_v20 = vld [vmem:[#allocation26 + $0x878] sm:$0xff] }
 0x92c   :  { %10974 = vmatpush1.bf16.msra.mxu0 %v17214_v16  ;;  %v17382_v16 = vcombine.low %v7638_v56, %v7642_v8  ;;  %v17391_v33 = vcombine.high %v7646_v21, %v7650_v20  ;;  %v7654_v28 = vld [vmem:[#allocation26 + $0x898] sm:$0xff] }
 0x92d   :  { %11015 = vmatpush1.bf16.msra.mxu1 %v17342_v17  ;;  %10975 = vmatprep.subr.bf16.mxu0 %v17223_v2  ;;  %v7774_v17 = vld [vmem:[#allocation26 + $0xc58] sm:$0xff] }
 0x92e   :  { %11016 = vmatprep.subr.bf16.mxu1 %v17351_v18  ;;  %v7778_v2 = vld [vmem:[#allocation26 + $0xc78] sm:$0xff]  ;;  %v17510_v18 = vcombine.low %v7766_v59, %v7770_v34 }
 0x92f   :  { %v7658_v48 = vld [vmem:[#allocation26 + $0x8b8] sm:$0xff]  ;;  %v17519_v31 = vcombine.high %v7774_v17, %v7778_v2 }
 0x930   :  { %10976 = vmatpush1.bf16.msra.mxu0 %v17222_v36  ;;  %v7782_v36 = vld [vmem:[#allocation26 + $0xc98] sm:$0xff]  ;;  %v17399_v29 = vcombine.high %v7654_v28, %v7658_v48 }
 0x931   :  { %11017 = vmatpush1.bf16.msra.mxu1 %v17350_v5  ;;  %10977 = vmatprep.subr.bf16.mxu0 %v17231_v39  ;;  %v7786_v5 = vld [vmem:[#allocation26 + $0xcb8] sm:$0xff]  ;;  %v17390_v39 = vcombine.low %v7646_v21, %v7650_v20 }
 0x932   :  { %11018 = vmatprep.subr.bf16.mxu1 %v17359_v1  ;;  %v17518_v1 = vcombine.low %v7774_v17, %v7778_v2  ;;  %v17527_v61 = vcombine.high %v7782_v36, %v7786_v5  ;;  %v7662_v44 = vld [vmem:[#allocation26 + $0x8d8] sm:$0xff] }
 0x933   :  { %v7666_v40 = vld [vmem:[#allocation26 + $0x8f8] sm:$0xff] }
 0x934   :  { %10978 = vmatpush1.bf16.msra.mxu0 %v17230_v47  ;;  %v7794_v47 = vld [vmem:[#allocation26 + $0xcf8] sm:$0xff] }
 0x935   :  { %11019 = vmatpush1.bf16.msra.mxu1 %v17358_v30  ;;  %10979 = vmatprep.subr.bf16.mxu0 %v17239_v43  ;;  %v17398_v30 = vcombine.low %v7654_v28, %v7658_v48  ;;  %v17407_v43 = vcombine.high %v7662_v44, %v7666_v40  ;;  %v7674_v50 = vld [vmem:[#allocation26 + $0x938] sm:$0xff] }
 0x936   :  { %11020 = vmatprep.subr.bf16.mxu1 %v17367_v51  ;;  %v7670_v51 = vld [vmem:[#allocation26 + $0x918] sm:$0xff] }
 0x937   :  { %v7798_v3 = vld [vmem:[#allocation26 + $0xd18] sm:$0xff]  ;;  %v17414_v59 = vcombine.low %v7670_v51, %v7674_v50 }
 0x938   :  { %10980 = vmatpush1.bf16.msra.mxu0 %v17238_v52  ;;  %v7802_v55 = vld [vmem:[#allocation26 + $0xd38] sm:$0xff]  ;;  %v17415_v52 = vcombine.high %v7670_v51, %v7674_v50 }
 0x939   :  { %11021 = vmatpush1.bf16.msra.mxu1 %v17366_v53  ;;  %10981 = vmatprep.subr.bf16.mxu0 %v17247_v7  ;;  %v17543_v53 = vcombine.high %v7798_v3, %v7802_v55  ;;  %v7678_v7 = vld [vmem:[#allocation26 + $0x958] sm:$0xff]  ;;  %v17542_v34 = vcombine.low %v7798_v3, %v7802_v55 }
 0x93a   :  { %11022 = vmatprep.subr.bf16.mxu1 %v17375_v45  ;;  %v7682_v45 = vld [vmem:[#allocation26 + $0x978] sm:$0xff] }
 0x93b   :  { %v7806_v56 = vld [vmem:[#allocation26 + $0xd58] sm:$0xff] }
 0x93c   :  { %10982 = vmatpush1.bf16.msra.mxu0 %v17246_v63  ;;  %v7810_v8 = vld [vmem:[#allocation26 + $0xd78] sm:$0xff]  ;;  %v17423_v63 = vcombine.high %v7678_v7, %v7682_v45 }
 0x93d   :  { %11023 = vmatpush1.bf16.msra.mxu1 %v17374_v10  ;;  %11033 = vmatprep.subr.bf16.mxu0 %v17383_v14  ;;  %v17551_v10 = vcombine.high %v7806_v56, %v7810_v8  ;;  %v7686_v14 = vld [vmem:[#allocation26 + $0x998] sm:$0xff]  ;;  %v17550_v17 = vcombine.low %v7806_v56, %v7810_v8 }
 0x93e   :  { %11074 = vmatprep.subr.bf16.mxu1 %v17511_v15  ;;  %v7690_v15 = vld [vmem:[#allocation26 + $0x9b8] sm:$0xff] }
 0x93f   :  { %10984 = vmatmul.mubr.bf16.vlgmr.msra.gmra.mrb[52].mxu0 %v20190_v25  ;;  %v7790_v25 = vld [vmem:[#allocation26 + $0xcd8] sm:$0xff]  ;;  %v17431_v2 = vcombine.high %v7686_v14, %v7690_v15 }
 0x940   :  { %11025 = vmatmul.mubr.bf16.vlgmr.msra.gmra.mrb[44].mxu1 %v20192_v54  ;;  %11034 = vmatpush1.bf16.msra.mxu0 %v17382_v16  ;;  %v17526_v54 = vcombine.low %v7782_v36, %v7786_v5  ;;  %v17534_v49 = vcombine.low %v7790_v25, %v7794_v47  ;;  %v7814_v21 = vld [vmem:[#allocation26 + $0xd98] sm:$0xff]  ;;  %v17422_v16 = vcombine.low %v7678_v7, %v7682_v45 }
 0x941   :  { %11065 = vmatprep.mubr.bf16.mxu0 %v20194_v4  ;;  %11075 = vmatpush1.bf16.msra.mxu1 %v17510_v18  ;;  %v17535_v4 = vcombine.high %v7790_v25, %v7794_v47  ;;  %v7818_v20 = vld [vmem:[#allocation26 + $0xdb8] sm:$0xff] }
 0x942   :  { %11106 = vmatprep.mubr.bf16.mxu1 %v20197_v41  ;;  %11035 = vmatprep.subr.bf16.mxu0 %v17391_v33  ;;  %v17406_v41 = vcombine.low %v7662_v44, %v7666_v40  ;;  %v17559_v33 = vcombine.high %v7814_v21, %v7818_v20  ;;  %v7694_v28 = vld [vmem:[#allocation26 + $0x9d8] sm:$0xff]  ;;  %v17430_v40 = vcombine.low %v7686_v14, %v7690_v15 }
 0x943   :  { %11076 = vmatprep.subr.bf16.mxu1 %v17519_v31  ;;  %v7698_v48 = vld [vmem:[#allocation26 + $0x9f8] sm:$0xff] }
 0x944   :  { %11036 = vmatpush1.bf16.msra.mxu0 %v17390_v39  ;;  %v7822_v39 = vld [vmem:[#allocation26 + $0xdd8] sm:$0xff] }
 0x945   :  { %11077 = vmatpush1.bf16.msra.mxu1 %v17518_v1  ;;  %11037 = vmatprep.subr.bf16.mxu0 %v17399_v29  ;;  %v7826_v1 = vld [vmem:[#allocation26 + $0xdf8] sm:$0xff] }
 0x946   :  { %11078 = vmatprep.subr.bf16.mxu1 %v17527_v61  ;;  %v17567_v51 = vcombine.high %v7822_v39, %v7826_v1  ;;  %v7702_v50 = vld [vmem:[#allocation26 + $0xa18] sm:$0xff] }
 0x947   :  { %v7706_v3 = vld [vmem:[#allocation26 + $0xa38] sm:$0xff] }
 0x948   :  { %11038 = vmatpush1.bf16.msra.mxu0 %v17398_v30  ;;  %v7834_v55 = vld [vmem:[#allocation26 + $0xe38] sm:$0xff] }
 0x949   :  { %11079 = vmatpush1.bf16.msra.mxu1 %v17526_v54  ;;  %11039 = vmatprep.subr.bf16.mxu0 %v17407_v43  ;;  %v17558_v54 = vcombine.low %v7814_v21, %v7818_v20  ;;  %v17439_v43 = vcombine.high %v7694_v28, %v7698_v48  ;;  %v7710_v7 = vld [vmem:[#allocation26 + $0xa58] sm:$0xff] }
 0x94a   :  { %11080 = vmatprep.subr.bf16.mxu1 %v17535_v4  ;;  %v7714_v45 = vld [vmem:[#allocation26 + $0xa78] sm:$0xff] }
 0x94b   :  { %v7838_v56 = vld [vmem:[#allocation26 + $0xe58] sm:$0xff] }
 0x94c   :  { %11040 = vmatpush1.bf16.msra.mxu0 %v17406_v41  ;;  %v17438_v41 = vcombine.low %v7694_v28, %v7698_v48  ;;  %v7842_v8 = vld [vmem:[#allocation26 + $0xe78] sm:$0xff] }
 0x94d   :  { %11081 = vmatpush1.bf16.msra.mxu1 %v17534_v49  ;;  %11041 = vmatprep.subr.bf16.mxu0 %v17415_v52  ;;  %v17566_v49 = vcombine.low %v7822_v39, %v7826_v1  ;;  %v17447_v52 = vcombine.high %v7702_v50, %v7706_v3  ;;  %v7718_v14 = vld [vmem:[#allocation26 + $0xa98] sm:$0xff] }
 0x94e   :  { %11082 = vmatprep.subr.bf16.mxu1 %v17543_v53  ;;  %v7722_v15 = vld [vmem:[#allocation26 + $0xab8] sm:$0xff] }
 0x94f   :  { %v7846_v21 = vld [vmem:[#allocation26 + $0xe98] sm:$0xff] }
 0x950   :  { %11042 = vmatpush1.bf16.msra.mxu0 %v17414_v59  ;;  %v17446_v59 = vcombine.low %v7702_v50, %v7706_v3  ;;  %v7850_v20 = vld [vmem:[#allocation26 + $0xeb8] sm:$0xff] }
 0x951   :  { %11083 = vmatpush1.bf16.msra.mxu1 %v17542_v34  ;;  %11043 = vmatprep.subr.bf16.mxu0 %v17423_v63  ;;  %v17455_v63 = vcombine.high %v7710_v7, %v7714_v45  ;;  %v7730_v28 = vld [vmem:[#allocation26 + $0xaf8] sm:$0xff] }
 0x952   :  { %v10739_v18 = vpop.f32.mrb[40].mxu0  ;;  %11084 = vmatprep.subr.bf16.mxu1 %v17551_v10  ;;  %v17583_v10 = vcombine.high %v7838_v56, %v7842_v8  ;;  %v7854_v48 = vld [vmem:[#allocation26 + $0xed8] sm:$0xff] }
 0x953   :  { %v10740_v31 = vadd.f32 %v10739_v18, %v20250_v60  ;;  %v10780_v36 = vpop.f32.mrb[32].mxu1  ;;  %v10741_v5 = vpop.f32.mrb[41].mxu0  ;;  %v17591_v18 = vcombine.high %v7846_v21, %v7850_v20  ;;  %v7870_v50 = vld [vmem:[#allocation26 + $0xf58] sm:$0xff] }
 0x954   :  { %v10742_v29 = vadd.f32 %v10741_v5, %v20252_v13  ;;  %v10782_v61 = vpop.f32.mrb[33].mxu1  ;;  %v10743_v44 = vpop.f32.mrb[42].mxu0  ;;  %11044 = vmatpush1.bf16.msra.mxu0 %v17422_v16  ;;  %v7830_v13 = vld [vmem:[#allocation26 + $0xe18] sm:$0xff]  ;;  %v17454_v16 = vcombine.low %v7710_v7, %v7714_v45  ;;  %v17590_v5 = vcombine.low %v7846_v21, %v7850_v20 }
 0x955   :  { %v20260_v25 = vadd.f32 %v10780_v36, %v10740_v31  ;;  %v10784_v47 = vpop.f32.mrb[34].mxu1  ;;  %11085 = vmatpush1.bf16.msra.mxu1 %v17550_v17  ;;  %v10744_v30 = vpop.f32.mrb[43].mxu0  ;;  %11045 = vmatprep.subr.bf16.mxu0 %v17431_v2  ;;  %v17575_v53 = vcombine.high %v7830_v13, %v7834_v55  ;;  %v17574_v34 = vcombine.low %v7830_v13, %v7834_v55  ;;  %v7858_v31 = vld [vmem:[#allocation26 + $0xef8] sm:$0xff] }
 0x956   :  { %v20262_v4 = vadd.f32 %v10782_v61, %v10742_v29  ;;  %v10785_v60 = vpop.f32.mrb[35].mxu1  ;;  %11086 = vmatprep.subr.bf16.mxu1 %v17559_v33  ;;  %v17582_v17 = vcombine.low %v7838_v56, %v7842_v8  ;;  %v17463_v2 = vcombine.high %v7718_v14, %v7722_v15  ;;  %v7726_v33 = vld [vmem:[#allocation26 + $0xad8] sm:$0xff]  ;;  %v17462_v36 = vcombine.low %v7718_v14, %v7722_v15 }
 0x957   :  { %v17471_v39 = vcombine.high %v7726_v33, %v7730_v28  ;;  %v17599_v1 = vcombine.high %v7854_v48, %v7858_v31  ;;  %v7734_v29 = vld [vmem:[#allocation26 + $0xb18] sm:$0xff]  ;;  %v17470_v47 = vcombine.low %v7726_v33, %v7730_v28  ;;  %v17598_v30 = vcombine.low %v7854_v48, %v7858_v31  ;;  %v6863_v33 = vld [vmem:[#allocation25 + $0x20] sm:$0xff] }
 0x958   :  { %11046 = vmatpush1.bf16.msra.mxu0 %v17430_v40  ;;  %v7738_v61 = vld [vmem:[#allocation26 + $0xb38] sm:$0xff]  ;;  %v6987_v48 = vld [vmem:[#allocation25 + $0x400] sm:$0xff] }
 0x959   :  { %11087 = vmatpush1.bf16.msra.mxu1 %v17558_v54  ;;  %11047 = vmatprep.subr.bf16.mxu0 %v17439_v43  ;;  %v7862_v44 = vld [vmem:[#allocation26 + $0xf18] sm:$0xff]  ;;  %v17479_v54 = vcombine.high %v7734_v29, %v7738_v61  ;;  %v17478_v13 = vcombine.low %v7734_v29, %v7738_v61  ;;  %v6991_v31 = vld [vmem:[#allocation25 + $0x420] sm:$0xff] }
 0x95a   :  { %11088 = vmatprep.subr.bf16.mxu1 %v17567_v51  ;;  %v7866_v40 = vld [vmem:[#allocation26 + $0xf38] sm:$0xff]  ;;  %v17761_v29 = vcombine.high %v6987_v48, %v6991_v31 }
 0x95b   :  { %v17607_v43 = vcombine.high %v7862_v44, %v7866_v40  ;;  %v7742_v60 = vld [vmem:[#allocation26 + $0xb58] sm:$0xff]  ;;  %v17606_v55 = vcombine.low %v7862_v44, %v7866_v40  ;;  %v6867_v44 = vld [vmem:[#allocation25 + $0x40] sm:$0xff] }
 0x95c   :  { %11048 = vmatpush1.bf16.msra.mxu0 %v17438_v41  ;;  %v7746_v51 = vld [vmem:[#allocation26 + $0xb78] sm:$0xff]  ;;  %v6871_v40 = vld [vmem:[#allocation25 + $0x60] sm:$0xff] }
 0x95d   :  { %11089 = vmatpush1.bf16.msra.mxu1 %v17566_v49  ;;  %11049 = vmatprep.subr.bf16.mxu0 %v17447_v52  ;;  %v7874_v3 = vld [vmem:[#allocation26 + $0xf78] sm:$0xff]  ;;  %v17487_v41 = vcombine.high %v7742_v60, %v7746_v51  ;;  %v17486_v56 = vcombine.low %v7742_v60, %v7746_v51  ;;  %v17760_v60 = vcombine.low %v6987_v48, %v6991_v31  ;;  %v7027_v48 = vld [vmem:[#allocation25 + $0x540] sm:$0xff] }
 0x95e   :  { %11090 = vmatprep.subr.bf16.mxu1 %v17575_v53  ;;  %v17615_v49 = vcombine.high %v7870_v50, %v7874_v3  ;;  %v7750_v52 = vld [vmem:[#allocation26 + $0xb98] sm:$0xff]  ;;  %v17614_v8 = vcombine.low %v7870_v50, %v7874_v3  ;;  %v17641_v51 = vcombine.high %v6867_v44, %v6871_v40  ;;  %v6875_v50 = vld [vmem:[#allocation25 + $0x80] sm:$0xff] }
 0x95f   :  { %v7754_v53 = vld [vmem:[#allocation26 + $0xbb8] sm:$0xff]  ;;  %v6879_v3 = vld [vmem:[#allocation25 + $0xa0] sm:$0xff] }
 0x960   :  { %11050 = vmatpush1.bf16.msra.mxu0 %v17446_v59  ;;  %v7878_v7 = vld [vmem:[#allocation26 + $0xf98] sm:$0xff]  ;;  %v17495_v59 = vcombine.high %v7750_v52, %v7754_v53  ;;  %v17494_v20 = vcombine.low %v7750_v52, %v7754_v53  ;;  %v17649_v53 = vcombine.high %v6875_v50, %v6879_v3  ;;  %v7031_v31 = vld [vmem:[#allocation25 + $0x560] sm:$0xff] }
 0x961   :  { %11091 = vmatpush1.bf16.msra.mxu1 %v17574_v34  ;;  %11051 = vmatprep.subr.bf16.mxu0 %v17455_v63  ;;  %v7882_v45 = vld [vmem:[#allocation26 + $0xfb8] sm:$0xff] }
 0x962   :  { %11092 = vmatprep.subr.bf16.mxu1 %v17583_v10  ;;  %v17623_v34 = vcombine.high %v7878_v7, %v7882_v45  ;;  %v7758_v63 = vld [vmem:[#allocation26 + $0xbd8] sm:$0xff] }
 0x963   :  { %v7762_v10 = vld [vmem:[#allocation26 + $0xbf8] sm:$0xff] }
 0x964   :  { %11052 = vmatpush1.bf16.msra.mxu0 %v17454_v16  ;;  %v7886_v14 = vld [vmem:[#allocation26 + $0xfd8] sm:$0xff]  ;;  %v17622_v16 = vcombine.low %v7878_v7, %v7882_v45  ;;  %v6883_v45 = vld [vmem:[#allocation25 + $0xc0] sm:$0xff] }
 0x965   :  { %11093 = vmatpush1.bf16.msra.mxu1 %v17582_v17  ;;  %11053 = vmatprep.subr.bf16.mxu0 %v17463_v2  ;;  %v7890_v15 = vld [vmem:[#allocation26 + $0xff8] sm:$0xff]  ;;  %v17503_v17 = vcombine.high %v7758_v63, %v7762_v10 }
 0x966   :  { %11094 = vmatprep.subr.bf16.mxu1 %v17591_v18  ;;  %v20264_v21 = vld [vmem:[#allocation11] sm:$0xff]  ;;  %v17631_v2 = vcombine.high %v7886_v14, %v7890_v15  ;;  %v6859_v18 = vld [vmem:[#allocation25] sm:$0xff] }
 0x967   :  { %v3610_v28 = vrot.slane %v20264_v21, %v19982_v9 }
 0x968   :  { %11054 = vmatpush1.bf16.msra.mxu0 %v17462_v36  ;;  %v3618_v36 = vrot.slane %v20264_v21, %v19992_v27 }
 0x969   :  { %11095 = vmatpush1.bf16.msra.mxu1 %v17590_v5  ;;  %11055 = vmatprep.subr.bf16.mxu0 %v17471_v39  ;;  %v17502_v5 = vcombine.low %v7758_v63, %v7762_v10  ;;  %v17630_v39 = vcombine.low %v7886_v14, %v7890_v15  ;;  %v18584_v61 = vadd.f32 %v20158_v62, %v3610_v28  ;;  %v6891_v10 = vld [vmem:[#allocation25 + $0x100] sm:$0xff] }
 0x96a   :  { %11096 = vmatprep.subr.bf16.mxu1 %v17599_v1  ;;  %v17633_v1 = vcombine.high %v6859_v18, %v6863_v33  ;;  %v6895_v14 = vld [vmem:[#allocation25 + $0x120] sm:$0xff] }
 0x96b   :  { %v7019_v15 = vld [vmem:[#allocation25 + $0x500] sm:$0xff] }
 0x96c   :  { %11056 = vmatpush1.bf16.msra.mxu0 %v17470_v47  ;;  %v18586_v47 = vadd.f32 %v20160_v26, %v3618_v36  ;;  %v17640_v26 = vcombine.low %v6867_v44, %v6871_v40  ;;  %v6903_v28 = vld [vmem:[#allocation25 + $0x160] sm:$0xff]  ;;  %v17664_v36 = vcombine.low %v6891_v10, %v6895_v14 }
 0x96d   :  { %11097 = vmatpush1.bf16.msra.mxu1 %v17598_v30  ;;  %11057 = vmatprep.subr.bf16.mxu0 %v17479_v54  ;;  %v17632_v30 = vcombine.low %v6859_v18, %v6863_v33  ;;  %v6995_v54 = vld [vmem:[#allocation25 + $0x440] sm:$0xff] }
 0x96e   :  { %11098 = vmatprep.subr.bf16.mxu1 %v17607_v43  ;;  %v6999_v43 = vld [vmem:[#allocation25 + $0x460] sm:$0xff] }
 0x96f   :  { %v17769_v62 = vcombine.high %v6995_v54, %v6999_v43  ;;  %v17768_v52 = vcombine.low %v6995_v54, %v6999_v43  ;;  %v6899_v33 = vld [vmem:[#allocation25 + $0x140] sm:$0xff] }
 0x970   :  { %11058 = vmatpush1.bf16.msra.mxu0 %v17478_v13  ;;  %v20272_v13 = vpack.c.bf16 %v18584_v61, %v18584_v61  ;;  %v6911_v61 = vld [vmem:[#allocation25 + $0x1a0] sm:$0xff] }
 0x971   :  { %11099 = vmatpush1.bf16.msra.mxu1 %v17606_v55  ;;  %11059 = vmatprep.subr.bf16.mxu0 %v17487_v41  ;;  %v7003_v55 = vld [vmem:[#allocation25 + $0x480] sm:$0xff] }
 0x972   :  { %11100 = vmatprep.subr.bf16.mxu1 %v17615_v49  ;;  %v7007_v41 = vld [vmem:[#allocation25 + $0x4a0] sm:$0xff]  ;;  %v20275_v49 = vpack.c.bf16 %v18586_v47, %v18586_v47  ;;  %v17672_v47 = vcombine.low %v6899_v33, %v6903_v28 }
 0x973   :  { %v17777_v7 = vcombine.high %v7003_v55, %v7007_v41  ;;  %v7035_v44 = vld [vmem:[#allocation25 + $0x580] sm:$0xff] }
 0x974   :  { %11060 = vmatpush1.bf16.msra.mxu0 %v17486_v56  ;;  %v7011_v56 = vld [vmem:[#allocation25 + $0x4c0] sm:$0xff] }
 0x975   :  { %11101 = vmatpush1.bf16.msra.mxu1 %v17614_v8  ;;  %11061 = vmatprep.subr.bf16.mxu0 %v17495_v59  ;;  %v7015_v8 = vld [vmem:[#allocation25 + $0x4e0] sm:$0xff]  ;;  %v17648_v59 = vcombine.low %v6875_v50, %v6879_v3 }
 0x976   :  { %11102 = vmatprep.subr.bf16.mxu1 %v17623_v34  ;;  %v17785_v63 = vcombine.high %v7011_v56, %v7015_v8  ;;  %v7039_v40 = vld [vmem:[#allocation25 + $0x5a0] sm:$0xff] }
 0x977   :  { %v6919_v50 = vld [vmem:[#allocation25 + $0x1e0] sm:$0xff] }
 0x978   :  { %11062 = vmatpush1.bf16.msra.mxu0 %v17494_v20  ;;  %v7023_v20 = vld [vmem:[#allocation25 + $0x520] sm:$0xff] }
 0x979   :  { %11103 = vmatpush1.bf16.msra.mxu1 %v17622_v16  ;;  %11063 = vmatprep.subr.bf16.mxu0 %v17503_v17  ;;  %v17784_v17 = vcombine.low %v7011_v56, %v7015_v8  ;;  %v17793_v18 = vcombine.high %v7019_v15, %v7023_v20  ;;  %v17808_v8 = vcombine.low %v7035_v44, %v7039_v40 }
 0x97a   :  { %11104 = vmatprep.subr.bf16.mxu1 %v17631_v2  ;;  %v17665_v2 = vcombine.high %v6891_v10, %v6895_v14  ;;  %v6927_v10 = vld [vmem:[#allocation25 + $0x220] sm:$0xff] }
 0x97b   :  { %v7051_v14 = vld [vmem:[#allocation25 + $0x600] sm:$0xff] }
 0x97c   :  { %11064 = vmatpush1.bf16.msra.mxu0 %v17502_v5  ;;  %v17792_v5 = vcombine.low %v7019_v15, %v7023_v20  ;;  %v7055_v15 = vld [vmem:[#allocation25 + $0x620] sm:$0xff] }
 0x97d   :  { %11105 = vmatpush1.bf16.msra.mxu1 %v17630_v39  ;;  %13675 = vmatprep.subr.bf16.mxu0 %v17633_v1  ;;  %v17673_v39 = vcombine.high %v6899_v33, %v6903_v28  ;;  %v17801_v1 = vcombine.high %v7027_v48, %v7031_v31  ;;  %v6935_v33 = vld [vmem:[#allocation25 + $0x260] sm:$0xff] }
 0x97e   :  { %13716 = vmatprep.subr.bf16.mxu1 %v17761_v29  ;;  %v6907_v29 = vld [vmem:[#allocation25 + $0x180] sm:$0xff] }
 0x97f   :  { %11066 = vmatmul.mubr.bf16.vlgmr.msra.gmra.mrb[56].mxu0 %v20208_v35  ;;  %v6887_v35 = vld [vmem:[#allocation25 + $0xe0] sm:$0xff]  ;;  %v17681_v54 = vcombine.high %v6907_v29, %v6911_v61 }
 0x980   :  { %11107 = vmatmul.mubr.bf16.vlgmr.msra.gmra.mrb[48].mxu1 %v20210_v0  ;;  %13676 = vmatpush1.bf16.msra.mxu0 %v17632_v30  ;;  %v17776_v0 = vcombine.low %v7003_v55, %v7007_v41  ;;  %v17657_v34 = vcombine.high %v6883_v45, %v6887_v35  ;;  %v17656_v16 = vcombine.low %v6883_v45, %v6887_v35  ;;  %v7043_v55 = vld [vmem:[#allocation25 + $0x5c0] sm:$0xff] }
 0x981   :  { %13707 = vmatprep.mubr.bf16.mxu0 %v20272_v13  ;;  %13717 = vmatpush1.bf16.msra.mxu1 %v17760_v60  ;;  %v17800_v30 = vcombine.low %v7027_v48, %v7031_v31  ;;  %v17809_v60 = vcombine.high %v7035_v44, %v7039_v40  ;;  %v7047_v41 = vld [vmem:[#allocation25 + $0x5e0] sm:$0xff] }
 0x982   :  { %13748 = vmatprep.mubr.bf16.mxu1 %v20275_v49  ;;  %13677 = vmatprep.subr.bf16.mxu0 %v17641_v51  ;;  %v6915_v51 = vld [vmem:[#allocation25 + $0x1c0] sm:$0xff] }
 0x983   :  { %13718 = vmatprep.subr.bf16.mxu1 %v17769_v62  ;;  %v17688_v20 = vcombine.low %v6915_v51, %v6919_v50  ;;  %v7059_v28 = vld [vmem:[#allocation25 + $0x640] sm:$0xff] }
 0x984   :  { %13678 = vmatpush1.bf16.msra.mxu0 %v17640_v26  ;;  %v7063_v48 = vld [vmem:[#allocation25 + $0x660] sm:$0xff] }
 0x985   :  { %13719 = vmatpush1.bf16.msra.mxu1 %v17768_v52  ;;  %13679 = vmatprep.subr.bf16.mxu0 %v17649_v53  ;;  %v7071_v44 = vld [vmem:[#allocation25 + $0x6a0] sm:$0xff] }
 0x986   :  { %13720 = vmatprep.subr.bf16.mxu1 %v17777_v7  ;;  %v17680_v7 = vcombine.low %v6907_v29, %v6911_v61  ;;  %v6943_v29 = vld [vmem:[#allocation25 + $0x2a0] sm:$0xff] }
 0x987   :  { %v7067_v61 = vld [vmem:[#allocation25 + $0x680] sm:$0xff] }
 0x988   :  { %13680 = vmatpush1.bf16.msra.mxu0 %v17648_v59  ;;  %v17689_v59 = vcombine.high %v6915_v51, %v6919_v50  ;;  %v7075_v51 = vld [vmem:[#allocation25 + $0x6c0] sm:$0xff] }
 0x989   :  { %13721 = vmatpush1.bf16.msra.mxu1 %v17776_v0  ;;  %13681 = vmatprep.subr.bf16.mxu0 %v17657_v34  ;;  %v17817_v34 = vcombine.high %v7043_v55, %v7047_v41  ;;  %v7079_v50 = vld [vmem:[#allocation25 + $0x6e0] sm:$0xff] }
 0x98a   :  { %13722 = vmatprep.subr.bf16.mxu1 %v17785_v63  ;;  %v6923_v63 = vld [vmem:[#allocation25 + $0x200] sm:$0xff] }
 0x98b   :  { %v17696_v31 = vcombine.low %v6923_v63, %v6927_v10 }
 0x98c   :  { %13682 = vmatpush1.bf16.msra.mxu0 %v17656_v16  ;;  %v17816_v16 = vcombine.low %v7043_v55, %v7047_v41  ;;  %v17849_v41 = vcombine.high %v7075_v51, %v7079_v50 }
 0x98d   :  { %13723 = vmatpush1.bf16.msra.mxu1 %v17784_v17  ;;  %13683 = vmatprep.subr.bf16.mxu0 %v17665_v2  ;;  %v17697_v17 = vcombine.high %v6923_v63, %v6927_v10  ;;  %v17825_v2 = vcombine.high %v7051_v14, %v7055_v15  ;;  %v6967_v63 = vld [vmem:[#allocation25 + $0x360] sm:$0xff] }
 0x98e   :  { %13724 = vmatprep.subr.bf16.mxu1 %v17793_v18  ;;  %v6931_v18 = vld [vmem:[#allocation25 + $0x240] sm:$0xff] }
 0x98f   :  { %v17704_v40 = vcombine.low %v6931_v18, %v6935_v33  ;;  %v7091_v10 = vld [vmem:[#allocation25 + $0x740] sm:$0xff] }
 0x990   :  { %13684 = vmatpush1.bf16.msra.mxu0 %v17664_v36  ;;  %v17824_v36 = vcombine.low %v7051_v14, %v7055_v15  ;;  %v7095_v14 = vld [vmem:[#allocation25 + $0x760] sm:$0xff] }
 0x991   :  { %13725 = vmatpush1.bf16.msra.mxu1 %v17792_v5  ;;  %13685 = vmatprep.subr.bf16.mxu0 %v17673_v39  ;;  %v17705_v5 = vcombine.high %v6931_v18, %v6935_v33  ;;  %v17833_v39 = vcombine.high %v7059_v28, %v7063_v48  ;;  %v6975_v18 = vld [vmem:[#allocation25 + $0x3a0] sm:$0xff] }
 0x992   :  { %v10821_v43 = vpop.f32.mrb[44].mxu0  ;;  %13726 = vmatprep.subr.bf16.mxu1 %v17801_v1  ;;  %v6939_v1 = vld [vmem:[#allocation25 + $0x280] sm:$0xff] }
 0x993   :  { %v10862_v3 = vpop.f32.mrb[36].mxu1  ;;  %v10823_v62 = vpop.f32.mrb[45].mxu0  ;;  %v7099_v33 = vld [vmem:[#allocation25 + $0x780] sm:$0xff] }
 0x994   :  { %v20280_v26 = vadd.f32 %v10862_v3, %v10821_v43  ;;  %v10864_v52 = vpop.f32.mrb[37].mxu1  ;;  %v10825_v53 = vpop.f32.mrb[46].mxu0  ;;  %13686 = vmatpush1.bf16.msra.mxu0 %v17672_v47  ;;  %v17832_v47 = vcombine.low %v7059_v28, %v7063_v48  ;;  %v6947_v43 = vld [vmem:[#allocation25 + $0x2c0] sm:$0xff]  ;;  %v17712_v3 = vcombine.low %v6939_v1, %v6943_v29 }
 0x995   :  { %v20282_v45 = vadd.f32 %v10864_v52, %v10823_v62  ;;  %v10866_v35 = vpop.f32.mrb[38].mxu1  ;;  %13727 = vmatpush1.bf16.msra.mxu1 %v17800_v30  ;;  %v10826_v56 = vpop.f32.mrb[47].mxu0  ;;  %13687 = vmatprep.subr.bf16.mxu0 %v17681_v54  ;;  %v17713_v30 = vcombine.high %v6939_v1, %v6943_v29  ;;  %v17841_v54 = vcombine.high %v7067_v61, %v7071_v44  ;;  %v6955_v52 = vld [vmem:[#allocation25 + $0x300] sm:$0xff] }
 0x996   :  { %v10867_v0 = vpop.f32.mrb[39].mxu1  ;;  %13728 = vmatprep.subr.bf16.mxu1 %v17809_v60  ;;  %v6951_v60 = vld [vmem:[#allocation25 + $0x2e0] sm:$0xff]  ;;  %v17840_v62 = vcombine.low %v7067_v61, %v7071_v44 }
 0x997   :  { %v17721_v55 = vcombine.high %v6947_v43, %v6951_v60  ;;  %v6959_v53 = vld [vmem:[#allocation25 + $0x320] sm:$0xff]  ;;  %v17720_v56 = vcombine.low %v6947_v43, %v6951_v60 }
 0x998   :  { %13688 = vmatpush1.bf16.msra.mxu0 %v17680_v7  ;;  %v7083_v7 = vld [vmem:[#allocation25 + $0x700] sm:$0xff]  ;;  %v17728_v15 = vcombine.low %v6955_v52, %v6959_v53 }
 0x999   :  { %13729 = vmatpush1.bf16.msra.mxu1 %v17808_v8  ;;  %13689 = vmatprep.subr.bf16.mxu0 %v17689_v59  ;;  %v7087_v35 = vld [vmem:[#allocation25 + $0x720] sm:$0xff]  ;;  %v17848_v8 = vcombine.low %v7075_v51, %v7079_v50  ;;  %v17729_v59 = vcombine.high %v6955_v52, %v6959_v53  ;;  %v3626_v50 = vrot.slane %v20264_v21, %v20097_v6 }
 0x99a   :  { %13730 = vmatprep.subr.bf16.mxu1 %v17817_v34  ;;  %v17857_v0 = vcombine.high %v7083_v7, %v7087_v35  ;;  %v6963_v34 = vld [vmem:[#allocation25 + $0x340] sm:$0xff] }
 0x99b   :  { %v7103_v28 = vld [vmem:[#allocation25 + $0x7a0] sm:$0xff]  ;;  %v17736_v48 = vcombine.low %v6963_v34, %v6967_v63 }
 0x99c   :  { %13690 = vmatpush1.bf16.msra.mxu0 %v17688_v20  ;;  %v17856_v20 = vcombine.low %v7083_v7, %v7087_v35  ;;  %v6983_v1 = vld [vmem:[#allocation25 + $0x3e0] sm:$0xff] }
 0x99d   :  { %13731 = vmatpush1.bf16.msra.mxu1 %v17816_v16  ;;  %13691 = vmatprep.subr.bf16.mxu0 %v17697_v17  ;;  %v17737_v16 = vcombine.high %v6963_v34, %v6967_v63  ;;  %v17865_v17 = vcombine.high %v7091_v10, %v7095_v14  ;;  %v7107_v29 = vld [vmem:[#allocation25 + $0x7c0] sm:$0xff] }
 0x99e   :  { %13732 = vmatprep.subr.bf16.mxu1 %v17825_v2  ;;  %v6971_v2 = vld [vmem:[#allocation25 + $0x380] sm:$0xff] }
 0x99f   :  { %v7111_v61 = vld [vmem:[#allocation25 + $0x7e0] sm:$0xff]  ;;  %v17744_v44 = vcombine.low %v6971_v2, %v6975_v18 }
 0x9a0   :  { %13692 = vmatpush1.bf16.msra.mxu0 %v17696_v31  ;;  %v17864_v31 = vcombine.low %v7091_v10, %v7095_v14  ;;  %v17881_v43 = vcombine.high %v7107_v29, %v7111_v61  ;;  %v7115_v60 = vld [vmem:[#allocation25 + $0x800] sm:$0xff]  ;;  %v17880_v53 = vcombine.low %v7107_v29, %v7111_v61 }
 0x9a1   :  { %13733 = vmatpush1.bf16.msra.mxu1 %v17824_v36  ;;  %13693 = vmatprep.subr.bf16.mxu0 %v17705_v5  ;;  %v17745_v36 = vcombine.high %v6971_v2, %v6975_v18  ;;  %v17873_v5 = vcombine.high %v7099_v33, %v7103_v28  ;;  %v7119_v51 = vld [vmem:[#allocation25 + $0x820] sm:$0xff] }
 0x9a2   :  { %13734 = vmatprep.subr.bf16.mxu1 %v17833_v39  ;;  %v6979_v39 = vld [vmem:[#allocation25 + $0x3c0] sm:$0xff]  ;;  %v17889_v7 = vcombine.high %v7115_v60, %v7119_v51  ;;  %v17888_v63 = vcombine.low %v7115_v60, %v7119_v51 }
 0x9a3   :  { %v7251_v10 = vld [vmem:[#allocation25 + $0xc40] sm:$0xff] }
 0x9a4   :  { %13694 = vmatpush1.bf16.msra.mxu0 %v17704_v40  ;;  %v3606_v40 = vrot.slane %v20264_v21, %v19985_v11  ;;  %v7255_v14 = vld [vmem:[#allocation25 + $0xc60] sm:$0xff] }
 0x9a5   :  { %13735 = vmatpush1.bf16.msra.mxu1 %v17832_v47  ;;  %13695 = vmatprep.subr.bf16.mxu0 %v17713_v30  ;;  %v17872_v47 = vcombine.low %v7099_v33, %v7103_v28  ;;  %v17753_v30 = vcombine.high %v6979_v39, %v6983_v1  ;;  %v7259_v2 = vld [vmem:[#allocation25 + $0xc80] sm:$0xff] }
 0x9a6   :  { %13736 = vmatprep.subr.bf16.mxu1 %v17841_v54  ;;  %v3614_v54 = vrot.slane %v20264_v21, %v20015_v38  ;;  %v18583_v52 = vadd.f32 %v20154_v57, %v3606_v40  ;;  %v7263_v18 = vld [vmem:[#allocation25 + $0xca0] sm:$0xff] }
 0x9a7   :  { %v7271_v29 = vld [vmem:[#allocation25 + $0xce0] sm:$0xff] }
 0x9a8   :  { %13696 = vmatpush1.bf16.msra.mxu0 %v17712_v3  ;;  %v7243_v3 = vld [vmem:[#allocation25 + $0xc00] sm:$0xff]  ;;  %v18585_v35 = vadd.f32 %v20156_v58, %v3614_v54 }
 0x9a9   :  { %13737 = vmatpush1.bf16.msra.mxu1 %v17840_v62  ;;  %13697 = vmatprep.subr.bf16.mxu0 %v17721_v55  ;;  %v7247_v62 = vld [vmem:[#allocation25 + $0xc20] sm:$0xff]  ;;  %v3634_v55 = vrot.slane %v20264_v21, %v20117_v19 }
 0x9aa   :  { %13738 = vmatprep.subr.bf16.mxu1 %v17849_v41  ;;  %v17752_v41 = vcombine.low %v6979_v39, %v6983_v1  ;;  %v18016_v57 = vcombine.low %v7243_v3, %v7247_v62  ;;  %v7143_v39 = vld [vmem:[#allocation25 + $0x8e0] sm:$0xff] }
 0x9ab   :  { %v18590_v34 = vadd.f32 %v20226_v37, %v3634_v55  ;;  %v18025_v37 = vcombine.high %v7251_v10, %v7255_v14  ;;  %v7267_v1 = vld [vmem:[#allocation25 + $0xcc0] sm:$0xff] }
 0x9ac   :  { %13698 = vmatpush1.bf16.msra.mxu0 %v17720_v56  ;;  %v18017_v56 = vcombine.high %v7243_v3, %v7247_v62  ;;  %v7151_v54 = vld [vmem:[#allocation25 + $0x920] sm:$0xff] }
 0x9ad   :  { %13739 = vmatpush1.bf16.msra.mxu1 %v17848_v8  ;;  %13699 = vmatprep.subr.bf16.mxu0 %v17729_v59  ;;  %v18588_v8 = vadd.f32 %v20224_v23, %v3626_v50  ;;  %v7123_v59 = vld [vmem:[#allocation25 + $0x840] sm:$0xff]  ;;  %v20303_v33 = vpack.c.bf16 %v18590_v34, %v18590_v34  ;;  %v18040_v50 = vcombine.low %v7267_v1, %v7271_v29 }
 0x9ae   :  { %13740 = vmatprep.subr.bf16.mxu1 %v17857_v0  ;;  %v7127_v0 = vld [vmem:[#allocation25 + $0x860] sm:$0xff] }
 0x9af   :  { %v17897_v58 = vcombine.high %v7123_v59, %v7127_v0  ;;  %v20300_v23 = vpack.c.bf16 %v18588_v8, %v18588_v8  ;;  %v17896_v28 = vcombine.low %v7123_v59, %v7127_v0  ;;  %v7279_v60 = vld [vmem:[#allocation25 + $0xd20] sm:$0xff] }
 0x9b0   :  { %13700 = vmatpush1.bf16.msra.mxu0 %v17728_v15  ;;  %v20296_v15 = vpack.c.bf16 %v18583_v52, %v18583_v52  ;;  %v7155_v55 = vld [vmem:[#allocation25 + $0x940] sm:$0xff] }
 0x9b1   :  { %13741 = vmatpush1.bf16.msra.mxu1 %v17856_v20  ;;  %13701 = vmatprep.subr.bf16.mxu0 %v17737_v16  ;;  %v20298_v20 = vpack.c.bf16 %v18585_v35, %v18585_v35  ;;  %v7131_v16 = vld [vmem:[#allocation25 + $0x880] sm:$0xff] }
 0x9b2   :  { %13742 = vmatprep.subr.bf16.mxu1 %v17865_v17  ;;  %v7135_v17 = vld [vmem:[#allocation25 + $0x8a0] sm:$0xff] }
 0x9b3   :  { %v17904_v61 = vcombine.low %v7131_v16, %v7135_v17  ;;  %v7283_v52 = vld [vmem:[#allocation25 + $0xd40] sm:$0xff] }
 0x9b4   :  { %13702 = vmatpush1.bf16.msra.mxu0 %v17736_v48  ;;  %v18024_v48 = vcombine.low %v7251_v10, %v7255_v14  ;;  %v7163_v59 = vld [vmem:[#allocation25 + $0x980] sm:$0xff] }
 0x9b5   :  { %13743 = vmatpush1.bf16.msra.mxu1 %v17864_v31  ;;  %13703 = vmatprep.subr.bf16.mxu0 %v17745_v36  ;;  %v17905_v31 = vcombine.high %v7131_v16, %v7135_v17  ;;  %v18033_v36 = vcombine.high %v7259_v2, %v7263_v18  ;;  %v7167_v0 = vld [vmem:[#allocation25 + $0x9a0] sm:$0xff] }
 0x9b6   :  { %13744 = vmatprep.subr.bf16.mxu1 %v17873_v5  ;;  %v7139_v5 = vld [vmem:[#allocation25 + $0x8c0] sm:$0xff] }
 0x9b7   :  { %v17913_v40 = vcombine.high %v7139_v5, %v7143_v39  ;;  %v17912_v51 = vcombine.low %v7139_v5, %v7143_v39  ;;  %v7291_v34 = vld [vmem:[#allocation25 + $0xd80] sm:$0xff] }
 0x9b8   :  { %13704 = vmatpush1.bf16.msra.mxu0 %v17744_v44  ;;  %v18032_v44 = vcombine.low %v7259_v2, %v7263_v18  ;;  %v7171_v17 = vld [vmem:[#allocation25 + $0x9c0] sm:$0xff] }
 0x9b9   :  { %13745 = vmatpush1.bf16.msra.mxu1 %v17872_v47  ;;  %13705 = vmatprep.subr.bf16.mxu0 %v17753_v30  ;;  %v18041_v47 = vcombine.high %v7267_v1, %v7271_v29  ;;  %v7147_v30 = vld [vmem:[#allocation25 + $0x900] sm:$0xff]  ;;  %v17936_v1 = vcombine.low %v7163_v59, %v7167_v0 }
 0x9ba   :  { %13746 = vmatprep.subr.bf16.mxu1 %v17881_v43  ;;  %v7275_v43 = vld [vmem:[#allocation25 + $0xd00] sm:$0xff]  ;;  %v17921_v3 = vcombine.high %v7147_v30, %v7151_v54 }
 0x9bb   :  { %v18049_v62 = vcombine.high %v7275_v43, %v7279_v60  ;;  %v18048_v35 = vcombine.low %v7275_v43, %v7279_v60  ;;  %v7179_v43 = vld [vmem:[#allocation25 + $0xa00] sm:$0xff] }
 0x9bc   :  { %13706 = vmatpush1.bf16.msra.mxu0 %v17752_v41  ;;  %v7159_v41 = vld [vmem:[#allocation25 + $0x960] sm:$0xff] }
 0x9bd   :  { %13747 = vmatpush1.bf16.msra.mxu1 %v17880_v53  ;;  %13757 = vmatprep.subr.bf16.mxu0 %v17889_v7  ;;  %v7287_v53 = vld [vmem:[#allocation25 + $0xd60] sm:$0xff]  ;;  %v17920_v7 = vcombine.low %v7147_v30, %v7151_v54  ;;  %v17928_v10 = vcombine.low %v7155_v55, %v7159_v41 }
 0x9be   :  { %13798 = vmatprep.subr.bf16.mxu1 %v18017_v56  ;;  %v17929_v56 = vcombine.high %v7155_v55, %v7159_v41  ;;  %v18057_v8 = vcombine.high %v7283_v52, %v7287_v53  ;;  %v18056_v14 = vcombine.low %v7283_v52, %v7287_v53  ;;  %v7183_v60 = vld [vmem:[#allocation25 + $0xa20] sm:$0xff] }
 0x9bf   :  { %13708 = vmatmul.mubr.bf16.vlgmr.msra.gmra.mrb[60].mxu0 %v20296_v15  ;;  %v7187_v41 = vld [vmem:[#allocation25 + $0xa40] sm:$0xff] }
 0x9c0   :  { %13749 = vmatmul.mubr.bf16.vlgmr.msra.gmra.mrb[52].mxu1 %v20298_v20  ;;  %13758 = vmatpush1.bf16.msra.mxu0 %v17888_v63  ;;  %v7295_v63 = vld [vmem:[#allocation25 + $0xda0] sm:$0xff] }
 0x9c1   :  { %13789 = vmatprep.mubr.bf16.mxu0 %v20300_v23  ;;  %13799 = vmatpush1.bf16.msra.mxu1 %v18016_v57  ;;  %v17937_v57 = vcombine.high %v7163_v59, %v7167_v0  ;;  %v18065_v16 = vcombine.high %v7291_v34, %v7295_v63  ;;  %v7191_v52 = vld [vmem:[#allocation25 + $0xa60] sm:$0xff] }
 0x9c2   :  { %13830 = vmatprep.mubr.bf16.mxu1 %v20303_v33  ;;  %13759 = vmatprep.subr.bf16.mxu0 %v17897_v58  ;;  %v7315_v53 = vld [vmem:[#allocation25 + $0xe40] sm:$0xff] }
 0x9c3   :  { %13800 = vmatprep.subr.bf16.mxu1 %v18025_v37  ;;  %v7175_v37 = vld [vmem:[#allocation25 + $0x9e0] sm:$0xff] }
 0x9c4   :  { %13760 = vmatpush1.bf16.msra.mxu0 %v17896_v28  ;;  %v7195_v0 = vld [vmem:[#allocation25 + $0xa80] sm:$0xff] }
 0x9c5   :  { %13801 = vmatpush1.bf16.msra.mxu1 %v18024_v48  ;;  %13761 = vmatprep.subr.bf16.mxu0 %v17905_v31  ;;  %v7299_v48 = vld [vmem:[#allocation25 + $0xdc0] sm:$0xff] }
 0x9c6   :  { %13802 = vmatprep.subr.bf16.mxu1 %v18033_v36  ;;  %v7303_v31 = vld [vmem:[#allocation25 + $0xde0] sm:$0xff] }
 0x9c7   :  { %v18073_v54 = vcombine.high %v7299_v48, %v7303_v31 }
 0x9c8   :  { %13762 = vmatpush1.bf16.msra.mxu0 %v17904_v61 }
 0x9c9   :  { %13803 = vmatpush1.bf16.msra.mxu1 %v18032_v44  ;;  %13763 = vmatprep.subr.bf16.mxu0 %v17913_v40  ;;  %v18064_v40 = vcombine.low %v7291_v34, %v7295_v63  ;;  %v7199_v34 = vld [vmem:[#allocation25 + $0xaa0] sm:$0xff] }
 0x9ca   :  { %13804 = vmatprep.subr.bf16.mxu1 %v18041_v47  ;;  %v17945_v47 = vcombine.high %v7171_v17, %v7175_v37  ;;  %v7323_v63 = vld [vmem:[#allocation25 + $0xe80] sm:$0xff] }
 0x9cc   :  { %13764 = vmatpush1.bf16.msra.mxu0 %v17912_v51  ;;  %v7311_v51 = vld [vmem:[#allocation25 + $0xe20] sm:$0xff] }
 0x9cd   :  { %13805 = vmatpush1.bf16.msra.mxu1 %v18040_v50  ;;  %13765 = vmatprep.subr.bf16.mxu0 %v17921_v3  ;;  %v17944_v50 = vcombine.low %v7171_v17, %v7175_v37  ;;  %v18072_v3 = vcombine.low %v7299_v48, %v7303_v31  ;;  %v7203_v17 = vld [vmem:[#allocation25 + $0xac0] sm:$0xff] }
 0x9ce   :  { %13806 = vmatprep.subr.bf16.mxu1 %v18049_v62  ;;  %v17953_v62 = vcombine.high %v7179_v43, %v7183_v60  ;;  %v7207_v37 = vld [vmem:[#allocation25 + $0xae0] sm:$0xff] }
 0x9cf   :  { %v17977_v31 = vcombine.high %v7203_v17, %v7207_v37 }
 0x9d0   :  { %13766 = vmatpush1.bf16.msra.mxu0 %v17920_v7  ;;  %v7319_v7 = vld [vmem:[#allocation25 + $0xe60] sm:$0xff] }
 0x9d1   :  { %13807 = vmatpush1.bf16.msra.mxu1 %v18048_v35  ;;  %13767 = vmatprep.subr.bf16.mxu0 %v17929_v56  ;;  %v17952_v35 = vcombine.low %v7179_v43, %v7183_v60  ;;  %v18089_v59 = vcombine.high %v7315_v53, %v7319_v7  ;;  %v7223_v43 = vld [vmem:[#allocation25 + $0xb60] sm:$0xff] }
 0x9d2   :  { %v10903_v58 = vpop.f32.mrb[48].mxu0  ;;  %13808 = vmatprep.subr.bf16.mxu1 %v18057_v8  ;;  %v17961_v8 = vcombine.high %v7187_v41, %v7191_v52  ;;  %v7347_v60 = vld [vmem:[#allocation25 + $0xf40] sm:$0xff] }
 0x9d3   :  { %v10904_v2 = vadd.f32 %v10903_v58, %v20280_v26  ;;  %v10944_v18 = vpop.f32.mrb[40].mxu1  ;;  %v10905_v28 = vpop.f32.mrb[49].mxu0  ;;  %v17969_v58 = vcombine.high %v7195_v0, %v7199_v34 }
 0x9d4   :  { %v10906_v36 = vadd.f32 %v10905_v28, %v20282_v45  ;;  %v10946_v5 = vpop.f32.mrb[41].mxu1  ;;  %v10907_v39 = vpop.f32.mrb[50].mxu0  ;;  %13768 = vmatpush1.bf16.msra.mxu0 %v17928_v10  ;;  %v7307_v45 = vld [vmem:[#allocation25 + $0xe00] sm:$0xff]  ;;  %v17968_v28 = vcombine.low %v7195_v0, %v7199_v34 }
 0x9d5   :  { %v20310_v29 = vadd.f32 %v10944_v18, %v10904_v2  ;;  %v10948_v61 = vpop.f32.mrb[42].mxu1  ;;  %13809 = vmatpush1.bf16.msra.mxu1 %v18056_v14  ;;  %v10908_v44 = vpop.f32.mrb[51].mxu0  ;;  %13769 = vmatprep.subr.bf16.mxu0 %v17937_v57  ;;  %v18081_v55 = vcombine.high %v7307_v45, %v7311_v51  ;;  %v18080_v56 = vcombine.low %v7307_v45, %v7311_v51  ;;  %v7327_v10 = vld [vmem:[#allocation25 + $0xea0] sm:$0xff] }
 0x9d6   :  { %v20312_v30 = vadd.f32 %v10946_v5, %v10906_v36  ;;  %v10949_v26 = vpop.f32.mrb[43].mxu1  ;;  %13810 = vmatprep.subr.bf16.mxu1 %v18065_v16  ;;  %v17960_v14 = vcombine.low %v7187_v41, %v7191_v52  ;;  %v18088_v57 = vcombine.low %v7315_v53, %v7319_v7  ;;  %v18097_v16 = vcombine.high %v7323_v63, %v7327_v10  ;;  %v7331_v2 = vld [vmem:[#allocation25 + $0xec0] sm:$0xff] }
 0x9d7   :  { %v7335_v18 = vld [vmem:[#allocation25 + $0xee0] sm:$0xff]  ;;  %v18096_v48 = vcombine.low %v7323_v63, %v7327_v10  ;;  %v17976_v44 = vcombine.low %v7203_v17, %v7207_v37  ;;  %v6860_v37 = vld [vmem:[#allocation25 + $0x8] sm:$0xff] }
 0x9d8   :  { %13770 = vmatpush1.bf16.msra.mxu0 %v17936_v1  ;;  %v18105_v36 = vcombine.high %v7331_v2, %v7335_v18  ;;  %v7211_v5 = vld [vmem:[#allocation25 + $0xb00] sm:$0xff] }
 0x9d9   :  { %13811 = vmatpush1.bf16.msra.mxu1 %v18064_v40  ;;  %13771 = vmatprep.subr.bf16.mxu0 %v17945_v47  ;;  %v7215_v39 = vld [vmem:[#allocation25 + $0xb20] sm:$0xff]  ;;  %v18104_v40 = vcombine.low %v7331_v2, %v7335_v18  ;;  %v6864_v2 = vld [vmem:[#allocation25 + $0x28] sm:$0xff] }
 0x9da   :  { %13812 = vmatprep.subr.bf16.mxu1 %v18073_v54  ;;  %v7339_v1 = vld [vmem:[#allocation25 + $0xf00] sm:$0xff]  ;;  %v17985_v47 = vcombine.high %v7211_v5, %v7215_v39  ;;  %v17984_v51 = vcombine.low %v7211_v5, %v7215_v39  ;;  %v6988_v18 = vld [vmem:[#allocation25 + $0x408] sm:$0xff]  ;;  %v17635_v5 = vcombine.high %v6860_v37, %v6864_v2 }
 0x9db   :  { %v7343_v61 = vld [vmem:[#allocation25 + $0xf20] sm:$0xff] }
 0x9dc   :  { %13772 = vmatpush1.bf16.msra.mxu0 %v17944_v50  ;;  %v18113_v26 = vcombine.high %v7339_v1, %v7343_v61  ;;  %v7219_v54 = vld [vmem:[#allocation25 + $0xb40] sm:$0xff]  ;;  %v18112_v50 = vcombine.low %v7339_v1, %v7343_v61  ;;  %v6868_v61 = vld [vmem:[#allocation25 + $0x48] sm:$0xff] }
 0x9dd   :  { %13813 = vmatpush1.bf16.msra.mxu1 %v18072_v3  ;;  %13773 = vmatprep.subr.bf16.mxu0 %v17953_v62  ;;  %v7351_v45 = vld [vmem:[#allocation25 + $0xf60] sm:$0xff]  ;;  %v17993_v3 = vcombine.high %v7219_v54, %v7223_v43  ;;  %v17992_v7 = vcombine.low %v7219_v54, %v7223_v43 }
 0x9de   :  { %13814 = vmatprep.subr.bf16.mxu1 %v18081_v55  ;;  %v18121_v62 = vcombine.high %v7347_v60, %v7351_v45  ;;  %v7227_v55 = vld [vmem:[#allocation25 + $0xb80] sm:$0xff] }
 0x9df   :  { %v7231_v41 = vld [vmem:[#allocation25 + $0xba0] sm:$0xff] }
 0x9e0   :  { %13774 = vmatpush1.bf16.msra.mxu0 %v17952_v35  ;;  %v7355_v52 = vld [vmem:[#allocation25 + $0xf80] sm:$0xff]  ;;  %v18120_v35 = vcombine.low %v7347_v60, %v7351_v45  ;;  %v18000_v10 = vcombine.low %v7227_v55, %v7231_v41  ;;  %v6876_v60 = vld [vmem:[#allocation25 + $0x88] sm:$0xff] }
 0x9e1   :  { %13815 = vmatpush1.bf16.msra.mxu1 %v18080_v56  ;;  %13775 = vmatprep.subr.bf16.mxu0 %v17961_v8  ;;  %v7359_v53 = vld [vmem:[#allocation25 + $0xfa0] sm:$0xff]  ;;  %v18001_v56 = vcombine.high %v7227_v55, %v7231_v41  ;;  %v6880_v45 = vld [vmem:[#allocation25 + $0xa8] sm:$0xff] }
 0x9e2   :  { %13816 = vmatprep.subr.bf16.mxu1 %v18089_v59  ;;  %v18129_v8 = vcombine.high %v7355_v52, %v7359_v53  ;;  %v7235_v59 = vld [vmem:[#allocation25 + $0xbc0] sm:$0xff]  ;;  %v17651_v55 = vcombine.high %v6876_v60, %v6880_v45 }
 0x9e3   :  { %v7239_v0 = vld [vmem:[#allocation25 + $0xbe0] sm:$0xff] }
 0x9e4   :  { %13776 = vmatpush1.bf16.msra.mxu0 %v17960_v14  ;;  %v7363_v34 = vld [vmem:[#allocation25 + $0xfc0] sm:$0xff]  ;;  %v3622_v14 = vrot.slane %v20264_v21, %v20112_v12 }
 0x9e5   :  { %13817 = vmatpush1.bf16.msra.mxu1 %v18088_v57  ;;  %13777 = vmatprep.subr.bf16.mxu0 %v17969_v58  ;;  %v7367_v63 = vld [vmem:[#allocation25 + $0xfe0] sm:$0xff]  ;;  %v18128_v57 = vcombine.low %v7355_v52, %v7359_v53  ;;  %v18009_v58 = vcombine.high %v7235_v59, %v7239_v0  ;;  %v6884_v52 = vld [vmem:[#allocation25 + $0xc8] sm:$0xff] }
 0x9e6   :  { %13818 = vmatprep.subr.bf16.mxu1 %v18097_v16  ;;  %v3630_v16 = vrot.slane %v20264_v21, %v20132_v46  ;;  %v18137_v17 = vcombine.high %v7363_v34, %v7367_v63  ;;  %v6872_v21 = vld [vmem:[#allocation25 + $0x68] sm:$0xff] }
 0x9e7   :  { %v17643_v43 = vcombine.high %v6868_v61, %v6872_v21  ;;  %v6888_v53 = vld [vmem:[#allocation25 + $0xe8] sm:$0xff] }
 0x9e8   :  { %13778 = vmatpush1.bf16.msra.mxu0 %v17968_v28  ;;  %v6992_v28 = vld [vmem:[#allocation25 + $0x428] sm:$0xff]  ;;  %v18589_v39 = vadd.f32 %v20222_v22, %v3630_v16 }
 0x9e9   :  { %13819 = vmatpush1.bf16.msra.mxu1 %v18096_v48  ;;  %13779 = vmatprep.subr.bf16.mxu0 %v17977_v31  ;;  %v18008_v48 = vcombine.low %v7235_v59, %v7239_v0  ;;  %v18587_v31 = vadd.f32 %v20220_v24, %v3622_v14  ;;  %v17763_v1 = vcombine.high %v6988_v18, %v6992_v28  ;;  %v7024_v14 = vld [vmem:[#allocation25 + $0x528] sm:$0xff] }
 0x9ea   :  { %13820 = vmatprep.subr.bf16.mxu1 %v18105_v36  ;;  %v18136_v36 = vcombine.low %v7363_v34, %v7367_v63  ;;  %v17762_v54 = vcombine.low %v6988_v18, %v6992_v28  ;;  %v20322_v24 = vpack.c.bf16 %v18589_v39, %v18589_v39  ;;  %v17659_v59 = vcombine.high %v6884_v52, %v6888_v53  ;;  %v6892_v34 = vld [vmem:[#allocation25 + $0x108] sm:$0xff] }
 0x9eb   :  { %v6896_v63 = vld [vmem:[#allocation25 + $0x128] sm:$0xff] }
 0x9ec   :  { %13780 = vmatpush1.bf16.msra.mxu0 %v17976_v44  ;;  %v17634_v44 = vcombine.low %v6860_v37, %v6864_v2  ;;  %v17667_v16 = vcombine.high %v6892_v34, %v6896_v63  ;;  %v6900_v37 = vld [vmem:[#allocation25 + $0x148] sm:$0xff] }
 0x9ed   :  { %13821 = vmatpush1.bf16.msra.mxu1 %v18104_v40  ;;  %13781 = vmatprep.subr.bf16.mxu0 %v17985_v47  ;;  %v6996_v40 = vld [vmem:[#allocation25 + $0x448] sm:$0xff] }
 0x9ee   :  { %13822 = vmatprep.subr.bf16.mxu1 %v18113_v26  ;;  %v7000_v47 = vld [vmem:[#allocation25 + $0x468] sm:$0xff]  ;;  %v20320_v26 = vpack.c.bf16 %v18587_v31, %v18587_v31 }
 0x9ef   :  { %v17771_v22 = vcombine.high %v6996_v40, %v7000_v47  ;;  %v6904_v2 = vld [vmem:[#allocation25 + $0x168] sm:$0xff] }
 0x9f0   :  { %13782 = vmatpush1.bf16.msra.mxu0 %v17984_v51  ;;  %v7004_v51 = vld [vmem:[#allocation25 + $0x488] sm:$0xff] }
 0x9f1   :  { %13823 = vmatpush1.bf16.msra.mxu1 %v18112_v50  ;;  %13783 = vmatprep.subr.bf16.mxu0 %v17993_v3  ;;  %v7008_v50 = vld [vmem:[#allocation25 + $0x4a8] sm:$0xff]  ;;  %v17642_v3 = vcombine.low %v6868_v61, %v6872_v21 }
 0x9f2   :  { %13824 = vmatprep.subr.bf16.mxu1 %v18121_v62  ;;  %v17770_v62 = vcombine.low %v6996_v40, %v7000_v47  ;;  %v17779_v41 = vcombine.high %v7004_v51, %v7008_v50  ;;  %v7028_v18 = vld [vmem:[#allocation25 + $0x548] sm:$0xff] }
 0x9f3   :  { %v7032_v28 = vld [vmem:[#allocation25 + $0x568] sm:$0xff] }
 0x9f4   :  { %13784 = vmatpush1.bf16.msra.mxu0 %v17992_v7  ;;  %v7012_v7 = vld [vmem:[#allocation25 + $0x4c8] sm:$0xff]  ;;  %v17802_v40 = vcombine.low %v7028_v18, %v7032_v28 }
 0x9f5   :  { %13825 = vmatpush1.bf16.msra.mxu1 %v18120_v35  ;;  %13785 = vmatprep.subr.bf16.mxu0 %v18001_v56  ;;  %v7016_v35 = vld [vmem:[#allocation25 + $0x4e8] sm:$0xff]  ;;  %v17650_v56 = vcombine.low %v6876_v60, %v6880_v45 }
 0x9f6   :  { %13826 = vmatprep.subr.bf16.mxu1 %v18129_v8  ;;  %v17778_v8 = vcombine.low %v7004_v51, %v7008_v50  ;;  %v17787_v0 = vcombine.high %v7012_v7, %v7016_v35  ;;  %v6908_v39 = vld [vmem:[#allocation25 + $0x188] sm:$0xff] }
 0x9f7   :  { %v7036_v61 = vld [vmem:[#allocation25 + $0x588] sm:$0xff] }
 0x9f8   :  { %13786 = vmatpush1.bf16.msra.mxu0 %v18000_v10  ;;  %v7020_v10 = vld [vmem:[#allocation25 + $0x508] sm:$0xff] }
 0x9f9   :  { %13827 = vmatpush1.bf16.msra.mxu1 %v18128_v57  ;;  %13787 = vmatprep.subr.bf16.mxu0 %v18009_v58  ;;  %v17658_v57 = vcombine.low %v6884_v52, %v6888_v53  ;;  %v17786_v58 = vcombine.low %v7012_v7, %v7016_v35  ;;  %v17794_v31 = vcombine.low %v7020_v10, %v7024_v14  ;;  %v7040_v21 = vld [vmem:[#allocation25 + $0x5a8] sm:$0xff] }
 0x9fa   :  { %13828 = vmatprep.subr.bf16.mxu1 %v18137_v17  ;;  %v17795_v17 = vcombine.high %v7020_v10, %v7024_v14  ;;  %v6916_v60 = vld [vmem:[#allocation25 + $0x1c8] sm:$0xff] }
 0x9fb   :  { %v6920_v45 = vld [vmem:[#allocation25 + $0x1e8] sm:$0xff] }
 0x9fc   :  { %13788 = vmatpush1.bf16.msra.mxu0 %v18008_v48  ;;  %v17666_v48 = vcombine.low %v6892_v34, %v6896_v63  ;;  %v7044_v50 = vld [vmem:[#allocation25 + $0x5c8] sm:$0xff] }
 0x9fd   :  { %13829 = vmatpush1.bf16.msra.mxu1 %v18136_v36  ;;  %13839 = vmatprep.subr.bf16.mxu0 %v17635_v5  ;;  %v17675_v36 = vcombine.high %v6900_v37, %v6904_v2  ;;  %v17803_v5 = vcombine.high %v7028_v18, %v7032_v28  ;;  %v6924_v34 = vld [vmem:[#allocation25 + $0x208] sm:$0xff] }
 0x9fe   :  { %13880 = vmatprep.subr.bf16.mxu1 %v17763_v1  ;;  %v6912_v1 = vld [vmem:[#allocation25 + $0x1a8] sm:$0xff] }
 0x9ff   :  { %13790 = vmatmul.mubr.bf16.vlgmr.msra.gmra.mrb[64].mxu0 %v20320_v26  ;;  %v17683_v47 = vcombine.high %v6908_v39, %v6912_v1  ;;  %v17682_v52 = vcombine.low %v6908_v39, %v6912_v1  ;;  %v6928_v63 = vld [vmem:[#allocation25 + $0x228] sm:$0xff] }
 0xa00   :  { %13831 = vmatmul.mubr.bf16.vlgmr.msra.gmra.mrb[56].mxu1 %v20322_v24  ;;  %13840 = vmatpush1.bf16.msra.mxu0 %v17634_v44  ;;  %v17674_v44 = vcombine.low %v6900_v37, %v6904_v2  ;;  %v7052_v10 = vld [vmem:[#allocation25 + $0x608] sm:$0xff] }
 0xa01   :  { %13871 = vmatprep.mubr.bf16.mxu0 %v20272_v13  ;;  %13881 = vmatpush1.bf16.msra.mxu1 %v17762_v54  ;;  %v7056_v14 = vld [vmem:[#allocation25 + $0x628] sm:$0xff] }
 0xa02   :  { %13912 = vmatprep.mubr.bf16.mxu1 %v20275_v49  ;;  %13841 = vmatprep.subr.bf16.mxu0 %v17643_v43  ;;  %v17811_v43 = vcombine.high %v7036_v61, %v7040_v21  ;;  %v6932_v37 = vld [vmem:[#allocation25 + $0x248] sm:$0xff] }
 0xa03   :  { %13882 = vmatprep.subr.bf16.mxu1 %v17771_v22  ;;  %v6936_v2 = vld [vmem:[#allocation25 + $0x268] sm:$0xff] }
 0xa04   :  { %13842 = vmatpush1.bf16.msra.mxu0 %v17642_v3  ;;  %v7048_v3 = vld [vmem:[#allocation25 + $0x5e8] sm:$0xff] }
 0xa05   :  { %13883 = vmatpush1.bf16.msra.mxu1 %v17770_v62  ;;  %13843 = vmatprep.subr.bf16.mxu0 %v17651_v55  ;;  %v7060_v18 = vld [vmem:[#allocation25 + $0x648] sm:$0xff] }
 0xa06   :  { %13884 = vmatprep.subr.bf16.mxu1 %v17779_v41  ;;  %v7064_v28 = vld [vmem:[#allocation25 + $0x668] sm:$0xff] }
 0xa07   :  { %v6940_v39 = vld [vmem:[#allocation25 + $0x288] sm:$0xff] }
 0xa08   :  { %13844 = vmatpush1.bf16.msra.mxu0 %v17650_v56  ;;  %v17810_v56 = vcombine.low %v7036_v61, %v7040_v21  ;;  %v6944_v1 = vld [vmem:[#allocation25 + $0x2a8] sm:$0xff] }
 0xa09   :  { %13885 = vmatpush1.bf16.msra.mxu1 %v17778_v8  ;;  %13845 = vmatprep.subr.bf16.mxu0 %v17659_v59  ;;  %v17691_v8 = vcombine.high %v6916_v60, %v6920_v45  ;;  %v7068_v61 = vld [vmem:[#allocation25 + $0x688] sm:$0xff] }
 0xa0a   :  { %13886 = vmatprep.subr.bf16.mxu1 %v17787_v0  ;;  %v17819_v0 = vcombine.high %v7044_v50, %v7048_v3  ;;  %v7072_v21 = vld [vmem:[#allocation25 + $0x6a8] sm:$0xff] }
 0xa0c   :  { %13846 = vmatpush1.bf16.msra.mxu0 %v17658_v57  ;;  %v17690_v57 = vcombine.low %v6916_v60, %v6920_v45  ;;  %v6952_v60 = vld [vmem:[#allocation25 + $0x2e8] sm:$0xff] }
 0xa0d   :  { %13887 = vmatpush1.bf16.msra.mxu1 %v17786_v58  ;;  %13847 = vmatprep.subr.bf16.mxu0 %v17667_v16  ;;  %v17818_v58 = vcombine.low %v7044_v50, %v7048_v3  ;;  %v17699_v16 = vcombine.high %v6924_v34, %v6928_v63  ;;  %v7076_v45 = vld [vmem:[#allocation25 + $0x6c8] sm:$0xff]  ;;  %v17842_v50 = vcombine.low %v7068_v61, %v7072_v21 }
 0xa0e   :  { %13888 = vmatprep.subr.bf16.mxu1 %v17795_v17  ;;  %v17827_v17 = vcombine.high %v7052_v10, %v7056_v14 }
 0xa10   :  { %13848 = vmatpush1.bf16.msra.mxu0 %v17666_v48  ;;  %v17698_v48 = vcombine.low %v6924_v34, %v6928_v63  ;;  %v6964_v34 = vld [vmem:[#allocation25 + $0x348] sm:$0xff] }
 0xa11   :  { %13889 = vmatpush1.bf16.msra.mxu1 %v17794_v31  ;;  %13849 = vmatprep.subr.bf16.mxu0 %v17675_v36  ;;  %v17826_v31 = vcombine.low %v7052_v10, %v7056_v14  ;;  %v17707_v36 = vcombine.high %v6932_v37, %v6936_v2  ;;  %v6968_v63 = vld [vmem:[#allocation25 + $0x368] sm:$0xff] }
 0xa12   :  { %v10985_v54 = vpop.f32.mrb[52].mxu0  ;;  %13890 = vmatprep.subr.bf16.mxu1 %v17803_v5  ;;  %v17835_v5 = vcombine.high %v7060_v18, %v7064_v28  ;;  %v7092_v10 = vld [vmem:[#allocation25 + $0x748] sm:$0xff] }
 0xa13   :  { %v11026_v22 = vpop.f32.mrb[44].mxu1  ;;  %v10987_v51 = vpop.f32.mrb[53].mxu0  ;;  %v7096_v14 = vld [vmem:[#allocation25 + $0x768] sm:$0xff] }
 0xa14   :  { %v20328_v62 = vadd.f32 %v11026_v22, %v10985_v54  ;;  %v11028_v55 = vpop.f32.mrb[45].mxu1  ;;  %v10989_v41 = vpop.f32.mrb[54].mxu0  ;;  %13850 = vmatpush1.bf16.msra.mxu0 %v17674_v44  ;;  %v17706_v44 = vcombine.low %v6932_v37, %v6936_v2  ;;  %v17843_v54 = vcombine.high %v7068_v61, %v7072_v21  ;;  %v7080_v22 = vld [vmem:[#allocation25 + $0x6e8] sm:$0xff] }
 0xa15   :  { %v20330_v53 = vadd.f32 %v11028_v55, %v10987_v51  ;;  %v11030_v7 = vpop.f32.mrb[46].mxu1  ;;  %13891 = vmatpush1.bf16.msra.mxu1 %v17802_v40  ;;  %v10990_v35 = vpop.f32.mrb[55].mxu0  ;;  %13851 = vmatprep.subr.bf16.mxu0 %v17683_v47  ;;  %v17834_v40 = vcombine.low %v7060_v18, %v7064_v28  ;;  %v17715_v47 = vcombine.high %v6940_v39, %v6944_v1  ;;  %v6956_v41 = vld [vmem:[#allocation25 + $0x308] sm:$0xff] }
 0xa16   :  { %v11031_v59 = vpop.f32.mrb[47].mxu1  ;;  %13892 = vmatprep.subr.bf16.mxu1 %v17811_v43  ;;  %v6948_v43 = vld [vmem:[#allocation25 + $0x2c8] sm:$0xff]  ;;  %v17714_v51 = vcombine.low %v6940_v39, %v6944_v1  ;;  %v17851_v55 = vcombine.high %v7076_v45, %v7080_v22 }
 0xa17   :  { %v17723_v3 = vcombine.high %v6948_v43, %v6952_v60  ;;  %v7084_v7 = vld [vmem:[#allocation25 + $0x708] sm:$0xff] }
 0xa18   :  { %13852 = vmatpush1.bf16.msra.mxu0 %v17682_v52  ;;  %v6960_v52 = vld [vmem:[#allocation25 + $0x328] sm:$0xff] }
 0xa19   :  { %13893 = vmatpush1.bf16.msra.mxu1 %v17810_v56  ;;  %13853 = vmatprep.subr.bf16.mxu0 %v17691_v8  ;;  %v7088_v35 = vld [vmem:[#allocation25 + $0x728] sm:$0xff]  ;;  %v17722_v56 = vcombine.low %v6948_v43, %v6952_v60  ;;  %v17850_v8 = vcombine.low %v7076_v45, %v7080_v22  ;;  %v17731_v59 = vcombine.high %v6956_v41, %v6960_v52 }
 0xa1a   :  { %13894 = vmatprep.subr.bf16.mxu1 %v17819_v0  ;;  %v17859_v0 = vcombine.high %v7084_v7, %v7088_v35  ;;  %v6972_v37 = vld [vmem:[#allocation25 + $0x388] sm:$0xff] }
 0xa1b   :  { %v6976_v2 = vld [vmem:[#allocation25 + $0x3a8] sm:$0xff] }
 0xa1c   :  { %13854 = vmatpush1.bf16.msra.mxu0 %v17690_v57  ;;  %v17730_v57 = vcombine.low %v6956_v41, %v6960_v52  ;;  %v7100_v18 = vld [vmem:[#allocation25 + $0x788] sm:$0xff] }
 0xa1d   :  { %13895 = vmatpush1.bf16.msra.mxu1 %v17818_v58  ;;  %13855 = vmatprep.subr.bf16.mxu0 %v17699_v16  ;;  %v17858_v58 = vcombine.low %v7084_v7, %v7088_v35  ;;  %v17739_v16 = vcombine.high %v6964_v34, %v6968_v63  ;;  %v7104_v28 = vld [vmem:[#allocation25 + $0x7a8] sm:$0xff] }
 0xa1e   :  { %13896 = vmatprep.subr.bf16.mxu1 %v17827_v17  ;;  %v17867_v17 = vcombine.high %v7092_v10, %v7096_v14  ;;  %v6980_v39 = vld [vmem:[#allocation25 + $0x3c8] sm:$0xff] }
 0xa1f   :  { %v6984_v1 = vld [vmem:[#allocation25 + $0x3e8] sm:$0xff] }
 0xa20   :  { %13856 = vmatpush1.bf16.msra.mxu0 %v17698_v48  ;;  %v17738_v48 = vcombine.low %v6964_v34, %v6968_v63  ;;  %v7108_v61 = vld [vmem:[#allocation25 + $0x7c8] sm:$0xff] }
 0xa21   :  { %13897 = vmatpush1.bf16.msra.mxu1 %v17826_v31  ;;  %13857 = vmatprep.subr.bf16.mxu0 %v17707_v36  ;;  %v17866_v31 = vcombine.low %v7092_v10, %v7096_v14  ;;  %v17747_v36 = vcombine.high %v6972_v37, %v6976_v2  ;;  %v7112_v21 = vld [vmem:[#allocation25 + $0x7e8] sm:$0xff] }
 0xa22   :  { %13898 = vmatprep.subr.bf16.mxu1 %v17835_v5  ;;  %v17875_v5 = vcombine.high %v7100_v18, %v7104_v28  ;;  %v7116_v43 = vld [vmem:[#allocation25 + $0x808] sm:$0xff] }
 0xa23   :  { %v7120_v60 = vld [vmem:[#allocation25 + $0x828] sm:$0xff] }
 0xa24   :  { %13858 = vmatpush1.bf16.msra.mxu0 %v17706_v44  ;;  %v17746_v44 = vcombine.low %v6972_v37, %v6976_v2  ;;  %v7244_v45 = vld [vmem:[#allocation25 + $0xc08] sm:$0xff]  ;;  %v17890_v7 = vcombine.low %v7116_v43, %v7120_v60 }
 0xa25   :  { %13899 = vmatpush1.bf16.msra.mxu1 %v17834_v40  ;;  %13859 = vmatprep.subr.bf16.mxu0 %v17715_v47  ;;  %v17874_v40 = vcombine.low %v7100_v18, %v7104_v28  ;;  %v17755_v47 = vcombine.high %v6980_v39, %v6984_v1  ;;  %v7248_v22 = vld [vmem:[#allocation25 + $0xc28] sm:$0xff] }
 0xa26   :  { %13900 = vmatprep.subr.bf16.mxu1 %v17843_v54  ;;  %v17883_v54 = vcombine.high %v7108_v61, %v7112_v21  ;;  %v7124_v41 = vld [vmem:[#allocation25 + $0x848] sm:$0xff] }
 0xa27   :  { %v7128_v52 = vld [vmem:[#allocation25 + $0x868] sm:$0xff] }
 0xa28   :  { %13860 = vmatpush1.bf16.msra.mxu0 %v17714_v51  ;;  %v17754_v51 = vcombine.low %v6980_v39, %v6984_v1  ;;  %v7252_v35 = vld [vmem:[#allocation25 + $0xc48] sm:$0xff] }
 0xa29   :  { %13901 = vmatpush1.bf16.msra.mxu1 %v17842_v50  ;;  %13861 = vmatprep.subr.bf16.mxu0 %v17723_v3  ;;  %v17882_v50 = vcombine.low %v7108_v61, %v7112_v21  ;;  %v17891_v3 = vcombine.high %v7116_v43, %v7120_v60  ;;  %v7136_v34 = vld [vmem:[#allocation25 + $0x8a8] sm:$0xff] }
 0xa2a   :  { %13902 = vmatprep.subr.bf16.mxu1 %v17851_v55  ;;  %v18019_v55 = vcombine.high %v7244_v45, %v7248_v22  ;;  %v7260_v10 = vld [vmem:[#allocation25 + $0xc88] sm:$0xff] }
 0xa2b   :  { %v7264_v14 = vld [vmem:[#allocation25 + $0xca8] sm:$0xff] }
 0xa2c   :  { %13862 = vmatpush1.bf16.msra.mxu0 %v17722_v56  ;;  %v7256_v56 = vld [vmem:[#allocation25 + $0xc68] sm:$0xff] }
 0xa2d   :  { %13903 = vmatpush1.bf16.msra.mxu1 %v17850_v8  ;;  %13863 = vmatprep.subr.bf16.mxu0 %v17731_v59  ;;  %v18018_v8 = vcombine.low %v7244_v45, %v7248_v22  ;;  %v17899_v59 = vcombine.high %v7124_v41, %v7128_v52  ;;  %v18027_v63 = vcombine.high %v7252_v35, %v7256_v56  ;;  %v7140_v37 = vld [vmem:[#allocation25 + $0x8c8] sm:$0xff] }
 0xa2e   :  { %13904 = vmatprep.subr.bf16.mxu1 %v17859_v0  ;;  %v7132_v0 = vld [vmem:[#allocation25 + $0x888] sm:$0xff] }
 0xa2f   :  { %v7144_v2 = vld [vmem:[#allocation25 + $0x8e8] sm:$0xff] }
 0xa30   :  { %13864 = vmatpush1.bf16.msra.mxu0 %v17730_v57  ;;  %v17898_v57 = vcombine.low %v7124_v41, %v7128_v52  ;;  %v7268_v18 = vld [vmem:[#allocation25 + $0xcc8] sm:$0xff] }
 0xa31   :  { %13905 = vmatpush1.bf16.msra.mxu1 %v17858_v58  ;;  %13865 = vmatprep.subr.bf16.mxu0 %v17739_v16  ;;  %v18026_v58 = vcombine.low %v7252_v35, %v7256_v56  ;;  %v17907_v16 = vcombine.high %v7132_v0, %v7136_v34  ;;  %v7272_v28 = vld [vmem:[#allocation25 + $0xce8] sm:$0xff] }
 0xa32   :  { %13906 = vmatprep.subr.bf16.mxu1 %v17867_v17  ;;  %v18035_v17 = vcombine.high %v7260_v10, %v7264_v14  ;;  %v7148_v39 = vld [vmem:[#allocation25 + $0x908] sm:$0xff] }
 0xa33   :  { %v7152_v1 = vld [vmem:[#allocation25 + $0x928] sm:$0xff] }
 0xa34   :  { %13866 = vmatpush1.bf16.msra.mxu0 %v17738_v48  ;;  %v17906_v48 = vcombine.low %v7132_v0, %v7136_v34  ;;  %v7276_v61 = vld [vmem:[#allocation25 + $0xd08] sm:$0xff] }
 0xa35   :  { %13907 = vmatpush1.bf16.msra.mxu1 %v17866_v31  ;;  %13867 = vmatprep.subr.bf16.mxu0 %v17747_v36  ;;  %v18034_v31 = vcombine.low %v7260_v10, %v7264_v14  ;;  %v17915_v36 = vcombine.high %v7140_v37, %v7144_v2  ;;  %v7280_v21 = vld [vmem:[#allocation25 + $0xd28] sm:$0xff] }
 0xa36   :  { %13908 = vmatprep.subr.bf16.mxu1 %v17875_v5  ;;  %v18043_v5 = vcombine.high %v7268_v18, %v7272_v28  ;;  %v7156_v43 = vld [vmem:[#allocation25 + $0x948] sm:$0xff] }
 0xa37   :  { %v7160_v60 = vld [vmem:[#allocation25 + $0x968] sm:$0xff] }
 0xa38   :  { %13868 = vmatpush1.bf16.msra.mxu0 %v17746_v44  ;;  %v17914_v44 = vcombine.low %v7140_v37, %v7144_v2  ;;  %v7284_v45 = vld [vmem:[#allocation25 + $0xd48] sm:$0xff]  ;;  %v17930_v56 = vcombine.low %v7156_v43, %v7160_v60 }
 0xa39   :  { %13909 = vmatpush1.bf16.msra.mxu1 %v17874_v40  ;;  %13869 = vmatprep.subr.bf16.mxu0 %v17755_v47  ;;  %v18042_v40 = vcombine.low %v7268_v18, %v7272_v28  ;;  %v17923_v47 = vcombine.high %v7148_v39, %v7152_v1  ;;  %v7288_v22 = vld [vmem:[#allocation25 + $0xd68] sm:$0xff] }
 0xa3a   :  { %13910 = vmatprep.subr.bf16.mxu1 %v17883_v54  ;;  %v18051_v54 = vcombine.high %v7276_v61, %v7280_v21  ;;  %v7164_v41 = vld [vmem:[#allocation25 + $0x988] sm:$0xff] }
 0xa3b   :  { %v7168_v52 = vld [vmem:[#allocation25 + $0x9a8] sm:$0xff] }
 0xa3c   :  { %13870 = vmatpush1.bf16.msra.mxu0 %v17754_v51  ;;  %v17922_v51 = vcombine.low %v7148_v39, %v7152_v1  ;;  %v7296_v35 = vld [vmem:[#allocation25 + $0xda8] sm:$0xff]  ;;  %v17938_v28 = vcombine.low %v7164_v41, %v7168_v52 }
 0xa3d   :  { %13911 = vmatpush1.bf16.msra.mxu1 %v17882_v50  ;;  %13921 = vmatprep.subr.bf16.mxu0 %v17891_v3  ;;  %v18050_v50 = vcombine.low %v7276_v61, %v7280_v21  ;;  %v17931_v3 = vcombine.high %v7156_v43, %v7160_v60  ;;  %v7176_v10 = vld [vmem:[#allocation25 + $0x9e8] sm:$0xff] }
 0xa3e   :  { %13962 = vmatprep.subr.bf16.mxu1 %v18019_v55  ;;  %v18059_v55 = vcombine.high %v7284_v45, %v7288_v22  ;;  %v7180_v21 = vld [vmem:[#allocation25 + $0xa08] sm:$0xff] }
 0xa3f   :  { %13872 = vmatmul.mubr.bf16.vlgmr.msra.gmra.mrb[68].mxu0 %v20296_v15 }
 0xa40   :  { %13913 = vmatmul.mubr.bf16.vlgmr.msra.gmra.mrb[60].mxu1 %v20298_v20  ;;  %13922 = vmatpush1.bf16.msra.mxu0 %v17890_v7  ;;  %v7292_v7 = vld [vmem:[#allocation25 + $0xd88] sm:$0xff] }
 0xa41   :  { %13953 = vmatprep.mubr.bf16.mxu0 %v20300_v23  ;;  %13963 = vmatpush1.bf16.msra.mxu1 %v18018_v8  ;;  %v18058_v8 = vcombine.low %v7284_v45, %v7288_v22  ;;  %v18067_v34 = vcombine.high %v7292_v7, %v7296_v35  ;;  %v7188_v45 = vld [vmem:[#allocation25 + $0xa48] sm:$0xff] }
 0xa42   :  { %13994 = vmatprep.mubr.bf16.mxu1 %v20303_v33  ;;  %13923 = vmatprep.subr.bf16.mxu0 %v17899_v59  ;;  %v17939_v59 = vcombine.high %v7164_v41, %v7168_v52  ;;  %v7192_v22 = vld [vmem:[#allocation25 + $0xa68] sm:$0xff] }
 0xa43   :  { %13964 = vmatprep.subr.bf16.mxu1 %v18027_v63  ;;  %v7172_v63 = vld [vmem:[#allocation25 + $0x9c8] sm:$0xff]  ;;  %v17963_v41 = vcombine.high %v7188_v45, %v7192_v22 }
 0xa44   :  { %13924 = vmatpush1.bf16.msra.mxu0 %v17898_v57  ;;  %v17947_v39 = vcombine.high %v7172_v63, %v7176_v10 }
 0xa45   :  { %13965 = vmatpush1.bf16.msra.mxu1 %v18026_v58  ;;  %13925 = vmatprep.subr.bf16.mxu0 %v17907_v16  ;;  %v7300_v16 = vld [vmem:[#allocation25 + $0xdc8] sm:$0xff] }
 0xa46   :  { %13966 = vmatprep.subr.bf16.mxu1 %v18035_v17  ;;  %v7304_v17 = vld [vmem:[#allocation25 + $0xde8] sm:$0xff] }
 0xa47   :  { %v18075_v61 = vcombine.high %v7300_v16, %v7304_v17 }
 0xa48   :  { %13926 = vmatpush1.bf16.msra.mxu0 %v17906_v48 }
 0xa49   :  { %13967 = vmatpush1.bf16.msra.mxu1 %v18034_v31  ;;  %13927 = vmatprep.subr.bf16.mxu0 %v17915_v36 }
 0xa4a   :  { %13968 = vmatprep.subr.bf16.mxu1 %v18043_v5  ;;  %v18066_v5 = vcombine.low %v7292_v7, %v7296_v35  ;;  %v7196_v7 = vld [vmem:[#allocation25 + $0xa88] sm:$0xff] }
 0xa4b   :  { %v7200_v35 = vld [vmem:[#allocation25 + $0xaa8] sm:$0xff] }
 0xa4c   :  { %13928 = vmatpush1.bf16.msra.mxu0 %v17914_v44  ;;  %v7184_v44 = vld [vmem:[#allocation25 + $0xa28] sm:$0xff] }
 0xa4d   :  { %13969 = vmatpush1.bf16.msra.mxu1 %v18042_v40  ;;  %13929 = vmatprep.subr.bf16.mxu0 %v17923_v47  ;;  %v7312_v40 = vld [vmem:[#allocation25 + $0xe28] sm:$0xff]  ;;  %v17946_v47 = vcombine.low %v7172_v63, %v7176_v10  ;;  %v17955_v43 = vcombine.high %v7180_v21, %v7184_v44 }
 0xa4e   :  { %13970 = vmatprep.subr.bf16.mxu1 %v18051_v54  ;;  %v18074_v54 = vcombine.low %v7300_v16, %v7304_v17  ;;  %v7204_v10 = vld [vmem:[#allocation25 + $0xac8] sm:$0xff]  ;;  %v17970_v16 = vcombine.low %v7196_v7, %v7200_v35 }
 0xa50   :  { %13930 = vmatpush1.bf16.msra.mxu0 %v17922_v51  ;;  %v7316_v51 = vld [vmem:[#allocation25 + $0xe48] sm:$0xff] }
 0xa51   :  { %13971 = vmatpush1.bf16.msra.mxu1 %v18050_v50  ;;  %13931 = vmatprep.subr.bf16.mxu0 %v17931_v3  ;;  %v7320_v50 = vld [vmem:[#allocation25 + $0xe68] sm:$0xff]  ;;  %v17954_v3 = vcombine.low %v7180_v21, %v7184_v44 }
 0xa52   :  { %v11067_v0 = vpop.f32.mrb[56].mxu0  ;;  %13972 = vmatprep.subr.bf16.mxu1 %v18059_v55  ;;  %v18091_v52 = vcombine.high %v7316_v51, %v7320_v50  ;;  %v7220_v21 = vld [vmem:[#allocation25 + $0xb48] sm:$0xff] }
 0xa53   :  { %v11068_v14 = vadd.f32 %v11067_v0, %v20328_v62  ;;  %v11108_v57 = vpop.f32.mrb[48].mxu1  ;;  %v11069_v58 = vpop.f32.mrb[57].mxu0  ;;  %v18090_v0 = vcombine.low %v7316_v51, %v7320_v50  ;;  %v7224_v44 = vld [vmem:[#allocation25 + $0xb68] sm:$0xff] }
 0xa54   :  { %v11070_v37 = vadd.f32 %v11069_v58, %v20330_v53  ;;  %v11110_v2 = vpop.f32.mrb[49].mxu1  ;;  %v11071_v18 = vpop.f32.mrb[58].mxu0  ;;  %13932 = vmatpush1.bf16.msra.mxu0 %v17930_v56  ;;  %v7308_v53 = vld [vmem:[#allocation25 + $0xe08] sm:$0xff] }
 0xa55   :  { %v20338_v48 = vadd.f32 %v11108_v57, %v11068_v14  ;;  %v11112_v31 = vpop.f32.mrb[50].mxu1  ;;  %13973 = vmatpush1.bf16.msra.mxu1 %v18058_v8  ;;  %v11072_v36 = vpop.f32.mrb[59].mxu0  ;;  %13933 = vmatprep.subr.bf16.mxu0 %v17939_v59  ;;  %v18083_v60 = vcombine.high %v7308_v53, %v7312_v40  ;;  %v18082_v55 = vcombine.low %v7308_v53, %v7312_v40  ;;  %v7324_v56 = vld [vmem:[#allocation25 + $0xe88] sm:$0xff] }
 0xa56   :  { %v20340_v1 = vadd.f32 %v11110_v2, %v11070_v37  ;;  %v11113_v62 = vpop.f32.mrb[51].mxu1  ;;  %13974 = vmatprep.subr.bf16.mxu1 %v18067_v34  ;;  %v7328_v8 = vld [vmem:[#allocation25 + $0xea8] sm:$0xff]  ;;  %v17962_v59 = vcombine.low %v7188_v45, %v7192_v22  ;;  %v17971_v34 = vcombine.high %v7196_v7, %v7200_v35 }
 0xa57   :  { %v18099_v63 = vcombine.high %v7324_v56, %v7328_v8  ;;  %v7208_v14 = vld [vmem:[#allocation25 + $0xae8] sm:$0xff]  ;;  %v18098_v17 = vcombine.low %v7324_v56, %v7328_v8 }
 0xa58   :  { %13934 = vmatpush1.bf16.msra.mxu0 %v17938_v28  ;;  %v7332_v57 = vld [vmem:[#allocation25 + $0xec8] sm:$0xff]  ;;  %v17979_v37 = vcombine.high %v7204_v10, %v7208_v14 }
 0xa59   :  { %13975 = vmatpush1.bf16.msra.mxu1 %v18066_v5  ;;  %13935 = vmatprep.subr.bf16.mxu0 %v17947_v39  ;;  %v7336_v58 = vld [vmem:[#allocation25 + $0xee8] sm:$0xff]  ;;  %v17978_v5 = vcombine.low %v7204_v10, %v7208_v14  ;;  %v6861_v10 = vld [vmem:[#allocation25 + $0x10] sm:$0xff] }
 0xa5a   :  { %13976 = vmatprep.subr.bf16.mxu1 %v18075_v61  ;;  %v18107_v2 = vcombine.high %v7332_v57, %v7336_v58  ;;  %v7212_v18 = vld [vmem:[#allocation25 + $0xb08] sm:$0xff]  ;;  %v18106_v39 = vcombine.low %v7332_v57, %v7336_v58  ;;  %v6865_v14 = vld [vmem:[#allocation25 + $0x30] sm:$0xff] }
 0xa5b   :  { %v7216_v28 = vld [vmem:[#allocation25 + $0xb28] sm:$0xff]  ;;  %v6989_v57 = vld [vmem:[#allocation25 + $0x410] sm:$0xff] }
 0xa5c   :  { %13936 = vmatpush1.bf16.msra.mxu0 %v17946_v47  ;;  %v7340_v31 = vld [vmem:[#allocation25 + $0xf08] sm:$0xff]  ;;  %v17987_v62 = vcombine.high %v7212_v18, %v7216_v28  ;;  %v17986_v47 = vcombine.low %v7212_v18, %v7216_v28  ;;  %v6993_v58 = vld [vmem:[#allocation25 + $0x430] sm:$0xff] }
 0xa5d   :  { %13977 = vmatpush1.bf16.msra.mxu1 %v18074_v54  ;;  %13937 = vmatprep.subr.bf16.mxu0 %v17955_v43  ;;  %v7344_v36 = vld [vmem:[#allocation25 + $0xf28] sm:$0xff]  ;;  %v17995_v43 = vcombine.high %v7220_v21, %v7224_v44  ;;  %v6869_v18 = vld [vmem:[#allocation25 + $0x50] sm:$0xff] }
 0xa5e   :  { %13978 = vmatprep.subr.bf16.mxu1 %v18083_v60  ;;  %v18115_v61 = vcombine.high %v7340_v31, %v7344_v36  ;;  %v7348_v53 = vld [vmem:[#allocation25 + $0xf48] sm:$0xff]  ;;  %v18114_v54 = vcombine.low %v7340_v31, %v7344_v36  ;;  %v6873_v28 = vld [vmem:[#allocation25 + $0x70] sm:$0xff]  ;;  %v17636_v31 = vcombine.low %v6861_v10, %v6865_v14 }
 0xa5f   :  { %v7352_v40 = vld [vmem:[#allocation25 + $0xf68] sm:$0xff]  ;;  %v6997_v36 = vld [vmem:[#allocation25 + $0x450] sm:$0xff] }
 0xa60   :  { %13938 = vmatpush1.bf16.msra.mxu0 %v17954_v3  ;;  %v18123_v60 = vcombine.high %v7348_v53, %v7352_v40  ;;  %v7228_v45 = vld [vmem:[#allocation25 + $0xb88] sm:$0xff]  ;;  %v17994_v3 = vcombine.low %v7220_v21, %v7224_v44  ;;  %v6881_v21 = vld [vmem:[#allocation25 + $0xb0] sm:$0xff] }
 0xa61   :  { %13979 = vmatpush1.bf16.msra.mxu1 %v18082_v55  ;;  %13939 = vmatprep.subr.bf16.mxu0 %v17963_v41  ;;  %v7232_v22 = vld [vmem:[#allocation25 + $0xba8] sm:$0xff]  ;;  %v18122_v55 = vcombine.low %v7348_v53, %v7352_v40  ;;  %v7005_v53 = vld [vmem:[#allocation25 + $0x490] sm:$0xff] }
 0xa62   :  { %13980 = vmatprep.subr.bf16.mxu1 %v18091_v52  ;;  %v7356_v51 = vld [vmem:[#allocation25 + $0xf88] sm:$0xff]  ;;  %v18003_v41 = vcombine.high %v7228_v45, %v7232_v22  ;;  %v7009_v40 = vld [vmem:[#allocation25 + $0x4b0] sm:$0xff] }
 0xa63   :  { %v7360_v50 = vld [vmem:[#allocation25 + $0xfa8] sm:$0xff] }
 0xa64   :  { %13940 = vmatpush1.bf16.msra.mxu0 %v17962_v59  ;;  %v18131_v52 = vcombine.high %v7356_v51, %v7360_v50  ;;  %v7236_v7 = vld [vmem:[#allocation25 + $0xbc8] sm:$0xff]  ;;  %v18002_v59 = vcombine.low %v7228_v45, %v7232_v22  ;;  %v6885_v45 = vld [vmem:[#allocation25 + $0xd0] sm:$0xff] }
 0xa65   :  { %13981 = vmatpush1.bf16.msra.mxu1 %v18090_v0  ;;  %13941 = vmatprep.subr.bf16.mxu0 %v17971_v34  ;;  %v7240_v35 = vld [vmem:[#allocation25 + $0xbe8] sm:$0xff]  ;;  %v18130_v0 = vcombine.low %v7356_v51, %v7360_v50  ;;  %v6889_v22 = vld [vmem:[#allocation25 + $0xf0] sm:$0xff] }
 0xa66   :  { %13982 = vmatprep.subr.bf16.mxu1 %v18099_v63  ;;  %v7364_v56 = vld [vmem:[#allocation25 + $0xfc8] sm:$0xff]  ;;  %v18011_v34 = vcombine.high %v7236_v7, %v7240_v35  ;;  %v7013_v51 = vld [vmem:[#allocation25 + $0x4d0] sm:$0xff] }
 0xa67   :  { %v7368_v8 = vld [vmem:[#allocation25 + $0xfe8] sm:$0xff]  ;;  %v7017_v50 = vld [vmem:[#allocation25 + $0x4f0] sm:$0xff] }
 0xa68   :  { %13942 = vmatpush1.bf16.msra.mxu0 %v17970_v16  ;;  %v18139_v63 = vcombine.high %v7364_v56, %v7368_v8  ;;  %v18010_v16 = vcombine.low %v7236_v7, %v7240_v35  ;;  %v6893_v7 = vld [vmem:[#allocation25 + $0x110] sm:$0xff] }
 0xa69   :  { %13983 = vmatpush1.bf16.msra.mxu1 %v18098_v17  ;;  %13943 = vmatprep.subr.bf16.mxu0 %v17979_v37  ;;  %v18138_v17 = vcombine.low %v7364_v56, %v7368_v8  ;;  %v17637_v37 = vcombine.high %v6861_v10, %v6865_v14  ;;  %v6897_v35 = vld [vmem:[#allocation25 + $0x130] sm:$0xff] }
 0xa6a   :  { %13984 = vmatprep.subr.bf16.mxu1 %v18107_v2  ;;  %v17765_v2 = vcombine.high %v6989_v57, %v6993_v58  ;;  %v7021_v56 = vld [vmem:[#allocation25 + $0x510] sm:$0xff] }
 0xa6b   :  { %v7025_v8 = vld [vmem:[#allocation25 + $0x530] sm:$0xff] }
 0xa6c   :  { %13944 = vmatpush1.bf16.msra.mxu0 %v17978_v5  ;;  %v7001_v5 = vld [vmem:[#allocation25 + $0x470] sm:$0xff] }
 0xa6d   :  { %13985 = vmatpush1.bf16.msra.mxu1 %v18106_v39  ;;  %13945 = vmatprep.subr.bf16.mxu0 %v17987_v62  ;;  %v17764_v39 = vcombine.low %v6989_v57, %v6993_v58  ;;  %v17645_v62 = vcombine.high %v6869_v18, %v6873_v28  ;;  %v17773_v44 = vcombine.high %v6997_v36, %v7001_v5  ;;  %v6901_v10 = vld [vmem:[#allocation25 + $0x150] sm:$0xff] }
 0xa6e   :  { %13986 = vmatprep.subr.bf16.mxu1 %v18115_v61  ;;  %v6877_v61 = vld [vmem:[#allocation25 + $0x90] sm:$0xff] }
 0xa6f   :  { %v6905_v14 = vld [vmem:[#allocation25 + $0x170] sm:$0xff] }
 0xa70   :  { %13946 = vmatpush1.bf16.msra.mxu0 %v17986_v47  ;;  %v17644_v47 = vcombine.low %v6869_v18, %v6873_v28  ;;  %v7029_v57 = vld [vmem:[#allocation25 + $0x550] sm:$0xff] }
 0xa71   :  { %13987 = vmatpush1.bf16.msra.mxu1 %v18114_v54  ;;  %13947 = vmatprep.subr.bf16.mxu0 %v17995_v43  ;;  %v17772_v54 = vcombine.low %v6997_v36, %v7001_v5  ;;  %v17653_v43 = vcombine.high %v6877_v61, %v6881_v21  ;;  %v7033_v58 = vld [vmem:[#allocation25 + $0x570] sm:$0xff]  ;;  %v17676_v5 = vcombine.low %v6901_v10, %v6905_v14 }
 0xa72   :  { %13988 = vmatprep.subr.bf16.mxu1 %v18123_v60  ;;  %v17781_v60 = vcombine.high %v7005_v53, %v7009_v40  ;;  %v6909_v18 = vld [vmem:[#allocation25 + $0x190] sm:$0xff] }
 0xa73   :  { %v6913_v28 = vld [vmem:[#allocation25 + $0x1b0] sm:$0xff] }
 0xa74   :  { %13948 = vmatpush1.bf16.msra.mxu0 %v17994_v3  ;;  %v17652_v3 = vcombine.low %v6877_v61, %v6881_v21  ;;  %v7041_v36 = vld [vmem:[#allocation25 + $0x5b0] sm:$0xff] }
 0xa75   :  { %13989 = vmatpush1.bf16.msra.mxu1 %v18122_v55  ;;  %13949 = vmatprep.subr.bf16.mxu0 %v18003_v41  ;;  %v17780_v55 = vcombine.low %v7005_v53, %v7009_v40  ;;  %v17661_v41 = vcombine.high %v6885_v45, %v6889_v22  ;;  %v6921_v53 = vld [vmem:[#allocation25 + $0x1f0] sm:$0xff] }
 0xa76   :  { %13990 = vmatprep.subr.bf16.mxu1 %v18131_v52  ;;  %v17789_v52 = vcombine.high %v7013_v51, %v7017_v50 }
 0xa78   :  { %13950 = vmatpush1.bf16.msra.mxu0 %v18002_v59  ;;  %v17660_v59 = vcombine.low %v6885_v45, %v6889_v22 }
 0xa79   :  { %13991 = vmatpush1.bf16.msra.mxu1 %v18130_v0  ;;  %13951 = vmatprep.subr.bf16.mxu0 %v18011_v34  ;;  %v17788_v0 = vcombine.low %v7013_v51, %v7017_v50  ;;  %v17669_v34 = vcombine.high %v6893_v7, %v6897_v35  ;;  %v17684_v50 = vcombine.low %v6909_v18, %v6913_v28 }
 0xa7a   :  { %13992 = vmatprep.subr.bf16.mxu1 %v18139_v63  ;;  %v17797_v63 = vcombine.high %v7021_v56, %v7025_v8 }
 0xa7c   :  { %13952 = vmatpush1.bf16.msra.mxu0 %v18010_v16  ;;  %v17668_v16 = vcombine.low %v6893_v7, %v6897_v35 }
 0xa7d   :  { %13993 = vmatpush1.bf16.msra.mxu1 %v18138_v17  ;;  %14003 = vmatprep.subr.bf16.mxu0 %v17637_v37  ;;  %v17796_v17 = vcombine.low %v7021_v56, %v7025_v8  ;;  %v17677_v37 = vcombine.high %v6901_v10, %v6905_v14  ;;  %v6925_v8 = vld [vmem:[#allocation25 + $0x210] sm:$0xff] }
 0xa7e   :  { %14044 = vmatprep.subr.bf16.mxu1 %v17765_v2  ;;  %v17805_v2 = vcombine.high %v7029_v57, %v7033_v58 }
 0xa7f   :  { %13954 = vmatmul.mubr.bf16.vlgmr.msra.gmra.mrb[72].mxu0 %v20320_v26 }
 0xa80   :  { %13995 = vmatmul.mubr.bf16.vlgmr.msra.gmra.mrb[64].mxu1 %v20322_v24  ;;  %14004 = vmatpush1.bf16.msra.mxu0 %v17636_v31  ;;  %v7037_v31 = vld [vmem:[#allocation25 + $0x590] sm:$0xff] }
 0xa81   :  { %14035 = vmatprep.mubr.bf16.mxu0 %v20272_v13  ;;  %14045 = vmatpush1.bf16.msra.mxu1 %v17764_v39  ;;  %v17804_v39 = vcombine.low %v7029_v57, %v7033_v58  ;;  %v17813_v21 = vcombine.high %v7037_v31, %v7041_v36  ;;  %v6933_v57 = vld [vmem:[#allocation25 + $0x250] sm:$0xff] }
 0xa82   :  { %14076 = vmatprep.mubr.bf16.mxu1 %v20275_v49  ;;  %14005 = vmatprep.subr.bf16.mxu0 %v17645_v62  ;;  %v17685_v62 = vcombine.high %v6909_v18, %v6913_v28  ;;  %v6937_v58 = vld [vmem:[#allocation25 + $0x270] sm:$0xff] }
 0xa83   :  { %14046 = vmatprep.subr.bf16.mxu1 %v17773_v44  ;;  %v6917_v44 = vld [vmem:[#allocation25 + $0x1d0] sm:$0xff]  ;;  %v17709_v18 = vcombine.high %v6933_v57, %v6937_v58 }
 0xa84   :  { %14006 = vmatpush1.bf16.msra.mxu0 %v17644_v47  ;;  %v17693_v7 = vcombine.high %v6917_v44, %v6921_v53 }
 0xa85   :  { %14047 = vmatpush1.bf16.msra.mxu1 %v17772_v54  ;;  %14007 = vmatprep.subr.bf16.mxu0 %v17653_v43  ;;  %v7045_v43 = vld [vmem:[#allocation25 + $0x5d0] sm:$0xff] }
 0xa86   :  { %14048 = vmatprep.subr.bf16.mxu1 %v17781_v60  ;;  %v7049_v60 = vld [vmem:[#allocation25 + $0x5f0] sm:$0xff] }
 0xa87   :  { %v17821_v56 = vcombine.high %v7045_v43, %v7049_v60 }
 0xa88   :  { %14008 = vmatpush1.bf16.msra.mxu0 %v17652_v3 }
 0xa89   :  { %14049 = vmatpush1.bf16.msra.mxu1 %v17780_v55  ;;  %14009 = vmatprep.subr.bf16.mxu0 %v17661_v41 }
 0xa8a   :  { %14050 = vmatprep.subr.bf16.mxu1 %v17789_v52  ;;  %v17812_v52 = vcombine.low %v7037_v31, %v7041_v36  ;;  %v6941_v31 = vld [vmem:[#allocation25 + $0x290] sm:$0xff] }
 0xa8b   :  { %v6945_v36 = vld [vmem:[#allocation25 + $0x2b0] sm:$0xff] }
 0xa8c   :  { %14010 = vmatpush1.bf16.msra.mxu0 %v17660_v59  ;;  %v6929_v59 = vld [vmem:[#allocation25 + $0x230] sm:$0xff] }
 0xa8d   :  { %14051 = vmatpush1.bf16.msra.mxu1 %v17788_v0  ;;  %14011 = vmatprep.subr.bf16.mxu0 %v17669_v34  ;;  %v7057_v0 = vld [vmem:[#allocation25 + $0x630] sm:$0xff]  ;;  %v17692_v34 = vcombine.low %v6917_v44, %v6921_v53  ;;  %v17701_v10 = vcombine.high %v6925_v8, %v6929_v59 }
 0xa8e   :  { %14052 = vmatprep.subr.bf16.mxu1 %v17797_v63  ;;  %v17820_v63 = vcombine.low %v7045_v43, %v7049_v60  ;;  %v6949_v53 = vld [vmem:[#allocation25 + $0x2d0] sm:$0xff]  ;;  %v17716_v43 = vcombine.low %v6941_v31, %v6945_v36 }
 0xa90   :  { %14012 = vmatpush1.bf16.msra.mxu0 %v17668_v16  ;;  %v7061_v16 = vld [vmem:[#allocation25 + $0x650] sm:$0xff] }
 0xa91   :  { %14053 = vmatpush1.bf16.msra.mxu1 %v17796_v17  ;;  %14013 = vmatprep.subr.bf16.mxu0 %v17677_v37  ;;  %v7065_v17 = vld [vmem:[#allocation25 + $0x670] sm:$0xff]  ;;  %v17700_v37 = vcombine.low %v6925_v8, %v6929_v59 }
 0xa92   :  { %v13709_v61 = vpop.f32.mrb[60].mxu0  ;;  %14054 = vmatprep.subr.bf16.mxu1 %v17805_v2  ;;  %v17837_v28 = vcombine.high %v7061_v16, %v7065_v17  ;;  %v6965_v8 = vld [vmem:[#allocation25 + $0x350] sm:$0xff] }
 0xa93   :  { %v13710_v40 = vadd.f32 %v13709_v61, %v20242_v32  ;;  %v13750_v47 = vpop.f32.mrb[52].mxu1  ;;  %v13711_v54 = vpop.f32.mrb[61].mxu0  ;;  %v17836_v61 = vcombine.low %v7061_v16, %v7065_v17  ;;  %v6969_v59 = vld [vmem:[#allocation25 + $0x370] sm:$0xff] }
 0xa94   :  { %v13712_v45 = vadd.f32 %v13711_v54, %v20244_v42  ;;  %v13752_v22 = vpop.f32.mrb[53].mxu1  ;;  %v13713_v51 = vpop.f32.mrb[62].mxu0  ;;  %14014 = vmatpush1.bf16.msra.mxu0 %v17676_v5  ;;  %v7053_v42 = vld [vmem:[#allocation25 + $0x610] sm:$0xff] }
 0xa95   :  { %v20348_v3 = vadd.f32 %v13750_v47, %v13710_v40  ;;  %v13754_v55 = vpop.f32.mrb[54].mxu1  ;;  %14055 = vmatpush1.bf16.msra.mxu1 %v17804_v39  ;;  %v13714_v41 = vpop.f32.mrb[63].mxu0  ;;  %14015 = vmatprep.subr.bf16.mxu0 %v17685_v62  ;;  %v17829_v14 = vcombine.high %v7053_v42, %v7057_v0  ;;  %v17828_v2 = vcombine.low %v7053_v42, %v7057_v0  ;;  %v7069_v5 = vld [vmem:[#allocation25 + $0x690] sm:$0xff] }
 0xa96   :  { %v20350_v35 = vadd.f32 %v13752_v22, %v13712_v45  ;;  %v13755_v32 = vpop.f32.mrb[55].mxu1  ;;  %14056 = vmatprep.subr.bf16.mxu1 %v17813_v21  ;;  %v7073_v39 = vld [vmem:[#allocation25 + $0x6b0] sm:$0xff]  ;;  %v17708_v62 = vcombine.low %v6933_v57, %v6937_v58  ;;  %v17717_v21 = vcombine.high %v6941_v31, %v6945_v36 }
 0xa97   :  { %v17845_v44 = vcombine.high %v7069_v5, %v7073_v39  ;;  %v6953_v40 = vld [vmem:[#allocation25 + $0x2f0] sm:$0xff]  ;;  %v17844_v60 = vcombine.low %v7069_v5, %v7073_v39 }
 0xa98   :  { %14016 = vmatpush1.bf16.msra.mxu0 %v17684_v50  ;;  %v7077_v47 = vld [vmem:[#allocation25 + $0x6d0] sm:$0xff]  ;;  %v17725_v45 = vcombine.high %v6949_v53, %v6953_v40 }
 0xa99   :  { %14057 = vmatpush1.bf16.msra.mxu1 %v17812_v52  ;;  %14017 = vmatprep.subr.bf16.mxu0 %v17693_v7  ;;  %v7081_v54 = vld [vmem:[#allocation25 + $0x6f0] sm:$0xff]  ;;  %v17724_v52 = vcombine.low %v6949_v53, %v6953_v40 }
 0xa9a   :  { %14058 = vmatprep.subr.bf16.mxu1 %v17821_v56  ;;  %v17853_v22 = vcombine.high %v7077_v47, %v7081_v54  ;;  %v6957_v51 = vld [vmem:[#allocation25 + $0x310] sm:$0xff]  ;;  %v17852_v7 = vcombine.low %v7077_v47, %v7081_v54 }
 0xa9b   :  { %v6961_v50 = vld [vmem:[#allocation25 + $0x330] sm:$0xff] }
 0xa9c   :  { %14018 = vmatpush1.bf16.msra.mxu0 %v17692_v34  ;;  %v7085_v55 = vld [vmem:[#allocation25 + $0x710] sm:$0xff]  ;;  %v17733_v32 = vcombine.high %v6957_v51, %v6961_v50  ;;  %v17732_v34 = vcombine.low %v6957_v51, %v6961_v50 }
 0xa9d   :  { %14059 = vmatpush1.bf16.msra.mxu1 %v17820_v63  ;;  %14019 = vmatprep.subr.bf16.mxu0 %v17701_v10  ;;  %v7089_v41 = vld [vmem:[#allocation25 + $0x730] sm:$0xff]  ;;  %v17741_v10 = vcombine.high %v6965_v8, %v6969_v59 }
 0xa9e   :  { %14060 = vmatprep.subr.bf16.mxu1 %v17829_v14  ;;  %v17861_v56 = vcombine.high %v7085_v55, %v7089_v41  ;;  %v7093_v42 = vld [vmem:[#allocation25 + $0x750] sm:$0xff]  ;;  %v17860_v63 = vcombine.low %v7085_v55, %v7089_v41 }
 0xa9f   :  { %v7097_v0 = vld [vmem:[#allocation25 + $0x770] sm:$0xff] }
 0xaa0   :  { %14020 = vmatpush1.bf16.msra.mxu0 %v17700_v37  ;;  %v17869_v14 = vcombine.high %v7093_v42, %v7097_v0  ;;  %v6973_v57 = vld [vmem:[#allocation25 + $0x390] sm:$0xff]  ;;  %v17740_v37 = vcombine.low %v6965_v8, %v6969_v59 }
 0xaa1   :  { %14061 = vmatpush1.bf16.msra.mxu1 %v17828_v2  ;;  %14021 = vmatprep.subr.bf16.mxu0 %v17709_v18  ;;  %v6977_v58 = vld [vmem:[#allocation25 + $0x3b0] sm:$0xff]  ;;  %v17868_v2 = vcombine.low %v7093_v42, %v7097_v0 }
 0xaa2   :  { %14062 = vmatprep.subr.bf16.mxu1 %v17837_v28  ;;  %v7101_v16 = vld [vmem:[#allocation25 + $0x790] sm:$0xff]  ;;  %v17749_v18 = vcombine.high %v6973_v57, %v6977_v58 }
 0xaa3   :  { %v7105_v17 = vld [vmem:[#allocation25 + $0x7b0] sm:$0xff] }
 0xaa4   :  { %14022 = vmatpush1.bf16.msra.mxu0 %v17708_v62  ;;  %v17877_v28 = vcombine.high %v7101_v16, %v7105_v17  ;;  %v6981_v31 = vld [vmem:[#allocation25 + $0x3d0] sm:$0xff]  ;;  %v17748_v62 = vcombine.low %v6973_v57, %v6977_v58 }
 0xaa5   :  { %14063 = vmatpush1.bf16.msra.mxu1 %v17836_v61  ;;  %14023 = vmatprep.subr.bf16.mxu0 %v17717_v21  ;;  %v6985_v36 = vld [vmem:[#allocation25 + $0x3f0] sm:$0xff]  ;;  %v17876_v61 = vcombine.low %v7101_v16, %v7105_v17 }
 0xaa6   :  { %14064 = vmatprep.subr.bf16.mxu1 %v17845_v44  ;;  %v7109_v5 = vld [vmem:[#allocation25 + $0x7d0] sm:$0xff]  ;;  %v17757_v21 = vcombine.high %v6981_v31, %v6985_v36 }
 0xaa7   :  { %v7113_v39 = vld [vmem:[#allocation25 + $0x7f0] sm:$0xff] }
 0xaa8   :  { %14024 = vmatpush1.bf16.msra.mxu0 %v17716_v43  ;;  %v17885_v44 = vcombine.high %v7109_v5, %v7113_v39  ;;  %v7117_v53 = vld [vmem:[#allocation25 + $0x810] sm:$0xff]  ;;  %v17756_v43 = vcombine.low %v6981_v31, %v6985_v36 }
 0xaa9   :  { %14065 = vmatpush1.bf16.msra.mxu1 %v17844_v60  ;;  %14025 = vmatprep.subr.bf16.mxu0 %v17725_v45  ;;  %v7121_v40 = vld [vmem:[#allocation25 + $0x830] sm:$0xff]  ;;  %v17884_v60 = vcombine.low %v7109_v5, %v7113_v39 }
 0xaaa   :  { %14066 = vmatprep.subr.bf16.mxu1 %v17853_v22  ;;  %v7245_v47 = vld [vmem:[#allocation25 + $0xc10] sm:$0xff]  ;;  %v17893_v45 = vcombine.high %v7117_v53, %v7121_v40  ;;  %v17892_v55 = vcombine.low %v7117_v53, %v7121_v40 }
 0xaab   :  { %v7249_v54 = vld [vmem:[#allocation25 + $0xc30] sm:$0xff] }
 0xaac   :  { %14026 = vmatpush1.bf16.msra.mxu0 %v17724_v52  ;;  %v18021_v22 = vcombine.high %v7245_v47, %v7249_v54  ;;  %v7125_v51 = vld [vmem:[#allocation25 + $0x850] sm:$0xff] }
 0xaad   :  { %14067 = vmatpush1.bf16.msra.mxu1 %v17852_v7  ;;  %14027 = vmatprep.subr.bf16.mxu0 %v17733_v32  ;;  %v7129_v50 = vld [vmem:[#allocation25 + $0x870] sm:$0xff]  ;;  %v18020_v7 = vcombine.low %v7245_v47, %v7249_v54 }
 0xaae   :  { %14068 = vmatprep.subr.bf16.mxu1 %v17861_v56  ;;  %v7253_v41 = vld [vmem:[#allocation25 + $0xc50] sm:$0xff]  ;;  %v17901_v32 = vcombine.high %v7125_v51, %v7129_v50 }
 0xaaf   :  { %v7257_v52 = vld [vmem:[#allocation25 + $0xc70] sm:$0xff] }
 0xab0   :  { %14028 = vmatpush1.bf16.msra.mxu0 %v17732_v34  ;;  %v7133_v56 = vld [vmem:[#allocation25 + $0x890] sm:$0xff]  ;;  %v18029_v59 = vcombine.high %v7253_v41, %v7257_v52  ;;  %v17900_v34 = vcombine.low %v7125_v51, %v7129_v50 }
 0xab1   :  { %14069 = vmatpush1.bf16.msra.mxu1 %v17860_v63  ;;  %14029 = vmatprep.subr.bf16.mxu0 %v17741_v10  ;;  %v7137_v8 = vld [vmem:[#allocation25 + $0x8b0] sm:$0xff]  ;;  %v18028_v63 = vcombine.low %v7253_v41, %v7257_v52 }
 0xab2   :  { %14070 = vmatprep.subr.bf16.mxu1 %v17869_v14  ;;  %v7261_v42 = vld [vmem:[#allocation25 + $0xc90] sm:$0xff]  ;;  %v17909_v10 = vcombine.high %v7133_v56, %v7137_v8 }
 0xab3   :  { %v7265_v0 = vld [vmem:[#allocation25 + $0xcb0] sm:$0xff] }
 0xab4   :  { %14030 = vmatpush1.bf16.msra.mxu0 %v17740_v37  ;;  %v18037_v14 = vcombine.high %v7261_v42, %v7265_v0  ;;  %v7141_v57 = vld [vmem:[#allocation25 + $0x8d0] sm:$0xff]  ;;  %v17908_v37 = vcombine.low %v7133_v56, %v7137_v8 }
 0xab5   :  { %14071 = vmatpush1.bf16.msra.mxu1 %v17868_v2  ;;  %14031 = vmatprep.subr.bf16.mxu0 %v17749_v18  ;;  %v7145_v58 = vld [vmem:[#allocation25 + $0x8f0] sm:$0xff]  ;;  %v18036_v2 = vcombine.low %v7261_v42, %v7265_v0 }
 0xab6   :  { %14072 = vmatprep.subr.bf16.mxu1 %v17877_v28  ;;  %v7269_v16 = vld [vmem:[#allocation25 + $0xcd0] sm:$0xff]  ;;  %v17917_v18 = vcombine.high %v7141_v57, %v7145_v58 }
 0xab7   :  { %v7273_v17 = vld [vmem:[#allocation25 + $0xcf0] sm:$0xff] }
 0xab8   :  { %14032 = vmatpush1.bf16.msra.mxu0 %v17748_v62  ;;  %v18045_v28 = vcombine.high %v7269_v16, %v7273_v17  ;;  %v7149_v31 = vld [vmem:[#allocation25 + $0x910] sm:$0xff]  ;;  %v17916_v62 = vcombine.low %v7141_v57, %v7145_v58 }
 0xab9   :  { %14073 = vmatpush1.bf16.msra.mxu1 %v17876_v61  ;;  %14033 = vmatprep.subr.bf16.mxu0 %v17757_v21  ;;  %v7153_v36 = vld [vmem:[#allocation25 + $0x930] sm:$0xff]  ;;  %v18044_v61 = vcombine.low %v7269_v16, %v7273_v17 }
 0xaba   :  { %14074 = vmatprep.subr.bf16.mxu1 %v17885_v44  ;;  %v7277_v5 = vld [vmem:[#allocation25 + $0xd10] sm:$0xff]  ;;  %v17925_v21 = vcombine.high %v7149_v31, %v7153_v36 }
 0xabb   :  { %v7281_v39 = vld [vmem:[#allocation25 + $0xd30] sm:$0xff] }
 0xabc   :  { %14034 = vmatpush1.bf16.msra.mxu0 %v17756_v43  ;;  %v18053_v44 = vcombine.high %v7277_v5, %v7281_v39  ;;  %v7157_v53 = vld [vmem:[#allocation25 + $0x950] sm:$0xff]  ;;  %v17924_v43 = vcombine.low %v7149_v31, %v7153_v36 }
 0xabd   :  { %14075 = vmatpush1.bf16.msra.mxu1 %v17884_v60  ;;  %14085 = vmatprep.subr.bf16.mxu0 %v17893_v45  ;;  %v7161_v40 = vld [vmem:[#allocation25 + $0x970] sm:$0xff]  ;;  %v18052_v60 = vcombine.low %v7277_v5, %v7281_v39 }
 0xabe   :  { %14126 = vmatprep.subr.bf16.mxu1 %v18021_v22  ;;  %v7285_v47 = vld [vmem:[#allocation25 + $0xd50] sm:$0xff]  ;;  %v17933_v45 = vcombine.high %v7157_v53, %v7161_v40  ;;  %v17932_v52 = vcombine.low %v7157_v53, %v7161_v40 }
 0xabf   :  { %14036 = vmatmul.mubr.bf16.vlgmr.msra.gmra.mrb[76].mxu0 %v20296_v15  ;;  %v7289_v54 = vld [vmem:[#allocation25 + $0xd70] sm:$0xff] }
 0xac0   :  { %14077 = vmatmul.mubr.bf16.vlgmr.msra.gmra.mrb[68].mxu1 %v20298_v20  ;;  %14086 = vmatpush1.bf16.msra.mxu0 %v17892_v55  ;;  %v18061_v22 = vcombine.high %v7285_v47, %v7289_v54  ;;  %v7165_v51 = vld [vmem:[#allocation25 + $0x990] sm:$0xff] }
 0xac1   :  { %14117 = vmatprep.mubr.bf16.mxu0 %v20300_v23  ;;  %14127 = vmatpush1.bf16.msra.mxu1 %v18020_v7  ;;  %v7169_v50 = vld [vmem:[#allocation25 + $0x9b0] sm:$0xff]  ;;  %v18060_v7 = vcombine.low %v7285_v47, %v7289_v54 }
 0xac2   :  { %14158 = vmatprep.mubr.bf16.mxu1 %v20303_v33  ;;  %14087 = vmatprep.subr.bf16.mxu0 %v17901_v32  ;;  %v7293_v55 = vld [vmem:[#allocation25 + $0xd90] sm:$0xff]  ;;  %v17941_v32 = vcombine.high %v7165_v51, %v7169_v50  ;;  %v17940_v17 = vcombine.low %v7165_v51, %v7169_v50 }
 0xac3   :  { %14128 = vmatprep.subr.bf16.mxu1 %v18029_v59  ;;  %v7297_v41 = vld [vmem:[#allocation25 + $0xdb0] sm:$0xff] }
 0xac4   :  { %14088 = vmatpush1.bf16.msra.mxu0 %v17900_v34  ;;  %v18069_v8 = vcombine.high %v7293_v55, %v7297_v41  ;;  %v7173_v59 = vld [vmem:[#allocation25 + $0x9d0] sm:$0xff] }
 0xac5   :  { %14129 = vmatpush1.bf16.msra.mxu1 %v18028_v63  ;;  %14089 = vmatprep.subr.bf16.mxu0 %v17909_v10  ;;  %v7177_v42 = vld [vmem:[#allocation25 + $0x9f0] sm:$0xff] }
 0xac6   :  { %14130 = vmatprep.subr.bf16.mxu1 %v18037_v14  ;;  %v7301_v10 = vld [vmem:[#allocation25 + $0xdd0] sm:$0xff]  ;;  %v17949_v31 = vcombine.high %v7173_v59, %v7177_v42 }
 0xac7   :  { %v7305_v14 = vld [vmem:[#allocation25 + $0xdf0] sm:$0xff] }
 0xac8   :  { %14090 = vmatpush1.bf16.msra.mxu0 %v17908_v37  ;;  %v18077_v5 = vcombine.high %v7301_v10, %v7305_v14  ;;  %v7181_v39 = vld [vmem:[#allocation25 + $0xa10] sm:$0xff] }
 0xac9   :  { %14131 = vmatpush1.bf16.msra.mxu1 %v18036_v2  ;;  %14091 = vmatprep.subr.bf16.mxu0 %v17917_v18  ;;  %v7189_v47 = vld [vmem:[#allocation25 + $0xa50] sm:$0xff] }
 0xaca   :  { %14132 = vmatprep.subr.bf16.mxu1 %v18045_v28  ;;  %v18068_v28 = vcombine.low %v7293_v55, %v7297_v41  ;;  %v7193_v54 = vld [vmem:[#allocation25 + $0xa70] sm:$0xff] }
 0xacb   :  { %v17965_v51 = vcombine.high %v7189_v47, %v7193_v54  ;;  %v7197_v55 = vld [vmem:[#allocation25 + $0xa90] sm:$0xff] }
 0xacc   :  { %14092 = vmatpush1.bf16.msra.mxu0 %v17916_v62  ;;  %v7185_v62 = vld [vmem:[#allocation25 + $0xa30] sm:$0xff] }
 0xacd   :  { %14133 = vmatpush1.bf16.msra.mxu1 %v18044_v61  ;;  %14093 = vmatprep.subr.bf16.mxu0 %v17925_v21  ;;  %v7313_v61 = vld [vmem:[#allocation25 + $0xe30] sm:$0xff]  ;;  %v17948_v21 = vcombine.low %v7173_v59, %v7177_v42  ;;  %v17957_v53 = vcombine.high %v7181_v39, %v7185_v62 }
 0xace   :  { %14134 = vmatprep.subr.bf16.mxu1 %v18053_v44  ;;  %v18076_v44 = vcombine.low %v7301_v10, %v7305_v14  ;;  %v7201_v41 = vld [vmem:[#allocation25 + $0xab0] sm:$0xff] }
 0xacf   :  { %v7205_v42 = vld [vmem:[#allocation25 + $0xad0] sm:$0xff]  ;;  %v17972_v10 = vcombine.low %v7197_v55, %v7201_v41 }
 0xad0   :  { %14094 = vmatpush1.bf16.msra.mxu0 %v17924_v43  ;;  %v7317_v43 = vld [vmem:[#allocation25 + $0xe50] sm:$0xff] }
 0xad1   :  { %14135 = vmatpush1.bf16.msra.mxu1 %v18052_v60  ;;  %14095 = vmatprep.subr.bf16.mxu0 %v17933_v45  ;;  %v7321_v60 = vld [vmem:[#allocation25 + $0xe70] sm:$0xff]  ;;  %v17956_v45 = vcombine.low %v7181_v39, %v7185_v62 }
 0xad2   :  { %v13791_v56 = vpop.f32.mrb[64].mxu0  ;;  %14136 = vmatprep.subr.bf16.mxu1 %v18061_v22  ;;  %v18093_v50 = vcombine.high %v7317_v43, %v7321_v60  ;;  %v7221_v39 = vld [vmem:[#allocation25 + $0xb50] sm:$0xff] }
 0xad3   :  { %v13792_v0 = vadd.f32 %v13791_v56, %v20348_v3  ;;  %v13832_v34 = vpop.f32.mrb[56].mxu1  ;;  %v13793_v63 = vpop.f32.mrb[65].mxu0  ;;  %v18092_v56 = vcombine.low %v7317_v43, %v7321_v60  ;;  %v7225_v62 = vld [vmem:[#allocation25 + $0xb70] sm:$0xff] }
 0xad4   :  { %v13794_v57 = vadd.f32 %v13793_v63, %v20350_v35  ;;  %v13834_v58 = vpop.f32.mrb[57].mxu1  ;;  %v13795_v16 = vpop.f32.mrb[66].mxu0  ;;  %14096 = vmatpush1.bf16.msra.mxu0 %v17932_v52  ;;  %v7309_v35 = vld [vmem:[#allocation25 + $0xe10] sm:$0xff] }
 0xad5   :  { %v20358_v37 = vadd.f32 %v13832_v34, %v13792_v0  ;;  %v13836_v2 = vpop.f32.mrb[58].mxu1  ;;  %14137 = vmatpush1.bf16.msra.mxu1 %v18060_v7  ;;  %v13796_v18 = vpop.f32.mrb[67].mxu0  ;;  %14097 = vmatprep.subr.bf16.mxu0 %v17941_v32  ;;  %v18085_v40 = vcombine.high %v7309_v35, %v7313_v61  ;;  %v18084_v22 = vcombine.low %v7309_v35, %v7313_v61  ;;  %v7325_v52 = vld [vmem:[#allocation25 + $0xe90] sm:$0xff] }
 0xad6   :  { %v20360_v36 = vadd.f32 %v13834_v58, %v13794_v57  ;;  %v13837_v3 = vpop.f32.mrb[59].mxu1  ;;  %14138 = vmatprep.subr.bf16.mxu1 %v18069_v8  ;;  %v7329_v7 = vld [vmem:[#allocation25 + $0xeb0] sm:$0xff]  ;;  %v17964_v32 = vcombine.low %v7189_v47, %v7193_v54  ;;  %v17973_v8 = vcombine.high %v7197_v55, %v7201_v41 }
 0xad7   :  { %v18101_v59 = vcombine.high %v7325_v52, %v7329_v7  ;;  %v7209_v0 = vld [vmem:[#allocation25 + $0xaf0] sm:$0xff]  ;;  %v18100_v14 = vcombine.low %v7325_v52, %v7329_v7 }
 0xad8   :  { %14098 = vmatpush1.bf16.msra.mxu0 %v17940_v17  ;;  %v7333_v34 = vld [vmem:[#allocation25 + $0xed0] sm:$0xff]  ;;  %v17981_v57 = vcombine.high %v7205_v42, %v7209_v0 }
 0xad9   :  { %14139 = vmatpush1.bf16.msra.mxu1 %v18068_v28  ;;  %14099 = vmatprep.subr.bf16.mxu0 %v17949_v31  ;;  %v7337_v63 = vld [vmem:[#allocation25 + $0xef0] sm:$0xff]  ;;  %v17980_v28 = vcombine.low %v7205_v42, %v7209_v0  ;;  %v6862_v42 = vld [vmem:[#allocation25 + $0x18] sm:$0xff] }
 0xada   :  { %14140 = vmatprep.subr.bf16.mxu1 %v18077_v5  ;;  %v18109_v58 = vcombine.high %v7333_v34, %v7337_v63  ;;  %v7213_v16 = vld [vmem:[#allocation25 + $0xb10] sm:$0xff]  ;;  %v18108_v31 = vcombine.low %v7333_v34, %v7337_v63  ;;  %v6866_v0 = vld [vmem:[#allocation25 + $0x38] sm:$0xff] }
 0xadb   :  { %v7217_v17 = vld [vmem:[#allocation25 + $0xb30] sm:$0xff]  ;;  %v6990_v34 = vld [vmem:[#allocation25 + $0x418] sm:$0xff] }
 0xadc   :  { %14100 = vmatpush1.bf16.msra.mxu0 %v17948_v21  ;;  %v7341_v2 = vld [vmem:[#allocation25 + $0xf10] sm:$0xff]  ;;  %v17989_v3 = vcombine.high %v7213_v16, %v7217_v17  ;;  %v17988_v21 = vcombine.low %v7213_v16, %v7217_v17  ;;  %v6994_v63 = vld [vmem:[#allocation25 + $0x438] sm:$0xff] }
 0xadd   :  { %14141 = vmatpush1.bf16.msra.mxu1 %v18076_v44  ;;  %14101 = vmatprep.subr.bf16.mxu0 %v17957_v53  ;;  %v7345_v18 = vld [vmem:[#allocation25 + $0xf30] sm:$0xff]  ;;  %v17997_v53 = vcombine.high %v7221_v39, %v7225_v62  ;;  %v6870_v16 = vld [vmem:[#allocation25 + $0x58] sm:$0xff] }
 0xade   :  { %14142 = vmatprep.subr.bf16.mxu1 %v18085_v40  ;;  %v18117_v5 = vcombine.high %v7341_v2, %v7345_v18  ;;  %v7349_v35 = vld [vmem:[#allocation25 + $0xf50] sm:$0xff]  ;;  %v18116_v44 = vcombine.low %v7341_v2, %v7345_v18  ;;  %v6874_v17 = vld [vmem:[#allocation25 + $0x78] sm:$0xff]  ;;  %v17638_v2 = vcombine.low %v6862_v42, %v6866_v0 }
 0xadf   :  { %v7353_v61 = vld [vmem:[#allocation25 + $0xf70] sm:$0xff]  ;;  %v6998_v18 = vld [vmem:[#allocation25 + $0x458] sm:$0xff] }
 0xae0   :  { %14102 = vmatpush1.bf16.msra.mxu0 %v17956_v45  ;;  %v18125_v40 = vcombine.high %v7349_v35, %v7353_v61  ;;  %v7229_v47 = vld [vmem:[#allocation25 + $0xb90] sm:$0xff]  ;;  %v17996_v45 = vcombine.low %v7221_v39, %v7225_v62  ;;  %v6882_v39 = vld [vmem:[#allocation25 + $0xb8] sm:$0xff] }
 0xae1   :  { %14143 = vmatpush1.bf16.msra.mxu1 %v18084_v22  ;;  %14103 = vmatprep.subr.bf16.mxu0 %v17965_v51  ;;  %v7233_v54 = vld [vmem:[#allocation25 + $0xbb0] sm:$0xff]  ;;  %v18124_v22 = vcombine.low %v7349_v35, %v7353_v61  ;;  %v7006_v35 = vld [vmem:[#allocation25 + $0x498] sm:$0xff] }
 0xae2   :  { %14144 = vmatprep.subr.bf16.mxu1 %v18093_v50  ;;  %v7357_v43 = vld [vmem:[#allocation25 + $0xf90] sm:$0xff]  ;;  %v18005_v51 = vcombine.high %v7229_v47, %v7233_v54  ;;  %v7010_v61 = vld [vmem:[#allocation25 + $0x4b8] sm:$0xff] }
 0xae3   :  { %v7361_v60 = vld [vmem:[#allocation25 + $0xfb0] sm:$0xff] }
 0xae4   :  { %14104 = vmatpush1.bf16.msra.mxu0 %v17964_v32  ;;  %v18133_v50 = vcombine.high %v7357_v43, %v7361_v60  ;;  %v7237_v55 = vld [vmem:[#allocation25 + $0xbd0] sm:$0xff]  ;;  %v18004_v32 = vcombine.low %v7229_v47, %v7233_v54  ;;  %v6886_v47 = vld [vmem:[#allocation25 + $0xd8] sm:$0xff] }
 0xae5   :  { %14145 = vmatpush1.bf16.msra.mxu1 %v18092_v56  ;;  %14105 = vmatprep.subr.bf16.mxu0 %v17973_v8  ;;  %v7241_v41 = vld [vmem:[#allocation25 + $0xbf0] sm:$0xff]  ;;  %v18132_v56 = vcombine.low %v7357_v43, %v7361_v60  ;;  %v6890_v54 = vld [vmem:[#allocation25 + $0xf8] sm:$0xff] }
 0xae6   :  { %14146 = vmatprep.subr.bf16.mxu1 %v18101_v59  ;;  %v7365_v52 = vld [vmem:[#allocation25 + $0xfd0] sm:$0xff]  ;;  %v18013_v8 = vcombine.high %v7237_v55, %v7241_v41  ;;  %v7014_v43 = vld [vmem:[#allocation25 + $0x4d8] sm:$0xff] }
 0xae7   :  { %v7369_v7 = vld [vmem:[#allocation25 + $0xff0] sm:$0xff]  ;;  %v7018_v60 = vld [vmem:[#allocation25 + $0x4f8] sm:$0xff] }
 0xae8   :  { %14106 = vmatpush1.bf16.msra.mxu0 %v17972_v10  ;;  %v18141_v59 = vcombine.high %v7365_v52, %v7369_v7  ;;  %v18012_v10 = vcombine.low %v7237_v55, %v7241_v41  ;;  %v6898_v55 = vld [vmem:[#allocation25 + $0x138] sm:$0xff] }
 0xae9   :  { %14147 = vmatpush1.bf16.msra.mxu1 %v18100_v14  ;;  %14107 = vmatprep.subr.bf16.mxu0 %v17981_v57  ;;  %v18140_v14 = vcombine.low %v7365_v52, %v7369_v7  ;;  %v17639_v57 = vcombine.high %v6862_v42, %v6866_v0  ;;  %v7022_v41 = vld [vmem:[#allocation25 + $0x518] sm:$0xff]  ;;  %v17790_v7 = vcombine.low %v7014_v43, %v7018_v60 }
 0xaea   :  { %14148 = vmatprep.subr.bf16.mxu1 %v18109_v58  ;;  %v17767_v58 = vcombine.high %v6990_v34, %v6994_v63  ;;  %v7026_v52 = vld [vmem:[#allocation25 + $0x538] sm:$0xff] }
 0xaeb   :  { %v7030_v42 = vld [vmem:[#allocation25 + $0x558] sm:$0xff] }
 0xaec   :  { %14108 = vmatpush1.bf16.msra.mxu0 %v17980_v28  ;;  %v7002_v28 = vld [vmem:[#allocation25 + $0x478] sm:$0xff] }
 0xaed   :  { %14149 = vmatpush1.bf16.msra.mxu1 %v18108_v31  ;;  %14109 = vmatprep.subr.bf16.mxu0 %v17989_v3  ;;  %v17766_v31 = vcombine.low %v6990_v34, %v6994_v63  ;;  %v17647_v3 = vcombine.high %v6870_v16, %v6874_v17  ;;  %v17775_v62 = vcombine.high %v6998_v18, %v7002_v28  ;;  %v7034_v0 = vld [vmem:[#allocation25 + $0x578] sm:$0xff] }
 0xaee   :  { %14150 = vmatprep.subr.bf16.mxu1 %v18117_v5  ;;  %v6878_v5 = vld [vmem:[#allocation25 + $0x98] sm:$0xff]  ;;  %v17798_v63 = vcombine.low %v7022_v41, %v7026_v52 }
 0xaf0   :  { %14110 = vmatpush1.bf16.msra.mxu0 %v17988_v21  ;;  %v17646_v21 = vcombine.low %v6870_v16, %v6874_v17  ;;  %v7038_v16 = vld [vmem:[#allocation25 + $0x598] sm:$0xff] }
 0xaf1   :  { %14151 = vmatpush1.bf16.msra.mxu1 %v18116_v44  ;;  %14111 = vmatprep.subr.bf16.mxu0 %v17997_v53  ;;  %v17774_v44 = vcombine.low %v6998_v18, %v7002_v28  ;;  %v17655_v53 = vcombine.high %v6878_v5, %v6882_v39  ;;  %v7042_v17 = vld [vmem:[#allocation25 + $0x5b8] sm:$0xff]  ;;  %v17806_v18 = vcombine.low %v7030_v42, %v7034_v0 }
 0xaf2   :  { %14152 = vmatprep.subr.bf16.mxu1 %v18125_v40  ;;  %v17783_v40 = vcombine.high %v7006_v35, %v7010_v61 }
 0xaf4   :  { %14112 = vmatpush1.bf16.msra.mxu0 %v17996_v45  ;;  %v17654_v45 = vcombine.low %v6878_v5, %v6882_v39  ;;  %v6918_v5 = vld [vmem:[#allocation25 + $0x1d8] sm:$0xff] }
 0xaf5   :  { %14153 = vmatpush1.bf16.msra.mxu1 %v18124_v22  ;;  %14113 = vmatprep.subr.bf16.mxu0 %v18005_v51  ;;  %v17782_v22 = vcombine.low %v7006_v35, %v7010_v61  ;;  %v17663_v51 = vcombine.high %v6886_v47, %v6890_v54  ;;  %v6922_v39 = vld [vmem:[#allocation25 + $0x1f8] sm:$0xff] }
 0xaf6   :  { %14154 = vmatprep.subr.bf16.mxu1 %v18133_v50  ;;  %v6894_v50 = vld [vmem:[#allocation25 + $0x118] sm:$0xff] }
 0xaf7   :  { %v17670_v34 = vcombine.low %v6894_v50, %v6898_v55 }
 0xaf8   :  { %14114 = vmatpush1.bf16.msra.mxu0 %v18004_v32  ;;  %v17671_v32 = vcombine.high %v6894_v50, %v6898_v55  ;;  %v6926_v55 = vld [vmem:[#allocation25 + $0x218] sm:$0xff] }
 0xaf9   :  { %14155 = vmatpush1.bf16.msra.mxu1 %v18132_v56  ;;  %14115 = vmatprep.subr.bf16.mxu0 %v18013_v8  ;;  %v17799_v56 = vcombine.high %v7022_v41, %v7026_v52  ;;  %v6902_v8 = vld [vmem:[#allocation25 + $0x158] sm:$0xff] }
 0xafa   :  { %14156 = vmatprep.subr.bf16.mxu1 %v18141_v59  ;;  %v6906_v59 = vld [vmem:[#allocation25 + $0x178] sm:$0xff] }
 0xafb   :  { %v6930_v41 = vld [vmem:[#allocation25 + $0x238] sm:$0xff] }
 0xafc   :  { %14116 = vmatpush1.bf16.msra.mxu0 %v18012_v10  ;;  %v17679_v10 = vcombine.high %v6902_v8, %v6906_v59  ;;  %v7058_v52 = vld [vmem:[#allocation25 + $0x638] sm:$0xff] }
 0xafd   :  { %14157 = vmatpush1.bf16.msra.mxu1 %v18140_v14  ;;  %14167 = vmatprep.subr.bf16.mxu0 %v17639_v57  ;;  %v17807_v14 = vcombine.high %v7030_v42, %v7034_v0  ;;  %v6910_v57 = vld [vmem:[#allocation25 + $0x198] sm:$0xff] }
 0xafe   :  { %14208 = vmatprep.subr.bf16.mxu1 %v17767_v58  ;;  %v6914_v58 = vld [vmem:[#allocation25 + $0x1b8] sm:$0xff] }
 0xaff   :  { %14118 = vmatmul.mubr.bf16.vlgmr.msra.gmra.mrb[80].mxu0 %v20320_v26  ;;  %v17687_v28 = vcombine.high %v6910_v57, %v6914_v58  ;;  %v7062_v42 = vld [vmem:[#allocation25 + $0x658] sm:$0xff] }
 0xb00   :  { %14159 = vmatmul.mubr.bf16.vlgmr.msra.gmra.mrb[72].mxu1 %v20322_v24  ;;  %14168 = vmatpush1.bf16.msra.mxu0 %v17638_v2  ;;  %v17678_v2 = vcombine.low %v6902_v8, %v6906_v59  ;;  %v6934_v8 = vld [vmem:[#allocation25 + $0x258] sm:$0xff] }
 0xb01   :  { %14199 = vmatprep.mubr.bf16.mxu0 %v20272_v13  ;;  %14209 = vmatpush1.bf16.msra.mxu1 %v17766_v31  ;;  %v17791_v13 = vcombine.high %v7014_v43, %v7018_v60  ;;  %v6938_v59 = vld [vmem:[#allocation25 + $0x278] sm:$0xff] }
 0xb02   :  { %14240 = vmatprep.mubr.bf16.mxu1 %v20275_v49  ;;  %14169 = vmatprep.subr.bf16.mxu0 %v17647_v3  ;;  %v17662_v49 = vcombine.low %v6886_v47, %v6890_v54  ;;  %v17815_v3 = vcombine.high %v7038_v16, %v7042_v17  ;;  %v17686_v54 = vcombine.low %v6910_v57, %v6914_v58  ;;  %v7066_v0 = vld [vmem:[#allocation25 + $0x678] sm:$0xff] }
 0xb03   :  { %14210 = vmatprep.subr.bf16.mxu1 %v17775_v62  ;;  %v6942_v57 = vld [vmem:[#allocation25 + $0x298] sm:$0xff] }
 0xb04   :  { %14170 = vmatpush1.bf16.msra.mxu0 %v17646_v21  ;;  %v7046_v21 = vld [vmem:[#allocation25 + $0x5d8] sm:$0xff] }
 0xb05   :  { %14211 = vmatpush1.bf16.msra.mxu1 %v17774_v44  ;;  %14171 = vmatprep.subr.bf16.mxu0 %v17655_v53  ;;  %v7050_v44 = vld [vmem:[#allocation25 + $0x5f8] sm:$0xff] }
 0xb06   :  { %14212 = vmatprep.subr.bf16.mxu1 %v17783_v40  ;;  %v17823_v50 = vcombine.high %v7046_v21, %v7050_v44  ;;  %v6946_v58 = vld [vmem:[#allocation25 + $0x2b8] sm:$0xff] }
 0xb08   :  { %14172 = vmatpush1.bf16.msra.mxu0 %v17654_v45 }
 0xb09   :  { %14213 = vmatpush1.bf16.msra.mxu1 %v17782_v22  ;;  %14173 = vmatprep.subr.bf16.mxu0 %v17663_v51  ;;  %v17814_v22 = vcombine.low %v7038_v16, %v7042_v17  ;;  %v17695_v51 = vcombine.high %v6918_v5, %v6922_v39  ;;  %v7070_v16 = vld [vmem:[#allocation25 + $0x698] sm:$0xff] }
 0xb0a   :  { %14214 = vmatprep.subr.bf16.mxu1 %v17791_v13  ;;  %v7074_v17 = vld [vmem:[#allocation25 + $0x6b8] sm:$0xff] }
 0xb0c   :  { %14174 = vmatpush1.bf16.msra.mxu0 %v17662_v49  ;;  %v17694_v49 = vcombine.low %v6918_v5, %v6922_v39  ;;  %v6954_v5 = vld [vmem:[#allocation25 + $0x2f8] sm:$0xff] }
 0xb0d   :  { %14215 = vmatpush1.bf16.msra.mxu1 %v17790_v7  ;;  %14175 = vmatprep.subr.bf16.mxu0 %v17671_v32  ;;  %v17822_v7 = vcombine.low %v7046_v21, %v7050_v44  ;;  %v17703_v32 = vcombine.high %v6926_v55, %v6930_v41  ;;  %v7078_v39 = vld [vmem:[#allocation25 + $0x6d8] sm:$0xff] }
 0xb0e   :  { %14216 = vmatprep.subr.bf16.mxu1 %v17799_v56 }
 0xb10   :  { %14176 = vmatpush1.bf16.msra.mxu0 %v17670_v34  ;;  %v17702_v34 = vcombine.low %v6926_v55, %v6930_v41  ;;  %v7094_v55 = vld [vmem:[#allocation25 + $0x758] sm:$0xff] }
 0xb11   :  { %14217 = vmatpush1.bf16.msra.mxu1 %v17798_v63  ;;  %14177 = vmatprep.subr.bf16.mxu0 %v17679_v10  ;;  %v17711_v10 = vcombine.high %v6934_v8, %v6938_v59  ;;  %v7098_v41 = vld [vmem:[#allocation25 + $0x778] sm:$0xff] }
 0xb12   :  { %v13873_v31 = vpop.f32.mrb[68].mxu0  ;;  %14218 = vmatprep.subr.bf16.mxu1 %v17807_v14  ;;  %v17839_v14 = vcombine.high %v7062_v42, %v7066_v0 }
 0xb13   :  { %v13874_v62 = vadd.f32 %v13873_v31, %v20260_v25  ;;  %v13914_v35 = vpop.f32.mrb[60].mxu1  ;;  %v13875_v61 = vpop.f32.mrb[69].mxu0  ;;  %v17847_v31 = vcombine.high %v7070_v16, %v7074_v17 }
 0xb14   :  { %v13876_v53 = vadd.f32 %v13875_v61, %v20262_v4  ;;  %v13916_v40 = vpop.f32.mrb[61].mxu1  ;;  %v13877_v47 = vpop.f32.mrb[70].mxu0  ;;  %14178 = vmatpush1.bf16.msra.mxu0 %v17678_v2  ;;  %v7054_v4 = vld [vmem:[#allocation25 + $0x618] sm:$0xff]  ;;  %v17710_v2 = vcombine.low %v6934_v8, %v6938_v59  ;;  %v17846_v61 = vcombine.low %v7070_v16, %v7074_v17 }
 0xb15   :  { %v20368_v43 = vadd.f32 %v13914_v35, %v13874_v62  ;;  %v13918_v60 = vpop.f32.mrb[62].mxu1  ;;  %14219 = vmatpush1.bf16.msra.mxu1 %v17806_v18  ;;  %v13878_v45 = vpop.f32.mrb[71].mxu0  ;;  %14179 = vmatprep.subr.bf16.mxu0 %v17687_v28  ;;  %v17831_v56 = vcombine.high %v7054_v4, %v7058_v52  ;;  %v17830_v63 = vcombine.low %v7054_v4, %v7058_v52  ;;  %v7082_v62 = vld [vmem:[#allocation25 + $0x6f8] sm:$0xff] }
 0xb16   :  { %v20370_v13 = vadd.f32 %v13916_v40, %v13876_v53  ;;  %v13919_v25 = vpop.f32.mrb[63].mxu1  ;;  %14220 = vmatprep.subr.bf16.mxu1 %v17815_v3  ;;  %v17838_v18 = vcombine.low %v7062_v42, %v7066_v0  ;;  %v17719_v28 = vcombine.high %v6942_v57, %v6946_v58  ;;  %v6950_v3 = vld [vmem:[#allocation25 + $0x2d8] sm:$0xff]  ;;  %v17718_v35 = vcombine.low %v6942_v57, %v6946_v58 }
 0xb17   :  { %v17727_v21 = vcombine.high %v6950_v3, %v6954_v5  ;;  %v17855_v44 = vcombine.high %v7078_v39, %v7082_v62  ;;  %v6958_v53 = vld [vmem:[#allocation25 + $0x318] sm:$0xff]  ;;  %v17726_v60 = vcombine.low %v6950_v3, %v6954_v5  ;;  %v17854_v45 = vcombine.low %v7078_v39, %v7082_v62 }
 0xb18   :  { %14180 = vmatpush1.bf16.msra.mxu0 %v17686_v54  ;;  %v6962_v40 = vld [vmem:[#allocation25 + $0x338] sm:$0xff]  ;;  %v17870_v0 = vcombine.low %v7094_v55, %v7098_v41 }
 0xb19   :  { %14221 = vmatpush1.bf16.msra.mxu1 %v17814_v22  ;;  %14181 = vmatprep.subr.bf16.mxu0 %v17695_v51  ;;  %v7086_v47 = vld [vmem:[#allocation25 + $0x718] sm:$0xff]  ;;  %v17735_v22 = vcombine.high %v6958_v53, %v6962_v40  ;;  %v17734_v4 = vcombine.low %v6958_v53, %v6962_v40 }
 0xb1a   :  { %14222 = vmatprep.subr.bf16.mxu1 %v17823_v50  ;;  %v7090_v54 = vld [vmem:[#allocation25 + $0x738] sm:$0xff] }
 0xb1b   :  { %v17863_v51 = vcombine.high %v7086_v47, %v7090_v54  ;;  %v6966_v25 = vld [vmem:[#allocation25 + $0x358] sm:$0xff]  ;;  %v17862_v52 = vcombine.low %v7086_v47, %v7090_v54 }
 0xb1c   :  { %14182 = vmatpush1.bf16.msra.mxu0 %v17694_v49  ;;  %v6970_v50 = vld [vmem:[#allocation25 + $0x378] sm:$0xff] }
 0xb1d   :  { %14223 = vmatpush1.bf16.msra.mxu1 %v17822_v7  ;;  %14183 = vmatprep.subr.bf16.mxu0 %v17703_v32  ;;  %v17743_v49 = vcombine.high %v6966_v25, %v6970_v50  ;;  %v17871_v7 = vcombine.high %v7094_v55, %v7098_v41  ;;  %v6974_v32 = vld [vmem:[#allocation25 + $0x398] sm:$0xff]  ;;  %v17742_v42 = vcombine.low %v6966_v25, %v6970_v50 }
 0xb1e   :  { %14224 = vmatprep.subr.bf16.mxu1 %v17831_v56  ;;  %v6978_v56 = vld [vmem:[#allocation25 + $0x3b8] sm:$0xff] }
 0xb1f   :  { %v7102_v8 = vld [vmem:[#allocation25 + $0x798] sm:$0xff]  ;;  %v17750_v16 = vcombine.low %v6974_v32, %v6978_v56 }
 0xb20   :  { %14184 = vmatpush1.bf16.msra.mxu0 %v17702_v34  ;;  %v7106_v59 = vld [vmem:[#allocation25 + $0x7b8] sm:$0xff]  ;;  %v17751_v34 = vcombine.high %v6974_v32, %v6978_v56 }
 0xb21   :  { %14225 = vmatpush1.bf16.msra.mxu1 %v17830_v63  ;;  %14185 = vmatprep.subr.bf16.mxu0 %v17711_v10  ;;  %v17879_v63 = vcombine.high %v7102_v8, %v7106_v59  ;;  %v6982_v10 = vld [vmem:[#allocation25 + $0x3d8] sm:$0xff]  ;;  %v17878_v17 = vcombine.low %v7102_v8, %v7106_v59 }
 0xb22   :  { %14226 = vmatprep.subr.bf16.mxu1 %v17839_v14  ;;  %v6986_v14 = vld [vmem:[#allocation25 + $0x3f8] sm:$0xff] }
 0xb23   :  { %v7110_v57 = vld [vmem:[#allocation25 + $0x7d8] sm:$0xff]  ;;  %v17758_v39 = vcombine.low %v6982_v10, %v6986_v14 }
 0xb24   :  { %14186 = vmatpush1.bf16.msra.mxu0 %v17710_v2  ;;  %v7114_v58 = vld [vmem:[#allocation25 + $0x7f8] sm:$0xff]  ;;  %v17759_v2 = vcombine.high %v6982_v10, %v6986_v14 }
 0xb25   :  { %14227 = vmatpush1.bf16.msra.mxu1 %v17838_v18  ;;  %14187 = vmatprep.subr.bf16.mxu0 %v17719_v28  ;;  %v17887_v18 = vcombine.high %v7110_v57, %v7114_v58  ;;  %v7118_v28 = vld [vmem:[#allocation25 + $0x818] sm:$0xff]  ;;  %v17886_v62 = vcombine.low %v7110_v57, %v7114_v58 }
 0xb26   :  { %14228 = vmatprep.subr.bf16.mxu1 %v17847_v31  ;;  %v7122_v31 = vld [vmem:[#allocation25 + $0x838] sm:$0xff] }
 0xb27   :  { %v7246_v3 = vld [vmem:[#allocation25 + $0xc18] sm:$0xff]  ;;  %v17894_v53 = vcombine.low %v7118_v28, %v7122_v31 }
 0xb28   :  { %14188 = vmatpush1.bf16.msra.mxu0 %v17718_v35  ;;  %v7250_v5 = vld [vmem:[#allocation25 + $0xc38] sm:$0xff]  ;;  %v17895_v35 = vcombine.high %v7118_v28, %v7122_v31 }
 0xb29   :  { %14229 = vmatpush1.bf16.msra.mxu1 %v17846_v61  ;;  %14189 = vmatprep.subr.bf16.mxu0 %v17727_v21  ;;  %v18023_v61 = vcombine.high %v7246_v3, %v7250_v5  ;;  %v7126_v21 = vld [vmem:[#allocation25 + $0x858] sm:$0xff]  ;;  %v18022_v54 = vcombine.low %v7246_v3, %v7250_v5 }
 0xb2a   :  { %14230 = vmatprep.subr.bf16.mxu1 %v17855_v44  ;;  %v7130_v44 = vld [vmem:[#allocation25 + $0x878] sm:$0xff] }
 0xb2b   :  { %v7254_v40 = vld [vmem:[#allocation25 + $0xc58] sm:$0xff]  ;;  %v17902_v55 = vcombine.low %v7126_v21, %v7130_v44 }
 0xb2c   :  { %14190 = vmatpush1.bf16.msra.mxu0 %v17726_v60  ;;  %v7258_v47 = vld [vmem:[#allocation25 + $0xc78] sm:$0xff]  ;;  %v17903_v60 = vcombine.high %v7126_v21, %v7130_v44 }
 0xb2d   :  { %14231 = vmatpush1.bf16.msra.mxu1 %v17854_v45  ;;  %14191 = vmatprep.subr.bf16.mxu0 %v17735_v22  ;;  %v7134_v45 = vld [vmem:[#allocation25 + $0x898] sm:$0xff]  ;;  %v18030_v41 = vcombine.low %v7254_v40, %v7258_v47 }
 0xb2e   :  { %14232 = vmatprep.subr.bf16.mxu1 %v17863_v51  ;;  %v7138_v22 = vld [vmem:[#allocation25 + $0x8b8] sm:$0xff]  ;;  %v18031_v51 = vcombine.high %v7254_v40, %v7258_v47 }
 0xb2f   :  { %v7262_v25 = vld [vmem:[#allocation25 + $0xc98] sm:$0xff]  ;;  %v17910_v56 = vcombine.low %v7134_v45, %v7138_v22 }
 0xb30   :  { %14192 = vmatpush1.bf16.msra.mxu0 %v17734_v4  ;;  %v7266_v50 = vld [vmem:[#allocation25 + $0xcb8] sm:$0xff]  ;;  %v17911_v4 = vcombine.high %v7134_v45, %v7138_v22 }
 0xb31   :  { %14233 = vmatpush1.bf16.msra.mxu1 %v17862_v52  ;;  %14193 = vmatprep.subr.bf16.mxu0 %v17743_v49  ;;  %v18039_v52 = vcombine.high %v7262_v25, %v7266_v50  ;;  %v7142_v49 = vld [vmem:[#allocation25 + $0x8d8] sm:$0xff] }
 0xb32   :  { %14234 = vmatprep.subr.bf16.mxu1 %v17871_v7  ;;  %v7146_v7 = vld [vmem:[#allocation25 + $0x8f8] sm:$0xff] }
 0xb33   :  { %v7274_v32 = vld [vmem:[#allocation25 + $0xcf8] sm:$0xff]  ;;  %v17919_v8 = vcombine.high %v7142_v49, %v7146_v7 }
 0xb34   :  { %14194 = vmatpush1.bf16.msra.mxu0 %v17742_v42  ;;  %v7150_v59 = vld [vmem:[#allocation25 + $0x918] sm:$0xff] }
 0xb35   :  { %14235 = vmatpush1.bf16.msra.mxu1 %v17870_v0  ;;  %14195 = vmatprep.subr.bf16.mxu0 %v17751_v34  ;;  %v7154_v42 = vld [vmem:[#allocation25 + $0x938] sm:$0xff] }
 0xb36   :  { %14236 = vmatprep.subr.bf16.mxu1 %v17879_v63  ;;  %v7278_v0 = vld [vmem:[#allocation25 + $0xd18] sm:$0xff]  ;;  %v17927_v10 = vcombine.high %v7150_v59, %v7154_v42 }
 0xb37   :  { %v7282_v34 = vld [vmem:[#allocation25 + $0xd38] sm:$0xff] }
 0xb38   :  { %14196 = vmatpush1.bf16.msra.mxu0 %v17750_v16  ;;  %v18055_v14 = vcombine.high %v7278_v0, %v7282_v34  ;;  %v7158_v57 = vld [vmem:[#allocation25 + $0x958] sm:$0xff] }
 0xb39   :  { %14237 = vmatpush1.bf16.msra.mxu1 %v17878_v17  ;;  %14197 = vmatprep.subr.bf16.mxu0 %v17759_v2  ;;  %v7162_v58 = vld [vmem:[#allocation25 + $0x978] sm:$0xff]  ;;  %v17926_v2 = vcombine.low %v7150_v59, %v7154_v42 }
 0xb3a   :  { %14238 = vmatprep.subr.bf16.mxu1 %v17887_v18  ;;  %v7286_v16 = vld [vmem:[#allocation25 + $0xd58] sm:$0xff]  ;;  %v18054_v18 = vcombine.low %v7278_v0, %v7282_v34  ;;  %v17935_v28 = vcombine.high %v7158_v57, %v7162_v58 }
 0xb3b   :  { %v7290_v17 = vld [vmem:[#allocation25 + $0xd78] sm:$0xff] }
 0xb3c   :  { %14198 = vmatpush1.bf16.msra.mxu0 %v17758_v39  ;;  %v18063_v31 = vcombine.high %v7286_v16, %v7290_v17  ;;  %v7166_v3 = vld [vmem:[#allocation25 + $0x998] sm:$0xff] }
 0xb3d   :  { %14239 = vmatpush1.bf16.msra.mxu1 %v17886_v62  ;;  %14249 = vmatprep.subr.bf16.mxu0 %v17895_v35  ;;  %v7170_v5 = vld [vmem:[#allocation25 + $0x9b8] sm:$0xff]  ;;  %v17934_v35 = vcombine.low %v7158_v57, %v7162_v58 }
 0xb3e   :  { %14290 = vmatprep.subr.bf16.mxu1 %v18023_v61  ;;  %v7294_v39 = vld [vmem:[#allocation25 + $0xd98] sm:$0xff]  ;;  %v18062_v61 = vcombine.low %v7286_v16, %v7290_v17  ;;  %v17943_v21 = vcombine.high %v7166_v3, %v7170_v5 }
 0xb3f   :  { %14200 = vmatmul.mubr.bf16.vlgmr.msra.gmra.mrb[84].mxu0 %v20296_v15  ;;  %v7270_v15 = vld [vmem:[#allocation25 + $0xcd8] sm:$0xff] }
 0xb40   :  { %14241 = vmatmul.mubr.bf16.vlgmr.msra.gmra.mrb[76].mxu1 %v20298_v20  ;;  %14250 = vmatpush1.bf16.msra.mxu0 %v17894_v53  ;;  %v18038_v20 = vcombine.low %v7262_v25, %v7266_v50  ;;  %v18046_v63 = vcombine.low %v7270_v15, %v7274_v32  ;;  %v7298_v62 = vld [vmem:[#allocation25 + $0xdb8] sm:$0xff] }
 0xb41   :  { %14281 = vmatprep.mubr.bf16.mxu0 %v20300_v23  ;;  %14291 = vmatpush1.bf16.msra.mxu1 %v18022_v54  ;;  %v18047_v23 = vcombine.high %v7270_v15, %v7274_v32  ;;  %v18071_v53 = vcombine.high %v7294_v39, %v7298_v62  ;;  %v7174_v40 = vld [vmem:[#allocation25 + $0x9d8] sm:$0xff] }
 0xb42   :  { %14322 = vmatprep.mubr.bf16.mxu1 %v20303_v33  ;;  %14251 = vmatprep.subr.bf16.mxu0 %v17903_v60  ;;  %v17918_v33 = vcombine.low %v7142_v49, %v7146_v7  ;;  %v7178_v47 = vld [vmem:[#allocation25 + $0x9f8] sm:$0xff]  ;;  %v18070_v7 = vcombine.low %v7294_v39, %v7298_v62 }
 0xb43   :  { %14292 = vmatprep.subr.bf16.mxu1 %v18031_v51  ;;  %v7302_v22 = vld [vmem:[#allocation25 + $0xdd8] sm:$0xff]  ;;  %v17951_v15 = vcombine.high %v7174_v40, %v7178_v47  ;;  %v17950_v59 = vcombine.low %v7174_v40, %v7178_v47 }
 0xb44   :  { %14252 = vmatpush1.bf16.msra.mxu0 %v17902_v55  ;;  %v7306_v51 = vld [vmem:[#allocation25 + $0xdf8] sm:$0xff] }
 0xb45   :  { %14293 = vmatpush1.bf16.msra.mxu1 %v18030_v41  ;;  %14253 = vmatprep.subr.bf16.mxu0 %v17911_v4  ;;  %v17942_v41 = vcombine.low %v7166_v3, %v7170_v5  ;;  %v18078_v42 = vcombine.low %v7302_v22, %v7306_v51 }
 0xb46   :  { %14294 = vmatprep.subr.bf16.mxu1 %v18039_v52 }
 0xb48   :  { %14254 = vmatpush1.bf16.msra.mxu0 %v17910_v56  ;;  %v18079_v56 = vcombine.high %v7302_v22, %v7306_v51  ;;  %v7342_v22 = vld [vmem:[#allocation25 + $0xf18] sm:$0xff] }
 0xb49   :  { %14295 = vmatpush1.bf16.msra.mxu1 %v18038_v20  ;;  %14255 = vmatprep.subr.bf16.mxu0 %v17919_v8  ;;  %v7182_v20 = vld [vmem:[#allocation25 + $0xa18] sm:$0xff] }
 0xb4a   :  { %14296 = vmatprep.subr.bf16.mxu1 %v18047_v23  ;;  %v7186_v8 = vld [vmem:[#allocation25 + $0xa38] sm:$0xff] }
 0xb4b   :  { %v7314_v23 = vld [vmem:[#allocation25 + $0xe38] sm:$0xff]  ;;  %v17959_v0 = vcombine.high %v7182_v20, %v7186_v8  ;;  %v17958_v57 = vcombine.low %v7182_v20, %v7186_v8 }
 0xb4c   :  { %14256 = vmatpush1.bf16.msra.mxu0 %v17918_v33  ;;  %v7190_v33 = vld [vmem:[#allocation25 + $0xa58] sm:$0xff] }
 0xb4d   :  { %14297 = vmatpush1.bf16.msra.mxu1 %v18046_v63  ;;  %14257 = vmatprep.subr.bf16.mxu0 %v17927_v10  ;;  %v7194_v63 = vld [vmem:[#allocation25 + $0xa78] sm:$0xff] }
 0xb4e   :  { %14298 = vmatprep.subr.bf16.mxu1 %v18055_v14  ;;  %v7318_v10 = vld [vmem:[#allocation25 + $0xe58] sm:$0xff]  ;;  %v17967_v16 = vcombine.high %v7190_v33, %v7194_v63  ;;  %v17966_v3 = vcombine.low %v7190_v33, %v7194_v63 }
 0xb4f   :  { %v7322_v14 = vld [vmem:[#allocation25 + $0xe78] sm:$0xff] }
 0xb50   :  { %14258 = vmatpush1.bf16.msra.mxu0 %v17926_v2  ;;  %v18095_v17 = vcombine.high %v7318_v10, %v7322_v14  ;;  %v7198_v2 = vld [vmem:[#allocation25 + $0xa98] sm:$0xff]  ;;  %v18094_v5 = vcombine.low %v7318_v10, %v7322_v14 }
 0xb51   :  { %14299 = vmatpush1.bf16.msra.mxu1 %v18054_v18  ;;  %14259 = vmatprep.subr.bf16.mxu0 %v17935_v28  ;;  %v7202_v18 = vld [vmem:[#allocation25 + $0xab8] sm:$0xff] }
 0xb52   :  { %v13955_v44 = vpop.f32.mrb[72].mxu0  ;;  %14300 = vmatprep.subr.bf16.mxu1 %v18063_v31  ;;  %v7326_v28 = vld [vmem:[#allocation25 + $0xe98] sm:$0xff]  ;;  %v17975_v39 = vcombine.high %v7198_v2, %v7202_v18 }
 0xb53   :  { %v13956_v54 = vadd.f32 %v13955_v44, %v20368_v43  ;;  %v13996_v60 = vpop.f32.mrb[64].mxu1  ;;  %v13957_v45 = vpop.f32.mrb[73].mxu0  ;;  %v7330_v31 = vld [vmem:[#allocation25 + $0xeb8] sm:$0xff] }
 0xb54   :  { %v13958_v25 = vadd.f32 %v13957_v45, %v20370_v13  ;;  %v13998_v50 = vpop.f32.mrb[65].mxu1  ;;  %v13959_v55 = vpop.f32.mrb[74].mxu0  ;;  %14260 = vmatpush1.bf16.msra.mxu0 %v17934_v35  ;;  %v7310_v13 = vld [vmem:[#allocation25 + $0xe18] sm:$0xff]  ;;  %v18103_v62 = vcombine.high %v7326_v28, %v7330_v31  ;;  %v18102_v40 = vcombine.low %v7326_v28, %v7330_v31 }
 0xb55   :  { %v20378_v4 = vadd.f32 %v13996_v60, %v13956_v54  ;;  %v14000_v52 = vpop.f32.mrb[66].mxu1  ;;  %14301 = vmatpush1.bf16.msra.mxu1 %v18062_v61  ;;  %v13960_v49 = vpop.f32.mrb[75].mxu0  ;;  %14261 = vmatprep.subr.bf16.mxu0 %v17943_v21  ;;  %v18087_v34 = vcombine.high %v7310_v13, %v7314_v23  ;;  %v18086_v58 = vcombine.low %v7310_v13, %v7314_v23  ;;  %v7206_v35 = vld [vmem:[#allocation25 + $0xad8] sm:$0xff] }
 0xb56   :  { %v20380_v32 = vadd.f32 %v13998_v50, %v13958_v25  ;;  %v14001_v43 = vpop.f32.mrb[67].mxu1  ;;  %14302 = vmatprep.subr.bf16.mxu1 %v18071_v53  ;;  %v7210_v61 = vld [vmem:[#allocation25 + $0xaf8] sm:$0xff]  ;;  %v17974_v53 = vcombine.low %v7198_v2, %v7202_v18 }
 0xb57   :  { %v7334_v21 = vld [vmem:[#allocation25 + $0xed8] sm:$0xff]  ;;  %v17983_v47 = vcombine.high %v7206_v35, %v7210_v61  ;;  %v17982_v25 = vcombine.low %v7206_v35, %v7210_v61 }
 0xb58   :  { %14262 = vmatpush1.bf16.msra.mxu0 %v17942_v41  ;;  %v7338_v44 = vld [vmem:[#allocation25 + $0xef8] sm:$0xff] }
 0xb59   :  { %14303 = vmatpush1.bf16.msra.mxu1 %v18070_v7  ;;  %14263 = vmatprep.subr.bf16.mxu0 %v17951_v15  ;;  %v18111_v54 = vcombine.high %v7334_v21, %v7338_v44  ;;  %v7214_v60 = vld [vmem:[#allocation25 + $0xb18] sm:$0xff]  ;;  %v18110_v50 = vcombine.low %v7334_v21, %v7338_v44  ;;  %v18720_v21 = vld [vmem:[#allocation29 + $0x8] ss:$16 sps:$4 sm:$0xff]  }
 0xb5a   :  { %14304 = vmatprep.subr.bf16.mxu1 %v18079_v56  ;;  %v7218_v45 = vld [vmem:[#allocation25 + $0xb38] sm:$0xff] }
 0xb5b   :  { %v7346_v51 = vld [vmem:[#allocation25 + $0xf38] sm:$0xff]  ;;  %v17991_v55 = vcombine.high %v7214_v60, %v7218_v45  ;;  %v17990_v43 = vcombine.low %v7214_v60, %v7218_v45 }
 0xb5c   :  { %14264 = vmatpush1.bf16.msra.mxu0 %v17950_v59  ;;  %v18119_v41 = vcombine.high %v7342_v22, %v7346_v51  ;;  %v7222_v52 = vld [vmem:[#allocation25 + $0xb58] sm:$0xff]  ;;  %v18118_v56 = vcombine.low %v7342_v22, %v7346_v51  ;;  %v18732_v22 = vld [vmem:[#allocation29 + $0x48] ss:$16 sps:$4 sm:$0xff]  }
 0xb5d   :  { %14305 = vmatpush1.bf16.msra.mxu1 %v18078_v42  ;;  %14265 = vmatprep.subr.bf16.mxu0 %v17959_v0  ;;  %v7226_v49 = vld [vmem:[#allocation25 + $0xb78] sm:$0xff] }
 0xb5e   :  { %14306 = vmatprep.subr.bf16.mxu1 %v18087_v34  ;;  %v7350_v7 = vld [vmem:[#allocation25 + $0xf58] sm:$0xff]  ;;  %v17999_v20 = vcombine.high %v7222_v52, %v7226_v49  ;;  %v17998_v0 = vcombine.low %v7222_v52, %v7226_v49  ;;  %v18744_v52 = vld [vmem:[#allocation29 + $0x88] ss:$16 sps:$4 sm:$0xff]  }
 0xb5f   :  { %v7354_v15 = vld [vmem:[#allocation25 + $0xf78] sm:$0xff] }
 0xb60   :  { %14266 = vmatpush1.bf16.msra.mxu0 %v17958_v57  ;;  %v18127_v8 = vcombine.high %v7350_v7, %v7354_v15  ;;  %v7230_v13 = vld [vmem:[#allocation25 + $0xb98] sm:$0xff]  ;;  %v18126_v34 = vcombine.low %v7350_v7, %v7354_v15  ;;  %v18752_v7 = vld [vmem:[#allocation29 + $0xac] ss:$16 sps:$4 sm:$0xff]  }
 0xb61   :  { %14307 = vmatpush1.bf16.msra.mxu1 %v18086_v58  ;;  %14267 = vmatprep.subr.bf16.mxu0 %v17967_v16  ;;  %v7234_v23 = vld [vmem:[#allocation25 + $0xbb8] sm:$0xff]  ;;  %v20382_v16 = vld [vmem:[#allocation28] sm:$0xff] }
 0xb62   :  { %14308 = vmatprep.subr.bf16.mxu1 %v18095_v17  ;;  %v7358_v59 = vld [vmem:[#allocation25 + $0xf98] sm:$0xff]  ;;  %v18007_v33 = vcombine.high %v7230_v13, %v7234_v23  ;;  %v18006_v17 = vcombine.low %v7230_v13, %v7234_v23  ;;  %v14340_v31 = vrot.slane %v20382_v16, %v19982_v9 }
 0xb63   :  { %v7362_v42 = vld [vmem:[#allocation25 + $0xfb8] sm:$0xff] }
 0xb64   :  { %14268 = vmatpush1.bf16.msra.mxu0 %v17966_v3  ;;  %v18135_v63 = vcombine.high %v7358_v59, %v7362_v42  ;;  %v7238_v10 = vld [vmem:[#allocation25 + $0xbd8] sm:$0xff]  ;;  %v18134_v2 = vcombine.low %v7358_v59, %v7362_v42  ;;  %v14374_v35 = vadd.f32 %v14340_v31, %v20360_v36  ;;  %v18734_v36 = vld [vmem:[#allocation29 + $0x4c] ss:$16 sps:$4 sm:$0xff]  }
 0xb65   :  { %14309 = vmatpush1.bf16.msra.mxu1 %v18094_v5  ;;  %14269 = vmatprep.subr.bf16.mxu0 %v17975_v39  ;;  %v7242_v14 = vld [vmem:[#allocation25 + $0xbf8] sm:$0xff]  ;;  %v18770_v31 = vld [vmem:[#allocation29 + $0x10c] ss:$16 sps:$4 sm:$0xff]  }
 0xb66   :  { %14310 = vmatprep.subr.bf16.mxu1 %v18103_v62  ;;  %v7366_v57 = vld [vmem:[#allocation25 + $0xfd8] sm:$0xff]  ;;  %v18015_v18 = vcombine.high %v7238_v10, %v7242_v14  ;;  %v18014_v3 = vcombine.low %v7238_v10, %v7242_v14  ;;  %v18722_v62 = vld [vmem:[#allocation29 + $0xc] ss:$16 sps:$4 sm:$0xff]  }
 0xb67   :  { %v7370_v58 = vld [vmem:[#allocation25 + $0xff8] sm:$0xff] }
 0xb68   :  { %14270 = vmatpush1.bf16.msra.mxu0 %v17974_v53  ;;  %v18143_v28 = vcombine.high %v7366_v57, %v7370_v58  ;;  %v18142_v5 = vcombine.low %v7366_v57, %v7370_v58  ;;  %v18719_v39 = vld [vmem:[#allocation29 + $0x4] ss:$16 sps:$4 sm:$0xff]   ;;  %v18717_v61 = vld [vmem:[#allocation29] ss:$16 sps:$4 sm:$0xff]   ;;  %v14638_v53 = vpack.c.bf16 %v14374_v35, %v14374_v35  ;;  %v18756_v57 = vld [vmem:[#allocation29 + $0xc8] ss:$16 sps:$4 sm:$0xff]  }
 0xb69   :  { %14311 = vmatpush1.bf16.msra.mxu1 %v18102_v40  ;;  %14271 = vmatprep.subr.bf16.mxu0 %v17983_v47  ;;  %v18725_v44 = vld [vmem:[#allocation29 + $0x24] ss:$16 sps:$4 sm:$0xff]   ;;  %v18728_v40 = vld [vmem:[#allocation29 + $0x2c] ss:$16 sps:$4 sm:$0xff]   ;;  %v18723_v47 = vld [vmem:[#allocation29 + $0x20] ss:$16 sps:$4 sm:$0xff]  }
 0xb6a   :  { %14312 = vmatprep.subr.bf16.mxu1 %v18111_v54  ;;  %v18726_v54 = vld [vmem:[#allocation29 + $0x28] ss:$16 sps:$4 sm:$0xff]   ;;  %v18731_v60 = vld [vmem:[#allocation29 + $0x44] ss:$16 sps:$4 sm:$0xff]   ;;  %v18729_v45 = vld [vmem:[#allocation29 + $0x40] ss:$16 sps:$4 sm:$0xff]  }
 0xb6b   :  { %v18737_v51 = vld [vmem:[#allocation29 + $0x64] ss:$16 sps:$4 sm:$0xff]   ;;  %v18747_v15 = vld [vmem:[#allocation29 + $0xa0] ss:$16 sps:$4 sm:$0xff]  }
 0xb6c   :  { %14272 = vmatpush1.bf16.msra.mxu0 %v17982_v25  ;;  %v18738_v25 = vld [vmem:[#allocation29 + $0x68] ss:$16 sps:$4 sm:$0xff]   ;;  %v18749_v49 = vld [vmem:[#allocation29 + $0xa4] ss:$16 sps:$4 sm:$0xff]   ;;  %v18771_v35 = vld [vmem:[#allocation29 + $0x120] ss:$16 sps:$4 sm:$0xff]  }
 0xb6d   :  { %14313 = vmatpush1.bf16.msra.mxu1 %v18110_v50  ;;  %14273 = vmatprep.subr.bf16.mxu0 %v17991_v55  ;;  %v18743_v50 = vld [vmem:[#allocation29 + $0x84] ss:$16 sps:$4 sm:$0xff]   ;;  %v18746_v55 = vld [vmem:[#allocation29 + $0x8c] ss:$16 sps:$4 sm:$0xff]  }
 0xb6e   :  { %14314 = vmatprep.subr.bf16.mxu1 %v18119_v41  ;;  %v18741_v41 = vld [vmem:[#allocation29 + $0x80] ss:$16 sps:$4 sm:$0xff]   ;;  %v18761_v58 = vld [vmem:[#allocation29 + $0xe4] ss:$16 sps:$4 sm:$0xff]  }
 0xb70   :  { %14274 = vmatpush1.bf16.msra.mxu0 %v17990_v43  ;;  %v18750_v43 = vld [vmem:[#allocation29 + $0xa8] ss:$16 sps:$4 sm:$0xff]  }
 0xb71   :  { %14315 = vmatpush1.bf16.msra.mxu1 %v18118_v56  ;;  %14275 = vmatprep.subr.bf16.mxu0 %v17999_v20  ;;  %v18755_v56 = vld [vmem:[#allocation29 + $0xc4] ss:$16 sps:$4 sm:$0xff]  }
 0xb72   :  { %14316 = vmatprep.subr.bf16.mxu1 %v18127_v8  ;;  %v18758_v8 = vld [vmem:[#allocation29 + $0xcc] ss:$16 sps:$4 sm:$0xff]  }
 0xb74   :  { %14276 = vmatpush1.bf16.msra.mxu0 %v17998_v0 }
 0xb75   :  { %14317 = vmatpush1.bf16.msra.mxu1 %v18126_v34  ;;  %14277 = vmatprep.subr.bf16.mxu0 %v18007_v33  ;;  %v18753_v33 = vld [vmem:[#allocation29 + $0xc0] ss:$16 sps:$4 sm:$0xff]  }
 0xb76   :  { %14318 = vmatprep.subr.bf16.mxu1 %v18135_v63 }
 0xb78   :  { %14278 = vmatpush1.bf16.msra.mxu0 %v18006_v17 }
 0xb79   :  { %14319 = vmatpush1.bf16.msra.mxu1 %v18134_v2  ;;  %14279 = vmatprep.subr.bf16.mxu0 %v18015_v18  ;;  %v18759_v18 = vld [vmem:[#allocation29 + $0xe0] ss:$16 sps:$4 sm:$0xff]  }
 0xb7a   :  { %14320 = vmatprep.subr.bf16.mxu1 %v18143_v28  ;;  %v18767_v28 = vld [vmem:[#allocation29 + $0x104] ss:$16 sps:$4 sm:$0xff]  }
 0xb7c   :  { %14280 = vmatpush1.bf16.msra.mxu0 %v18014_v3  ;;  %v18765_v3 = vld [vmem:[#allocation29 + $0x100] ss:$16 sps:$4 sm:$0xff]  }
 0xb7d   :  { %14321 = vmatpush1.bf16.msra.mxu1 %v18142_v5  ;;  %15947 = vmatprep.subr.bf16.mxu0 %v18719_v39  ;;  %v18768_v5 = vld [vmem:[#allocation29 + $0x108] ss:$16 sps:$4 sm:$0xff]   ;;  %v18773_v39 = vld [vmem:[#allocation29 + $0x124] ss:$16 sps:$4 sm:$0xff]  }
 0xb7e   :  { %16111 = vmatprep.subr.bf16.mxu1 %v18722_v62  ;;  %v18776_v62 = vld [vmem:[#allocation29 + $0x12c] ss:$16 sps:$4 sm:$0xff]  }
 0xb7f   :  { %14282 = vmatmul.mubr.bf16.vlgmr.msra.gmra.mrb[88].mxu0 %v20320_v26  ;;  %v18740_v26 = vld [vmem:[#allocation29 + $0x6c] ss:$16 sps:$4 sm:$0xff]  }
 0xb80   :  { %14323 = vmatmul.mubr.bf16.vlgmr.msra.gmra.mrb[80].mxu1 %v20322_v24  ;;  %15948 = vmatpush1.bf16.msra.mxu0 %v18717_v61  ;;  %v18735_v24 = vld [vmem:[#allocation29 + $0x60] ss:$16 sps:$4 sm:$0xff]   ;;  %v18774_v61 = vld [vmem:[#allocation29 + $0x128] ss:$16 sps:$4 sm:$0xff]  }
 0xb81   :  { %15979 = vmatprep.mubr.bf16.mxu0 %v14638_v53  ;;  %16112 = vmatpush1.bf16.msra.mxu1 %v18720_v21  ;;  %v18779_v21 = vld [vmem:[#allocation29 + $0x144] ss:$16 sps:$4 sm:$0xff]  }
 0xb82   :  { %16143 = vmatprep.mubr.bf16.mxu1 %v14638_v53  ;;  %15949 = vmatprep.subr.bf16.mxu0 %v18725_v44  ;;  %v18782_v44 = vld [vmem:[#allocation29 + $0x14c] ss:$16 sps:$4 sm:$0xff]   ;;  %v18777_v53 = vld [vmem:[#allocation29 + $0x140] ss:$16 sps:$4 sm:$0xff]  }
 0xb83   :  { %16113 = vmatprep.subr.bf16.mxu1 %v18728_v40  ;;  %v18780_v40 = vld [vmem:[#allocation29 + $0x148] ss:$16 sps:$4 sm:$0xff]  }
 0xb84   :  { %15950 = vmatpush1.bf16.msra.mxu0 %v18723_v47  ;;  %v18785_v47 = vld [vmem:[#allocation29 + $0x164] ss:$16 sps:$4 sm:$0xff]  }
 0xb85   :  { %16114 = vmatpush1.bf16.msra.mxu1 %v18726_v54  ;;  %15951 = vmatprep.subr.bf16.mxu0 %v18731_v60  ;;  %v18788_v54 = vld [vmem:[#allocation29 + $0x16c] ss:$16 sps:$4 sm:$0xff]   ;;  %v18783_v60 = vld [vmem:[#allocation29 + $0x160] ss:$16 sps:$4 sm:$0xff]  }
 0xb86   :  { %16115 = vmatprep.subr.bf16.mxu1 %v18734_v36  ;;  %v18786_v36 = vld [vmem:[#allocation29 + $0x168] ss:$16 sps:$4 sm:$0xff]  }
 0xb88   :  { %15952 = vmatpush1.bf16.msra.mxu0 %v18729_v45  ;;  %v18791_v45 = vld [vmem:[#allocation29 + $0x184] ss:$16 sps:$4 sm:$0xff]  }
 0xb89   :  { %16116 = vmatpush1.bf16.msra.mxu1 %v18732_v22  ;;  %15953 = vmatprep.subr.bf16.mxu0 %v18737_v51  ;;  %v18794_v22 = vld [vmem:[#allocation29 + $0x18c] ss:$16 sps:$4 sm:$0xff]   ;;  %v18789_v51 = vld [vmem:[#allocation29 + $0x180] ss:$16 sps:$4 sm:$0xff]  }
 0xb8a   :  { %16117 = vmatprep.subr.bf16.mxu1 %v18740_v26  ;;  %v18792_v26 = vld [vmem:[#allocation29 + $0x188] ss:$16 sps:$4 sm:$0xff]  }
 0xb8c   :  { %15954 = vmatpush1.bf16.msra.mxu0 %v18735_v24  ;;  %v18797_v24 = vld [vmem:[#allocation29 + $0x1a4] ss:$16 sps:$4 sm:$0xff]  }
 0xb8d   :  { %16118 = vmatpush1.bf16.msra.mxu1 %v18738_v25  ;;  %15955 = vmatprep.subr.bf16.mxu0 %v18743_v50  ;;  %v18800_v25 = vld [vmem:[#allocation29 + $0x1ac] ss:$16 sps:$4 sm:$0xff]   ;;  %v18795_v50 = vld [vmem:[#allocation29 + $0x1a0] ss:$16 sps:$4 sm:$0xff]  }
 0xb8e   :  { %16119 = vmatprep.subr.bf16.mxu1 %v18746_v55  ;;  %v18798_v55 = vld [vmem:[#allocation29 + $0x1a8] ss:$16 sps:$4 sm:$0xff]  }
 0xb90   :  { %15956 = vmatpush1.bf16.msra.mxu0 %v18741_v41  ;;  %v18803_v41 = vld [vmem:[#allocation29 + $0x1c4] ss:$16 sps:$4 sm:$0xff]  }
 0xb91   :  { %16120 = vmatpush1.bf16.msra.mxu1 %v18744_v52  ;;  %15957 = vmatprep.subr.bf16.mxu0 %v18749_v49  ;;  %v18806_v52 = vld [vmem:[#allocation29 + $0x1cc] ss:$16 sps:$4 sm:$0xff]   ;;  %v18801_v49 = vld [vmem:[#allocation29 + $0x1c0] ss:$16 sps:$4 sm:$0xff]  }
 0xb92   :  { %v14037_v20 = vpop.f32.mrb[76].mxu0  ;;  %16121 = vmatprep.subr.bf16.mxu1 %v18752_v7  ;;  %v14336_v7 = vrot.slane %v20382_v16, %v19985_v11 }
 0xb93   :  { %v14038_v13 = vadd.f32 %v14037_v20, %v20310_v29  ;;  %v14078_v23 = vpop.f32.mrb[68].mxu1  ;;  %v14039_v59 = vpop.f32.mrb[77].mxu0  ;;  %v18764_v29 = vld [vmem:[#allocation29 + $0xec] ss:$16 sps:$4 sm:$0xff]   ;;  %v14348_v20 = vrot.slane %v20382_v16, %v19992_v27 }
 0xb94   :  { %v14040_v42 = vadd.f32 %v14039_v59, %v20312_v30  ;;  %v14080_v0 = vpop.f32.mrb[69].mxu1  ;;  %v14041_v34 = vpop.f32.mrb[78].mxu0  ;;  %15958 = vmatpush1.bf16.msra.mxu0 %v18747_v15  ;;  %v18762_v30 = vld [vmem:[#allocation29 + $0xe8] ss:$16 sps:$4 sm:$0xff]   ;;  %v18815_v59 = vld [vmem:[#allocation29 + $0x204] ss:$16 sps:$4 sm:$0xff]  }
 0xb95   :  { %v20391_v63 = vadd.f32 %v14078_v23, %v14038_v13  ;;  %v14082_v10 = vpop.f32.mrb[70].mxu1  ;;  %16122 = vmatpush1.bf16.msra.mxu1 %v18750_v43  ;;  %v14042_v14 = vpop.f32.mrb[79].mxu0  ;;  %15959 = vmatprep.subr.bf16.mxu0 %v18755_v56  ;;  %v18804_v15 = vld [vmem:[#allocation29 + $0x1c8] ss:$16 sps:$4 sm:$0xff]   ;;  %v18809_v43 = vld [vmem:[#allocation29 + $0x1e4] ss:$16 sps:$4 sm:$0xff]   ;;  %v14373_v13 = vadd.f32 %v14336_v7, %v20358_v37 }
 0xb96   :  { %v20393_v17 = vadd.f32 %v14080_v0, %v14040_v42  ;;  %v14083_v2 = vpop.f32.mrb[71].mxu1  ;;  %16123 = vmatprep.subr.bf16.mxu1 %v18758_v8  ;;  %v18812_v56 = vld [vmem:[#allocation29 + $0x1ec] ss:$16 sps:$4 sm:$0xff]   ;;  %v18807_v8 = vld [vmem:[#allocation29 + $0x1e0] ss:$16 sps:$4 sm:$0xff]   ;;  %v14376_v0 = vadd.f32 %v14348_v20, %v20380_v32 }
 0xb97   :  { %v18810_v23 = vld [vmem:[#allocation29 + $0x1e8] ss:$16 sps:$4 sm:$0xff]   ;;  %v18818_v42 = vld [vmem:[#allocation29 + $0x20c] ss:$16 sps:$4 sm:$0xff]   ;;  %v18813_v34 = vld [vmem:[#allocation29 + $0x200] ss:$16 sps:$4 sm:$0xff]  }
 0xb98   :  { %15960 = vmatpush1.bf16.msra.mxu0 %v18753_v33  ;;  %v14637_v33 = vpack.c.bf16 %v14373_v13, %v14373_v13  ;;  %v18816_v10 = vld [vmem:[#allocation29 + $0x208] ss:$16 sps:$4 sm:$0xff]   ;;  %v18821_v14 = vld [vmem:[#allocation29 + $0x224] ss:$16 sps:$4 sm:$0xff]   ;;  %v18819_v37 = vld [vmem:[#allocation29 + $0x220] ss:$16 sps:$4 sm:$0xff]  }
 0xb99   :  { %16124 = vmatpush1.bf16.msra.mxu1 %v18756_v57  ;;  %15961 = vmatprep.subr.bf16.mxu0 %v18761_v58  ;;  %v14640_v57 = vpack.c.bf16 %v14376_v0, %v14376_v0  ;;  %v18824_v58 = vld [vmem:[#allocation29 + $0x22c] ss:$16 sps:$4 sm:$0xff]   ;;  %v18822_v2 = vld [vmem:[#allocation29 + $0x228] ss:$16 sps:$4 sm:$0xff]  }
 0xb9a   :  { %16125 = vmatprep.subr.bf16.mxu1 %v18764_v29  ;;  %v18827_v29 = vld [vmem:[#allocation29 + $0x244] ss:$16 sps:$4 sm:$0xff]   ;;  %v18830_v32 = vld [vmem:[#allocation29 + $0x24c] ss:$16 sps:$4 sm:$0xff]   ;;  %v18864_v13 = vld [vmem:[#allocation29 + $0x308] ss:$16 sps:$4 sm:$0xff]  }
 0xb9b   :  { %v18866_v20 = vld [vmem:[#allocation29 + $0x30c] ss:$16 sps:$4 sm:$0xff]   ;;  %v18870_v0 = vld [vmem:[#allocation29 + $0x328] ss:$16 sps:$4 sm:$0xff]  }
 0xb9c   :  { %15962 = vmatpush1.bf16.msra.mxu0 %v18759_v18  ;;  %v18825_v18 = vld [vmem:[#allocation29 + $0x240] ss:$16 sps:$4 sm:$0xff]  }
 0xb9d   :  { %16126 = vmatpush1.bf16.msra.mxu1 %v18762_v30  ;;  %15963 = vmatprep.subr.bf16.mxu0 %v18767_v28  ;;  %v18828_v30 = vld [vmem:[#allocation29 + $0x248] ss:$16 sps:$4 sm:$0xff]   ;;  %v18833_v28 = vld [vmem:[#allocation29 + $0x264] ss:$16 sps:$4 sm:$0xff]  }
 0xb9e   :  { %16127 = vmatprep.subr.bf16.mxu1 %v18770_v31  ;;  %v18836_v31 = vld [vmem:[#allocation29 + $0x26c] ss:$16 sps:$4 sm:$0xff]  }
 0xba0   :  { %15964 = vmatpush1.bf16.msra.mxu0 %v18765_v3  ;;  %v18831_v3 = vld [vmem:[#allocation29 + $0x260] ss:$16 sps:$4 sm:$0xff]  }
 0xba1   :  { %16128 = vmatpush1.bf16.msra.mxu1 %v18768_v5  ;;  %15965 = vmatprep.subr.bf16.mxu0 %v18773_v39  ;;  %v18834_v5 = vld [vmem:[#allocation29 + $0x268] ss:$16 sps:$4 sm:$0xff]   ;;  %v18839_v39 = vld [vmem:[#allocation29 + $0x284] ss:$16 sps:$4 sm:$0xff]  }
 0xba2   :  { %16129 = vmatprep.subr.bf16.mxu1 %v18776_v62  ;;  %v18842_v62 = vld [vmem:[#allocation29 + $0x28c] ss:$16 sps:$4 sm:$0xff]  }
 0xba4   :  { %15966 = vmatpush1.bf16.msra.mxu0 %v18771_v35  ;;  %v18837_v35 = vld [vmem:[#allocation29 + $0x280] ss:$16 sps:$4 sm:$0xff]  }
 0xba5   :  { %16130 = vmatpush1.bf16.msra.mxu1 %v18774_v61  ;;  %15967 = vmatprep.subr.bf16.mxu0 %v18779_v21  ;;  %v18840_v61 = vld [vmem:[#allocation29 + $0x288] ss:$16 sps:$4 sm:$0xff]   ;;  %v18845_v21 = vld [vmem:[#allocation29 + $0x2a4] ss:$16 sps:$4 sm:$0xff]  }
 0xba6   :  { %16131 = vmatprep.subr.bf16.mxu1 %v18782_v44  ;;  %v18848_v44 = vld [vmem:[#allocation29 + $0x2ac] ss:$16 sps:$4 sm:$0xff]  }
 0xba8   :  { %15968 = vmatpush1.bf16.msra.mxu0 %v18777_v53  ;;  %v18843_v53 = vld [vmem:[#allocation29 + $0x2a0] ss:$16 sps:$4 sm:$0xff]  }
 0xba9   :  { %16132 = vmatpush1.bf16.msra.mxu1 %v18780_v40  ;;  %15969 = vmatprep.subr.bf16.mxu0 %v18785_v47  ;;  %v18846_v40 = vld [vmem:[#allocation29 + $0x2a8] ss:$16 sps:$4 sm:$0xff]   ;;  %v18851_v47 = vld [vmem:[#allocation29 + $0x2c4] ss:$16 sps:$4 sm:$0xff]  }
 0xbaa   :  { %16133 = vmatprep.subr.bf16.mxu1 %v18788_v54 }
 0xbac   :  { %15970 = vmatpush1.bf16.msra.mxu0 %v18783_v60  ;;  %v18854_v60 = vld [vmem:[#allocation29 + $0x2cc] ss:$16 sps:$4 sm:$0xff]  }
 0xbad   :  { %16134 = vmatpush1.bf16.msra.mxu1 %v18786_v36  ;;  %15971 = vmatprep.subr.bf16.mxu0 %v18791_v45 }
 0xbae   :  { %16135 = vmatprep.subr.bf16.mxu1 %v18794_v22 }
 0xbb0   :  { %15972 = vmatpush1.bf16.msra.mxu0 %v18789_v51 }
 0xbb1   :  { %16136 = vmatpush1.bf16.msra.mxu1 %v18792_v26  ;;  %15973 = vmatprep.subr.bf16.mxu0 %v18797_v24 }
 0xbb2   :  { %16137 = vmatprep.subr.bf16.mxu1 %v18800_v25  ;;  %v18849_v25 = vld [vmem:[#allocation29 + $0x2c0] ss:$16 sps:$4 sm:$0xff]  }
 0xbb4   :  { %15974 = vmatpush1.bf16.msra.mxu0 %v18795_v50 }
 0xbb5   :  { %16138 = vmatpush1.bf16.msra.mxu1 %v18798_v55  ;;  %15975 = vmatprep.subr.bf16.mxu0 %v18803_v41 }
 0xbb6   :  { %16139 = vmatprep.subr.bf16.mxu1 %v18806_v52  ;;  %v18852_v52 = vld [vmem:[#allocation29 + $0x2c8] ss:$16 sps:$4 sm:$0xff]  }
 0xbb8   :  { %15976 = vmatpush1.bf16.msra.mxu0 %v18801_v49  ;;  %v18857_v49 = vld [vmem:[#allocation29 + $0x2e4] ss:$16 sps:$4 sm:$0xff]  }
 0xbb9   :  { %16140 = vmatpush1.bf16.msra.mxu1 %v18804_v15  ;;  %15977 = vmatprep.subr.bf16.mxu0 %v18809_v43  ;;  %v18855_v43 = vld [vmem:[#allocation29 + $0x2e0] ss:$16 sps:$4 sm:$0xff]  }
 0xbba   :  { %16141 = vmatprep.subr.bf16.mxu1 %v18812_v56  ;;  %v18863_v56 = vld [vmem:[#allocation29 + $0x304] ss:$16 sps:$4 sm:$0xff]  }
 0xbbc   :  { %15978 = vmatpush1.bf16.msra.mxu0 %v18807_v8  ;;  %v18861_v8 = vld [vmem:[#allocation29 + $0x300] ss:$16 sps:$4 sm:$0xff]  }
 0xbbd   :  { %16142 = vmatpush1.bf16.msra.mxu1 %v18810_v23  ;;  %15988 = vmatprep.subr.bf16.mxu0 %v18815_v59  ;;  %v18869_v23 = vld [vmem:[#allocation29 + $0x324] ss:$16 sps:$4 sm:$0xff]   ;;  %v18872_v59 = vld [vmem:[#allocation29 + $0x32c] ss:$16 sps:$4 sm:$0xff]  }
 0xbbe   :  { %16152 = vmatprep.subr.bf16.mxu1 %v18818_v42  ;;  %v18867_v42 = vld [vmem:[#allocation29 + $0x320] ss:$16 sps:$4 sm:$0xff]  }
 0xbbf   :  { %15980 = vmatmul.mubr.bf16.vlgmr.msra.gmra.mrb[92].mxu0 %v14637_v33 }
 0xbc0   :  { %16144 = vmatmul.mubr.bf16.vlgmr.msra.gmra.mrb[84].mxu1 %v14637_v33  ;;  %15989 = vmatpush1.bf16.msra.mxu0 %v18813_v34  ;;  %v18875_v34 = vld [vmem:[#allocation29 + $0x344] ss:$16 sps:$4 sm:$0xff]   ;;  %v18878_v33 = vld [vmem:[#allocation29 + $0x34c] ss:$16 sps:$4 sm:$0xff]  }
 0xbc1   :  { %16020 = vmatprep.mubr.bf16.mxu0 %v14640_v57  ;;  %16153 = vmatpush1.bf16.msra.mxu1 %v18816_v10  ;;  %v18873_v10 = vld [vmem:[#allocation29 + $0x340] ss:$16 sps:$4 sm:$0xff]  }
 0xbc2   :  { %16184 = vmatprep.mubr.bf16.mxu1 %v14640_v57  ;;  %15990 = vmatprep.subr.bf16.mxu0 %v18821_v14  ;;  %v18876_v14 = vld [vmem:[#allocation29 + $0x348] ss:$16 sps:$4 sm:$0xff]   ;;  %v18881_v57 = vld [vmem:[#allocation29 + $0x364] ss:$16 sps:$4 sm:$0xff]  }
 0xbc3   :  { %16154 = vmatprep.subr.bf16.mxu1 %v18824_v58  ;;  %v18884_v58 = vld [vmem:[#allocation29 + $0x36c] ss:$16 sps:$4 sm:$0xff]  }
 0xbc4   :  { %15991 = vmatpush1.bf16.msra.mxu0 %v18819_v37  ;;  %v18879_v37 = vld [vmem:[#allocation29 + $0x360] ss:$16 sps:$4 sm:$0xff]  }
 0xbc5   :  { %16155 = vmatpush1.bf16.msra.mxu1 %v18822_v2  ;;  %15992 = vmatprep.subr.bf16.mxu0 %v18827_v29  ;;  %v18882_v2 = vld [vmem:[#allocation29 + $0x368] ss:$16 sps:$4 sm:$0xff]   ;;  %v18887_v29 = vld [vmem:[#allocation29 + $0x384] ss:$16 sps:$4 sm:$0xff]  }
 0xbc6   :  { %16156 = vmatprep.subr.bf16.mxu1 %v18830_v32  ;;  %v18890_v32 = vld [vmem:[#allocation29 + $0x38c] ss:$16 sps:$4 sm:$0xff]  }
 0xbc8   :  { %15993 = vmatpush1.bf16.msra.mxu0 %v18825_v18  ;;  %v18885_v18 = vld [vmem:[#allocation29 + $0x380] ss:$16 sps:$4 sm:$0xff]  }
 0xbc9   :  { %16157 = vmatpush1.bf16.msra.mxu1 %v18828_v30  ;;  %15994 = vmatprep.subr.bf16.mxu0 %v18833_v28  ;;  %v18888_v30 = vld [vmem:[#allocation29 + $0x388] ss:$16 sps:$4 sm:$0xff]   ;;  %v18893_v28 = vld [vmem:[#allocation29 + $0x3a4] ss:$16 sps:$4 sm:$0xff]  }
 0xbca   :  { %16158 = vmatprep.subr.bf16.mxu1 %v18836_v31  ;;  %v18896_v31 = vld [vmem:[#allocation29 + $0x3ac] ss:$16 sps:$4 sm:$0xff]  }
 0xbcc   :  { %15995 = vmatpush1.bf16.msra.mxu0 %v18831_v3  ;;  %v18891_v3 = vld [vmem:[#allocation29 + $0x3a0] ss:$16 sps:$4 sm:$0xff]  }
 0xbcd   :  { %16159 = vmatpush1.bf16.msra.mxu1 %v18834_v5  ;;  %15996 = vmatprep.subr.bf16.mxu0 %v18839_v39  ;;  %v18894_v5 = vld [vmem:[#allocation29 + $0x3a8] ss:$16 sps:$4 sm:$0xff]   ;;  %v18899_v39 = vld [vmem:[#allocation29 + $0x3c4] ss:$16 sps:$4 sm:$0xff]  }
 0xbce   :  { %16160 = vmatprep.subr.bf16.mxu1 %v18842_v62  ;;  %v18902_v62 = vld [vmem:[#allocation29 + $0x3cc] ss:$16 sps:$4 sm:$0xff]  }
 0xbd0   :  { %15997 = vmatpush1.bf16.msra.mxu0 %v18837_v35  ;;  %v18897_v35 = vld [vmem:[#allocation29 + $0x3c0] ss:$16 sps:$4 sm:$0xff]  }
 0xbd1   :  { %16161 = vmatpush1.bf16.msra.mxu1 %v18840_v61  ;;  %15998 = vmatprep.subr.bf16.mxu0 %v18845_v21  ;;  %v14344_v61 = vrot.slane %v20382_v16, %v20015_v38  ;;  %v18900_v21 = vld [vmem:[#allocation29 + $0x3c8] ss:$16 sps:$4 sm:$0xff]  }
 0xbd2   :  { %v14119_v54 = vpop.f32.mrb[80].mxu0  ;;  %16162 = vmatprep.subr.bf16.mxu1 %v18848_v44  ;;  %v18905_v44 = vld [vmem:[#allocation29 + $0x3e4] ss:$16 sps:$4 sm:$0xff]  }
 0xbd3   :  { %v14120_v36 = vadd.f32 %v14119_v54, %v20391_v63  ;;  %v14160_v45 = vpop.f32.mrb[72].mxu1  ;;  %v14121_v22 = vpop.f32.mrb[81].mxu0  ;;  %v18860_v63 = vld [vmem:[#allocation29 + $0x2ec] ss:$16 sps:$4 sm:$0xff]   ;;  %v14375_v54 = vadd.f32 %v14344_v61, %v20378_v4  ;;  %v18915_v4 = vld [vmem:[#allocation29 + $0x420] ss:$16 sps:$4 sm:$0xff]  }
 0xbd4   :  { %v14122_v51 = vadd.f32 %v14121_v22, %v20393_v17  ;;  %v14162_v26 = vpop.f32.mrb[73].mxu1  ;;  %v14123_v24 = vpop.f32.mrb[82].mxu0  ;;  %15999 = vmatpush1.bf16.msra.mxu0 %v18843_v53  ;;  %v18858_v17 = vld [vmem:[#allocation29 + $0x2e8] ss:$16 sps:$4 sm:$0xff]   ;;  %v18908_v53 = vld [vmem:[#allocation29 + $0x3ec] ss:$16 sps:$4 sm:$0xff]  }
 0xbd5   :  { %v20403_v50 = vadd.f32 %v14160_v45, %v14120_v36  ;;  %v14164_v55 = vpop.f32.mrb[74].mxu1  ;;  %16163 = vmatpush1.bf16.msra.mxu1 %v18846_v40  ;;  %v14124_v41 = vpop.f32.mrb[83].mxu0  ;;  %16000 = vmatprep.subr.bf16.mxu0 %v18851_v47  ;;  %v14356_v40 = vrot.slane %v20382_v16, %v20097_v6  ;;  %v18903_v47 = vld [vmem:[#allocation29 + $0x3e0] ss:$16 sps:$4 sm:$0xff]   ;;  %v18911_v36 = vld [vmem:[#allocation29 + $0x404] ss:$16 sps:$4 sm:$0xff]  }
 0xbd6   :  { %v20405_v7 = vadd.f32 %v14162_v26, %v14122_v51  ;;  %v14165_v15 = vpop.f32.mrb[75].mxu1  ;;  %16164 = vmatprep.subr.bf16.mxu1 %v18854_v60  ;;  %v18906_v60 = vld [vmem:[#allocation29 + $0x3e8] ss:$16 sps:$4 sm:$0xff]   ;;  %v18914_v45 = vld [vmem:[#allocation29 + $0x40c] ss:$16 sps:$4 sm:$0xff]   ;;  %v14639_v26 = vpack.c.bf16 %v14375_v54, %v14375_v54 }
 0xbd7   :  { %v18909_v51 = vld [vmem:[#allocation29 + $0x400] ss:$16 sps:$4 sm:$0xff]   ;;  %v18912_v24 = vld [vmem:[#allocation29 + $0x408] ss:$16 sps:$4 sm:$0xff]   ;;  %v18917_v6 = vld [vmem:[#allocation29 + $0x424] ss:$16 sps:$4 sm:$0xff]  }
 0xbd8   :  { %16001 = vmatpush1.bf16.msra.mxu0 %v18849_v25  ;;  %v14378_v22 = vadd.f32 %v14356_v40, %v20405_v7  ;;  %v18920_v55 = vld [vmem:[#allocation29 + $0x42c] ss:$16 sps:$4 sm:$0xff]   ;;  %v18918_v41 = vld [vmem:[#allocation29 + $0x428] ss:$16 sps:$4 sm:$0xff]   ;;  %v18921_v7 = vld [vmem:[#allocation29 + $0x440] ss:$16 sps:$4 sm:$0xff]  }
 0xbd9   :  { %16165 = vmatpush1.bf16.msra.mxu1 %v18852_v52  ;;  %16002 = vmatprep.subr.bf16.mxu0 %v18857_v49  ;;  %v18923_v52 = vld [vmem:[#allocation29 + $0x444] ss:$16 sps:$4 sm:$0xff]   ;;  %v18926_v49 = vld [vmem:[#allocation29 + $0x44c] ss:$16 sps:$4 sm:$0xff]   ;;  %v18924_v15 = vld [vmem:[#allocation29 + $0x448] ss:$16 sps:$4 sm:$0xff]  }
 0xbda   :  { %16166 = vmatprep.subr.bf16.mxu1 %v18860_v63  ;;  %v14642_v25 = vpack.c.bf16 %v14378_v22, %v14378_v22  ;;  %v18929_v63 = vld [vmem:[#allocation29 + $0x464] ss:$16 sps:$4 sm:$0xff]   ;;  %v18963_v54 = vld [vmem:[#allocation29 + $0x520] ss:$16 sps:$4 sm:$0xff]  }
 0xbdb   :  { %v18959_v61 = vld [vmem:[#allocation29 + $0x504] ss:$16 sps:$4 sm:$0xff]   ;;  %v18969_v22 = vld [vmem:[#allocation29 + $0x540] ss:$16 sps:$4 sm:$0xff]  }
 0xbdc   :  { %16003 = vmatpush1.bf16.msra.mxu0 %v18855_v43  ;;  %v18932_v43 = vld [vmem:[#allocation29 + $0x46c] ss:$16 sps:$4 sm:$0xff]   ;;  %v18965_v40 = vld [vmem:[#allocation29 + $0x524] ss:$16 sps:$4 sm:$0xff]  }
 0xbdd   :  { %16167 = vmatpush1.bf16.msra.mxu1 %v18858_v17  ;;  %16004 = vmatprep.subr.bf16.mxu0 %v18863_v56  ;;  %v18927_v17 = vld [vmem:[#allocation29 + $0x460] ss:$16 sps:$4 sm:$0xff]   ;;  %v18930_v56 = vld [vmem:[#allocation29 + $0x468] ss:$16 sps:$4 sm:$0xff]  }
 0xbde   :  { %16168 = vmatprep.subr.bf16.mxu1 %v18866_v20  ;;  %v18935_v20 = vld [vmem:[#allocation29 + $0x484] ss:$16 sps:$4 sm:$0xff]  }
 0xbe0   :  { %16005 = vmatpush1.bf16.msra.mxu0 %v18861_v8  ;;  %v18938_v8 = vld [vmem:[#allocation29 + $0x48c] ss:$16 sps:$4 sm:$0xff]  }
 0xbe1   :  { %16169 = vmatpush1.bf16.msra.mxu1 %v18864_v13  ;;  %16006 = vmatprep.subr.bf16.mxu0 %v18869_v23  ;;  %v18933_v13 = vld [vmem:[#allocation29 + $0x480] ss:$16 sps:$4 sm:$0xff]   ;;  %v18936_v23 = vld [vmem:[#allocation29 + $0x488] ss:$16 sps:$4 sm:$0xff]  }
 0xbe2   :  { %16170 = vmatprep.subr.bf16.mxu1 %v18872_v59  ;;  %v18941_v59 = vld [vmem:[#allocation29 + $0x4a4] ss:$16 sps:$4 sm:$0xff]  }
 0xbe4   :  { %16007 = vmatpush1.bf16.msra.mxu0 %v18867_v42  ;;  %v18944_v42 = vld [vmem:[#allocation29 + $0x4ac] ss:$16 sps:$4 sm:$0xff]  }
 0xbe5   :  { %16171 = vmatpush1.bf16.msra.mxu1 %v18870_v0  ;;  %16008 = vmatprep.subr.bf16.mxu0 %v18875_v34  ;;  %v18939_v0 = vld [vmem:[#allocation29 + $0x4a0] ss:$16 sps:$4 sm:$0xff]   ;;  %v18942_v34 = vld [vmem:[#allocation29 + $0x4a8] ss:$16 sps:$4 sm:$0xff]  }
 0xbe6   :  { %16172 = vmatprep.subr.bf16.mxu1 %v18878_v33  ;;  %v18947_v33 = vld [vmem:[#allocation29 + $0x4c4] ss:$16 sps:$4 sm:$0xff]  }
 0xbe8   :  { %16009 = vmatpush1.bf16.msra.mxu0 %v18873_v10 }
 0xbe9   :  { %16173 = vmatpush1.bf16.msra.mxu1 %v18876_v14  ;;  %16010 = vmatprep.subr.bf16.mxu0 %v18881_v57  ;;  %v18950_v14 = vld [vmem:[#allocation29 + $0x4cc] ss:$16 sps:$4 sm:$0xff]  }
 0xbea   :  { %16174 = vmatprep.subr.bf16.mxu1 %v18884_v58 }
 0xbec   :  { %16011 = vmatpush1.bf16.msra.mxu0 %v18879_v37 }
 0xbed   :  { %16175 = vmatpush1.bf16.msra.mxu1 %v18882_v2  ;;  %16012 = vmatprep.subr.bf16.mxu0 %v18887_v29 }
 0xbee   :  { %16176 = vmatprep.subr.bf16.mxu1 %v18890_v32 }
 0xbf0   :  { %16013 = vmatpush1.bf16.msra.mxu0 %v18885_v18  ;;  %v18945_v18 = vld [vmem:[#allocation29 + $0x4c0] ss:$16 sps:$4 sm:$0xff]  }
 0xbf1   :  { %16177 = vmatpush1.bf16.msra.mxu1 %v18888_v30  ;;  %16014 = vmatprep.subr.bf16.mxu0 %v18893_v28 }
 0xbf2   :  { %16178 = vmatprep.subr.bf16.mxu1 %v18896_v31 }
 0xbf4   :  { %16015 = vmatpush1.bf16.msra.mxu0 %v18891_v3  ;;  %v18948_v3 = vld [vmem:[#allocation29 + $0x4c8] ss:$16 sps:$4 sm:$0xff]  }
 0xbf5   :  { %16179 = vmatpush1.bf16.msra.mxu1 %v18894_v5  ;;  %16016 = vmatprep.subr.bf16.mxu0 %v18899_v39  ;;  %v18953_v5 = vld [vmem:[#allocation29 + $0x4e4] ss:$16 sps:$4 sm:$0xff]  }
 0xbf6   :  { %16180 = vmatprep.subr.bf16.mxu1 %v18902_v62 }
 0xbf8   :  { %16017 = vmatpush1.bf16.msra.mxu0 %v18897_v35  ;;  %v18951_v35 = vld [vmem:[#allocation29 + $0x4e0] ss:$16 sps:$4 sm:$0xff]  }
 0xbf9   :  { %16181 = vmatpush1.bf16.msra.mxu1 %v18900_v21  ;;  %16018 = vmatprep.subr.bf16.mxu0 %v18905_v44  ;;  %v18962_v21 = vld [vmem:[#allocation29 + $0x50c] ss:$16 sps:$4 sm:$0xff]   ;;  %v18957_v44 = vld [vmem:[#allocation29 + $0x500] ss:$16 sps:$4 sm:$0xff]  }
 0xbfa   :  { %16182 = vmatprep.subr.bf16.mxu1 %v18908_v53  ;;  %v18960_v53 = vld [vmem:[#allocation29 + $0x508] ss:$16 sps:$4 sm:$0xff]  }
 0xbfc   :  { %16019 = vmatpush1.bf16.msra.mxu0 %v18903_v47  ;;  %v18968_v47 = vld [vmem:[#allocation29 + $0x52c] ss:$16 sps:$4 sm:$0xff]  }
 0xbfd   :  { %16183 = vmatpush1.bf16.msra.mxu1 %v18906_v60  ;;  %16029 = vmatprep.subr.bf16.mxu0 %v18911_v36  ;;  %v18966_v60 = vld [vmem:[#allocation29 + $0x528] ss:$16 sps:$4 sm:$0xff]   ;;  %v18971_v36 = vld [vmem:[#allocation29 + $0x544] ss:$16 sps:$4 sm:$0xff]  }
 0xbfe   :  { %16193 = vmatprep.subr.bf16.mxu1 %v18914_v45  ;;  %v18974_v45 = vld [vmem:[#allocation29 + $0x54c] ss:$16 sps:$4 sm:$0xff]  }
 0xbff   :  { %16021 = vmatmul.mubr.bf16.vlgmr.msra.gmra.mrb[92].mxu0 %v14639_v26 }
 0xc00   :  { %16185 = vmatmul.mubr.bf16.vlgmr.msra.gmra.mrb[84].mxu1 %v14639_v26  ;;  %16030 = vmatpush1.bf16.msra.mxu0 %v18909_v51  ;;  %v18972_v51 = vld [vmem:[#allocation29 + $0x548] ss:$16 sps:$4 sm:$0xff]   ;;  %v18977_v26 = vld [vmem:[#allocation29 + $0x564] ss:$16 sps:$4 sm:$0xff]  }
 0xc01   :  { %16061 = vmatprep.mubr.bf16.mxu0 %v14642_v25  ;;  %16194 = vmatpush1.bf16.msra.mxu1 %v18912_v24  ;;  %v18980_v24 = vld [vmem:[#allocation29 + $0x56c] ss:$16 sps:$4 sm:$0xff]  }
 0xc02   :  { %16225 = vmatprep.mubr.bf16.mxu1 %v14642_v25  ;;  %16031 = vmatprep.subr.bf16.mxu0 %v18917_v6  ;;  %v18975_v6 = vld [vmem:[#allocation29 + $0x560] ss:$16 sps:$4 sm:$0xff]   ;;  %v18978_v25 = vld [vmem:[#allocation29 + $0x568] ss:$16 sps:$4 sm:$0xff]  }
 0xc03   :  { %16195 = vmatprep.subr.bf16.mxu1 %v18920_v55  ;;  %v18983_v55 = vld [vmem:[#allocation29 + $0x584] ss:$16 sps:$4 sm:$0xff]  }
 0xc04   :  { %16032 = vmatpush1.bf16.msra.mxu0 %v18915_v4  ;;  %v18986_v4 = vld [vmem:[#allocation29 + $0x58c] ss:$16 sps:$4 sm:$0xff]  }
 0xc05   :  { %16196 = vmatpush1.bf16.msra.mxu1 %v18918_v41  ;;  %16033 = vmatprep.subr.bf16.mxu0 %v18923_v52  ;;  %v18981_v41 = vld [vmem:[#allocation29 + $0x580] ss:$16 sps:$4 sm:$0xff]   ;;  %v18984_v52 = vld [vmem:[#allocation29 + $0x588] ss:$16 sps:$4 sm:$0xff]  }
 0xc06   :  { %16197 = vmatprep.subr.bf16.mxu1 %v18926_v49  ;;  %v18989_v49 = vld [vmem:[#allocation29 + $0x5a4] ss:$16 sps:$4 sm:$0xff]  }
 0xc08   :  { %16034 = vmatpush1.bf16.msra.mxu0 %v18921_v7  ;;  %v18992_v7 = vld [vmem:[#allocation29 + $0x5ac] ss:$16 sps:$4 sm:$0xff]  }
 0xc09   :  { %16198 = vmatpush1.bf16.msra.mxu1 %v18924_v15  ;;  %16035 = vmatprep.subr.bf16.mxu0 %v18929_v63  ;;  %v18987_v15 = vld [vmem:[#allocation29 + $0x5a0] ss:$16 sps:$4 sm:$0xff]   ;;  %v18990_v63 = vld [vmem:[#allocation29 + $0x5a8] ss:$16 sps:$4 sm:$0xff]  }
 0xc0a   :  { %16199 = vmatprep.subr.bf16.mxu1 %v18932_v43  ;;  %v18995_v43 = vld [vmem:[#allocation29 + $0x5c4] ss:$16 sps:$4 sm:$0xff]  }
 0xc0c   :  { %16036 = vmatpush1.bf16.msra.mxu0 %v18927_v17  ;;  %v18998_v17 = vld [vmem:[#allocation29 + $0x5cc] ss:$16 sps:$4 sm:$0xff]  }
 0xc0d   :  { %16200 = vmatpush1.bf16.msra.mxu1 %v18930_v56  ;;  %16037 = vmatprep.subr.bf16.mxu0 %v18935_v20  ;;  %v18993_v56 = vld [vmem:[#allocation29 + $0x5c0] ss:$16 sps:$4 sm:$0xff]   ;;  %v14352_v20 = vrot.slane %v20382_v16, %v20112_v12  ;;  %v19008_v12 = vld [vmem:[#allocation29 + $0x608] ss:$16 sps:$4 sm:$0xff]   ;;  %v19013_v16 = vld [vmem:[#allocation29 + $0x624] ss:$16 sps:$4 sm:$0xff]  }
 0xc0e   :  { %16201 = vmatprep.subr.bf16.mxu1 %v18938_v8  ;;  %v18996_v8 = vld [vmem:[#allocation29 + $0x5c8] ss:$16 sps:$4 sm:$0xff]  }
 0xc10   :  { %16038 = vmatpush1.bf16.msra.mxu0 %v18933_v13  ;;  %v19001_v13 = vld [vmem:[#allocation29 + $0x5e4] ss:$16 sps:$4 sm:$0xff]  }
 0xc11   :  { %16202 = vmatpush1.bf16.msra.mxu1 %v18936_v23  ;;  %16039 = vmatprep.subr.bf16.mxu0 %v18941_v59  ;;  %v19004_v23 = vld [vmem:[#allocation29 + $0x5ec] ss:$16 sps:$4 sm:$0xff]   ;;  %v18999_v59 = vld [vmem:[#allocation29 + $0x5e0] ss:$16 sps:$4 sm:$0xff]  }
 0xc12   :  { %v14201_v10 = vpop.f32.mrb[84].mxu0  ;;  %16203 = vmatprep.subr.bf16.mxu1 %v18944_v42  ;;  %v14377_v42 = vadd.f32 %v14352_v20, %v20403_v50  ;;  %v19014_v50 = vld [vmem:[#allocation29 + $0x628] ss:$16 sps:$4 sm:$0xff]  }
 0xc13   :  { %v14202_v57 = vadd.f32 %v14201_v10, %v20338_v48  ;;  %v14242_v58 = vpop.f32.mrb[76].mxu1  ;;  %v14203_v37 = vpop.f32.mrb[85].mxu0  ;;  %v18956_v48 = vld [vmem:[#allocation29 + $0x4ec] ss:$16 sps:$4 sm:$0xff]   ;;  %v19005_v10 = vld [vmem:[#allocation29 + $0x600] ss:$16 sps:$4 sm:$0xff]  }
 0xc14   :  { %v14204_v2 = vadd.f32 %v14203_v37, %v20340_v1  ;;  %v14244_v29 = vpop.f32.mrb[77].mxu1  ;;  %v14205_v32 = vpop.f32.mrb[86].mxu0  ;;  %16040 = vmatpush1.bf16.msra.mxu0 %v18939_v0  ;;  %v18954_v1 = vld [vmem:[#allocation29 + $0x4e8] ss:$16 sps:$4 sm:$0xff]   ;;  %v19019_v37 = vld [vmem:[#allocation29 + $0x644] ss:$16 sps:$4 sm:$0xff]  }
 0xc15   :  { %v20415_v30 = vadd.f32 %v14242_v58, %v14202_v57  ;;  %v14246_v28 = vpop.f32.mrb[78].mxu1  ;;  %16204 = vmatpush1.bf16.msra.mxu1 %v18942_v34  ;;  %v14206_v31 = vpop.f32.mrb[87].mxu0  ;;  %16041 = vmatprep.subr.bf16.mxu0 %v18947_v33  ;;  %v19002_v0 = vld [vmem:[#allocation29 + $0x5e8] ss:$16 sps:$4 sm:$0xff]   ;;  %v19007_v34 = vld [vmem:[#allocation29 + $0x604] ss:$16 sps:$4 sm:$0xff]  }
 0xc16   :  { %v20417_v39 = vadd.f32 %v14244_v29, %v14204_v2  ;;  %v14247_v62 = vpop.f32.mrb[79].mxu1  ;;  %16205 = vmatprep.subr.bf16.mxu1 %v18950_v14  ;;  %v19010_v33 = vld [vmem:[#allocation29 + $0x60c] ss:$16 sps:$4 sm:$0xff]   ;;  %v14641_v14 = vpack.c.bf16 %v14377_v42, %v14377_v42  ;;  %v19011_v58 = vld [vmem:[#allocation29 + $0x620] ss:$16 sps:$4 sm:$0xff]  }
 0xc17   :  { %v19016_v57 = vld [vmem:[#allocation29 + $0x62c] ss:$16 sps:$4 sm:$0xff]   ;;  %v19017_v29 = vld [vmem:[#allocation29 + $0x640] ss:$16 sps:$4 sm:$0xff]   ;;  %v19020_v32 = vld [vmem:[#allocation29 + $0x648] ss:$16 sps:$4 sm:$0xff]  }
 0xc18   :  { %16042 = vmatpush1.bf16.msra.mxu0 %v18945_v18  ;;  %v19022_v2 = vld [vmem:[#allocation29 + $0x64c] ss:$16 sps:$4 sm:$0xff]   ;;  %v19025_v18 = vld [vmem:[#allocation29 + $0x664] ss:$16 sps:$4 sm:$0xff]   ;;  %v19023_v31 = vld [vmem:[#allocation29 + $0x660] ss:$16 sps:$4 sm:$0xff]  }
 0xc19   :  { %16206 = vmatpush1.bf16.msra.mxu1 %v18948_v3  ;;  %16043 = vmatprep.subr.bf16.mxu0 %v18953_v5  ;;  %v19028_v28 = vld [vmem:[#allocation29 + $0x66c] ss:$16 sps:$4 sm:$0xff]   ;;  %v19026_v3 = vld [vmem:[#allocation29 + $0x668] ss:$16 sps:$4 sm:$0xff]   ;;  %v19031_v5 = vld [vmem:[#allocation29 + $0x684] ss:$16 sps:$4 sm:$0xff]  }
 0xc1a   :  { %16207 = vmatprep.subr.bf16.mxu1 %v18956_v48  ;;  %v19034_v62 = vld [vmem:[#allocation29 + $0x68c] ss:$16 sps:$4 sm:$0xff]   ;;  %v19029_v48 = vld [vmem:[#allocation29 + $0x680] ss:$16 sps:$4 sm:$0xff]   ;;  %v19056_v20 = vld [vmem:[#allocation29 + $0x708] ss:$16 sps:$4 sm:$0xff]  }
 0xc1b   :  { %v19067_v42 = vld [vmem:[#allocation29 + $0x744] ss:$16 sps:$4 sm:$0xff]  }
 0xc1c   :  { %16044 = vmatpush1.bf16.msra.mxu0 %v18951_v35  ;;  %v19032_v35 = vld [vmem:[#allocation29 + $0x688] ss:$16 sps:$4 sm:$0xff]  }
 0xc1d   :  { %16208 = vmatpush1.bf16.msra.mxu1 %v18954_v1  ;;  %16045 = vmatprep.subr.bf16.mxu0 %v18959_v61  ;;  %v19037_v1 = vld [vmem:[#allocation29 + $0x6a4] ss:$16 sps:$4 sm:$0xff]   ;;  %v19040_v61 = vld [vmem:[#allocation29 + $0x6ac] ss:$16 sps:$4 sm:$0xff]  }
 0xc1e   :  { %16209 = vmatprep.subr.bf16.mxu1 %v18962_v21  ;;  %v19035_v21 = vld [vmem:[#allocation29 + $0x6a0] ss:$16 sps:$4 sm:$0xff]  }
 0xc20   :  { %16046 = vmatpush1.bf16.msra.mxu0 %v18957_v44  ;;  %v19038_v44 = vld [vmem:[#allocation29 + $0x6a8] ss:$16 sps:$4 sm:$0xff]  }
 0xc21   :  { %16210 = vmatpush1.bf16.msra.mxu1 %v18960_v53  ;;  %16047 = vmatprep.subr.bf16.mxu0 %v18965_v40  ;;  %v19043_v53 = vld [vmem:[#allocation29 + $0x6c4] ss:$16 sps:$4 sm:$0xff]  }
 0xc22   :  { %16211 = vmatprep.subr.bf16.mxu1 %v18968_v47  ;;  %v19046_v47 = vld [vmem:[#allocation29 + $0x6cc] ss:$16 sps:$4 sm:$0xff]  }
 0xc24   :  { %16048 = vmatpush1.bf16.msra.mxu0 %v18963_v54 }
 0xc25   :  { %16212 = vmatpush1.bf16.msra.mxu1 %v18966_v60  ;;  %16049 = vmatprep.subr.bf16.mxu0 %v18971_v36 }
 0xc26   :  { %16213 = vmatprep.subr.bf16.mxu1 %v18974_v45 }
 0xc28   :  { %16050 = vmatpush1.bf16.msra.mxu0 %v18969_v22 }
 0xc29   :  { %16214 = vmatpush1.bf16.msra.mxu1 %v18972_v51  ;;  %16051 = vmatprep.subr.bf16.mxu0 %v18977_v26  ;;  %v20424_v51 = vld [vmem:[#allocation28] sm:$0xff] }
 0xc2a   :  { %16215 = vmatprep.subr.bf16.mxu1 %v18980_v24  ;;  %v14364_v26 = vrot.slane %v20424_v51, %v20117_v19  ;;  %v19050_v19 = vld [vmem:[#allocation29 + $0x6e8] ss:$16 sps:$4 sm:$0xff]  }
 0xc2c   :  { %16052 = vmatpush1.bf16.msra.mxu0 %v18975_v6  ;;  %v19041_v6 = vld [vmem:[#allocation29 + $0x6c0] ss:$16 sps:$4 sm:$0xff]  }
 0xc2d   :  { %16216 = vmatpush1.bf16.msra.mxu1 %v18978_v25  ;;  %16053 = vmatprep.subr.bf16.mxu0 %v18983_v55 }
 0xc2e   :  { %16217 = vmatprep.subr.bf16.mxu1 %v18986_v4 }
 0xc30   :  { %16054 = vmatpush1.bf16.msra.mxu0 %v18981_v41  ;;  %v19049_v41 = vld [vmem:[#allocation29 + $0x6e4] ss:$16 sps:$4 sm:$0xff]  }
 0xc31   :  { %16218 = vmatpush1.bf16.msra.mxu1 %v18984_v52  ;;  %16055 = vmatprep.subr.bf16.mxu0 %v18989_v49 }
 0xc32   :  { %16219 = vmatprep.subr.bf16.mxu1 %v18992_v7 }
 0xc34   :  { %16056 = vmatpush1.bf16.msra.mxu0 %v18987_v15  ;;  %v19047_v15 = vld [vmem:[#allocation29 + $0x6e0] ss:$16 sps:$4 sm:$0xff]  }
 0xc35   :  { %16220 = vmatpush1.bf16.msra.mxu1 %v18990_v63  ;;  %16057 = vmatprep.subr.bf16.mxu0 %v18995_v43  ;;  %v19055_v43 = vld [vmem:[#allocation29 + $0x704] ss:$16 sps:$4 sm:$0xff]  }
 0xc36   :  { %16221 = vmatprep.subr.bf16.mxu1 %v18998_v17  ;;  %v19058_v17 = vld [vmem:[#allocation29 + $0x70c] ss:$16 sps:$4 sm:$0xff]  }
 0xc38   :  { %16058 = vmatpush1.bf16.msra.mxu0 %v18993_v56  ;;  %v19053_v56 = vld [vmem:[#allocation29 + $0x700] ss:$16 sps:$4 sm:$0xff]  }
 0xc39   :  { %16222 = vmatpush1.bf16.msra.mxu1 %v18996_v8  ;;  %16059 = vmatprep.subr.bf16.mxu0 %v19001_v13  ;;  %v19061_v8 = vld [vmem:[#allocation29 + $0x724] ss:$16 sps:$4 sm:$0xff]   ;;  %v19064_v13 = vld [vmem:[#allocation29 + $0x72c] ss:$16 sps:$4 sm:$0xff]  }
 0xc3a   :  { %16223 = vmatprep.subr.bf16.mxu1 %v19004_v23  ;;  %v19059_v23 = vld [vmem:[#allocation29 + $0x720] ss:$16 sps:$4 sm:$0xff]  }
 0xc3c   :  { %16060 = vmatpush1.bf16.msra.mxu0 %v18999_v59  ;;  %v19062_v59 = vld [vmem:[#allocation29 + $0x728] ss:$16 sps:$4 sm:$0xff]  }
 0xc3d   :  { %16224 = vmatpush1.bf16.msra.mxu1 %v19002_v0  ;;  %16070 = vmatprep.subr.bf16.mxu0 %v19007_v34  ;;  %v19070_v0 = vld [vmem:[#allocation29 + $0x74c] ss:$16 sps:$4 sm:$0xff]   ;;  %v19065_v34 = vld [vmem:[#allocation29 + $0x740] ss:$16 sps:$4 sm:$0xff]  }
 0xc3e   :  { %16234 = vmatprep.subr.bf16.mxu1 %v19010_v33  ;;  %v19068_v33 = vld [vmem:[#allocation29 + $0x748] ss:$16 sps:$4 sm:$0xff]  }
 0xc3f   :  { %16062 = vmatmul.mubr.bf16.vlgmr.msra.gmra.mrb[92].mxu0 %v14641_v14 }
 0xc40   :  { %16226 = vmatmul.mubr.bf16.vlgmr.msra.gmra.mrb[84].mxu1 %v14641_v14  ;;  %16071 = vmatpush1.bf16.msra.mxu0 %v19005_v10  ;;  %v19073_v10 = vld [vmem:[#allocation29 + $0x764] ss:$16 sps:$4 sm:$0xff]   ;;  %v19076_v14 = vld [vmem:[#allocation29 + $0x76c] ss:$16 sps:$4 sm:$0xff]  }
 0xc41   :  { %16235 = vmatpush1.bf16.msra.mxu1 %v19008_v12  ;;  %16072 = vmatprep.subr.bf16.mxu0 %v19013_v16  ;;  %v19071_v12 = vld [vmem:[#allocation29 + $0x760] ss:$16 sps:$4 sm:$0xff]   ;;  %v19074_v16 = vld [vmem:[#allocation29 + $0x768] ss:$16 sps:$4 sm:$0xff]  }
 0xc42   :  { %16236 = vmatprep.subr.bf16.mxu1 %v19016_v57  ;;  %v19079_v57 = vld [vmem:[#allocation29 + $0x784] ss:$16 sps:$4 sm:$0xff]  }
 0xc44   :  { %16073 = vmatpush1.bf16.msra.mxu0 %v19011_v58  ;;  %v19082_v58 = vld [vmem:[#allocation29 + $0x78c] ss:$16 sps:$4 sm:$0xff]  }
 0xc45   :  { %16237 = vmatpush1.bf16.msra.mxu1 %v19014_v50  ;;  %16074 = vmatprep.subr.bf16.mxu0 %v19019_v37  ;;  %v19077_v50 = vld [vmem:[#allocation29 + $0x780] ss:$16 sps:$4 sm:$0xff]   ;;  %v19080_v37 = vld [vmem:[#allocation29 + $0x788] ss:$16 sps:$4 sm:$0xff]  }
 0xc46   :  { %16238 = vmatprep.subr.bf16.mxu1 %v19022_v2  ;;  %v19085_v2 = vld [vmem:[#allocation29 + $0x7a4] ss:$16 sps:$4 sm:$0xff]  }
 0xc48   :  { %16075 = vmatpush1.bf16.msra.mxu0 %v19017_v29  ;;  %v19088_v29 = vld [vmem:[#allocation29 + $0x7ac] ss:$16 sps:$4 sm:$0xff]  }
 0xc49   :  { %16239 = vmatpush1.bf16.msra.mxu1 %v19020_v32  ;;  %16076 = vmatprep.subr.bf16.mxu0 %v19025_v18  ;;  %v19083_v32 = vld [vmem:[#allocation29 + $0x7a0] ss:$16 sps:$4 sm:$0xff]   ;;  %v19086_v18 = vld [vmem:[#allocation29 + $0x7a8] ss:$16 sps:$4 sm:$0xff]  }
 0xc4a   :  { %16240 = vmatprep.subr.bf16.mxu1 %v19028_v28  ;;  %v19091_v28 = vld [vmem:[#allocation29 + $0x7c4] ss:$16 sps:$4 sm:$0xff]  }
 0xc4c   :  { %16077 = vmatpush1.bf16.msra.mxu0 %v19023_v31  ;;  %v19094_v31 = vld [vmem:[#allocation29 + $0x7cc] ss:$16 sps:$4 sm:$0xff]  }
 0xc4d   :  { %16241 = vmatpush1.bf16.msra.mxu1 %v19026_v3  ;;  %16078 = vmatprep.subr.bf16.mxu0 %v19031_v5  ;;  %v19089_v3 = vld [vmem:[#allocation29 + $0x7c0] ss:$16 sps:$4 sm:$0xff]   ;;  %v14360_v5 = vrot.slane %v20424_v51, %v20132_v46 }
 0xc4e   :  { %16242 = vmatprep.subr.bf16.mxu1 %v19034_v62  ;;  %v19092_v62 = vld [vmem:[#allocation29 + $0x7c8] ss:$16 sps:$4 sm:$0xff]   ;;  %v14645_v46 = vld [vmem:[#allocation31] sm:$0xf] }
 0xc50   :  { %16079 = vmatpush1.bf16.msra.mxu0 %v19029_v48  ;;  %v19097_v48 = vld [vmem:[#allocation29 + $0x7e4] ss:$16 sps:$4 sm:$0xff]  }
 0xc51   :  { %16243 = vmatpush1.bf16.msra.mxu1 %v19032_v35  ;;  %16080 = vmatprep.subr.bf16.mxu0 %v19037_v1  ;;  %v19100_v35 = vld [vmem:[#allocation29 + $0x7ec] ss:$16 sps:$4 sm:$0xff]   ;;  %v19095_v1 = vld [vmem:[#allocation29 + $0x7e0] ss:$16 sps:$4 sm:$0xff]  }
 0xc52   :  { %v14283_v40 = vpop.f32.mrb[88].mxu0  ;;  %16244 = vmatprep.subr.bf16.mxu1 %v19040_v61 }
 0xc53   :  { %v14284_v54 = vadd.f32 %v14283_v40, %v20415_v30  ;;  %v14324_v60 = vpop.f32.mrb[80].mxu1  ;;  %v14285_v36 = vpop.f32.mrb[89].mxu0  ;;  %v19044_v30 = vld [vmem:[#allocation29 + $0x6c8] ss:$16 sps:$4 sm:$0xff]   ;;  %v14650_v40 = vrot.slane %v14645_v46, %v19985_v11 }
 0xc54   :  { %v14286_v45 = vadd.f32 %v14285_v36, %v20417_v39  ;;  %v14326_v22 = vpop.f32.mrb[81].mxu1  ;;  %v14287_v24 = vpop.f32.mrb[90].mxu0  ;;  %16081 = vmatpush1.bf16.msra.mxu0 %v19035_v21  ;;  %v19052_v39 = vld [vmem:[#allocation29 + $0x6ec] ss:$16 sps:$4 sm:$0xff]   ;;  %v19098_v21 = vld [vmem:[#allocation29 + $0x7e8] ss:$16 sps:$4 sm:$0xff]   ;;  %v14662_v36 = vrot.slane %v14645_v46, %v19992_v27 }
 0xc55   :  { %v20428_v25 = vadd.f32 %v14324_v60, %v14284_v54  ;;  %v14328_v55 = vpop.f32.mrb[82].mxu1  ;;  %16245 = vmatpush1.bf16.msra.mxu1 %v19038_v44  ;;  %v14288_v4 = vpop.f32.mrb[91].mxu0  ;;  %16082 = vmatprep.subr.bf16.mxu0 %v19043_v53  ;;  %v16275_v53 = vld [vmem:[#allocation32] sm:$0xf]  ;;  %v14654_v54 = vrot.slane %v14645_v46, %v19982_v9 }
 0xc56   :  { %v14327_v52 = vadd.f32 %v14326_v22, %v14286_v45  ;;  %v14329_v49 = vpop.f32.mrb[83].mxu1  ;;  %16246 = vmatprep.subr.bf16.mxu1 %v19046_v47  ;;  %v14658_v47 = vrot.slane %v14645_v46, %v20015_v38  ;;  %v16280_v60 = vrot.slane %v16275_v53, %v19985_v11  ;;  %v16288_v22 = vrot.slane %v16275_v53, %v20015_v38 }
 0xc57   :  { %v14379_v61 = vadd.f32 %v14360_v5, %v20428_v25  ;;  %v16284_v51 = vrot.slane %v16275_v53, %v19982_v9 }
 0xc58   :  { %v14380_v7 = vadd.f32 %v14364_v26, %v14327_v52  ;;  %16083 = vmatpush1.bf16.msra.mxu0 %v19041_v6 }
 0xc59   :  { %16247 = vmatpush1.bf16.msra.mxu1 %v19044_v30  ;;  %16084 = vmatprep.subr.bf16.mxu0 %v19049_v41  ;;  %v14643_v44 = vpack.c.bf16 %v14379_v61, %v14379_v61  ;;  %v16292_v30 = vrot.slane %v16275_v53, %v19992_v27 }
 0xc5a   :  { %v14644_v63 = vpack.c.bf16 %v14380_v7, %v14380_v7  ;;  %16248 = vmatprep.subr.bf16.mxu1 %v19052_v39 }
 0xc5c   :  { %16085 = vmatpush1.bf16.msra.mxu0 %v19047_v15  ;;  %16102 = vmatprep.mubr.bf16.mxu0 %v14644_v63 }
 0xc5d   :  { %16249 = vmatpush1.bf16.msra.mxu1 %v19050_v19  ;;  %16266 = vmatprep.mubr.bf16.mxu1 %v14644_v63 }
 0xc5e   :  { %16086 = vmatprep.subr.bf16.mxu0 %v19055_v43  ;;  %16250 = vmatprep.subr.bf16.mxu1 %v19058_v17 }
 0xc60   :  { %16087 = vmatpush1.bf16.msra.mxu0 %v19053_v56 }
 0xc61   :  { %16251 = vmatpush1.bf16.msra.mxu1 %v19056_v20  ;;  %16088 = vmatprep.subr.bf16.mxu0 %v19061_v8  ;;  %v18400_v8 = vld [vmem:[#allocation2] ss:$0 sm:$0xff] }
 0xc62   :  { %16252 = vmatprep.subr.bf16.mxu1 %v19064_v13 }
 0xc64   :  { %16089 = vmatpush1.bf16.msra.mxu0 %v19059_v23 }
 0xc65   :  { %16253 = vmatpush1.bf16.msra.mxu1 %v19062_v59  ;;  %16090 = vmatprep.subr.bf16.mxu0 %v19067_v42 }
 0xc66   :  { %16254 = vmatprep.subr.bf16.mxu1 %v19070_v0 }
 0xc68   :  { %16091 = vmatpush1.bf16.msra.mxu0 %v19065_v34 }
 0xc69   :  { %16255 = vmatpush1.bf16.msra.mxu1 %v19068_v33  ;;  %16092 = vmatprep.subr.bf16.mxu0 %v19073_v10 }
 0xc6a   :  { %16256 = vmatprep.subr.bf16.mxu1 %v19076_v14 }
 0xc6c   :  { %16093 = vmatpush1.bf16.msra.mxu0 %v19071_v12 }
 0xc6d   :  { %16257 = vmatpush1.bf16.msra.mxu1 %v19074_v16  ;;  %16094 = vmatprep.subr.bf16.mxu0 %v19079_v57 }
 0xc6e   :  { %16258 = vmatprep.subr.bf16.mxu1 %v19082_v58 }
 0xc70   :  { %16095 = vmatpush1.bf16.msra.mxu0 %v19077_v50 }
 0xc71   :  { %16259 = vmatpush1.bf16.msra.mxu1 %v19080_v37  ;;  %16096 = vmatprep.subr.bf16.mxu0 %v19085_v2 }
 0xc72   :  { %16260 = vmatprep.subr.bf16.mxu1 %v19088_v29 }
 0xc74   :  { %16097 = vmatpush1.bf16.msra.mxu0 %v19083_v32 }
 0xc75   :  { %16261 = vmatpush1.bf16.msra.mxu1 %v19086_v18  ;;  %16098 = vmatprep.subr.bf16.mxu0 %v19091_v28 }
 0xc76   :  { %16262 = vmatprep.subr.bf16.mxu1 %v19094_v31 }
 0xc78   :  { %16099 = vmatpush1.bf16.msra.mxu0 %v19089_v3 }
 0xc79   :  { %16263 = vmatpush1.bf16.msra.mxu1 %v19092_v62  ;;  %16100 = vmatprep.subr.bf16.mxu0 %v19097_v48 }
 0xc7a   :  { %16264 = vmatprep.subr.bf16.mxu1 %v19100_v35 }
 0xc7c   :  { %16101 = vmatpush1.bf16.msra.mxu0 %v19095_v1 }
 0xc7d   :  { %16265 = vmatpush1.bf16.msra.mxu1 %v19098_v21 }
 0xc7f   :  { %16103 = vmatmul.mubr.bf16.vlgmr.msra.gmra.mrb[92].mxu0 %v14643_v44 }
 0xc80   :  { %16267 = vmatmul.mubr.bf16.vlgmr.msra.gmra.mrb[84].mxu1 %v14643_v44 }
 0xd52   :  { %v16104_v45 = vpop.f32.mrb[92].mxu0 }
 0xd53   :  { %v18591_v26 = vadd.f32 %v16104_v45, %v14650_v40  ;;  %v16268_v24 = vpop.f32.mrb[84].mxu1  ;;  %v16106_v6 = vpop.f32.mrb[93].mxu0 }
 0xd54   :  { %v18593_v25 = vadd.f32 %v16268_v24, %v14658_v47  ;;  %v18592_v55 = vadd.f32 %v16106_v6, %v14654_v54  ;;  %v16270_v4 = vpop.f32.mrb[85].mxu1  ;;  %v16108_v41 = vpop.f32.mrb[94].mxu0 }
 0xd55   :  { %v16297_v52 = vmul.f32 %v18591_v26, %v16280_v60  ;;  %v18594_v49 = vadd.f32 %v16270_v4, %v14662_v36  ;;  %v16272_v11 = vpop.f32.mrb[86].mxu1  ;;  %v16109_v39 = vpop.f32.mrb[95].mxu0 }
 0xd56   :  { %v16299_v7 = vmul.f32 %v18593_v25, %v16288_v22  ;;  %v16298_v15 = vmul.f32 %v18592_v55, %v16284_v51  ;;  %v16273_v19 = vpop.f32.mrb[87].mxu1 }
 0xd57   :  { %v16302_v38 = vsel %vm16301_vm6, %v16297_v52, 0.0  ;;  %v16300_v63 = vmul.f32 %v18594_v49, %v16292_v30 }
 0xd58   :  { %v16303_v9 = vsel %vm16301_vm6, %v16298_v15, 0.0  ;;  %v16305_v17 = vsel %vm16301_vm6, %v16299_v7, 0.0 }
 0xd59   :  { %v16304_v43 = vadd.f32 %v16303_v9, %v16302_v38  ;;  %v16307_v20 = vsel %vm16301_vm6, %v16300_v63, 0.0 }
 0xd5b   :  { %v16306_v56 = vadd.f32 %v16305_v17, %v16304_v43 }
 0xd5d   :  { %v16308_v27 = vadd.f32 %v16307_v20, %v16306_v56 }
 0xd5f   :  { %16309 = vadd.xlane.f32.xlu0 %v16308_v27 }
 0xdec   :  { %v16310_v13 = vpop.xlane.xlu0 %16309 }
 0xded   :  { %v16318_v23 = vadd.f32 %v18400_v8, %v16310_v13 }
 0xdef   :  { %v16319_v59 = vmax.f32 %v16318_v23, 0.0 }
 0xdf1   :  { %16321 = vst.msk [vmem:[%s20469_s21] sm:$0x3] %vm16320_vm7, %v16319_v59 }
 0xdf2   :  { %16326 = vsyncpa [#allocation4], 1 }
 0xdf3   :  { %16327 = vsyncpa [#allocation6], 1 }
 0xdf4   :  { %16328 = vsyncpa [#allocation9], 1 }
 0xdf5   :  { %16329 = vsyncpa [#allocation12], 1 }
 0xdf6   :  { %16330 = vsyncpa [#allocation15], 1 }
 0xdf7   :  { %16331 = vsyncpa [#allocation18], 1 }
 0xdf8   :  { %16332 = vsyncpa [#allocation21], 1 }
 0xdf9   :  { %16333 = vsyncpa [#allocation24], 1 }
 0xdfa   :  { %16334 = vsyncpa [#allocation27], 1 }
 0xdfb   :  { %16335 = vsyncpa [#allocation30], 1 }
 0xdfc   :  { %16336 = vsyncpa [#allocation33], 1 }

</bundles_post_ra>
